<compile_context>
chip_gen: v7x
topology: tpu7x:2x2x1
jax: 0.10.0
libtpu: 0.0.40
codegen_flags: <defaults>
</compile_context>

<pallas_src>
import functools

import jax
import jax.numpy as jnp
import numpy as np
from jax import lax
from jax.experimental import pallas as pl
from jax.experimental.pallas import tpu as pltpu

BN_EPS = 1e-5
LN_EPS = 1e-5
L2_EPS = 1e-12


# ----------------------------- Pallas kernels ------------------------------

def conv_bn_relu_pool_kernel(x_ref, w_ref, shift_ref, out_ref, *, npool):
    # x_ref:     (1, 4*Npool, K)  im2col rows, pool-member-major (m*Npool + p)
    # w_ref:     (K, Tc)          im2col'd 3x3 weight tile, BN scale pre-folded
    # shift_ref: (1, Tc)          folded BN shift (+ conv bias)
    # out_ref:   (1, Npool, Tc)
    y = jnp.dot(x_ref[0], w_ref[...], preferred_element_type=jnp.float32)
    m01 = jnp.maximum(y[0 * npool:1 * npool], y[1 * npool:2 * npool])
    m23 = jnp.maximum(y[2 * npool:3 * npool], y[3 * npool:4 * npool])
    pooled = jnp.maximum(m01, m23)                             # 2x2 max-pool
    out_ref[0] = jnp.maximum(pooled + shift_ref[...], 0.0)     # BN shift + ReLU


def mlp_head_kernel(x_ref, w1_ref, b1_ref, w2_ref, b2_ref, g_ref, bt_ref, out_ref):
    # x_ref: (Bt, 2048); w1: (2048, 512); w2: (512, 256); ln params: (1, 256)
    x = x_ref[...]
    h = jnp.dot(x, w1_ref[...], preferred_element_type=jnp.float32) + b1_ref[...]
    h = jnp.maximum(h, 0.0)                     # fc1 + ReLU (dropout = identity)
    z = jnp.dot(h, w2_ref[...], preferred_element_type=jnp.float32) + b2_ref[...]
    # F.normalize(p=2, dim=1, eps=1e-12):  z / max(||z||, eps)
    #   == z * rsqrt(max(sum(z^2), eps^2))   (rsqrt -> EUP slot)
    ssq = jnp.sum(z * z, axis=-1, keepdims=True)
    z = z * lax.rsqrt(jnp.maximum(ssq, L2_EPS * L2_EPS))
    # LayerNorm over last dim
    mu = jnp.mean(z, axis=-1, keepdims=True)
    var = jnp.mean((z - mu) ** 2, axis=-1, keepdims=True)
    out_ref[...] = (z - mu) * lax.rsqrt(var + LN_EPS) * g_ref[...] + bt_ref[...]


# ------------------------------- glue (JAX) --------------------------------

def _im2col_pool_order(x_nhwc):
    """(B, H, W, Cin) -> (B, 4*Ho*Wo, 9*Cin); rows grouped pool-member-major."""
    B, H, W, Cin = x_nhwc.shape
    Ho, Wo = H // 2, W // 2
    xp = jnp.pad(x_nhwc, ((0, 0), (1, 1), (1, 1), (0, 0)))
    cols = [xp[:, dy:dy + H, dx:dx + W, :] for dy in range(3) for dx in range(3)]
    patches = jnp.concatenate(cols, axis=-1)            # (B, H, W, 9*Cin)
    patches = patches[:, :2 * Ho, :2 * Wo, :]           # floor-mode pooling crop
    patches = patches.reshape(B, Ho, 2, Wo, 2, 9 * Cin)
    patches = patches.transpose(0, 2, 4, 1, 3, 5)       # (B, 2, 2, Ho, Wo, 9*Cin)
    return patches.reshape(B, 4 * Ho * Wo, 9 * Cin), Ho, Wo


def conv_block(x_nhwc, w9, shift):
    """conv3x3(pad=1) + BN(eval) + ReLU + maxpool2x2, with prepped weights."""
    B = x_nhwc.shape[0]
    K, Cout = w9.shape
    patches, Ho, Wo = _im2col_pool_order(x_nhwc)
    Npool = Ho * Wo
    Tc = Cout if Cout <= 128 else 128          # lane-sized Cout tiles (2nd axis)
    ncout = Cout // Tc
    kernel = functools.partial(conv_bn_relu_pool_kernel, npool=Npool)
    cost = pl.CostEstimate(
        flops=2 * B * 4 * Npool * K * Cout,
        transcendentals=0,
        bytes_accessed=4 * (B * 4 * Npool * K + K * Cout + Cout + B * Npool * Cout))
    out = pl.pallas_call(
        kernel,
        out_shape=jax.ShapeDtypeStruct((B, Npool, Cout), jnp.float32),
        grid=(B, ncout),
        in_specs=[
            pl.BlockSpec((1, 4 * Npool, K), lambda b, j: (b, 0, 0)),
            pl.BlockSpec((K, Tc), lambda b, j: (0, j)),
            pl.BlockSpec((1, Tc), lambda b, j: (0, j)),
        ],
        out_specs=pl.BlockSpec((1, Npool, Tc), lambda b, j: (b, 0, j)),
        compiler_params=pltpu.CompilerParams(
            dimension_semantics=("parallel", "parallel")),
        cost_estimate=cost,
    )(patches, w9, shift)
    return out.reshape(B, Ho, Wo, Cout)


def mlp_head(flat, KP):
    B, Din = flat.shape
    Dh = KP['fc1_w'].shape[1]
    Do = KP['fc2_w'].shape[1]
    Bt = B if B <= 128 else 128
    nb = pl.cdiv(B, Bt)
    cost = pl.CostEstimate(
        flops=2 * B * (Din * Dh + Dh * Do),
        transcendentals=2 * B,
        bytes_accessed=4 * (B * Din + Din * Dh + Dh + Dh * Do + 3 * Do + B * Do))
    return pl.pallas_call(
        mlp_head_kernel,
        out_shape=jax.ShapeDtypeStruct((B, Do), jnp.float32),
        grid=(nb,),
        in_specs=[
            pl.BlockSpec((Bt, Din), lambda i: (i, 0)),
            pl.BlockSpec((Din, Dh), lambda i: (0, 0)),
            pl.BlockSpec((1, Dh), lambda i: (0, 0)),
            pl.BlockSpec((Dh, Do), lambda i: (0, 0)),
            pl.BlockSpec((1, Do), lambda i: (0, 0)),
            pl.BlockSpec((1, Do), lambda i: (0, 0)),
            pl.BlockSpec((1, Do), lambda i: (0, 0)),
        ],
        out_specs=pl.BlockSpec((Bt, Do), lambda i: (i, 0)),
        compiler_params=pltpu.CompilerParams(dimension_semantics=("parallel",)),
        cost_estimate=cost,
    )(flat, KP['fc1_w'], KP['fc1_b'], KP['fc2_w'], KP['fc2_b'],
      KP['ln_g'], KP['ln_b'])


def prepare_params(P, input_features=20, input_width=128):
    """One-time weight prep (outside the forward): im2col + BN scale fold for
    the convs, fc transposes, and the NCHW->NHWC flatten permutation of fc1."""
    KP = {}
    for i in range(1, 5):
        w = P[f'conv{i}_w']                             # (Cout, Cin, 3, 3) OIHW
        Cout, Cin = w.shape[0], w.shape[1]
        scale = P[f'bn{i}_g'] / jnp.sqrt(P[f'bn{i}_v'] + BN_EPS)
        shift = (P[f'conv{i}_b'] - P[f'bn{i}_m']) * scale + P[f'bn{i}_b']
        # im2col weight: row index (ky*3+kx)*Cin + ci  ==  w[co, ci, ky, kx]
        w9 = jnp.transpose(w, (2, 3, 1, 0)).reshape(9 * Cin, Cout)
        KP[f'w{i}'] = w9 * scale[None, :]               # fold BN scale in
        KP[f'shift{i}'] = shift.reshape(1, Cout)
    # fc1 columns: PyTorch flattens NCHW; we flatten NHWC -> permute once.
    H4, W4 = input_features, input_width
    for _ in range(4):
        H4, W4 = H4 // 2, W4 // 2
    C4 = P['conv4_w'].shape[0]
    perm = np.arange(C4 * H4 * W4).reshape(C4, H4, W4).transpose(1, 2, 0).reshape(-1)
    KP['fc1_w'] = jnp.asarray(P['fc1_w'])[:, perm].T    # (C4*H4*W4, 512)
    KP['fc1_b'] = P['fc1_b'].reshape(1, -1)
    KP['fc2_w'] = P['fc2_w'].T                          # (512, 256)
    KP['fc2_b'] = P['fc2_b'].reshape(1, -1)
    KP['ln_g'] = P['ln_g'].reshape(1, -1)
    KP['ln_b'] = P['ln_b'].reshape(1, -1)
    return KP


def voice_auth_cnn_forward(x, KP):
    """x: (B, input_features, 128) -> (B, 256). KP = prepare_params(P)."""
    B = x.shape[0]
    h = x[..., None]                                    # NHWC with C=1
    for i in (1, 2, 3, 4):
        h = conv_block(h, KP[f'w{i}'], KP[f'shift{i}'])
    flat = h.reshape(B, -1)                             # NHWC flatten (free)
    return mlp_head(flat, KP)


# ------------------------- pure-JAX reference check ------------------------

def reference_forward(x, P):
    h = x[:, None, :, :]  # NCHW
    for i in (1, 2, 3, 4):
        w, b = P[f'conv{i}_w'], P[f'conv{i}_b']
        g, be, m, v = P[f'bn{i}_g'], P[f'bn{i}_b'], P[f'bn{i}_m'], P[f'bn{i}_v']
        h = lax.conv_general_dilated(
            h, w, (1, 1), ((1, 1), (1, 1)),
            dimension_numbers=('NCHW', 'OIHW', 'NCHW'),
            precision=lax.Precision.HIGHEST)
        h = h + b[None, :, None, None]
        h = ((h - m[None, :, None, None]) / jnp.sqrt(v + BN_EPS)[None, :, None, None]
             * g[None, :, None, None] + be[None, :, None, None])
        h = jnp.maximum(h, 0.0)
        Hc, Wc = (h.shape[2] // 2) * 2, (h.shape[3] // 2) * 2
        h = h[:, :, :Hc, :Wc].reshape(h.shape[0], h.shape[1], Hc // 2, 2, Wc // 2, 2)
        h = h.max(axis=(3, 5))
    flat = h.reshape(h.shape[0], -1)
    f1 = jnp.maximum(jnp.dot(flat, P['fc1_w'].T, precision=lax.Precision.HIGHEST)
                     + P['fc1_b'], 0.0)
    f2 = jnp.dot(f1, P['fc2_w'].T, precision=lax.Precision.HIGHEST) + P['fc2_b']
    n = jnp.sqrt(jnp.sum(f2 * f2, axis=1, keepdims=True))
    f2 = f2 / jnp.maximum(n, L2_EPS)
    mu = f2.mean(axis=1, keepdims=True)
    var = ((f2 - mu) ** 2).mean(axis=1, keepdims=True)
    return (f2 - mu) / jnp.sqrt(var + LN_EPS) * P['ln_g'] + P['ln_b']


# ------------------------------- params ------------------------------------

def init_params(key):
    chans = [1, 32, 64, 128, 256]
    keys = iter(jax.random.split(key, 32))
    P = {}
    for i in range(1, 5):
        cin, cout = chans[i - 1], chans[i]
        P[f'conv{i}_w'] = (jax.random.normal(next(keys), (cout, cin, 3, 3), jnp.float32)
                           / jnp.sqrt(9.0 * cin))
        P[f'conv{i}_b'] = 0.05 * jax.random.normal(next(keys), (cout,), jnp.float32)
        P[f'bn{i}_g'] = 1.0 + 0.1 * jax.random.normal(next(keys), (cout,), jnp.float32)
        P[f'bn{i}_b'] = 0.05 * jax.random.normal(next(keys), (cout,), jnp.float32)
        P[f'bn{i}_m'] = 0.02 * jax.random.normal(next(keys), (cout,), jnp.float32)
        P[f'bn{i}_v'] = jax.random.uniform(next(keys), (cout,), jnp.float32, 0.5, 1.5)
    to_linear = 256 * 1 * 8  # from _dummy_forward on (1, 1, 20, 128)
    P['fc1_w'] = (jax.random.normal(next(keys), (512, to_linear), jnp.float32)
                  / jnp.sqrt(float(to_linear)))
    P['fc1_b'] = 0.02 * jax.random.normal(next(keys), (512,), jnp.float32)
    P['fc2_w'] = (jax.random.normal(next(keys), (256, 512), jnp.float32)
                  / jnp.sqrt(512.0))
    P['fc2_b'] = 0.02 * jax.random.normal(next(keys), (256,), jnp.float32)
    P['ln_g'] = 1.0 + 0.1 * jax.random.normal(next(keys), (256,), jnp.float32)
    P['ln_b'] = 0.05 * jax.random.normal(next(keys), (256,), jnp.float32)
    return P


if __name__ == "__main__":
    x = jax.random.normal(jax.random.PRNGKey(0), (2, 20, 128), jnp.float32)
    P = init_params(jax.random.PRNGKey(42))
    KP = prepare_params(P, input_features=20, input_width=128)

    fwd = jax.jit(voice_auth_cnn_forward)
    out = jax.block_until_ready(fwd(x, KP))
    ref = jax.block_until_ready(reference_forward(x, P))
    np.testing.assert_allclose(np.asarray(out), np.asarray(ref), rtol=5e-3, atol=5e-3)
    print("KERNEL_OK")
</pallas_src>

<mosaic_0001>
module attributes {stable_mosaic.version = 11 : i64} {
  func.func @conv_bn_relu_pool_kernel(%arg0: i32, %arg1: i32, %arg2: memref<1x2560x9xf32, #tpu.memory_space<vmem>>, %arg3: memref<9x32xf32, #tpu.memory_space<vmem>>, %arg4: memref<1x32xf32, #tpu.memory_space<vmem>>, %arg5: memref<1x640x32xf32, #tpu.memory_space<vmem>>) attributes {dimension_semantics = [#tpu.dimension_semantics<parallel>, #tpu.dimension_semantics<parallel>], iteration_bounds = array<i64: 2, 1>, scalar_prefetch = 0 : i64, scratch_operands = 0 : i64, tpu.core_type = #tpu.core_type<tc>, window_params = [{transform_indices = @transform_0, window_bounds = array<i64: 1, 2560, 9>}, {transform_indices = @transform_1, window_bounds = array<i64: 9, 32>}, {transform_indices = @transform_2, window_bounds = array<i64: 1, 32>}, {transform_indices = @transform_3, window_bounds = array<i64: 1, 640, 32>}]} {
    %c0 = arith.constant 0 : index
    %c0_0 = arith.constant 0 : index
    %c0_1 = arith.constant 0 : index
    %0 = vector.load %arg2[%c0, %c0_0, %c0_1] : memref<1x2560x9xf32, #tpu.memory_space<vmem>>, vector<1x2560x9xf32>
    %1 = vector.shape_cast %0 : vector<1x2560x9xf32> to vector<2560x9xf32>
    %c0_2 = arith.constant 0 : index
    %c0_3 = arith.constant 0 : index
    %2 = vector.load %arg3[%c0_2, %c0_3] : memref<9x32xf32, #tpu.memory_space<vmem>>, vector<9x32xf32>
    %cst = arith.constant dense<0.000000e+00> : vector<2560x32xf32>
    %3 = tpu.matmul %1, %2, %cst {dimension_numbers = #tpu.dot_dimension_numbers<[1], [0], [0], [1], [0, 0, 1, 1], [], []>} : vector<2560x9xf32>, vector<9x32xf32>, vector<2560x32xf32> -> vector<2560x32xf32>
    %4 = vector.extract_strided_slice %3 {offsets = [0, 0], sizes = [640, 32], strides = [1, 1]} : vector<2560x32xf32> to vector<640x32xf32>
    %5 = vector.extract_strided_slice %3 {offsets = [640, 0], sizes = [640, 32], strides = [1, 1]} : vector<2560x32xf32> to vector<640x32xf32>
    %6 = arith.maximumf %4, %5 : vector<640x32xf32>
    %7 = vector.extract_strided_slice %3 {offsets = [1280, 0], sizes = [640, 32], strides = [1, 1]} : vector<2560x32xf32> to vector<640x32xf32>
    %8 = vector.extract_strided_slice %3 {offsets = [1920, 0], sizes = [640, 32], strides = [1, 1]} : vector<2560x32xf32> to vector<640x32xf32>
    %9 = arith.maximumf %7, %8 : vector<640x32xf32>
    %10 = arith.maximumf %6, %9 : vector<640x32xf32>
    %c0_4 = arith.constant 0 : index
    %c0_5 = arith.constant 0 : index
    %11 = vector.load %arg4[%c0_4, %c0_5] : memref<1x32xf32, #tpu.memory_space<vmem>>, vector<1x32xf32>
    %12 = vector.broadcast %11 : vector<1x32xf32> to vector<640x32xf32>
    %13 = arith.addf %10, %12 : vector<640x32xf32>
    %cst_6 = arith.constant 0.000000e+00 : f32
    %14 = vector.broadcast %cst_6 : f32 to vector<640x32xf32>
    %15 = arith.maximumf %13, %14 : vector<640x32xf32>
    %c0_7 = arith.constant 0 : index
    %c0_8 = arith.constant 0 : index
    %c0_9 = arith.constant 0 : index
    %16 = vector.load %arg5[%c0_7, %c0_8, %c0_9] : memref<1x640x32xf32, #tpu.memory_space<vmem>>, vector<1x640x32xf32>
    %17 = vector.shape_cast %16 : vector<1x640x32xf32> to vector<640x32xf32>
    %18 = vector.shape_cast %15 : vector<640x32xf32> to vector<1x640x32xf32>
    tpu.vector_store %arg5[%c0_7, %c0_8, %c0_9], %18 {strides = array<i32>} : memref<1x640x32xf32, #tpu.memory_space<vmem>>, vector<1x640x32xf32>,
    return
  }
  func.func @transform_0(%arg0: i32, %arg1: i32) -> (i32, i32, i32) {
    %c0_i32 = arith.constant 0 : i32
    %c0_i32_0 = arith.constant 0 : i32
    %c0_i32_1 = arith.constant 0 : i32
    return %arg0, %c0_i32, %c0_i32_0 : i32, i32, i32
  }
  func.func @transform_1(%arg0: i32, %arg1: i32) -> (i32, i32) {
    %c0_i32 = arith.constant 0 : i32
    %c0_i32_0 = arith.constant 0 : i32
    return %c0_i32, %arg1 : i32, i32
  }
  func.func @transform_2(%arg0: i32, %arg1: i32) -> (i32, i32) {
    %c0_i32 = arith.constant 0 : i32
    %c0_i32_0 = arith.constant 0 : i32
    return %c0_i32, %arg1 : i32, i32
  }
  func.func @transform_3(%arg0: i32, %arg1: i32) -> (i32, i32, i32) {
    %c0_i32 = arith.constant 0 : i32
    %c0_i32_0 = arith.constant 0 : i32
    return %arg0, %c0_i32, %arg1 : i32, i32, i32
  }
}

module attributes {stable_mosaic.version = 11 : i64} {
  func.func @conv_bn_relu_pool_kernel(%arg0: i32, %arg1: i32, %arg2: memref<1x640x288xf32, #tpu.memory_space<vmem>>, %arg3: memref<288x64xf32, #tpu.memory_space<vmem>>, %arg4: memref<1x64xf32, #tpu.memory_space<vmem>>, %arg5: memref<1x160x64xf32, #tpu.memory_space<vmem>>) attributes {dimension_semantics = [#tpu.dimension_semantics<parallel>, #tpu.dimension_semantics<parallel>], iteration_bounds = array<i64: 2, 1>, scalar_prefetch = 0 : i64, scratch_operands = 0 : i64, tpu.core_type = #tpu.core_type<tc>, window_params = [{transform_indices = @transform_0, window_bounds = array<i64: 1, 640, 288>}, {transform_indices = @transform_1, window_bounds = array<i64: 288, 64>}, {transform_indices = @transform_2, window_bounds = array<i64: 1, 64>}, {transform_indices = @transform_3, window_bounds = array<i64: 1, 160, 64>}]} {
    %c0 = arith.constant 0 : index
    %c0_0 = arith.constant 0 : index
    %c0_1 = arith.constant 0 : index
    %0 = vector.load %arg2[%c0, %c0_0, %c0_1] : memref<1x640x288xf32, #tpu.memory_space<vmem>>, vector<1x640x288xf32>
    %1 = vector.shape_cast %0 : vector<1x640x288xf32> to vector<640x288xf32>
    %c0_2 = arith.constant 0 : index
    %c0_3 = arith.constant 0 : index
    %2 = vector.load %arg3[%c0_2, %c0_3] : memref<288x64xf32, #tpu.memory_space<vmem>>, vector<288x64xf32>
    %cst = arith.constant dense<0.000000e+00> : vector<640x64xf32>
    %3 = tpu.matmul %1, %2, %cst {dimension_numbers = #tpu.dot_dimension_numbers<[1], [0], [0], [1], [0, 0, 1, 1], [], []>} : vector<640x288xf32>, vector<288x64xf32>, vector<640x64xf32> -> vector<640x64xf32>
    %4 = vector.extract_strided_slice %3 {offsets = [0, 0], sizes = [160, 64], strides = [1, 1]} : vector<640x64xf32> to vector<160x64xf32>
    %5 = vector.extract_strided_slice %3 {offsets = [160, 0], sizes = [160, 64], strides = [1, 1]} : vector<640x64xf32> to vector<160x64xf32>
    %6 = arith.maximumf %4, %5 : vector<160x64xf32>
    %7 = vector.extract_strided_slice %3 {offsets = [320, 0], sizes = [160, 64], strides = [1, 1]} : vector<640x64xf32> to vector<160x64xf32>
    %8 = vector.extract_strided_slice %3 {offsets = [480, 0], sizes = [160, 64], strides = [1, 1]} : vector<640x64xf32> to vector<160x64xf32>
    %9 = arith.maximumf %7, %8 : vector<160x64xf32>
    %10 = arith.maximumf %6, %9 : vector<160x64xf32>
    %c0_4 = arith.constant 0 : index
    %c0_5 = arith.constant 0 : index
    %11 = vector.load %arg4[%c0_4, %c0_5] : memref<1x64xf32, #tpu.memory_space<vmem>>, vector<1x64xf32>
    %12 = vector.broadcast %11 : vector<1x64xf32> to vector<160x64xf32>
    %13 = arith.addf %10, %12 : vector<160x64xf32>
    %cst_6 = arith.constant 0.000000e+00 : f32
    %14 = vector.broadcast %cst_6 : f32 to vector<160x64xf32>
    %15 = arith.maximumf %13, %14 : vector<160x64xf32>
    %c0_7 = arith.constant 0 : index
    %c0_8 = arith.constant 0 : index
    %c0_9 = arith.constant 0 : index
    %16 = vector.load %arg5[%c0_7, %c0_8, %c0_9] : memref<1x160x64xf32, #tpu.memory_space<vmem>>, vector<1x160x64xf32>
    %17 = vector.shape_cast %16 : vector<1x160x64xf32> to vector<160x64xf32>
    %18 = vector.shape_cast %15 : vector<160x64xf32> to vector<1x160x64xf32>
    tpu.vector_store %arg5[%c0_7, %c0_8, %c0_9], %18 {strides = array<i32>} : memref<1x160x64xf32, #tpu.memory_space<vmem>>, vector<1x160x64xf32>,
    return
  }
  func.func @transform_0(%arg0: i32, %arg1: i32) -> (i32, i32, i32) {
    %c0_i32 = arith.constant 0 : i32
    %c0_i32_0 = arith.constant 0 : i32
    %c0_i32_1 = arith.constant 0 : i32
    return %arg0, %c0_i32, %c0_i32_0 : i32, i32, i32
  }
  func.func @transform_1(%arg0: i32, %arg1: i32) -> (i32, i32) {
    %c0_i32 = arith.constant 0 : i32
    %c0_i32_0 = arith.constant 0 : i32
    return %c0_i32, %arg1 : i32, i32
  }
  func.func @transform_2(%arg0: i32, %arg1: i32) -> (i32, i32) {
    %c0_i32 = arith.constant 0 : i32
    %c0_i32_0 = arith.constant 0 : i32
    return %c0_i32, %arg1 : i32, i32
  }
  func.func @transform_3(%arg0: i32, %arg1: i32) -> (i32, i32, i32) {
    %c0_i32 = arith.constant 0 : i32
    %c0_i32_0 = arith.constant 0 : i32
    return %arg0, %c0_i32, %arg1 : i32, i32, i32
  }
}

module attributes {stable_mosaic.version = 11 : i64} {
  func.func @conv_bn_relu_pool_kernel(%arg0: i32, %arg1: i32, %arg2: memref<1x128x576xf32, #tpu.memory_space<vmem>>, %arg3: memref<576x128xf32, #tpu.memory_space<vmem>>, %arg4: memref<1x128xf32, #tpu.memory_space<vmem>>, %arg5: memref<1x32x128xf32, #tpu.memory_space<vmem>>) attributes {dimension_semantics = [#tpu.dimension_semantics<parallel>, #tpu.dimension_semantics<parallel>], iteration_bounds = array<i64: 2, 1>, scalar_prefetch = 0 : i64, scratch_operands = 0 : i64, tpu.core_type = #tpu.core_type<tc>, window_params = [{transform_indices = @transform_0, window_bounds = array<i64: 1, 128, 576>}, {transform_indices = @transform_1, window_bounds = array<i64: 576, 128>}, {transform_indices = @transform_2, window_bounds = array<i64: 1, 128>}, {transform_indices = @transform_3, window_bounds = array<i64: 1, 32, 128>}]} {
    %c0 = arith.constant 0 : index
    %c0_0 = arith.constant 0 : index
    %c0_1 = arith.constant 0 : index
    %0 = vector.load %arg2[%c0, %c0_0, %c0_1] : memref<1x128x576xf32, #tpu.memory_space<vmem>>, vector<1x128x576xf32>
    %1 = vector.shape_cast %0 : vector<1x128x576xf32> to vector<128x576xf32>
    %c0_2 = arith.constant 0 : index
    %c0_3 = arith.constant 0 : index
    %2 = vector.load %arg3[%c0_2, %c0_3] : memref<576x128xf32, #tpu.memory_space<vmem>>, vector<576x128xf32>
    %cst = arith.constant dense<0.000000e+00> : vector<128x128xf32>
    %3 = tpu.matmul %1, %2, %cst {dimension_numbers = #tpu.dot_dimension_numbers<[1], [0], [0], [1], [0, 0, 1, 1], [], []>} : vector<128x576xf32>, vector<576x128xf32>, vector<128x128xf32> -> vector<128x128xf32>
    %4 = vector.extract_strided_slice %3 {offsets = [0, 0], sizes = [32, 128], strides = [1, 1]} : vector<128x128xf32> to vector<32x128xf32>
    %5 = vector.extract_strided_slice %3 {offsets = [32, 0], sizes = [32, 128], strides = [1, 1]} : vector<128x128xf32> to vector<32x128xf32>
    %6 = arith.maximumf %4, %5 : vector<32x128xf32>
    %7 = vector.extract_strided_slice %3 {offsets = [64, 0], sizes = [32, 128], strides = [1, 1]} : vector<128x128xf32> to vector<32x128xf32>
    %8 = vector.extract_strided_slice %3 {offsets = [96, 0], sizes = [32, 128], strides = [1, 1]} : vector<128x128xf32> to vector<32x128xf32>
    %9 = arith.maximumf %7, %8 : vector<32x128xf32>
    %10 = arith.maximumf %6, %9 : vector<32x128xf32>
    %c0_4 = arith.constant 0 : index
    %c0_5 = arith.constant 0 : index
    %11 = vector.load %arg4[%c0_4, %c0_5] : memref<1x128xf32, #tpu.memory_space<vmem>>, vector<1x128xf32>
    %12 = vector.broadcast %11 : vector<1x128xf32> to vector<32x128xf32>
    %13 = arith.addf %10, %12 : vector<32x128xf32>
    %cst_6 = arith.constant 0.000000e+00 : f32
    %14 = vector.broadcast %cst_6 : f32 to vector<32x128xf32>
    %15 = arith.maximumf %13, %14 : vector<32x128xf32>
    %c0_7 = arith.constant 0 : index
    %c0_8 = arith.constant 0 : index
    %c0_9 = arith.constant 0 : index
    %16 = vector.load %arg5[%c0_7, %c0_8, %c0_9] : memref<1x32x128xf32, #tpu.memory_space<vmem>>, vector<1x32x128xf32>
    %17 = vector.shape_cast %16 : vector<1x32x128xf32> to vector<32x128xf32>
    %18 = vector.shape_cast %15 : vector<32x128xf32> to vector<1x32x128xf32>
    tpu.vector_store %arg5[%c0_7, %c0_8, %c0_9], %18 {strides = array<i32>} : memref<1x32x128xf32, #tpu.memory_space<vmem>>, vector<1x32x128xf32>,
    return
  }
  func.func @transform_0(%arg0: i32, %arg1: i32) -> (i32, i32, i32) {
    %c0_i32 = arith.constant 0 : i32
    %c0_i32_0 = arith.constant 0 : i32
    %c0_i32_1 = arith.constant 0 : i32
    return %arg0, %c0_i32, %c0_i32_0 : i32, i32, i32
  }
  func.func @transform_1(%arg0: i32, %arg1: i32) -> (i32, i32) {
    %c0_i32 = arith.constant 0 : i32
    %c0_i32_0 = arith.constant 0 : i32
    return %c0_i32, %arg1 : i32, i32
  }
  func.func @transform_2(%arg0: i32, %arg1: i32) -> (i32, i32) {
    %c0_i32 = arith.constant 0 : i32
    %c0_i32_0 = arith.constant 0 : i32
    return %c0_i32, %arg1 : i32, i32
  }
  func.func @transform_3(%arg0: i32, %arg1: i32) -> (i32, i32, i32) {
    %c0_i32 = arith.constant 0 : i32
    %c0_i32_0 = arith.constant 0 : i32
    return %arg0, %c0_i32, %arg1 : i32, i32, i32
  }
}

module attributes {stable_mosaic.version = 11 : i64} {
  func.func @mlp_head_kernel(%arg0: i32, %arg1: memref<2x2048xf32, #tpu.memory_space<vmem>>, %arg2: memref<2048x512xf32, #tpu.memory_space<vmem>>, %arg3: memref<1x512xf32, #tpu.memory_space<vmem>>, %arg4: memref<512x256xf32, #tpu.memory_space<vmem>>, %arg5: memref<1x256xf32, #tpu.memory_space<vmem>>, %arg6: memref<1x256xf32, #tpu.memory_space<vmem>>, %arg7: memref<1x256xf32, #tpu.memory_space<vmem>>, %arg8: memref<2x256xf32, #tpu.memory_space<vmem>>) attributes {dimension_semantics = [#tpu.dimension_semantics<parallel>], iteration_bounds = array<i64: 1>, scalar_prefetch = 0 : i64, scratch_operands = 0 : i64, tpu.core_type = #tpu.core_type<tc>, window_params = [{transform_indices = @transform_0, window_bounds = array<i64: 2, 2048>}, {pipeline_mode = #tpu.pipeline_mode<synchronous>, transform_indices = @transform_1, window_bounds = array<i64: 2048, 512>}, {pipeline_mode = #tpu.pipeline_mode<synchronous>, transform_indices = @transform_2, window_bounds = array<i64: 1, 512>}, {pipeline_mode = #tpu.pipeline_mode<synchronous>, transform_indices = @transform_3, window_bounds = array<i64: 512, 256>}, {pipeline_mode = #tpu.pipeline_mode<synchronous>, transform_indices = @transform_4, window_bounds = array<i64: 1, 256>}, {pipeline_mode = #tpu.pipeline_mode<synchronous>, transform_indices = @transform_5, window_bounds = array<i64: 1, 256>}, {pipeline_mode = #tpu.pipeline_mode<synchronous>, transform_indices = @transform_6, window_bounds = array<i64: 1, 256>}, {transform_indices = @transform_7, window_bounds = array<i64: 2, 256>}]} {
    %c0 = arith.constant 0 : index
    %c0_0 = arith.constant 0 : index
    %0 = vector.load %arg1[%c0, %c0_0] : memref<2x2048xf32, #tpu.memory_space<vmem>>, vector<2x2048xf32>
    %c0_1 = arith.constant 0 : index
    %c0_2 = arith.constant 0 : index
    %1 = vector.load %arg2[%c0_1, %c0_2] : memref<2048x512xf32, #tpu.memory_space<vmem>>, vector<2048x512xf32>
    %cst = arith.constant dense<0.000000e+00> : vector<2x512xf32>
    %2 = tpu.matmul %0, %1, %cst {dimension_numbers = #tpu.dot_dimension_numbers<[1], [0], [0], [1], [0, 0, 1, 1], [], []>} : vector<2x2048xf32>, vector<2048x512xf32>, vector<2x512xf32> -> vector<2x512xf32>
    %c0_3 = arith.constant 0 : index
    %c0_4 = arith.constant 0 : index
    %3 = vector.load %arg3[%c0_3, %c0_4] : memref<1x512xf32, #tpu.memory_space<vmem>>, vector<1x512xf32>
    %4 = vector.broadcast %3 : vector<1x512xf32> to vector<2x512xf32>
    %5 = arith.addf %2, %4 : vector<2x512xf32>
    %cst_5 = arith.constant 0.000000e+00 : f32
    %6 = vector.broadcast %cst_5 : f32 to vector<2x512xf32>
    %7 = arith.maximumf %5, %6 : vector<2x512xf32>
    %c0_6 = arith.constant 0 : index
    %c0_7 = arith.constant 0 : index
    %8 = vector.load %arg4[%c0_6, %c0_7] : memref<512x256xf32, #tpu.memory_space<vmem>>, vector<512x256xf32>
    %cst_8 = arith.constant dense<0.000000e+00> : vector<2x256xf32>
    %9 = tpu.matmul %7, %8, %cst_8 {dimension_numbers = #tpu.dot_dimension_numbers<[1], [0], [0], [1], [0, 0, 1, 1], [], []>} : vector<2x512xf32>, vector<512x256xf32>, vector<2x256xf32> -> vector<2x256xf32>
    %c0_9 = arith.constant 0 : index
    %c0_10 = arith.constant 0 : index
    %10 = vector.load %arg5[%c0_9, %c0_10] : memref<1x256xf32, #tpu.memory_space<vmem>>, vector<1x256xf32>
    %11 = vector.broadcast %10 : vector<1x256xf32> to vector<2x256xf32>
    %12 = arith.addf %9, %11 : vector<2x256xf32>
    %13 = arith.mulf %12, %12 : vector<2x256xf32>
    %cst_11 = arith.constant dense<0.000000e+00> : vector<2xf32>
    %14 = vector.multi_reduction <add>, %13, %cst_11 [1] : vector<2x256xf32> to vector<2xf32>
    %15 = vector.shape_cast %14 : vector<2xf32> to vector<2x1xf32>
    %cst_12 = arith.constant 1.000000e-24 : f32
    %16 = vector.broadcast %cst_12 : f32 to vector<2x1xf32>
    %17 = arith.maximumf %15, %16 : vector<2x1xf32>
    %18 = math.rsqrt %17 : vector<2x1xf32>
    %19 = vector.broadcast %18 : vector<2x1xf32> to vector<2x256xf32>
    %20 = arith.mulf %12, %19 : vector<2x256xf32>
    %cst_13 = arith.constant dense<0.000000e+00> : vector<2xf32>
    %21 = vector.multi_reduction <add>, %20, %cst_13 [1] : vector<2x256xf32> to vector<2xf32>
    %22 = vector.shape_cast %21 : vector<2xf32> to vector<2x1xf32>
    %cst_14 = arith.constant 2.560000e+02 : f32
    %23 = vector.broadcast %cst_14 : f32 to vector<2x1xf32>
    %24 = arith.divf %22, %23 : vector<2x1xf32>
    %25 = vector.broadcast %24 : vector<2x1xf32> to vector<2x256xf32>
    %26 = arith.subf %20, %25 : vector<2x256xf32>
    %27 = arith.mulf %26, %26 : vector<2x256xf32>
    %cst_15 = arith.constant dense<0.000000e+00> : vector<2xf32>
    %28 = vector.multi_reduction <add>, %27, %cst_15 [1] : vector<2x256xf32> to vector<2xf32>
    %29 = vector.shape_cast %28 : vector<2xf32> to vector<2x1xf32>
    %cst_16 = arith.constant 2.560000e+02 : f32
    %30 = vector.broadcast %cst_16 : f32 to vector<2x1xf32>
    %31 = arith.divf %29, %30 : vector<2x1xf32>
    %32 = vector.broadcast %24 : vector<2x1xf32> to vector<2x256xf32>
    %33 = arith.subf %20, %32 : vector<2x256xf32>
    %cst_17 = arith.constant 9.99999974E-6 : f32
    %34 = vector.broadcast %cst_17 : f32 to vector<2x1xf32>
    %35 = arith.addf %31, %34 : vector<2x1xf32>
    %36 = math.rsqrt %35 : vector<2x1xf32>
    %37 = vector.broadcast %36 : vector<2x1xf32> to vector<2x256xf32>
    %38 = arith.mulf %33, %37 : vector<2x256xf32>
    %c0_18 = arith.constant 0 : index
    %c0_19 = arith.constant 0 : index
    %39 = vector.load %arg6[%c0_18, %c0_19] : memref<1x256xf32, #tpu.memory_space<vmem>>, vector<1x256xf32>
    %40 = vector.broadcast %39 : vector<1x256xf32> to vector<2x256xf32>
    %41 = arith.mulf %38, %40 : vector<2x256xf32>
    %c0_20 = arith.constant 0 : index
    %c0_21 = arith.constant 0 : index
    %42 = vector.load %arg7[%c0_20, %c0_21] : memref<1x256xf32, #tpu.memory_space<vmem>>, vector<1x256xf32>
    %43 = vector.broadcast %42 : vector<1x256xf32> to vector<2x256xf32>
    %44 = arith.addf %41, %43 : vector<2x256xf32>
    %c0_22 = arith.constant 0 : index
    %c0_23 = arith.constant 0 : index
    %45 = vector.load %arg8[%c0_22, %c0_23] : memref<2x256xf32, #tpu.memory_space<vmem>>, vector<2x256xf32>
    tpu.vector_store %arg8[%c0_22, %c0_23], %44 {strides = array<i32>} : memref<2x256xf32, #tpu.memory_space<vmem>>, vector<2x256xf32>,
    return
  }
  func.func @transform_0(%arg0: i32) -> (i32, i32) {
    %c0_i32 = arith.constant 0 : i32
    %c0_i32_0 = arith.constant 0 : i32
    return %arg0, %c0_i32 : i32, i32
  }
  func.func @transform_1(%arg0: i32) -> (i32, i32) {
    %c0_i32 = arith.constant 0 : i32
    %c0_i32_0 = arith.constant 0 : i32
    %c0_i32_1 = arith.constant 0 : i32
    return %c0_i32, %c0_i32_0 : i32, i32
  }
  func.func @transform_2(%arg0: i32) -> (i32, i32) {
    %c0_i32 = arith.constant 0 : i32
    %c0_i32_0 = arith.constant 0 : i32
    %c0_i32_1 = arith.constant 0 : i32
    return %c0_i32, %c0_i32_0 : i32, i32
  }
  func.func @transform_3(%arg0: i32) -> (i32, i32) {
    %c0_i32 = arith.constant 0 : i32
    %c0_i32_0 = arith.constant 0 : i32
    %c0_i32_1 = arith.constant 0 : i32
    return %c0_i32, %c0_i32_0 : i32, i32
  }
  func.func @transform_4(%arg0: i32) -> (i32, i32) {
    %c0_i32 = arith.constant 0 : i32
    %c0_i32_0 = arith.constant 0 : i32
    %c0_i32_1 = arith.constant 0 : i32
    return %c0_i32, %c0_i32_0 : i32, i32
  }
  func.func @transform_5(%arg0: i32) -> (i32, i32) {
    %c0_i32 = arith.constant 0 : i32
    %c0_i32_0 = arith.constant 0 : i32
    %c0_i32_1 = arith.constant 0 : i32
    return %c0_i32, %c0_i32_0 : i32, i32
  }
  func.func @transform_6(%arg0: i32) -> (i32, i32) {
    %c0_i32 = arith.constant 0 : i32
    %c0_i32_0 = arith.constant 0 : i32
    %c0_i32_1 = arith.constant 0 : i32
    return %c0_i32, %c0_i32_0 : i32, i32
  }
  func.func @transform_7(%arg0: i32) -> (i32, i32) {
    %c0_i32 = arith.constant 0 : i32
    %c0_i32_0 = arith.constant 0 : i32
    return %arg0, %c0_i32 : i32, i32
  }
}

module attributes {stable_mosaic.version = 11 : i64} {
  func.func @conv_bn_relu_pool_kernel(%arg0: i32, %arg1: i32, %arg2: memref<1x32x1152xf32, #tpu.memory_space<vmem>>, %arg3: memref<1152x128xf32, #tpu.memory_space<vmem>>, %arg4: memref<1x128xf32, #tpu.memory_space<vmem>>, %arg5: memref<1x8x128xf32, #tpu.memory_space<vmem>>) attributes {dimension_semantics = [#tpu.dimension_semantics<parallel>, #tpu.dimension_semantics<parallel>], iteration_bounds = array<i64: 2, 2>, scalar_prefetch = 0 : i64, scratch_operands = 0 : i64, tpu.core_type = #tpu.core_type<tc>, window_params = [{transform_indices = @transform_0, window_bounds = array<i64: 1, 32, 1152>}, {transform_indices = @transform_1, window_bounds = array<i64: 1152, 128>}, {transform_indices = @transform_2, window_bounds = array<i64: 1, 128>}, {transform_indices = @transform_3, window_bounds = array<i64: 1, 8, 128>}]} {
    %c0 = arith.constant 0 : index
    %c0_0 = arith.constant 0 : index
    %c0_1 = arith.constant 0 : index
    %0 = vector.load %arg2[%c0, %c0_0, %c0_1] : memref<1x32x1152xf32, #tpu.memory_space<vmem>>, vector<1x32x1152xf32>
    %1 = vector.shape_cast %0 : vector<1x32x1152xf32> to vector<32x1152xf32>
    %c0_2 = arith.constant 0 : index
    %c0_3 = arith.constant 0 : index
    %2 = vector.load %arg3[%c0_2, %c0_3] : memref<1152x128xf32, #tpu.memory_space<vmem>>, vector<1152x128xf32>
    %cst = arith.constant dense<0.000000e+00> : vector<32x128xf32>
    %3 = tpu.matmul %1, %2, %cst {dimension_numbers = #tpu.dot_dimension_numbers<[1], [0], [0], [1], [0, 0, 1, 1], [], []>} : vector<32x1152xf32>, vector<1152x128xf32>, vector<32x128xf32> -> vector<32x128xf32>
    %4 = vector.extract_strided_slice %3 {offsets = [0, 0], sizes = [8, 128], strides = [1, 1]} : vector<32x128xf32> to vector<8x128xf32>
    %5 = vector.extract_strided_slice %3 {offsets = [8, 0], sizes = [8, 128], strides = [1, 1]} : vector<32x128xf32> to vector<8x128xf32>
    %6 = arith.maximumf %4, %5 : vector<8x128xf32>
    %7 = vector.extract_strided_slice %3 {offsets = [16, 0], sizes = [8, 128], strides = [1, 1]} : vector<32x128xf32> to vector<8x128xf32>
    %8 = vector.extract_strided_slice %3 {offsets = [24, 0], sizes = [8, 128], strides = [1, 1]} : vector<32x128xf32> to vector<8x128xf32>
    %9 = arith.maximumf %7, %8 : vector<8x128xf32>
    %10 = arith.maximumf %6, %9 : vector<8x128xf32>
    %c0_4 = arith.constant 0 : index
    %c0_5 = arith.constant 0 : index
    %11 = vector.load %arg4[%c0_4, %c0_5] : memref<1x128xf32, #tpu.memory_space<vmem>>, vector<1x128xf32>
    %12 = vector.broadcast %11 : vector<1x128xf32> to vector<8x128xf32>
    %13 = arith.addf %10, %12 : vector<8x128xf32>
    %cst_6 = arith.constant 0.000000e+00 : f32
    %14 = vector.broadcast %cst_6 : f32 to vector<8x128xf32>
    %15 = arith.maximumf %13, %14 : vector<8x128xf32>
    %c0_7 = arith.constant 0 : index
    %c0_8 = arith.constant 0 : index
    %c0_9 = arith.constant 0 : index
    %16 = vector.load %arg5[%c0_7, %c0_8, %c0_9] : memref<1x8x128xf32, #tpu.memory_space<vmem>>, vector<1x8x128xf32>
    %17 = vector.shape_cast %16 : vector<1x8x128xf32> to vector<8x128xf32>
    %18 = vector.shape_cast %15 : vector<8x128xf32> to vector<1x8x128xf32>
    tpu.vector_store %arg5[%c0_7, %c0_8, %c0_9], %18 {strides = array<i32>} : memref<1x8x128xf32, #tpu.memory_space<vmem>>, vector<1x8x128xf32>,
    return
  }
  func.func @transform_0(%arg0: i32, %arg1: i32) -> (i32, i32, i32) {
    %c0_i32 = arith.constant 0 : i32
    %c0_i32_0 = arith.constant 0 : i32
    %c0_i32_1 = arith.constant 0 : i32
    return %arg0, %c0_i32, %c0_i32_0 : i32, i32, i32
  }
  func.func @transform_1(%arg0: i32, %arg1: i32) -> (i32, i32) {
    %c0_i32 = arith.constant 0 : i32
    %c0_i32_0 = arith.constant 0 : i32
    return %c0_i32, %arg1 : i32, i32
  }
  func.func @transform_2(%arg0: i32, %arg1: i32) -> (i32, i32) {
    %c0_i32 = arith.constant 0 : i32
    %c0_i32_0 = arith.constant 0 : i32
    return %c0_i32, %arg1 : i32, i32
  }
  func.func @transform_3(%arg0: i32, %arg1: i32) -> (i32, i32, i32) {
    %c0_i32 = arith.constant 0 : i32
    %c0_i32_0 = arith.constant 0 : i32
    return %arg0, %c0_i32, %arg1 : i32, i32, i32
  }
}

</mosaic_0001>

<bundles_post_ra>
// kernel: voice_auth_cnn_forward.5
= control target key start
LH: loop header
LB: loop body
LE: loop exit
PB: predicated region body
PF: predicated region fallthrough
CT: control target
= control target key end

     0   :  { %s4987_s12 = smov 0   ;;  %s4989_s13 = smov 0   ;;  %s6404_s0 = inlined_call_operand.vmem [shape: f32[2,2560,9], index: 0, kind: input, shape index: {}]   ;;  %s6405_s1 = inlined_call_operand.vmem [shape: f32[9,32], index: 1, kind: input, shape index: {}]   ;;  %s6406_s2 = inlined_call_operand.vmem [shape: f32[1,32], index: 2, kind: input, shape index: {}]   ;;  %s6407_s3 = inlined_call_operand.vmem [shape: f32[2,640,32], index: 3, kind: output, shape index: {}]  }
   0x1   :  { %s4991_s14 = smov 0  }
   0x2 LB: > { %s25_s15 = sadd.s32 1, %s4960_s13  ;;  %p3773_p0 = scmp.ge.s32.totalorder %s4964_s14, 1  ;;  %s4964_s14 = sphi %s4991_s14, %s13_s14   ;;  %s4960_s13 = sphi %s4989_s13, %s6629_s13   ;;  %s4956_s12 = sphi %s4987_s12, %s6628_s12  }
   0x3   : > { %p27_p1 = scmp.ge.s32.totalorder %s25_s15, 2  ;;  %p168_p2 = scmp.lt.s32.totalorder %s4964_s14, 3 }
   0x5   : > { %s6631_s15 = smov (%p27_p1, %s25_s15), 0  ;;  %p169_p3 = pnand %p3773_p0, %p168_p2 }
   0x7   : > { %172 = sbr.rel (%p169_p3) target bundleno = 561 (0x231), region = 32 }
   0xe   : > { %v542_v0 = vld [vmem:[%s6405_s1] sm:$0xff]  ;;  %v543_v1 = vld [vmem:[%s6405_s1 + $0x8] sm:$0x1]  ;;  %vm1505_vm0 = vcmask 1040384   ;;  %p202_p4 = scmp.lt.s32.totalorder %s4956_s12, 1  ;;  %vm4966_vm1 = vmmov 1  }
   0xf   : > { %v4906_v2 = vpack.c.bf16 %v543_v1, %v542_v0  ;;  %vm4907_vm2 = vmpackc.low %vm1505_vm0, %vm4966_vm1  ;;  %vm544_vm3 = vcmask 72704   ;;  %vm3581_vm4 = vcmask 261120  }
  0x10   : > { %s6633_s12 = smov (!%p202_p4, %s4956_s12), 1 }
  0x11   : > { %4908 = vmatprep.subr.msk.bf16.mxu0 %vm4907_vm2, %v4906_v2  ;;  %4912 = vmatprep.subr.msk.bf16.mxu1 %vm4907_vm2, %v4906_v2  ;;  %s4914_s20 = smul.u32 2560, %s6633_s12 }
  0x12   : > { %4911 = vmatpush3.bf16.msk.msra.mxu0 %vm4907_vm2, %v4906_v2  ;;  %4913 = vmatpush3.bf16.msk.msra.mxu1 %vm4907_vm2, %v4906_v2  ;;  %s4915_s24 = smul.u32 640, %s6633_s12 }
  0x13   : > { %s5017_s23 = scalar_lea.vmem %s6404_s0, %s4914_s20 }
  0x14   : > { %v222_v3 = vld [vmem:[%s5017_s23] sm:$0xff]  ;;  %v223_v5 = vld [vmem:[%s5017_s23 + $0x8] sm:$0xff]  ;;  %v224_v7 = vld [vmem:[%s5017_s23 + $0x10] sm:$0xff]  ;;  %s5995_s29 = scalar_lea.vmem %s6407_s3, %s4915_s24 }
  0x15   : > { %v382_v4 = vld [vmem:[%s5017_s23 + $0x500] sm:$0xff]  ;;  %4426 = vmatprep.mubr.msk.f32.mxu0 %vm544_vm3, %v222_v3  ;;  %v383_v6 = vld [vmem:[%s5017_s23 + $0x508] sm:$0xff]  ;;  %v384_v8 = vld [vmem:[%s5017_s23 + $0x510] sm:$0xff] }
  0x16   : > { %4666 = vmatprep.mubr.msk.f32.mxu1 %vm544_vm3, %v382_v4  ;;  %4427 = vmatmul.mubr.msk.f32.vlgmr.msra.gmra.mrb[0].mxu0 %vm544_vm3, %v223_v5  ;;  %v225_v9 = vld [vmem:[%s5017_s23 + $0x18] sm:$0xff]  ;;  %v226_v11 = vld [vmem:[%s5017_s23 + $0x20] sm:$0xff]  ;;  %v227_v13 = vld [vmem:[%s5017_s23 + $0x28] sm:$0xff] }
  0x17   : > { %4667 = vmatmul.mubr.msk.f32.vlgmr.msra.gmra.mrb[0].mxu1 %vm544_vm3, %v383_v6  ;;  %4429 = vmatprep.mubr.msk.f32.mxu0 %vm544_vm3, %v224_v7  ;;  %v385_v10 = vld [vmem:[%s5017_s23 + $0x518] sm:$0xff]  ;;  %v386_v12 = vld [vmem:[%s5017_s23 + $0x520] sm:$0xff]  ;;  %v387_v14 = vld [vmem:[%s5017_s23 + $0x528] sm:$0xff] }
  0x18   : > { %4669 = vmatprep.mubr.msk.f32.mxu1 %vm544_vm3, %v384_v8  ;;  %v228_v15 = vld [vmem:[%s5017_s23 + $0x30] sm:$0xff]  ;;  %v229_v17 = vld [vmem:[%s5017_s23 + $0x38] sm:$0xff]  ;;  %v230_v19 = vld [vmem:[%s5017_s23 + $0x40] sm:$0xff] }
  0x19   : > { %v388_v16 = vld [vmem:[%s5017_s23 + $0x530] sm:$0xff]  ;;  %v389_v18 = vld [vmem:[%s5017_s23 + $0x538] sm:$0xff]  ;;  %v390_v20 = vld [vmem:[%s5017_s23 + $0x540] sm:$0xff] }
  0x1a   : > { %4430 = vmatmul.mubr.msk.f32.gmra.mrb[2].mxu0 %vm544_vm3, %v225_v9  ;;  %v231_v21 = vld [vmem:[%s5017_s23 + $0x48] sm:$0xff]  ;;  %v232_v23 = vld [vmem:[%s5017_s23 + $0x50] sm:$0xff]  ;;  %v233_v25 = vld [vmem:[%s5017_s23 + $0x58] sm:$0xff] }
  0x1b   : > { %4670 = vmatmul.mubr.msk.f32.gmra.mrb[2].mxu1 %vm544_vm3, %v385_v10  ;;  %4432 = vmatprep.mubr.msk.f32.mxu0 %vm544_vm3, %v226_v11  ;;  %v391_v22 = vld [vmem:[%s5017_s23 + $0x548] sm:$0xff]  ;;  %v392_v24 = vld [vmem:[%s5017_s23 + $0x550] sm:$0xff]  ;;  %v393_v26 = vld [vmem:[%s5017_s23 + $0x558] sm:$0xff] }
  0x1c   : > { %4672 = vmatprep.mubr.msk.f32.mxu1 %vm544_vm3, %v386_v12  ;;  %v234_v27 = vld [vmem:[%s5017_s23 + $0x60] sm:$0xff]  ;;  %v235_v29 = vld [vmem:[%s5017_s23 + $0x68] sm:$0xff]  ;;  %v236_v31 = vld [vmem:[%s5017_s23 + $0x70] sm:$0xff] }
  0x1d   : > { %v394_v28 = vld [vmem:[%s5017_s23 + $0x560] sm:$0xff]  ;;  %v395_v30 = vld [vmem:[%s5017_s23 + $0x568] sm:$0xff]  ;;  %v396_v32 = vld [vmem:[%s5017_s23 + $0x570] sm:$0xff] }
  0x1e   : > { %4433 = vmatmul.mubr.msk.f32.gmra.mrb[4].mxu0 %vm544_vm3, %v227_v13  ;;  %v237_v33 = vld [vmem:[%s5017_s23 + $0x78] sm:$0xff]  ;;  %v238_v35 = vld [vmem:[%s5017_s23 + $0x80] sm:$0xff]  ;;  %v239_v37 = vld [vmem:[%s5017_s23 + $0x88] sm:$0xff] }
  0x1f   : > { %4673 = vmatmul.mubr.msk.f32.gmra.mrb[4].mxu1 %vm544_vm3, %v387_v14  ;;  %4435 = vmatprep.mubr.msk.f32.mxu0 %vm544_vm3, %v228_v15  ;;  %v397_v34 = vld [vmem:[%s5017_s23 + $0x578] sm:$0xff]  ;;  %v398_v36 = vld [vmem:[%s5017_s23 + $0x580] sm:$0xff]  ;;  %v399_v38 = vld [vmem:[%s5017_s23 + $0x588] sm:$0xff] }
  0x20   : > { %4675 = vmatprep.mubr.msk.f32.mxu1 %vm544_vm3, %v388_v16  ;;  %v240_v39 = vld [vmem:[%s5017_s23 + $0x90] sm:$0xff]  ;;  %v241_v41 = vld [vmem:[%s5017_s23 + $0x98] sm:$0xff]  ;;  %v242_v43 = vld [vmem:[%s5017_s23 + $0xa0] sm:$0xff] }
  0x21   : > { %v400_v40 = vld [vmem:[%s5017_s23 + $0x590] sm:$0xff]  ;;  %v401_v42 = vld [vmem:[%s5017_s23 + $0x598] sm:$0xff]  ;;  %v402_v44 = vld [vmem:[%s5017_s23 + $0x5a0] sm:$0xff] }
  0x22   : > { %4436 = vmatmul.mubr.msk.f32.gmra.mrb[6].mxu0 %vm544_vm3, %v229_v17  ;;  %v243_v45 = vld [vmem:[%s5017_s23 + $0xa8] sm:$0xff]  ;;  %v244_v47 = vld [vmem:[%s5017_s23 + $0xb0] sm:$0xff]  ;;  %v245_v49 = vld [vmem:[%s5017_s23 + $0xb8] sm:$0xff] }
  0x23   : > { %4676 = vmatmul.mubr.msk.f32.gmra.mrb[6].mxu1 %vm544_vm3, %v389_v18  ;;  %4438 = vmatprep.mubr.msk.f32.mxu0 %vm544_vm3, %v230_v19  ;;  %v403_v46 = vld [vmem:[%s5017_s23 + $0x5a8] sm:$0xff]  ;;  %v404_v48 = vld [vmem:[%s5017_s23 + $0x5b0] sm:$0xff]  ;;  %v405_v50 = vld [vmem:[%s5017_s23 + $0x5b8] sm:$0xff] }
  0x24   : > { %4678 = vmatprep.mubr.msk.f32.mxu1 %vm544_vm3, %v390_v20  ;;  %v246_v51 = vld [vmem:[%s5017_s23 + $0xc0] sm:$0xff]  ;;  %v247_v53 = vld [vmem:[%s5017_s23 + $0xc8] sm:$0xff]  ;;  %v248_v55 = vld [vmem:[%s5017_s23 + $0xd0] sm:$0xff] }
  0x25   : > { %v406_v52 = vld [vmem:[%s5017_s23 + $0x5c0] sm:$0xff]  ;;  %v407_v54 = vld [vmem:[%s5017_s23 + $0x5c8] sm:$0xff]  ;;  %v408_v56 = vld [vmem:[%s5017_s23 + $0x5d0] sm:$0xff] }
  0x26   : > { %4439 = vmatmul.mubr.msk.f32.gmra.mrb[8].mxu0 %vm544_vm3, %v231_v21  ;;  %v249_v57 = vld [vmem:[%s5017_s23 + $0xd8] sm:$0xff]  ;;  %v250_v59 = vld [vmem:[%s5017_s23 + $0xe0] sm:$0xff]  ;;  %v251_v61 = vld [vmem:[%s5017_s23 + $0xe8] sm:$0xff] }
  0x27   : > { %4679 = vmatmul.mubr.msk.f32.gmra.mrb[8].mxu1 %vm544_vm3, %v391_v22  ;;  %4441 = vmatprep.mubr.msk.f32.mxu0 %vm544_vm3, %v232_v23  ;;  %v409_v58 = vld [vmem:[%s5017_s23 + $0x5d8] sm:$0xff]  ;;  %v410_v60 = vld [vmem:[%s5017_s23 + $0x5e0] sm:$0xff]  ;;  %v411_v62 = vld [vmem:[%s5017_s23 + $0x5e8] sm:$0xff] }
  0x28   : > { %4681 = vmatprep.mubr.msk.f32.mxu1 %vm544_vm3, %v392_v24  ;;  %v252_v63 = vld [vmem:[%s5017_s23 + $0xf0] sm:$0xff]  ;;  %v253_v1 = vld [vmem:[%s5017_s23 + $0xf8] sm:$0xff]  ;;  %v254_v3 = vld [vmem:[%s5017_s23 + $0x100] sm:$0xff] }
  0x29   : > { %v412_v0 = vld [vmem:[%s5017_s23 + $0x5f0] sm:$0xff]  ;;  %v413_v2 = vld [vmem:[%s5017_s23 + $0x5f8] sm:$0xff]  ;;  %v414_v4 = vld [vmem:[%s5017_s23 + $0x600] sm:$0xff] }
  0x2a   : > { %4442 = vmatmul.mubr.msk.f32.gmra.mrb[10].mxu0 %vm544_vm3, %v233_v25  ;;  %v255_v5 = vld [vmem:[%s5017_s23 + $0x108] sm:$0xff]  ;;  %v256_v7 = vld [vmem:[%s5017_s23 + $0x110] sm:$0xff]  ;;  %v257_v9 = vld [vmem:[%s5017_s23 + $0x118] sm:$0xff] }
  0x2b   : > { %4682 = vmatmul.mubr.msk.f32.gmra.mrb[10].mxu1 %vm544_vm3, %v393_v26  ;;  %4444 = vmatprep.mubr.msk.f32.mxu0 %vm544_vm3, %v234_v27  ;;  %v415_v6 = vld [vmem:[%s5017_s23 + $0x608] sm:$0xff]  ;;  %v416_v8 = vld [vmem:[%s5017_s23 + $0x610] sm:$0xff]  ;;  %v417_v10 = vld [vmem:[%s5017_s23 + $0x618] sm:$0xff] }
  0x2c   : > { %4684 = vmatprep.mubr.msk.f32.mxu1 %vm544_vm3, %v394_v28  ;;  %v258_v11 = vld [vmem:[%s5017_s23 + $0x120] sm:$0xff]  ;;  %v259_v13 = vld [vmem:[%s5017_s23 + $0x128] sm:$0xff]  ;;  %v260_v15 = vld [vmem:[%s5017_s23 + $0x130] sm:$0xff] }
  0x2d   : > { %v418_v12 = vld [vmem:[%s5017_s23 + $0x620] sm:$0xff]  ;;  %v419_v14 = vld [vmem:[%s5017_s23 + $0x628] sm:$0xff]  ;;  %v420_v16 = vld [vmem:[%s5017_s23 + $0x630] sm:$0xff] }
  0x2e   : > { %4445 = vmatmul.mubr.msk.f32.gmra.mrb[12].mxu0 %vm544_vm3, %v235_v29  ;;  %v261_v17 = vld [vmem:[%s5017_s23 + $0x138] sm:$0xff]  ;;  %v262_v19 = vld [vmem:[%s5017_s23 + $0x140] sm:$0xff]  ;;  %v263_v21 = vld [vmem:[%s5017_s23 + $0x148] sm:$0xff] }
  0x2f   : > { %4685 = vmatmul.mubr.msk.f32.gmra.mrb[12].mxu1 %vm544_vm3, %v395_v30  ;;  %4447 = vmatprep.mubr.msk.f32.mxu0 %vm544_vm3, %v236_v31  ;;  %v421_v18 = vld [vmem:[%s5017_s23 + $0x638] sm:$0xff]  ;;  %v422_v20 = vld [vmem:[%s5017_s23 + $0x640] sm:$0xff]  ;;  %v423_v22 = vld [vmem:[%s5017_s23 + $0x648] sm:$0xff] }
  0x30   : > { %4687 = vmatprep.mubr.msk.f32.mxu1 %vm544_vm3, %v396_v32  ;;  %v264_v23 = vld [vmem:[%s5017_s23 + $0x150] sm:$0xff]  ;;  %v265_v25 = vld [vmem:[%s5017_s23 + $0x158] sm:$0xff]  ;;  %v266_v27 = vld [vmem:[%s5017_s23 + $0x160] sm:$0xff] }
  0x31   : > { %v424_v24 = vld [vmem:[%s5017_s23 + $0x650] sm:$0xff]  ;;  %v425_v26 = vld [vmem:[%s5017_s23 + $0x658] sm:$0xff]  ;;  %v426_v28 = vld [vmem:[%s5017_s23 + $0x660] sm:$0xff] }
  0x32   : > { %4448 = vmatmul.mubr.msk.f32.gmra.mrb[14].mxu0 %vm544_vm3, %v237_v33  ;;  %v267_v29 = vld [vmem:[%s5017_s23 + $0x168] sm:$0xff]  ;;  %v268_v31 = vld [vmem:[%s5017_s23 + $0x170] sm:$0xff]  ;;  %v269_v33 = vld [vmem:[%s5017_s23 + $0x178] sm:$0xff] }
  0x33   : > { %4688 = vmatmul.mubr.msk.f32.gmra.mrb[14].mxu1 %vm544_vm3, %v397_v34  ;;  %4450 = vmatprep.mubr.msk.f32.mxu0 %vm544_vm3, %v238_v35  ;;  %v427_v30 = vld [vmem:[%s5017_s23 + $0x668] sm:$0xff]  ;;  %v428_v32 = vld [vmem:[%s5017_s23 + $0x670] sm:$0xff]  ;;  %v429_v34 = vld [vmem:[%s5017_s23 + $0x678] sm:$0xff] }
  0x34   : > { %4690 = vmatprep.mubr.msk.f32.mxu1 %vm544_vm3, %v398_v36  ;;  %v270_v35 = vld [vmem:[%s5017_s23 + $0x180] sm:$0xff] }
  0x35   : > { %v430_v36 = vld [vmem:[%s5017_s23 + $0x680] sm:$0xff] }
  0x36   : > { %4451 = vmatmul.mubr.msk.f32.gmra.mrb[16].mxu0 %vm544_vm3, %v239_v37  ;;  %v271_v37 = vld [vmem:[%s5017_s23 + $0x188] sm:$0xff] }
  0x37   : > { %4691 = vmatmul.mubr.msk.f32.gmra.mrb[16].mxu1 %vm544_vm3, %v399_v38  ;;  %4453 = vmatprep.mubr.msk.f32.mxu0 %vm544_vm3, %v240_v39  ;;  %v431_v38 = vld [vmem:[%s5017_s23 + $0x688] sm:$0xff]  ;;  %v272_v39 = vld [vmem:[%s5017_s23 + $0x190] sm:$0xff] }
  0x38   : > { %4693 = vmatprep.mubr.msk.f32.mxu1 %vm544_vm3, %v400_v40  ;;  %v432_v40 = vld [vmem:[%s5017_s23 + $0x690] sm:$0xff] }
  0x3a   : > { %4454 = vmatmul.mubr.msk.f32.gmra.mrb[18].mxu0 %vm544_vm3, %v241_v41  ;;  %v273_v41 = vld [vmem:[%s5017_s23 + $0x198] sm:$0xff] }
  0x3b   : > { %4694 = vmatmul.mubr.msk.f32.gmra.mrb[18].mxu1 %vm544_vm3, %v401_v42  ;;  %4456 = vmatprep.mubr.msk.f32.mxu0 %vm544_vm3, %v242_v43  ;;  %v433_v42 = vld [vmem:[%s5017_s23 + $0x698] sm:$0xff]  ;;  %v274_v43 = vld [vmem:[%s5017_s23 + $0x1a0] sm:$0xff] }
  0x3c   : > { %4696 = vmatprep.mubr.msk.f32.mxu1 %vm544_vm3, %v402_v44  ;;  %v434_v44 = vld [vmem:[%s5017_s23 + $0x6a0] sm:$0xff] }
  0x3e   : > { %4457 = vmatmul.mubr.msk.f32.gmra.mrb[20].mxu0 %vm544_vm3, %v243_v45  ;;  %v275_v45 = vld [vmem:[%s5017_s23 + $0x1a8] sm:$0xff] }
  0x3f   : > { %4697 = vmatmul.mubr.msk.f32.gmra.mrb[20].mxu1 %vm544_vm3, %v403_v46  ;;  %4459 = vmatprep.mubr.msk.f32.mxu0 %vm544_vm3, %v244_v47  ;;  %v435_v46 = vld [vmem:[%s5017_s23 + $0x6a8] sm:$0xff]  ;;  %v276_v47 = vld [vmem:[%s5017_s23 + $0x1b0] sm:$0xff] }
  0x40   : > { %4699 = vmatprep.mubr.msk.f32.mxu1 %vm544_vm3, %v404_v48  ;;  %v436_v48 = vld [vmem:[%s5017_s23 + $0x6b0] sm:$0xff] }
  0x42   : > { %4460 = vmatmul.mubr.msk.f32.gmra.mrb[22].mxu0 %vm544_vm3, %v245_v49  ;;  %v277_v49 = vld [vmem:[%s5017_s23 + $0x1b8] sm:$0xff] }
  0x43   : > { %4700 = vmatmul.mubr.msk.f32.gmra.mrb[22].mxu1 %vm544_vm3, %v405_v50  ;;  %4462 = vmatprep.mubr.msk.f32.mxu0 %vm544_vm3, %v246_v51  ;;  %v437_v50 = vld [vmem:[%s5017_s23 + $0x6b8] sm:$0xff]  ;;  %v278_v51 = vld [vmem:[%s5017_s23 + $0x1c0] sm:$0xff] }
  0x44   : > { %4702 = vmatprep.mubr.msk.f32.mxu1 %vm544_vm3, %v406_v52  ;;  %v438_v52 = vld [vmem:[%s5017_s23 + $0x6c0] sm:$0xff] }
  0x46   : > { %4463 = vmatmul.mubr.msk.f32.gmra.mrb[24].mxu0 %vm544_vm3, %v247_v53  ;;  %v279_v53 = vld [vmem:[%s5017_s23 + $0x1c8] sm:$0xff] }
  0x47   : > { %4703 = vmatmul.mubr.msk.f32.gmra.mrb[24].mxu1 %vm544_vm3, %v407_v54  ;;  %4465 = vmatprep.mubr.msk.f32.mxu0 %vm544_vm3, %v248_v55  ;;  %v439_v54 = vld [vmem:[%s5017_s23 + $0x6c8] sm:$0xff]  ;;  %v280_v55 = vld [vmem:[%s5017_s23 + $0x1d0] sm:$0xff] }
  0x48   : > { %4705 = vmatprep.mubr.msk.f32.mxu1 %vm544_vm3, %v408_v56  ;;  %v440_v56 = vld [vmem:[%s5017_s23 + $0x6d0] sm:$0xff] }
  0x4a   : > { %4466 = vmatmul.mubr.msk.f32.gmra.mrb[26].mxu0 %vm544_vm3, %v249_v57  ;;  %v281_v57 = vld [vmem:[%s5017_s23 + $0x1d8] sm:$0xff] }
  0x4b   : > { %4706 = vmatmul.mubr.msk.f32.gmra.mrb[26].mxu1 %vm544_vm3, %v409_v58  ;;  %4468 = vmatprep.mubr.msk.f32.mxu0 %vm544_vm3, %v250_v59  ;;  %v441_v58 = vld [vmem:[%s5017_s23 + $0x6d8] sm:$0xff]  ;;  %v282_v59 = vld [vmem:[%s5017_s23 + $0x1e0] sm:$0xff] }
  0x4c   : > { %4708 = vmatprep.mubr.msk.f32.mxu1 %vm544_vm3, %v410_v60  ;;  %v442_v60 = vld [vmem:[%s5017_s23 + $0x6e0] sm:$0xff] }
  0x4e   : > { %4469 = vmatmul.mubr.msk.f32.gmra.mrb[28].mxu0 %vm544_vm3, %v251_v61  ;;  %v283_v61 = vld [vmem:[%s5017_s23 + $0x1e8] sm:$0xff] }
  0x4f   : > { %4709 = vmatmul.mubr.msk.f32.gmra.mrb[28].mxu1 %vm544_vm3, %v411_v62  ;;  %4471 = vmatprep.mubr.msk.f32.mxu0 %vm544_vm3, %v252_v63  ;;  %v443_v62 = vld [vmem:[%s5017_s23 + $0x6e8] sm:$0xff]  ;;  %v284_v63 = vld [vmem:[%s5017_s23 + $0x1f0] sm:$0xff] }
  0x50   : > { %4711 = vmatprep.mubr.msk.f32.mxu1 %vm544_vm3, %v412_v0  ;;  %v444_v0 = vld [vmem:[%s5017_s23 + $0x6f0] sm:$0xff] }
  0x52   : > { %4472 = vmatmul.mubr.msk.f32.gmra.mrb[30].mxu0 %vm544_vm3, %v253_v1  ;;  %v285_v1 = vld [vmem:[%s5017_s23 + $0x1f8] sm:$0xff] }
  0x53   : > { %4712 = vmatmul.mubr.msk.f32.gmra.mrb[30].mxu1 %vm544_vm3, %v413_v2  ;;  %4474 = vmatprep.mubr.msk.f32.mxu0 %vm544_vm3, %v254_v3  ;;  %v445_v2 = vld [vmem:[%s5017_s23 + $0x6f8] sm:$0xff]  ;;  %v286_v3 = vld [vmem:[%s5017_s23 + $0x200] sm:$0xff] }
  0x54   : > { %4714 = vmatprep.mubr.msk.f32.mxu1 %vm544_vm3, %v414_v4  ;;  %v446_v4 = vld [vmem:[%s5017_s23 + $0x700] sm:$0xff] }
  0x56   : > { %4475 = vmatmul.mubr.msk.f32.gmra.mrb[32].mxu0 %vm544_vm3, %v255_v5  ;;  %v287_v5 = vld [vmem:[%s5017_s23 + $0x208] sm:$0xff] }
  0x57   : > { %4715 = vmatmul.mubr.msk.f32.gmra.mrb[32].mxu1 %vm544_vm3, %v415_v6  ;;  %4477 = vmatprep.mubr.msk.f32.mxu0 %vm544_vm3, %v256_v7  ;;  %v447_v6 = vld [vmem:[%s5017_s23 + $0x708] sm:$0xff]  ;;  %v288_v7 = vld [vmem:[%s5017_s23 + $0x210] sm:$0xff] }
  0x58   : > { %4717 = vmatprep.mubr.msk.f32.mxu1 %vm544_vm3, %v416_v8  ;;  %v448_v8 = vld [vmem:[%s5017_s23 + $0x710] sm:$0xff] }
  0x5a   : > { %4478 = vmatmul.mubr.msk.f32.gmra.mrb[34].mxu0 %vm544_vm3, %v257_v9  ;;  %v289_v9 = vld [vmem:[%s5017_s23 + $0x218] sm:$0xff] }
  0x5b   : > { %4718 = vmatmul.mubr.msk.f32.gmra.mrb[34].mxu1 %vm544_vm3, %v417_v10  ;;  %4480 = vmatprep.mubr.msk.f32.mxu0 %vm544_vm3, %v258_v11  ;;  %v449_v10 = vld [vmem:[%s5017_s23 + $0x718] sm:$0xff]  ;;  %v290_v11 = vld [vmem:[%s5017_s23 + $0x220] sm:$0xff] }
  0x5c   : > { %4720 = vmatprep.mubr.msk.f32.mxu1 %vm544_vm3, %v418_v12  ;;  %v450_v12 = vld [vmem:[%s5017_s23 + $0x720] sm:$0xff] }
  0x5e   : > { %4481 = vmatmul.mubr.msk.f32.gmra.mrb[36].mxu0 %vm544_vm3, %v259_v13  ;;  %v291_v13 = vld [vmem:[%s5017_s23 + $0x228] sm:$0xff] }
  0x5f   : > { %4721 = vmatmul.mubr.msk.f32.gmra.mrb[36].mxu1 %vm544_vm3, %v419_v14  ;;  %4483 = vmatprep.mubr.msk.f32.mxu0 %vm544_vm3, %v260_v15  ;;  %v451_v14 = vld [vmem:[%s5017_s23 + $0x728] sm:$0xff]  ;;  %v292_v15 = vld [vmem:[%s5017_s23 + $0x230] sm:$0xff] }
  0x60   : > { %4723 = vmatprep.mubr.msk.f32.mxu1 %vm544_vm3, %v420_v16  ;;  %v452_v16 = vld [vmem:[%s5017_s23 + $0x730] sm:$0xff] }
  0x62   : > { %4484 = vmatmul.mubr.msk.f32.gmra.mrb[38].mxu0 %vm544_vm3, %v261_v17  ;;  %v293_v17 = vld [vmem:[%s5017_s23 + $0x238] sm:$0xff] }
  0x63   : > { %4724 = vmatmul.mubr.msk.f32.gmra.mrb[38].mxu1 %vm544_vm3, %v421_v18  ;;  %4486 = vmatprep.mubr.msk.f32.mxu0 %vm544_vm3, %v262_v19  ;;  %v453_v18 = vld [vmem:[%s5017_s23 + $0x738] sm:$0xff]  ;;  %v294_v19 = vld [vmem:[%s5017_s23 + $0x240] sm:$0xff] }
  0x64   : > { %4726 = vmatprep.mubr.msk.f32.mxu1 %vm544_vm3, %v422_v20  ;;  %v454_v20 = vld [vmem:[%s5017_s23 + $0x740] sm:$0xff] }
  0x66   : > { %4487 = vmatmul.mubr.msk.f32.gmra.mrb[40].mxu0 %vm544_vm3, %v263_v21  ;;  %v295_v21 = vld [vmem:[%s5017_s23 + $0x248] sm:$0xff] }
  0x67   : > { %4727 = vmatmul.mubr.msk.f32.gmra.mrb[40].mxu1 %vm544_vm3, %v423_v22  ;;  %4489 = vmatprep.mubr.msk.f32.mxu0 %vm544_vm3, %v264_v23  ;;  %v455_v22 = vld [vmem:[%s5017_s23 + $0x748] sm:$0xff]  ;;  %v296_v23 = vld [vmem:[%s5017_s23 + $0x250] sm:$0xff] }
  0x68   : > { %4729 = vmatprep.mubr.msk.f32.mxu1 %vm544_vm3, %v424_v24  ;;  %v456_v24 = vld [vmem:[%s5017_s23 + $0x750] sm:$0xff] }
  0x6a   : > { %4490 = vmatmul.mubr.msk.f32.gmra.mrb[42].mxu0 %vm544_vm3, %v265_v25  ;;  %v297_v25 = vld [vmem:[%s5017_s23 + $0x258] sm:$0xff] }
  0x6b   : > { %4730 = vmatmul.mubr.msk.f32.gmra.mrb[42].mxu1 %vm544_vm3, %v425_v26  ;;  %4492 = vmatprep.mubr.msk.f32.mxu0 %vm544_vm3, %v266_v27  ;;  %v457_v26 = vld [vmem:[%s5017_s23 + $0x758] sm:$0xff]  ;;  %v298_v27 = vld [vmem:[%s5017_s23 + $0x260] sm:$0xff] }
  0x6c   : > { %4732 = vmatprep.mubr.msk.f32.mxu1 %vm544_vm3, %v426_v28  ;;  %v458_v28 = vld [vmem:[%s5017_s23 + $0x760] sm:$0xff] }
  0x6e   : > { %4493 = vmatmul.mubr.msk.f32.gmra.mrb[44].mxu0 %vm544_vm3, %v267_v29  ;;  %v299_v29 = vld [vmem:[%s5017_s23 + $0x268] sm:$0xff] }
  0x6f   : > { %4733 = vmatmul.mubr.msk.f32.gmra.mrb[44].mxu1 %vm544_vm3, %v427_v30  ;;  %4495 = vmatprep.mubr.msk.f32.mxu0 %vm544_vm3, %v268_v31  ;;  %v459_v30 = vld [vmem:[%s5017_s23 + $0x768] sm:$0xff]  ;;  %v300_v31 = vld [vmem:[%s5017_s23 + $0x270] sm:$0xff] }
  0x70   : > { %4735 = vmatprep.mubr.msk.f32.mxu1 %vm544_vm3, %v428_v32  ;;  %v460_v32 = vld [vmem:[%s5017_s23 + $0x770] sm:$0xff] }
  0x72   : > { %4496 = vmatmul.mubr.msk.f32.gmra.mrb[46].mxu0 %vm544_vm3, %v269_v33  ;;  %v301_v33 = vld [vmem:[%s5017_s23 + $0x278] sm:$0xff] }
  0x73   : > { %4736 = vmatmul.mubr.msk.f32.gmra.mrb[46].mxu1 %vm544_vm3, %v429_v34  ;;  %4498 = vmatprep.mubr.msk.f32.mxu0 %vm544_vm3, %v270_v35  ;;  %v461_v34 = vld [vmem:[%s5017_s23 + $0x778] sm:$0xff]  ;;  %v302_v35 = vld [vmem:[%s5017_s23 + $0x280] sm:$0xff] }
  0x74   : > { %4738 = vmatprep.mubr.msk.f32.mxu1 %vm544_vm3, %v430_v36  ;;  %v462_v36 = vld [vmem:[%s5017_s23 + $0x780] sm:$0xff] }
  0x76   : > { %4499 = vmatmul.mubr.msk.f32.gmra.mrb[48].mxu0 %vm544_vm3, %v271_v37  ;;  %v303_v37 = vld [vmem:[%s5017_s23 + $0x288] sm:$0xff] }
  0x77   : > { %4739 = vmatmul.mubr.msk.f32.gmra.mrb[48].mxu1 %vm544_vm3, %v431_v38  ;;  %4501 = vmatprep.mubr.msk.f32.mxu0 %vm544_vm3, %v272_v39  ;;  %v463_v38 = vld [vmem:[%s5017_s23 + $0x788] sm:$0xff]  ;;  %v304_v39 = vld [vmem:[%s5017_s23 + $0x290] sm:$0xff] }
  0x78   : > { %4741 = vmatprep.mubr.msk.f32.mxu1 %vm544_vm3, %v432_v40  ;;  %v464_v40 = vld [vmem:[%s5017_s23 + $0x790] sm:$0xff] }
  0x7a   : > { %4502 = vmatmul.mubr.msk.f32.gmra.mrb[50].mxu0 %vm544_vm3, %v273_v41  ;;  %v305_v41 = vld [vmem:[%s5017_s23 + $0x298] sm:$0xff] }
  0x7b   : > { %4742 = vmatmul.mubr.msk.f32.gmra.mrb[50].mxu1 %vm544_vm3, %v433_v42  ;;  %4504 = vmatprep.mubr.msk.f32.mxu0 %vm544_vm3, %v274_v43  ;;  %v465_v42 = vld [vmem:[%s5017_s23 + $0x798] sm:$0xff]  ;;  %v306_v43 = vld [vmem:[%s5017_s23 + $0x2a0] sm:$0xff] }
  0x7c   : > { %4744 = vmatprep.mubr.msk.f32.mxu1 %vm544_vm3, %v434_v44  ;;  %v466_v44 = vld [vmem:[%s5017_s23 + $0x7a0] sm:$0xff] }
  0x7e   : > { %4505 = vmatmul.mubr.msk.f32.gmra.mrb[52].mxu0 %vm544_vm3, %v275_v45  ;;  %v307_v45 = vld [vmem:[%s5017_s23 + $0x2a8] sm:$0xff] }
  0x7f   : > { %4745 = vmatmul.mubr.msk.f32.gmra.mrb[52].mxu1 %vm544_vm3, %v435_v46  ;;  %4507 = vmatprep.mubr.msk.f32.mxu0 %vm544_vm3, %v276_v47  ;;  %v467_v46 = vld [vmem:[%s5017_s23 + $0x7a8] sm:$0xff]  ;;  %v308_v47 = vld [vmem:[%s5017_s23 + $0x2b0] sm:$0xff] }
  0x80   : > { %4747 = vmatprep.mubr.msk.f32.mxu1 %vm544_vm3, %v436_v48  ;;  %v468_v48 = vld [vmem:[%s5017_s23 + $0x7b0] sm:$0xff] }
  0x82   : > { %4508 = vmatmul.mubr.msk.f32.gmra.mrb[54].mxu0 %vm544_vm3, %v277_v49  ;;  %v309_v49 = vld [vmem:[%s5017_s23 + $0x2b8] sm:$0xff] }
  0x83   : > { %4748 = vmatmul.mubr.msk.f32.gmra.mrb[54].mxu1 %vm544_vm3, %v437_v50  ;;  %4510 = vmatprep.mubr.msk.f32.mxu0 %vm544_vm3, %v278_v51  ;;  %v469_v50 = vld [vmem:[%s5017_s23 + $0x7b8] sm:$0xff]  ;;  %v310_v51 = vld [vmem:[%s5017_s23 + $0x2c0] sm:$0xff] }
  0x84   : > { %4750 = vmatprep.mubr.msk.f32.mxu1 %vm544_vm3, %v438_v52  ;;  %v470_v52 = vld [vmem:[%s5017_s23 + $0x7c0] sm:$0xff] }
  0x86   : > { %4511 = vmatmul.mubr.msk.f32.gmra.mrb[56].mxu0 %vm544_vm3, %v279_v53  ;;  %v311_v53 = vld [vmem:[%s5017_s23 + $0x2c8] sm:$0xff] }
  0x87   : > { %4751 = vmatmul.mubr.msk.f32.gmra.mrb[56].mxu1 %vm544_vm3, %v439_v54  ;;  %4513 = vmatprep.mubr.msk.f32.mxu0 %vm544_vm3, %v280_v55  ;;  %v471_v54 = vld [vmem:[%s5017_s23 + $0x7c8] sm:$0xff]  ;;  %v312_v55 = vld [vmem:[%s5017_s23 + $0x2d0] sm:$0xff] }
  0x88   : > { %4753 = vmatprep.mubr.msk.f32.mxu1 %vm544_vm3, %v440_v56  ;;  %v472_v56 = vld [vmem:[%s5017_s23 + $0x7d0] sm:$0xff] }
  0x8a   : > { %4514 = vmatmul.mubr.msk.f32.gmra.mrb[58].mxu0 %vm544_vm3, %v281_v57  ;;  %v313_v57 = vld [vmem:[%s5017_s23 + $0x2d8] sm:$0xff] }
  0x8b   : > { %4754 = vmatmul.mubr.msk.f32.gmra.mrb[58].mxu1 %vm544_vm3, %v441_v58  ;;  %4516 = vmatprep.mubr.msk.f32.mxu0 %vm544_vm3, %v282_v59  ;;  %v473_v58 = vld [vmem:[%s5017_s23 + $0x7d8] sm:$0xff]  ;;  %v314_v59 = vld [vmem:[%s5017_s23 + $0x2e0] sm:$0xff] }
  0x8c   : > { %4756 = vmatprep.mubr.msk.f32.mxu1 %vm544_vm3, %v442_v60  ;;  %v474_v60 = vld [vmem:[%s5017_s23 + $0x7e0] sm:$0xff] }
  0x8e   : > { %4517 = vmatmul.mubr.msk.f32.gmra.mrb[60].mxu0 %vm544_vm3, %v283_v61  ;;  %v315_v61 = vld [vmem:[%s5017_s23 + $0x2e8] sm:$0xff] }
  0x8f   : > { %4757 = vmatmul.mubr.msk.f32.gmra.mrb[60].mxu1 %vm544_vm3, %v443_v62  ;;  %4519 = vmatprep.mubr.msk.f32.mxu0 %vm544_vm3, %v284_v63  ;;  %v475_v62 = vld [vmem:[%s5017_s23 + $0x7e8] sm:$0xff]  ;;  %v316_v63 = vld [vmem:[%s5017_s23 + $0x2f0] sm:$0xff] }
  0x90   : > { %4759 = vmatprep.mubr.msk.f32.mxu1 %vm544_vm3, %v444_v0  ;;  %v476_v0 = vld [vmem:[%s5017_s23 + $0x7f0] sm:$0xff] }
  0x92   : > { %4520 = vmatmul.mubr.msk.f32.gmra.mrb[62].mxu0 %vm544_vm3, %v285_v1  ;;  %v317_v1 = vld [vmem:[%s5017_s23 + $0x2f8] sm:$0xff] }
  0x93   : > { %4760 = vmatmul.mubr.msk.f32.gmra.mrb[62].mxu1 %vm544_vm3, %v445_v2  ;;  %4522 = vmatprep.mubr.msk.f32.mxu0 %vm544_vm3, %v286_v3  ;;  %v477_v2 = vld [vmem:[%s5017_s23 + $0x7f8] sm:$0xff]  ;;  %v318_v3 = vld [vmem:[%s5017_s23 + $0x300] sm:$0xff] }
  0x94   : > { %4762 = vmatprep.mubr.msk.f32.mxu1 %vm544_vm3, %v446_v4  ;;  %v478_v4 = vld [vmem:[%s5017_s23 + $0x800] sm:$0xff] }
  0x96   : > { %4523 = vmatmul.mubr.msk.f32.gmra.mrb[64].mxu0 %vm544_vm3, %v287_v5  ;;  %v319_v5 = vld [vmem:[%s5017_s23 + $0x308] sm:$0xff] }
  0x97   : > { %4763 = vmatmul.mubr.msk.f32.gmra.mrb[64].mxu1 %vm544_vm3, %v447_v6  ;;  %4525 = vmatprep.mubr.msk.f32.mxu0 %vm544_vm3, %v288_v7  ;;  %v479_v6 = vld [vmem:[%s5017_s23 + $0x808] sm:$0xff]  ;;  %v320_v7 = vld [vmem:[%s5017_s23 + $0x310] sm:$0xff] }
  0x98   : > { %4765 = vmatprep.mubr.msk.f32.mxu1 %vm544_vm3, %v448_v8  ;;  %v480_v8 = vld [vmem:[%s5017_s23 + $0x810] sm:$0xff] }
  0x9a   : > { %4526 = vmatmul.mubr.msk.f32.gmra.mrb[66].mxu0 %vm544_vm3, %v289_v9  ;;  %v321_v9 = vld [vmem:[%s5017_s23 + $0x318] sm:$0xff] }
  0x9b   : > { %4766 = vmatmul.mubr.msk.f32.gmra.mrb[66].mxu1 %vm544_vm3, %v449_v10  ;;  %4528 = vmatprep.mubr.msk.f32.mxu0 %vm544_vm3, %v290_v11  ;;  %v481_v10 = vld [vmem:[%s5017_s23 + $0x818] sm:$0xff]  ;;  %v322_v11 = vld [vmem:[%s5017_s23 + $0x320] sm:$0xff] }
  0x9c   : > { %4768 = vmatprep.mubr.msk.f32.mxu1 %vm544_vm3, %v450_v12  ;;  %v482_v12 = vld [vmem:[%s5017_s23 + $0x820] sm:$0xff] }
  0x9e   : > { %4529 = vmatmul.mubr.msk.f32.gmra.mrb[68].mxu0 %vm544_vm3, %v291_v13  ;;  %v323_v13 = vld [vmem:[%s5017_s23 + $0x328] sm:$0xff] }
  0x9f   : > { %4769 = vmatmul.mubr.msk.f32.gmra.mrb[68].mxu1 %vm544_vm3, %v451_v14  ;;  %4531 = vmatprep.mubr.msk.f32.mxu0 %vm544_vm3, %v292_v15  ;;  %v483_v14 = vld [vmem:[%s5017_s23 + $0x828] sm:$0xff]  ;;  %v324_v15 = vld [vmem:[%s5017_s23 + $0x330] sm:$0xff] }
  0xa0   : > { %4771 = vmatprep.mubr.msk.f32.mxu1 %vm544_vm3, %v452_v16  ;;  %v484_v16 = vld [vmem:[%s5017_s23 + $0x830] sm:$0xff] }
  0xa2   : > { %4532 = vmatmul.mubr.msk.f32.gmra.mrb[70].mxu0 %vm544_vm3, %v293_v17  ;;  %v325_v17 = vld [vmem:[%s5017_s23 + $0x338] sm:$0xff] }
  0xa3   : > { %4772 = vmatmul.mubr.msk.f32.gmra.mrb[70].mxu1 %vm544_vm3, %v453_v18  ;;  %4534 = vmatprep.mubr.msk.f32.mxu0 %vm544_vm3, %v294_v19  ;;  %v485_v18 = vld [vmem:[%s5017_s23 + $0x838] sm:$0xff]  ;;  %v326_v19 = vld [vmem:[%s5017_s23 + $0x340] sm:$0xff] }
  0xa4   : > { %4774 = vmatprep.mubr.msk.f32.mxu1 %vm544_vm3, %v454_v20  ;;  %v486_v20 = vld [vmem:[%s5017_s23 + $0x840] sm:$0xff] }
  0xa6   : > { %4535 = vmatmul.mubr.msk.f32.gmra.mrb[72].mxu0 %vm544_vm3, %v295_v21  ;;  %v327_v21 = vld [vmem:[%s5017_s23 + $0x348] sm:$0xff] }
  0xa7   : > { %4775 = vmatmul.mubr.msk.f32.gmra.mrb[72].mxu1 %vm544_vm3, %v455_v22  ;;  %4537 = vmatprep.mubr.msk.f32.mxu0 %vm544_vm3, %v296_v23  ;;  %v487_v22 = vld [vmem:[%s5017_s23 + $0x848] sm:$0xff]  ;;  %v328_v23 = vld [vmem:[%s5017_s23 + $0x350] sm:$0xff] }
  0xa8   : > { %4777 = vmatprep.mubr.msk.f32.mxu1 %vm544_vm3, %v456_v24  ;;  %v488_v24 = vld [vmem:[%s5017_s23 + $0x850] sm:$0xff] }
  0xaa   : > { %4538 = vmatmul.mubr.msk.f32.gmra.mrb[74].mxu0 %vm544_vm3, %v297_v25  ;;  %v329_v25 = vld [vmem:[%s5017_s23 + $0x358] sm:$0xff] }
  0xab   : > { %4778 = vmatmul.mubr.msk.f32.gmra.mrb[74].mxu1 %vm544_vm3, %v457_v26  ;;  %4540 = vmatprep.mubr.msk.f32.mxu0 %vm544_vm3, %v298_v27  ;;  %v489_v26 = vld [vmem:[%s5017_s23 + $0x858] sm:$0xff]  ;;  %v330_v27 = vld [vmem:[%s5017_s23 + $0x360] sm:$0xff] }
  0xac   : > { %4780 = vmatprep.mubr.msk.f32.mxu1 %vm544_vm3, %v458_v28  ;;  %v490_v28 = vld [vmem:[%s5017_s23 + $0x860] sm:$0xff] }
  0xae   : > { %4541 = vmatmul.mubr.msk.f32.gmra.mrb[76].mxu0 %vm544_vm3, %v299_v29 }
  0xaf   : > { %4781 = vmatmul.mubr.msk.f32.gmra.mrb[76].mxu1 %vm544_vm3, %v459_v30  ;;  %4543 = vmatprep.mubr.msk.f32.mxu0 %vm544_vm3, %v300_v31 }
  0xb0   : > { %4783 = vmatprep.mubr.msk.f32.mxu1 %vm544_vm3, %v460_v32 }
  0xb2   : > { %4544 = vmatmul.mubr.msk.f32.gmra.mrb[78].mxu0 %vm544_vm3, %v301_v33  ;;  %v331_v33 = vld [vmem:[%s5017_s23 + $0x368] sm:$0xff] }
  0xb3   : > { %4784 = vmatmul.mubr.msk.f32.gmra.mrb[78].mxu1 %vm544_vm3, %v461_v34  ;;  %4546 = vmatprep.mubr.msk.f32.mxu0 %vm544_vm3, %v302_v35  ;;  %v491_v34 = vld [vmem:[%s5017_s23 + $0x868] sm:$0xff]  ;;  %v332_v35 = vld [vmem:[%s5017_s23 + $0x370] sm:$0xff] }
  0xb4   : > { %4786 = vmatprep.mubr.msk.f32.mxu1 %vm544_vm3, %v462_v36  ;;  %v492_v36 = vld [vmem:[%s5017_s23 + $0x870] sm:$0xff] }
  0xb6   : > { %4547 = vmatmul.mubr.msk.f32.gmra.mrb[80].mxu0 %vm544_vm3, %v303_v37 }
  0xb7   : > { %4787 = vmatmul.mubr.msk.f32.gmra.mrb[80].mxu1 %vm544_vm3, %v463_v38  ;;  %4549 = vmatprep.mubr.msk.f32.mxu0 %vm544_vm3, %v304_v39 }
  0xb8   : > { %4789 = vmatprep.mubr.msk.f32.mxu1 %vm544_vm3, %v464_v40 }
  0xba   : > { %4550 = vmatmul.mubr.msk.f32.gmra.mrb[82].mxu0 %vm544_vm3, %v305_v41  ;;  %v333_v41 = vld [vmem:[%s5017_s23 + $0x378] sm:$0xff] }
  0xbb   : > { %4790 = vmatmul.mubr.msk.f32.gmra.mrb[82].mxu1 %vm544_vm3, %v465_v42  ;;  %4552 = vmatprep.mubr.msk.f32.mxu0 %vm544_vm3, %v306_v43  ;;  %v493_v42 = vld [vmem:[%s5017_s23 + $0x878] sm:$0xff]  ;;  %v334_v43 = vld [vmem:[%s5017_s23 + $0x380] sm:$0xff] }
  0xbc   : > { %4792 = vmatprep.mubr.msk.f32.mxu1 %vm544_vm3, %v466_v44  ;;  %v494_v44 = vld [vmem:[%s5017_s23 + $0x880] sm:$0xff] }
  0xbe   : > { %4553 = vmatmul.mubr.msk.f32.gmra.mrb[84].mxu0 %vm544_vm3, %v307_v45 }
  0xbf   : > { %4793 = vmatmul.mubr.msk.f32.gmra.mrb[84].mxu1 %vm544_vm3, %v467_v46  ;;  %4555 = vmatprep.mubr.msk.f32.mxu0 %vm544_vm3, %v308_v47 }
  0xc0   : > { %4795 = vmatprep.mubr.msk.f32.mxu1 %vm544_vm3, %v468_v48 }
  0xc2   : > { %4556 = vmatmul.mubr.msk.f32.gmra.mrb[86].mxu0 %vm544_vm3, %v309_v49  ;;  %v335_v49 = vld [vmem:[%s5017_s23 + $0x388] sm:$0xff] }
  0xc3   : > { %4796 = vmatmul.mubr.msk.f32.gmra.mrb[86].mxu1 %vm544_vm3, %v469_v50  ;;  %4558 = vmatprep.mubr.msk.f32.mxu0 %vm544_vm3, %v310_v51  ;;  %v495_v50 = vld [vmem:[%s5017_s23 + $0x888] sm:$0xff]  ;;  %v336_v51 = vld [vmem:[%s5017_s23 + $0x390] sm:$0xff] }
  0xc4   : > { %4798 = vmatprep.mubr.msk.f32.mxu1 %vm544_vm3, %v470_v52  ;;  %v496_v52 = vld [vmem:[%s5017_s23 + $0x890] sm:$0xff] }
  0xc6   : > { %4559 = vmatmul.mubr.msk.f32.gmra.mrb[88].mxu0 %vm544_vm3, %v311_v53 }
  0xc7   : > { %4799 = vmatmul.mubr.msk.f32.gmra.mrb[88].mxu1 %vm544_vm3, %v471_v54  ;;  %4561 = vmatprep.mubr.msk.f32.mxu0 %vm544_vm3, %v312_v55 }
  0xc8   : > { %4801 = vmatprep.mubr.msk.f32.mxu1 %vm544_vm3, %v472_v56 }
  0xca   : > { %4562 = vmatmul.mubr.msk.f32.gmra.mrb[90].mxu0 %vm544_vm3, %v313_v57  ;;  %v337_v57 = vld [vmem:[%s5017_s23 + $0x398] sm:$0xff] }
  0xcb   : > { %4802 = vmatmul.mubr.msk.f32.gmra.mrb[90].mxu1 %vm544_vm3, %v473_v58  ;;  %4564 = vmatprep.mubr.msk.f32.mxu0 %vm544_vm3, %v314_v59  ;;  %v497_v58 = vld [vmem:[%s5017_s23 + $0x898] sm:$0xff]  ;;  %v338_v59 = vld [vmem:[%s5017_s23 + $0x3a0] sm:$0xff] }
  0xcc   : > { %4804 = vmatprep.mubr.msk.f32.mxu1 %vm544_vm3, %v474_v60  ;;  %v498_v60 = vld [vmem:[%s5017_s23 + $0x8a0] sm:$0xff] }
  0xce   : > { %4565 = vmatmul.mubr.msk.f32.gmra.mrb[92].mxu0 %vm544_vm3, %v315_v61 }
  0xcf   : > { %4805 = vmatmul.mubr.msk.f32.gmra.mrb[92].mxu1 %vm544_vm3, %v475_v62  ;;  %4567 = vmatprep.mubr.msk.f32.mxu0 %vm544_vm3, %v316_v63 }
  0xd0   : > { %4807 = vmatprep.mubr.msk.f32.mxu1 %vm544_vm3, %v476_v0 }
  0xd2   : > { %4568 = vmatmul.mubr.msk.f32.gmra.mrb[94].mxu0 %vm544_vm3, %v317_v1  ;;  %v339_v1 = vld [vmem:[%s5017_s23 + $0x3a8] sm:$0xff] }
  0xd3   : > { %4808 = vmatmul.mubr.msk.f32.gmra.mrb[94].mxu1 %vm544_vm3, %v477_v2  ;;  %4570 = vmatprep.mubr.msk.f32.mxu0 %vm544_vm3, %v318_v3  ;;  %v499_v2 = vld [vmem:[%s5017_s23 + $0x8a8] sm:$0xff]  ;;  %v340_v3 = vld [vmem:[%s5017_s23 + $0x3b0] sm:$0xff] }
  0xd4   : > { %4810 = vmatprep.mubr.msk.f32.mxu1 %vm544_vm3, %v478_v4  ;;  %v500_v4 = vld [vmem:[%s5017_s23 + $0x8b0] sm:$0xff] }
  0xd6   : > { %4571 = vmatmul.mubr.msk.f32.gmra.mrb[96].mxu0 %vm544_vm3, %v319_v5 }
  0xd7   : > { %4811 = vmatmul.mubr.msk.f32.gmra.mrb[96].mxu1 %vm544_vm3, %v479_v6  ;;  %4573 = vmatprep.mubr.msk.f32.mxu0 %vm544_vm3, %v320_v7 }
  0xd8   : > { %4813 = vmatprep.mubr.msk.f32.mxu1 %vm544_vm3, %v480_v8 }
  0xda   : > { %4574 = vmatmul.mubr.msk.f32.gmra.mrb[98].mxu0 %vm544_vm3, %v321_v9  ;;  %v341_v9 = vld [vmem:[%s5017_s23 + $0x3b8] sm:$0xff] }
  0xdb   : > { %4814 = vmatmul.mubr.msk.f32.gmra.mrb[98].mxu1 %vm544_vm3, %v481_v10  ;;  %4576 = vmatprep.mubr.msk.f32.mxu0 %vm544_vm3, %v322_v11  ;;  %v501_v10 = vld [vmem:[%s5017_s23 + $0x8b8] sm:$0xff]  ;;  %v342_v11 = vld [vmem:[%s5017_s23 + $0x3c0] sm:$0xff] }
  0xdc   : > { %4816 = vmatprep.mubr.msk.f32.mxu1 %vm544_vm3, %v482_v12  ;;  %v502_v12 = vld [vmem:[%s5017_s23 + $0x8c0] sm:$0xff] }
  0xde   : > { %4577 = vmatmul.mubr.msk.f32.gmra.mrb[100].mxu0 %vm544_vm3, %v323_v13 }
  0xdf   : > { %4817 = vmatmul.mubr.msk.f32.gmra.mrb[100].mxu1 %vm544_vm3, %v483_v14  ;;  %4579 = vmatprep.mubr.msk.f32.mxu0 %vm544_vm3, %v324_v15 }
  0xe0   : > { %4819 = vmatprep.mubr.msk.f32.mxu1 %vm544_vm3, %v484_v16 }
  0xe2   : > { %4580 = vmatmul.mubr.msk.f32.gmra.mrb[102].mxu0 %vm544_vm3, %v325_v17  ;;  %v343_v17 = vld [vmem:[%s5017_s23 + $0x3c8] sm:$0xff] }
  0xe3   : > { %4820 = vmatmul.mubr.msk.f32.gmra.mrb[102].mxu1 %vm544_vm3, %v485_v18  ;;  %4582 = vmatprep.mubr.msk.f32.mxu0 %vm544_vm3, %v326_v19  ;;  %v503_v18 = vld [vmem:[%s5017_s23 + $0x8c8] sm:$0xff]  ;;  %v344_v19 = vld [vmem:[%s5017_s23 + $0x3d0] sm:$0xff] }
  0xe4   : > { %4822 = vmatprep.mubr.msk.f32.mxu1 %vm544_vm3, %v486_v20  ;;  %v504_v20 = vld [vmem:[%s5017_s23 + $0x8d0] sm:$0xff] }
  0xe6   : > { %4583 = vmatmul.mubr.msk.f32.gmra.mrb[104].mxu0 %vm544_vm3, %v327_v21 }
  0xe7   : > { %4823 = vmatmul.mubr.msk.f32.gmra.mrb[104].mxu1 %vm544_vm3, %v487_v22  ;;  %4585 = vmatprep.mubr.msk.f32.mxu0 %vm544_vm3, %v328_v23 }
  0xe8   : > { %4825 = vmatprep.mubr.msk.f32.mxu1 %vm544_vm3, %v488_v24 }
  0xe9   : > { %v5451_v29 = vpop.f32.mrb[0].mxu0 }
  0xea   : > { %v5453_v30 = vpop.f32.mrb[0].mxu1  ;;  %v5455_v31 = vpop.f32.mrb[1].mxu0  ;;  %4586 = vmatmul.mubr.msk.f32.gmra.mrb[106].mxu0 %vm544_vm3, %v329_v25  ;;  %v345_v25 = vld [vmem:[%s5017_s23 + $0x3d8] sm:$0xff] }
  0xeb   : > { %v5458_v32 = vpop.f32.mrb[1].mxu1  ;;  %4826 = vmatmul.mubr.msk.f32.gmra.mrb[106].mxu1 %vm544_vm3, %v489_v26  ;;  %4588 = vmatprep.mubr.msk.f32.mxu0 %vm544_vm3, %v330_v27  ;;  %v505_v26 = vld [vmem:[%s5017_s23 + $0x8d8] sm:$0xff]  ;;  %v346_v27 = vld [vmem:[%s5017_s23 + $0x3e0] sm:$0xff] }
  0xec   : > { %4828 = vmatprep.mubr.msk.f32.mxu1 %vm544_vm3, %v490_v28  ;;  %v506_v28 = vld [vmem:[%s5017_s23 + $0x8e0] sm:$0xff] }
  0xed   : > { %v5467_v37 = vpop.f32.mrb[2].mxu0 }
  0xee   : > { %v5469_v38 = vpop.f32.mrb[2].mxu1  ;;  %v5471_v39 = vpop.f32.mrb[3].mxu0  ;;  %4589 = vmatmul.mubr.msk.f32.gmra.mrb[108].mxu0 %vm544_vm3, %v331_v33 }
  0xef   : > { %v5474_v40 = vpop.f32.mrb[3].mxu1  ;;  %4829 = vmatmul.mubr.msk.f32.gmra.mrb[108].mxu1 %vm544_vm3, %v491_v34  ;;  %4591 = vmatprep.mubr.msk.f32.mxu0 %vm544_vm3, %v332_v35 }
  0xf0   : > { %4831 = vmatprep.mubr.msk.f32.mxu1 %vm544_vm3, %v492_v36 }
  0xf1   : > { %v5483_v45 = vpop.f32.mrb[4].mxu0 }
  0xf2   : > { %v5485_v46 = vpop.f32.mrb[4].mxu1  ;;  %v5487_v47 = vpop.f32.mrb[5].mxu0  ;;  %4592 = vmatmul.mubr.msk.f32.gmra.mrb[110].mxu0 %vm544_vm3, %v333_v41  ;;  %v347_v41 = vld [vmem:[%s5017_s23 + $0x3e8] sm:$0xff] }
  0xf3   : > { %v5490_v48 = vpop.f32.mrb[5].mxu1  ;;  %4832 = vmatmul.mubr.msk.f32.gmra.mrb[110].mxu1 %vm544_vm3, %v493_v42  ;;  %4594 = vmatprep.mubr.msk.f32.mxu0 %vm544_vm3, %v334_v43  ;;  %v507_v42 = vld [vmem:[%s5017_s23 + $0x8e8] sm:$0xff]  ;;  %v348_v43 = vld [vmem:[%s5017_s23 + $0x3f0] sm:$0xff] }
  0xf4   : > { %4834 = vmatprep.mubr.msk.f32.mxu1 %vm544_vm3, %v494_v44  ;;  %v508_v44 = vld [vmem:[%s5017_s23 + $0x8f0] sm:$0xff] }
  0xf5   : > { %v5499_v53 = vpop.f32.mrb[6].mxu0 }
  0xf6   : > { %v5501_v54 = vpop.f32.mrb[6].mxu1  ;;  %v5503_v55 = vpop.f32.mrb[7].mxu0  ;;  %4595 = vmatmul.mubr.msk.f32.gmra.mrb[112].mxu0 %vm544_vm3, %v335_v49 }
  0xf7   : > { %v5506_v56 = vpop.f32.mrb[7].mxu1  ;;  %4835 = vmatmul.mubr.msk.f32.gmra.mrb[112].mxu1 %vm544_vm3, %v495_v50  ;;  %4597 = vmatprep.mubr.msk.f32.mxu0 %vm544_vm3, %v336_v51 }
  0xf8   : > { %4837 = vmatprep.mubr.msk.f32.mxu1 %vm544_vm3, %v496_v52 }
  0xf9   : > { %v5515_v61 = vpop.f32.mrb[8].mxu0 }
  0xfa   : > { %v5517_v62 = vpop.f32.mrb[8].mxu1  ;;  %v5519_v63 = vpop.f32.mrb[9].mxu0  ;;  %4598 = vmatmul.mubr.msk.f32.gmra.mrb[114].mxu0 %vm544_vm3, %v337_v57  ;;  %v349_v57 = vld [vmem:[%s5017_s23 + $0x3f8] sm:$0xff] }
  0xfb   : > { %v5522_v0 = vpop.f32.mrb[9].mxu1  ;;  %4838 = vmatmul.mubr.msk.f32.gmra.mrb[114].mxu1 %vm544_vm3, %v497_v58  ;;  %4600 = vmatprep.mubr.msk.f32.mxu0 %vm544_vm3, %v338_v59  ;;  %v509_v58 = vld [vmem:[%s5017_s23 + $0x8f8] sm:$0xff]  ;;  %v350_v59 = vld [vmem:[%s5017_s23 + $0x400] sm:$0xff] }
  0xfc   : > { %4840 = vmatprep.mubr.msk.f32.mxu1 %vm544_vm3, %v498_v60  ;;  %v510_v60 = vld [vmem:[%s5017_s23 + $0x900] sm:$0xff] }
  0xfd   : > { %v5531_v5 = vpop.f32.mrb[10].mxu0 }
  0xfe   : > { %v5533_v6 = vpop.f32.mrb[10].mxu1  ;;  %v5535_v7 = vpop.f32.mrb[11].mxu0  ;;  %4601 = vmatmul.mubr.msk.f32.gmra.mrb[116].mxu0 %vm544_vm3, %v339_v1 }
  0xff   : > { %v5538_v8 = vpop.f32.mrb[11].mxu1  ;;  %4841 = vmatmul.mubr.msk.f32.gmra.mrb[116].mxu1 %vm544_vm3, %v499_v2  ;;  %4603 = vmatprep.mubr.msk.f32.mxu0 %vm544_vm3, %v340_v3 }
 0x100   : > { %4843 = vmatprep.mubr.msk.f32.mxu1 %vm544_vm3, %v500_v4 }
 0x101   : > { %v5547_v13 = vpop.f32.mrb[12].mxu0 }
 0x102   : > { %v5549_v14 = vpop.f32.mrb[12].mxu1  ;;  %v5551_v15 = vpop.f32.mrb[13].mxu0  ;;  %4604 = vmatmul.mubr.msk.f32.gmra.mrb[118].mxu0 %vm544_vm3, %v341_v9  ;;  %v351_v9 = vld [vmem:[%s5017_s23 + $0x408] sm:$0xff] }
 0x103   : > { %v5554_v16 = vpop.f32.mrb[13].mxu1  ;;  %4844 = vmatmul.mubr.msk.f32.gmra.mrb[118].mxu1 %vm544_vm3, %v501_v10  ;;  %4606 = vmatprep.mubr.msk.f32.mxu0 %vm544_vm3, %v342_v11  ;;  %v511_v10 = vld [vmem:[%s5017_s23 + $0x908] sm:$0xff]  ;;  %v352_v11 = vld [vmem:[%s5017_s23 + $0x410] sm:$0xff] }
 0x104   : > { %4846 = vmatprep.mubr.msk.f32.mxu1 %vm544_vm3, %v502_v12  ;;  %v512_v12 = vld [vmem:[%s5017_s23 + $0x910] sm:$0xff] }
 0x105   : > { %v5563_v21 = vpop.f32.mrb[14].mxu0 }
 0x106   : > { %v5565_v22 = vpop.f32.mrb[14].mxu1  ;;  %v5567_v23 = vpop.f32.mrb[15].mxu0  ;;  %4607 = vmatmul.mubr.msk.f32.gmra.mrb[120].mxu0 %vm544_vm3, %v343_v17 }
 0x107   : > { %v5570_v24 = vpop.f32.mrb[15].mxu1  ;;  %4847 = vmatmul.mubr.msk.f32.gmra.mrb[120].mxu1 %vm544_vm3, %v503_v18  ;;  %4609 = vmatprep.mubr.msk.f32.mxu0 %vm544_vm3, %v344_v19 }
 0x108   : > { %4849 = vmatprep.mubr.msk.f32.mxu1 %vm544_vm3, %v504_v20 }
 0x109   : > { %v5579_v33 = vpop.f32.mrb[16].mxu0 }
 0x10a   : > { %v5581_v34 = vpop.f32.mrb[16].mxu1  ;;  %v5583_v35 = vpop.f32.mrb[17].mxu0  ;;  %4610 = vmatmul.mubr.msk.f32.gmra.mrb[122].mxu0 %vm544_vm3, %v345_v25  ;;  %v353_v25 = vld [vmem:[%s5017_s23 + $0x418] sm:$0xff] }
 0x10b   : > { %v5586_v36 = vpop.f32.mrb[17].mxu1  ;;  %4850 = vmatmul.mubr.msk.f32.gmra.mrb[122].mxu1 %vm544_vm3, %v505_v26  ;;  %4612 = vmatprep.mubr.msk.f32.mxu0 %vm544_vm3, %v346_v27  ;;  %v513_v26 = vld [vmem:[%s5017_s23 + $0x918] sm:$0xff]  ;;  %v354_v27 = vld [vmem:[%s5017_s23 + $0x420] sm:$0xff] }
 0x10c   : > { %4852 = vmatprep.mubr.msk.f32.mxu1 %vm544_vm3, %v506_v28  ;;  %v514_v28 = vld [vmem:[%s5017_s23 + $0x920] sm:$0xff] }
 0x10d   : > { %v5595_v49 = vpop.f32.mrb[18].mxu0 }
 0x10e   : > { %v5597_v50 = vpop.f32.mrb[18].mxu1  ;;  %v5599_v51 = vpop.f32.mrb[19].mxu0  ;;  %4613 = vmatmul.mubr.msk.f32.gmra.mrb[124].mxu0 %vm544_vm3, %v347_v41 }
 0x10f   : > { %v5602_v52 = vpop.f32.mrb[19].mxu1  ;;  %4853 = vmatmul.mubr.msk.f32.gmra.mrb[124].mxu1 %vm544_vm3, %v507_v42  ;;  %4615 = vmatprep.mubr.msk.f32.mxu0 %vm544_vm3, %v348_v43 }
 0x110   : > { %4855 = vmatprep.mubr.msk.f32.mxu1 %vm544_vm3, %v508_v44 }
 0x111   : > { %v5611_v1 = vpop.f32.mrb[20].mxu0 }
 0x112   : > { %v5613_v2 = vpop.f32.mrb[20].mxu1  ;;  %v5615_v3 = vpop.f32.mrb[21].mxu0  ;;  %4616 = vmatmul.mubr.msk.f32.gmra.mrb[126].mxu0 %vm544_vm3, %v349_v57  ;;  %v355_v57 = vld [vmem:[%s5017_s23 + $0x428] sm:$0xff] }
 0x113   : > { %v5618_v4 = vpop.f32.mrb[21].mxu1  ;;  %4856 = vmatmul.mubr.msk.f32.gmra.mrb[126].mxu1 %vm544_vm3, %v509_v58  ;;  %4618 = vmatprep.mubr.msk.f32.mxu0 %vm544_vm3, %v350_v59  ;;  %v515_v58 = vld [vmem:[%s5017_s23 + $0x928] sm:$0xff]  ;;  %v356_v59 = vld [vmem:[%s5017_s23 + $0x430] sm:$0xff] }
 0x114   : > { %4858 = vmatprep.mubr.msk.f32.mxu1 %vm544_vm3, %v510_v60  ;;  %v516_v60 = vld [vmem:[%s5017_s23 + $0x930] sm:$0xff] }
 0x115   : > { %v5627_v17 = vpop.f32.mrb[22].mxu0 }
 0x116   : > { %v5629_v18 = vpop.f32.mrb[22].mxu1  ;;  %v5631_v19 = vpop.f32.mrb[23].mxu0  ;;  %4619 = vmatmul.mubr.msk.f32.gmra.mrb[128].mxu0 %vm544_vm3, %v351_v9 }
 0x117   : > { %v5634_v20 = vpop.f32.mrb[23].mxu1  ;;  %4859 = vmatmul.mubr.msk.f32.gmra.mrb[128].mxu1 %vm544_vm3, %v511_v10  ;;  %4621 = vmatprep.mubr.msk.f32.mxu0 %vm544_vm3, %v352_v11 }
 0x118   : > { %4861 = vmatprep.mubr.msk.f32.mxu1 %vm544_vm3, %v512_v12 }
 0x119   : > { %v5643_v41 = vpop.f32.mrb[24].mxu0 }
 0x11a   : > { %v5645_v42 = vpop.f32.mrb[24].mxu1  ;;  %v5647_v43 = vpop.f32.mrb[25].mxu0  ;;  %4622 = vmatmul.mubr.msk.f32.gmra.mrb[130].mxu0 %vm544_vm3, %v353_v25  ;;  %v357_v25 = vld [vmem:[%s5017_s23 + $0x438] sm:$0xff] }
 0x11b   : > { %6408 = vst [vmem:[#allocation2_spill] sm:$0xff] %v5647_v43  ;;  %v5650_v44 = vpop.f32.mrb[25].mxu1  ;;  %4862 = vmatmul.mubr.msk.f32.gmra.mrb[130].mxu1 %vm544_vm3, %v513_v26  ;;  %4624 = vmatprep.mubr.msk.f32.mxu0 %vm544_vm3, %v354_v27  ;;  %v517_v26 = vld [vmem:[%s5017_s23 + $0x938] sm:$0xff]  ;;  %v358_v27 = vld [vmem:[%s5017_s23 + $0x440] sm:$0xff] }
 0x11c   : > { %6409 = vst [vmem:[#allocation3_spill] sm:$0xff] %v5650_v44  ;;  %4864 = vmatprep.mubr.msk.f32.mxu1 %vm544_vm3, %v514_v28  ;;  %v518_v28 = vld [vmem:[%s5017_s23 + $0x940] sm:$0xff] }
 0x11d   : > { %v5659_v9 = vpop.f32.mrb[26].mxu0 }
 0x11e   : > { %6410 = vst [vmem:[#allocation4_spill] sm:$0xff] %v5659_v9  ;;  %v5661_v10 = vpop.f32.mrb[26].mxu1  ;;  %v5663_v11 = vpop.f32.mrb[27].mxu0  ;;  %4625 = vmatmul.mubr.msk.f32.gmra.mrb[132].mxu0 %vm544_vm3, %v355_v57 }
 0x11f   : > { %6411 = vst [vmem:[#allocation5_spill] sm:$0xff] %v5661_v10  ;;  %6412 = vst [vmem:[#allocation6_spill] sm:$0xff] %v5663_v11  ;;  %v5666_v12 = vpop.f32.mrb[27].mxu1  ;;  %4865 = vmatmul.mubr.msk.f32.gmra.mrb[132].mxu1 %vm544_vm3, %v515_v58  ;;  %4627 = vmatprep.mubr.msk.f32.mxu0 %vm544_vm3, %v356_v59  ;;  %v359_v59 = vld [vmem:[%s5017_s23 + $0x448] sm:$0xff] }
 0x120   : > { %6413 = vst [vmem:[#allocation7_spill] sm:$0xff] %v5666_v12  ;;  %4867 = vmatprep.mubr.msk.f32.mxu1 %vm544_vm3, %v516_v60  ;;  %v519_v60 = vld [vmem:[%s5017_s23 + $0x948] sm:$0xff] }
 0x121   : > { %v5675_v10 = vpop.f32.mrb[28].mxu0 }
 0x122   : > { %6414 = vst [vmem:[#allocation8_spill] sm:$0xff] %v5675_v10  ;;  %v5677_v11 = vpop.f32.mrb[28].mxu1  ;;  %v5679_v57 = vpop.f32.mrb[29].mxu0  ;;  %4628 = vmatmul.mubr.msk.f32.gmra.mrb[134].mxu0 %vm544_vm3, %v357_v25  ;;  %v360_v10 = vld [vmem:[%s5017_s23 + $0x450] sm:$0xff] }
 0x123   : > { %6415 = vst [vmem:[#allocation9_spill] sm:$0xff] %v5677_v11  ;;  %6416 = vst [vmem:[#allocation10_spill] sm:$0xff] %v5679_v57  ;;  %v5682_v58 = vpop.f32.mrb[29].mxu1  ;;  %4868 = vmatmul.mubr.msk.f32.gmra.mrb[134].mxu1 %vm544_vm3, %v517_v26  ;;  %4630 = vmatprep.mubr.msk.f32.mxu0 %vm544_vm3, %v358_v27  ;;  %v520_v11 = vld [vmem:[%s5017_s23 + $0x950] sm:$0xff]  ;;  %v361_v27 = vld [vmem:[%s5017_s23 + $0x458] sm:$0xff] }
 0x124   : > { %6417 = vst [vmem:[#allocation11_spill] sm:$0xff] %v5682_v58  ;;  %4870 = vmatprep.mubr.msk.f32.mxu1 %vm544_vm3, %v518_v28  ;;  %v521_v28 = vld [vmem:[%s5017_s23 + $0x958] sm:$0xff] }
 0x125   : > { %v5691_v12 = vpop.f32.mrb[30].mxu0 }
 0x126   : > { %6418 = vst [vmem:[#allocation12_spill] sm:$0xff] %v5691_v12  ;;  %v5693_v57 = vpop.f32.mrb[30].mxu1  ;;  %v5695_v25 = vpop.f32.mrb[31].mxu0  ;;  %4631 = vmatmul.mubr.msk.f32.gmra.mrb[136].mxu0 %vm544_vm3, %v359_v59  ;;  %v362_v12 = vld [vmem:[%s5017_s23 + $0x460] sm:$0xff] }
 0x127   : > { %6419 = vst [vmem:[#allocation13_spill] sm:$0xff] %v5693_v57  ;;  %6420 = vst [vmem:[#allocation14_spill] sm:$0xff] %v5695_v25  ;;  %v5698_v26 = vpop.f32.mrb[31].mxu1  ;;  %4871 = vmatmul.mubr.msk.f32.gmra.mrb[136].mxu1 %vm544_vm3, %v519_v60  ;;  %4633 = vmatprep.mubr.msk.f32.mxu0 %vm544_vm3, %v360_v10  ;;  %v522_v57 = vld [vmem:[%s5017_s23 + $0x960] sm:$0xff]  ;;  %v363_v10 = vld [vmem:[%s5017_s23 + $0x468] sm:$0xff] }
 0x128   : > { %6421 = vst [vmem:[#allocation15_spill] sm:$0xff] %v5698_v26  ;;  %4873 = vmatprep.mubr.msk.f32.mxu1 %vm544_vm3, %v520_v11  ;;  %v523_v11 = vld [vmem:[%s5017_s23 + $0x968] sm:$0xff] }
 0x129   : > { %v5707_v58 = vpop.f32.mrb[32].mxu0 }
 0x12a   : > { %6422 = vst [vmem:[#allocation16_spill] sm:$0xff] %v5707_v58  ;;  %v5709_v25 = vpop.f32.mrb[32].mxu1  ;;  %v5711_v59 = vpop.f32.mrb[33].mxu0  ;;  %4634 = vmatmul.mubr.msk.f32.gmra.mrb[138].mxu0 %vm544_vm3, %v361_v27  ;;  %v364_v58 = vld [vmem:[%s5017_s23 + $0x470] sm:$0xff] }
 0x12b   : > { %6423 = vst [vmem:[#allocation17_spill] sm:$0xff] %v5709_v25  ;;  %6424 = vst [vmem:[#allocation18_spill] sm:$0xff] %v5711_v59  ;;  %v5714_v60 = vpop.f32.mrb[33].mxu1  ;;  %4874 = vmatmul.mubr.msk.f32.gmra.mrb[138].mxu1 %vm544_vm3, %v521_v28  ;;  %4636 = vmatprep.mubr.msk.f32.mxu0 %vm544_vm3, %v362_v12  ;;  %v524_v25 = vld [vmem:[%s5017_s23 + $0x970] sm:$0xff]  ;;  %v365_v12 = vld [vmem:[%s5017_s23 + $0x478] sm:$0xff] }
 0x12c   : > { %6425 = vst [vmem:[#allocation19_spill] sm:$0xff] %v5714_v60  ;;  %4876 = vmatprep.mubr.msk.f32.mxu1 %vm544_vm3, %v522_v57  ;;  %v525_v57 = vld [vmem:[%s5017_s23 + $0x978] sm:$0xff] }
 0x12d   : > { %v5723_v26 = vpop.f32.mrb[34].mxu0 }
 0x12e   : > { %6426 = vst [vmem:[#allocation20_spill] sm:$0xff] %v5723_v26  ;;  %v5725_v59 = vpop.f32.mrb[34].mxu1  ;;  %v5727_v27 = vpop.f32.mrb[35].mxu0  ;;  %4637 = vmatmul.mubr.msk.f32.gmra.mrb[140].mxu0 %vm544_vm3, %v363_v10  ;;  %v366_v26 = vld [vmem:[%s5017_s23 + $0x480] sm:$0xff] }
 0x12f   : > { %6427 = vst [vmem:[#allocation21_spill] sm:$0xff] %v5725_v59  ;;  %6428 = vst [vmem:[#allocation22_spill] sm:$0xff] %v5727_v27  ;;  %v5730_v28 = vpop.f32.mrb[35].mxu1  ;;  %4877 = vmatmul.mubr.msk.f32.gmra.mrb[140].mxu1 %vm544_vm3, %v523_v11  ;;  %4639 = vmatprep.mubr.msk.f32.mxu0 %vm544_vm3, %v364_v58  ;;  %v526_v59 = vld [vmem:[%s5017_s23 + $0x980] sm:$0xff]  ;;  %v367_v58 = vld [vmem:[%s5017_s23 + $0x488] sm:$0xff] }
 0x130   : > { %6429 = vst [vmem:[#allocation23_spill] sm:$0xff] %v5730_v28  ;;  %4879 = vmatprep.mubr.msk.f32.mxu1 %vm544_vm3, %v524_v25  ;;  %v527_v25 = vld [vmem:[%s5017_s23 + $0x988] sm:$0xff] }
 0x131   : > { %v5739_v60 = vpop.f32.mrb[36].mxu0 }
 0x132   : > { %6430 = vst [vmem:[#allocation24_spill] sm:$0xff] %v5739_v60  ;;  %v5741_v27 = vpop.f32.mrb[36].mxu1  ;;  %v5743_v10 = vpop.f32.mrb[37].mxu0  ;;  %4640 = vmatmul.mubr.msk.f32.gmra.mrb[142].mxu0 %vm544_vm3, %v365_v12  ;;  %v368_v60 = vld [vmem:[%s5017_s23 + $0x490] sm:$0xff] }
 0x133   : > { %6431 = vst [vmem:[#allocation25_spill] sm:$0xff] %v5741_v27  ;;  %6432 = vst [vmem:[#allocation26_spill] sm:$0xff] %v5743_v10  ;;  %v5746_v11 = vpop.f32.mrb[37].mxu1  ;;  %4880 = vmatmul.mubr.msk.f32.gmra.mrb[142].mxu1 %vm544_vm3, %v525_v57  ;;  %4642 = vmatprep.mubr.msk.f32.mxu0 %vm544_vm3, %v366_v26  ;;  %v528_v27 = vld [vmem:[%s5017_s23 + $0x990] sm:$0xff]  ;;  %v369_v26 = vld [vmem:[%s5017_s23 + $0x498] sm:$0xff] }
 0x134   : > { %6433 = vst [vmem:[#allocation27_spill] sm:$0xff] %v5746_v11  ;;  %4882 = vmatprep.mubr.msk.f32.mxu1 %vm544_vm3, %v526_v59  ;;  %v529_v59 = vld [vmem:[%s5017_s23 + $0x998] sm:$0xff] }
 0x135   : > { %v5755_v28 = vpop.f32.mrb[38].mxu0 }
 0x136   : > { %6434 = vst [vmem:[#allocation28_spill] sm:$0xff] %v5755_v28  ;;  %v5757_v10 = vpop.f32.mrb[38].mxu1  ;;  %v5759_v12 = vpop.f32.mrb[39].mxu0  ;;  %4643 = vmatmul.mubr.msk.f32.gmra.mrb[144].mxu0 %vm544_vm3, %v367_v58  ;;  %v370_v28 = vld [vmem:[%s5017_s23 + $0x4a0] sm:$0xff] }
 0x137   : > { %6435 = vst [vmem:[#allocation29_spill] sm:$0xff] %v5757_v10  ;;  %6436 = vst [vmem:[#allocation30_spill] sm:$0xff] %v5759_v12  ;;  %v5762_v57 = vpop.f32.mrb[39].mxu1  ;;  %4883 = vmatmul.mubr.msk.f32.gmra.mrb[144].mxu1 %vm544_vm3, %v527_v25  ;;  %4645 = vmatprep.mubr.msk.f32.mxu0 %vm544_vm3, %v368_v60  ;;  %v530_v10 = vld [vmem:[%s5017_s23 + $0x9a0] sm:$0xff]  ;;  %v371_v60 = vld [vmem:[%s5017_s23 + $0x4a8] sm:$0xff] }
 0x138   : > { %6437 = vst [vmem:[#allocation31_spill] sm:$0xff] %v5762_v57  ;;  %4885 = vmatprep.mubr.msk.f32.mxu1 %vm544_vm3, %v528_v27  ;;  %v531_v27 = vld [vmem:[%s5017_s23 + $0x9a8] sm:$0xff] }
 0x139   : > { %v5771_v11 = vpop.f32.mrb[40].mxu0 }
 0x13a   : > { %6438 = vst [vmem:[#allocation32_spill] sm:$0xff] %v5771_v11  ;;  %v5773_v12 = vpop.f32.mrb[40].mxu1  ;;  %v5775_v58 = vpop.f32.mrb[41].mxu0  ;;  %4646 = vmatmul.mubr.msk.f32.gmra.mrb[146].mxu0 %vm544_vm3, %v369_v26  ;;  %v372_v11 = vld [vmem:[%s5017_s23 + $0x4b0] sm:$0xff] }
 0x13b   : > { %6439 = vst [vmem:[#allocation33_spill] sm:$0xff] %v5773_v12  ;;  %6440 = vst [vmem:[#allocation34_spill] sm:$0xff] %v5775_v58  ;;  %v5778_v25 = vpop.f32.mrb[41].mxu1  ;;  %4886 = vmatmul.mubr.msk.f32.gmra.mrb[146].mxu1 %vm544_vm3, %v529_v59  ;;  %4648 = vmatprep.mubr.msk.f32.mxu0 %vm544_vm3, %v370_v28  ;;  %v532_v12 = vld [vmem:[%s5017_s23 + $0x9b0] sm:$0xff]  ;;  %v373_v28 = vld [vmem:[%s5017_s23 + $0x4b8] sm:$0xff] }
 0x13c   : > { %6441 = vst [vmem:[#allocation35_spill] sm:$0xff] %v5778_v25  ;;  %4888 = vmatprep.mubr.msk.f32.mxu1 %vm544_vm3, %v530_v10  ;;  %v533_v10 = vld [vmem:[%s5017_s23 + $0x9b8] sm:$0xff] }
 0x13d   : > { %v5787_v57 = vpop.f32.mrb[42].mxu0 }
 0x13e   : > { %6442 = vst [vmem:[#allocation36_spill] sm:$0xff] %v5787_v57  ;;  %v5789_v58 = vpop.f32.mrb[42].mxu1  ;;  %v5791_v26 = vpop.f32.mrb[43].mxu0  ;;  %4649 = vmatmul.mubr.msk.f32.gmra.mrb[148].mxu0 %vm544_vm3, %v371_v60  ;;  %v374_v57 = vld [vmem:[%s5017_s23 + $0x4c0] sm:$0xff] }
 0x13f   : > { %6443 = vst [vmem:[#allocation37_spill] sm:$0xff] %v5789_v58  ;;  %6444 = vst [vmem:[#allocation38_spill] sm:$0xff] %v5791_v26  ;;  %v5794_v59 = vpop.f32.mrb[43].mxu1  ;;  %4889 = vmatmul.mubr.msk.f32.gmra.mrb[148].mxu1 %vm544_vm3, %v531_v27  ;;  %4651 = vmatprep.mubr.msk.f32.mxu0 %vm544_vm3, %v372_v11  ;;  %v534_v58 = vld [vmem:[%s5017_s23 + $0x9c0] sm:$0xff]  ;;  %v375_v11 = vld [vmem:[%s5017_s23 + $0x4c8] sm:$0xff] }
 0x140   : > { %6445 = vst [vmem:[#allocation39_spill] sm:$0xff] %v5794_v59  ;;  %4891 = vmatprep.mubr.msk.f32.mxu1 %vm544_vm3, %v532_v12  ;;  %v535_v12 = vld [vmem:[%s5017_s23 + $0x9c8] sm:$0xff] }
 0x141   : > { %v5803_v25 = vpop.f32.mrb[44].mxu0 }
 0x142   : > { %6446 = vst [vmem:[#allocation40_spill] sm:$0xff] %v5803_v25  ;;  %v5805_v26 = vpop.f32.mrb[44].mxu1  ;;  %v5807_v60 = vpop.f32.mrb[45].mxu0  ;;  %4652 = vmatmul.mubr.msk.f32.gmra.mrb[150].mxu0 %vm544_vm3, %v373_v28  ;;  %v376_v25 = vld [vmem:[%s5017_s23 + $0x4d0] sm:$0xff] }
 0x143   : > { %6447 = vst [vmem:[#allocation41_spill] sm:$0xff] %v5805_v26  ;;  %6448 = vst [vmem:[#allocation42_spill] sm:$0xff] %v5807_v60  ;;  %v5810_v27 = vpop.f32.mrb[45].mxu1  ;;  %4892 = vmatmul.mubr.msk.f32.gmra.mrb[150].mxu1 %vm544_vm3, %v533_v10  ;;  %4654 = vmatprep.mubr.msk.f32.mxu0 %vm544_vm3, %v374_v57  ;;  %v536_v26 = vld [vmem:[%s5017_s23 + $0x9d0] sm:$0xff]  ;;  %v377_v57 = vld [vmem:[%s5017_s23 + $0x4d8] sm:$0xff] }
 0x144   : > { %6449 = vst [vmem:[#allocation43_spill] sm:$0xff] %v5810_v27  ;;  %4894 = vmatprep.mubr.msk.f32.mxu1 %vm544_vm3, %v534_v58  ;;  %v537_v58 = vld [vmem:[%s5017_s23 + $0x9d8] sm:$0xff] }
 0x145   : > { %v5819_v59 = vpop.f32.mrb[46].mxu0 }
 0x146   : > { %6450 = vst [vmem:[#allocation44_spill] sm:$0xff] %v5819_v59  ;;  %v5821_v60 = vpop.f32.mrb[46].mxu1  ;;  %v5823_v28 = vpop.f32.mrb[47].mxu0  ;;  %4655 = vmatmul.mubr.msk.f32.gmra.mrb[152].mxu0 %vm544_vm3, %v375_v11  ;;  %v378_v59 = vld [vmem:[%s5017_s23 + $0x4e0] sm:$0xff] }
 0x147   : > { %6451 = vst [vmem:[#allocation45_spill] sm:$0xff] %v5821_v60  ;;  %6452 = vst [vmem:[#allocation46_spill] sm:$0xff] %v5823_v28  ;;  %v5826_v10 = vpop.f32.mrb[47].mxu1  ;;  %4895 = vmatmul.mubr.msk.f32.gmra.mrb[152].mxu1 %vm544_vm3, %v535_v12  ;;  %4657 = vmatprep.mubr.msk.f32.mxu0 %vm544_vm3, %v376_v25  ;;  %v538_v60 = vld [vmem:[%s5017_s23 + $0x9e0] sm:$0xff]  ;;  %v379_v25 = vld [vmem:[%s5017_s23 + $0x4e8] sm:$0xff] }
 0x148   : > { %6453 = vst [vmem:[#allocation47_spill] sm:$0xff] %v5826_v10  ;;  %4897 = vmatprep.mubr.msk.f32.mxu1 %vm544_vm3, %v536_v26  ;;  %v539_v26 = vld [vmem:[%s5017_s23 + $0x9e8] sm:$0xff]  ;;  %v380_v10 = vld [vmem:[%s5017_s23 + $0x4f0] sm:$0xff] }
 0x149   : > { %v5835_v27 = vpop.f32.mrb[48].mxu0 }
 0x14a   : > { %6454 = vst [vmem:[#allocation48_spill] sm:$0xff] %v5835_v27  ;;  %v5837_v28 = vpop.f32.mrb[48].mxu1  ;;  %v5839_v11 = vpop.f32.mrb[49].mxu0  ;;  %4658 = vmatmul.mubr.msk.f32.gmra.mrb[154].mxu0 %vm544_vm3, %v377_v57  ;;  %v540_v27 = vld [vmem:[%s5017_s23 + $0x9f0] sm:$0xff] }
 0x14b   : > { %6455 = vst [vmem:[#allocation49_spill] sm:$0xff] %v5837_v28  ;;  %6456 = vst [vmem:[#allocation50_spill] sm:$0xff] %v5839_v11  ;;  %v5842_v12 = vpop.f32.mrb[49].mxu1  ;;  %4898 = vmatmul.mubr.msk.f32.gmra.mrb[154].mxu1 %vm544_vm3, %v537_v58  ;;  %4660 = vmatprep.mubr.msk.f32.mxu0 %vm544_vm3, %v378_v59  ;;  %v381_v59 = vld [vmem:[%s5017_s23 + $0x4f8] sm:$0xff] }
 0x14c   : > { %6457 = vst [vmem:[#allocation51_spill] sm:$0xff] %v5842_v12  ;;  %4900 = vmatprep.mubr.msk.f32.mxu1 %vm544_vm3, %v538_v60  ;;  %v541_v60 = vld [vmem:[%s5017_s23 + $0x9f8] sm:$0xff] }
 0x14d   : > { %v5851_v9 = vpop.f32.mrb[50].mxu0 }
 0x14e   : > { %6458 = vst [vmem:[#allocation52_spill] sm:$0xff] %v5851_v9  ;;  %v5853_v28 = vpop.f32.mrb[50].mxu1  ;;  %v5855_v11 = vpop.f32.mrb[51].mxu0  ;;  %4661 = vmatmul.mubr.msk.f32.gmra.mrb[156].mxu0 %vm544_vm3, %v379_v25 }
 0x14f   : > { %6459 = vst [vmem:[#allocation53_spill] sm:$0xff] %v5853_v28  ;;  %6460 = vst [vmem:[#allocation54_spill] sm:$0xff] %v5855_v11  ;;  %v5858_v57 = vpop.f32.mrb[51].mxu1  ;;  %4901 = vmatmul.mubr.msk.f32.gmra.mrb[156].mxu1 %vm544_vm3, %v539_v26  ;;  %4663 = vmatprep.mubr.msk.f32.mxu0 %vm544_vm3, %v380_v10 }
 0x150   : > { %6461 = vst [vmem:[#allocation55_spill] sm:$0xff] %v5858_v57  ;;  %4903 = vmatprep.mubr.msk.f32.mxu1 %vm544_vm3, %v540_v27 }
 0x151   : > { %v5865_v58 = vpop.f32.mrb[52].mxu0 }
 0x152   : > { %6462 = vst [vmem:[#allocation56_spill] sm:$0xff] %v5865_v58  ;;  %v5867_v12 = vpop.f32.mrb[52].mxu1  ;;  %v5869_v9 = vpop.f32.mrb[53].mxu0  ;;  %4664 = vmatmul.mubr.msk.f32.gmra.mrb[158].mxu0 %vm544_vm3, %v381_v59 }
 0x153   : > { %6463 = vst [vmem:[#allocation57_spill] sm:$0xff] %v5867_v12  ;;  %6464 = vst [vmem:[#allocation58_spill] sm:$0xff] %v5869_v9  ;;  %v5872_v11 = vpop.f32.mrb[53].mxu1  ;;  %4904 = vmatmul.mubr.msk.f32.gmra.mrb[158].mxu1 %vm544_vm3, %v541_v60 }
 0x154   : > { %6465 = vst [vmem:[#allocation59_spill] sm:$0xff] %v5872_v11 }
 0x155   : > { %v5875_v25 = vpop.f32.mrb[54].mxu0 }
 0x156   : > { %6466 = vst [vmem:[#allocation60_spill] sm:$0xff] %v5875_v25  ;;  %v5877_v26 = vpop.f32.mrb[54].mxu1  ;;  %v5879_v10 = vpop.f32.mrb[55].mxu0 }
 0x157   : > { %6467 = vst [vmem:[#allocation61_spill] sm:$0xff] %v5877_v26  ;;  %6468 = vst [vmem:[#allocation62_spill] sm:$0xff] %v5879_v10  ;;  %v5881_v27 = vpop.f32.mrb[55].mxu1 }
 0x158   : > { %6469 = vst [vmem:[#allocation63_spill] sm:$0xff] %v5881_v27 }
 0x159   : > { %v5883_v57 = vpop.f32.mrb[56].mxu0 }
 0x15a   : > { %6470 = vst [vmem:[#allocation64_spill] sm:$0xff] %v5883_v57  ;;  %v5885_v58 = vpop.f32.mrb[56].mxu1  ;;  %v5887_v12 = vpop.f32.mrb[57].mxu0 }
 0x15b   : > { %6471 = vst [vmem:[#allocation65_spill] sm:$0xff] %v5885_v58  ;;  %6472 = vst [vmem:[#allocation66_spill] sm:$0xff] %v5887_v12  ;;  %v5889_v9 = vpop.f32.mrb[57].mxu1 }
 0x15c   : > { %6473 = vst [vmem:[#allocation67_spill] sm:$0xff] %v5889_v9 }
 0x15d   : > { %v5891_v59 = vpop.f32.mrb[58].mxu0 }
 0x15e   : > { %6474 = vst [vmem:[#allocation68_spill] sm:$0xff] %v5891_v59  ;;  %v5893_v11 = vpop.f32.mrb[58].mxu1  ;;  %v5895_v60 = vpop.f32.mrb[59].mxu0 }
 0x15f   : > { %6475 = vst [vmem:[#allocation69_spill] sm:$0xff] %v5893_v11  ;;  %6476 = vst [vmem:[#allocation70_spill] sm:$0xff] %v5895_v60  ;;  %v5897_v25 = vpop.f32.mrb[59].mxu1 }
 0x160   : > { %6477 = vst [vmem:[#allocation71_spill] sm:$0xff] %v5897_v25 }
 0x161   : > { %v5899_v26 = vpop.f32.mrb[60].mxu0 }
 0x162   : > { %6478 = vst [vmem:[#allocation72_spill] sm:$0xff] %v5899_v26  ;;  %v5901_v10 = vpop.f32.mrb[60].mxu1  ;;  %v5903_v27 = vpop.f32.mrb[61].mxu0 }
 0x163   : > { %6479 = vst [vmem:[#allocation73_spill] sm:$0xff] %v5901_v10  ;;  %6480 = vst [vmem:[#allocation74_spill] sm:$0xff] %v5903_v27  ;;  %v5905_v57 = vpop.f32.mrb[61].mxu1 }
 0x164   : > { %6481 = vst [vmem:[#allocation75_spill] sm:$0xff] %v5905_v57 }
 0x165   : > { %v5907_v58 = vpop.f32.mrb[62].mxu0 }
 0x166   : > { %6482 = vst [vmem:[#allocation76_spill] sm:$0xff] %v5907_v58  ;;  %v5909_v12 = vpop.f32.mrb[62].mxu1  ;;  %v5911_v9 = vpop.f32.mrb[63].mxu0 }
 0x167   : > { %6483 = vst [vmem:[#allocation77_spill] sm:$0xff] %v5909_v12  ;;  %6484 = vst [vmem:[#allocation78_spill] sm:$0xff] %v5911_v9  ;;  %v5913_v59 = vpop.f32.mrb[63].mxu1 }
 0x168   : > { %6485 = vst [vmem:[#allocation79_spill] sm:$0xff] %v5913_v59 }
 0x169   : > { %v5915_v11 = vpop.f32.mrb[64].mxu0 }
 0x16a   : > { %6486 = vst [vmem:[#allocation80_spill] sm:$0xff] %v5915_v11  ;;  %v5917_v60 = vpop.f32.mrb[64].mxu1  ;;  %v5919_v25 = vpop.f32.mrb[65].mxu0 }
 0x16b   : > { %6487 = vst [vmem:[#allocation81_spill] sm:$0xff] %v5917_v60  ;;  %6488 = vst [vmem:[#allocation82_spill] sm:$0xff] %v5919_v25  ;;  %v5921_v26 = vpop.f32.mrb[65].mxu1 }
 0x16c   : > { %6489 = vst [vmem:[#allocation83_spill] sm:$0xff] %v5921_v26 }
 0x16d   : > { %v5923_v10 = vpop.f32.mrb[66].mxu0 }
 0x16e   : > { %6490 = vst [vmem:[#allocation84_spill] sm:$0xff] %v5923_v10  ;;  %v5925_v27 = vpop.f32.mrb[66].mxu1  ;;  %v5927_v57 = vpop.f32.mrb[67].mxu0 }
 0x16f   : > { %6491 = vst [vmem:[#allocation85_spill] sm:$0xff] %v5925_v27  ;;  %6492 = vst [vmem:[#allocation86_spill] sm:$0xff] %v5927_v57  ;;  %v5929_v58 = vpop.f32.mrb[67].mxu1 }
 0x170   : > { %6493 = vst [vmem:[#allocation87_spill] sm:$0xff] %v5929_v58 }
 0x171   : > { %v5931_v12 = vpop.f32.mrb[68].mxu0 }
 0x172   : > { %6494 = vst [vmem:[#allocation88_spill] sm:$0xff] %v5931_v12  ;;  %v5933_v9 = vpop.f32.mrb[68].mxu1  ;;  %v5935_v59 = vpop.f32.mrb[69].mxu0 }
 0x173   : > { %6495 = vst [vmem:[#allocation89_spill] sm:$0xff] %v5933_v9  ;;  %6496 = vst [vmem:[#allocation90_spill] sm:$0xff] %v5935_v59  ;;  %v5937_v11 = vpop.f32.mrb[69].mxu1 }
 0x174   : > { %6497 = vst [vmem:[#allocation91_spill] sm:$0xff] %v5937_v11 }
 0x175   : > { %v5939_v60 = vpop.f32.mrb[70].mxu0 }
 0x176   : > { %6498 = vst [vmem:[#allocation92_spill] sm:$0xff] %v5939_v60  ;;  %v5941_v25 = vpop.f32.mrb[70].mxu1  ;;  %v5943_v26 = vpop.f32.mrb[71].mxu0 }
 0x177   : > { %6499 = vst [vmem:[#allocation93_spill] sm:$0xff] %v5941_v25  ;;  %6500 = vst [vmem:[#allocation94_spill] sm:$0xff] %v5943_v26  ;;  %v5945_v10 = vpop.f32.mrb[71].mxu1 }
 0x178   : > { %6501 = vst [vmem:[#allocation95_spill] sm:$0xff] %v5945_v10 }
 0x179   : > { %v5947_v27 = vpop.f32.mrb[72].mxu0 }
 0x17a   : > { %6502 = vst [vmem:[#allocation96_spill] sm:$0xff] %v5947_v27  ;;  %v5949_v57 = vpop.f32.mrb[72].mxu1  ;;  %v5951_v58 = vpop.f32.mrb[73].mxu0 }
 0x17b   : > { %6503 = vst [vmem:[#allocation97_spill] sm:$0xff] %v5949_v57  ;;  %6504 = vst [vmem:[#allocation98_spill] sm:$0xff] %v5951_v58  ;;  %v5953_v12 = vpop.f32.mrb[73].mxu1 }
 0x17c   : > { %6505 = vst [vmem:[#allocation99_spill] sm:$0xff] %v5953_v12 }
 0x17d   : > { %v5955_v9 = vpop.f32.mrb[74].mxu0 }
 0x17e   : > { %6506 = vst [vmem:[#allocation100_spill] sm:$0xff] %v5955_v9  ;;  %v5957_v59 = vpop.f32.mrb[74].mxu1  ;;  %v5959_v11 = vpop.f32.mrb[75].mxu0 }
 0x17f   : > { %6507 = vst [vmem:[#allocation101_spill] sm:$0xff] %v5957_v59  ;;  %6508 = vst [vmem:[#allocation102_spill] sm:$0xff] %v5959_v11  ;;  %v5961_v25 = vpop.f32.mrb[75].mxu1 }
 0x180   : > { %6509 = vst [vmem:[#allocation103_spill] sm:$0xff] %v5961_v25 }
 0x181   : > { %v5963_v26 = vpop.f32.mrb[76].mxu0 }
 0x182   : > { %6510 = vst [vmem:[#allocation104_spill] sm:$0xff] %v5963_v26  ;;  %v5965_v10 = vpop.f32.mrb[76].mxu1  ;;  %v5967_v27 = vpop.f32.mrb[77].mxu0 }
 0x183   : > { %6511 = vst [vmem:[#allocation105_spill] sm:$0xff] %v5965_v10  ;;  %6512 = vst [vmem:[#allocation106_spill] sm:$0xff] %v5967_v27  ;;  %v5969_v57 = vpop.f32.mrb[77].mxu1 }
 0x184   : > { %6513 = vst [vmem:[#allocation107_spill] sm:$0xff] %v5969_v57  ;;  %v5985_v57 = vld [vmem:[%s6406_s2] ss:$0 sm:$0xff] }
 0x185   : > { %v5971_v58 = vpop.f32.mrb[78].mxu0 }
 0x186   : > { %6514 = vst [vmem:[#allocation108_spill] sm:$0xff] %v5971_v58  ;;  %v5973_v12 = vpop.f32.mrb[78].mxu1  ;;  %v5975_v9 = vpop.f32.mrb[79].mxu0 }
 0x187   : > { %6515 = vst [vmem:[#allocation109_spill] sm:$0xff] %v5973_v12  ;;  %6516 = vst [vmem:[#allocation110_spill] sm:$0xff] %v5975_v9  ;;  %v5977_v59 = vpop.f32.mrb[79].mxu1 }
 0x188   : > { %6517 = vst [vmem:[#allocation111_spill] sm:$0xff] %v5977_v59 }
 0x189   : > { %v4548_v11 = vpop.f32.mrb[80].mxu0 }
 0x18a   : > { %v4788_v60 = vpop.f32.mrb[80].mxu1  ;;  %v3175_v25 = vmax.f32 %v5451_v29, %v4548_v11  ;;  %v1975_v28 = vpop.f32.mrb[81].mxu0 }
 0x18b   : > { %v3255_v26 = vmax.f32 %v5453_v30, %v4788_v60  ;;  %v2775_v10 = vpop.f32.mrb[81].mxu1  ;;  %v3174_v12 = vmax.f32 %v5455_v31, %v1975_v28 }
 0x18c   : > { %v3254_v9 = vmax.f32 %v5458_v32, %v2775_v10 }
 0x18d   : > { %v3335_v58 = vmax.f32 %v3175_v25, %v3255_v26  ;;  %v4551_v27 = vpop.f32.mrb[82].mxu0 }
 0x18e   : > { %v3334_v59 = vmax.f32 %v3174_v12, %v3254_v9  ;;  %v4791_v44 = vpop.f32.mrb[82].mxu1  ;;  %v3177_v30 = vmax.f32 %v5467_v37, %v4551_v27  ;;  %v1985_v60 = vpop.f32.mrb[83].mxu0 }
 0x18f   : > { %v3422_v29 = vadd.f32 %v5985_v57, %v3335_v58  ;;  %v3257_v11 = vmax.f32 %v5469_v38, %v4791_v44  ;;  %v2785_v43 = vpop.f32.mrb[83].mxu1  ;;  %v3176_v32 = vmax.f32 %v5471_v39, %v1985_v60 }
 0x190   : > { %v3421_v31 = vadd.f32 %v5985_v57, %v3334_v59  ;;  %v3256_v9 = vmax.f32 %v5474_v40, %v2785_v43 }
 0x191   : > { %v3502_v28 = vmax.f32 %v3422_v29, 0.0  ;;  %v3337_v37 = vmax.f32 %v3177_v30, %v3257_v11  ;;  %v4554_v44 = vpop.f32.mrb[84].mxu0 }
 0x192   : > { %v3501_v12 = vmax.f32 %v3421_v31, 0.0  ;;  %v3336_v38 = vmax.f32 %v3176_v32, %v3256_v9  ;;  %v4794_v58 = vpop.f32.mrb[84].mxu1  ;;  %v3179_v26 = vmax.f32 %v5483_v45, %v4554_v44  ;;  %v1995_v27 = vpop.f32.mrb[85].mxu0 }
 0x193   : > { %3583 = vst.msk [vmem:[%s5995_s29 + $0x8] sm:$0xff] %vm3581_vm4, %v3502_v28  ;;  %v3424_v25 = vadd.f32 %v5985_v57, %v3337_v37  ;;  %v3259_v10 = vmax.f32 %v5485_v46, %v4794_v58  ;;  %v2795_v59 = vpop.f32.mrb[85].mxu1  ;;  %v3178_v40 = vmax.f32 %v5487_v47, %v1995_v27 }
 0x194   : > { %3582 = vst.msk [vmem:[%s5995_s29] sm:$0xff] %vm3581_vm4, %v3501_v12  ;;  %v3423_v39 = vadd.f32 %v5985_v57, %v3336_v38  ;;  %v3258_v43 = vmax.f32 %v5490_v48, %v2795_v59 }
 0x195   : > { %v3504_v29 = vmax.f32 %v3424_v25, 0.0  ;;  %v3339_v30 = vmax.f32 %v3179_v26, %v3259_v10  ;;  %v4557_v31 = vpop.f32.mrb[86].mxu0 }
 0x196   : > { %v3503_v11 = vmax.f32 %v3423_v39, 0.0  ;;  %v3338_v60 = vmax.f32 %v3178_v40, %v3258_v43  ;;  %v4797_v32 = vpop.f32.mrb[86].mxu1  ;;  %v3181_v46 = vmax.f32 %v5499_v53, %v4557_v31  ;;  %v2005_v28 = vpop.f32.mrb[87].mxu0 }
 0x197   : > { %3585 = vst.msk [vmem:[%s5995_s29 + $0x18] sm:$0xff] %vm3581_vm4, %v3504_v29  ;;  %v3426_v45 = vadd.f32 %v5985_v57, %v3339_v30  ;;  %v3261_v9 = vmax.f32 %v5501_v54, %v4797_v32  ;;  %v2805_v37 = vpop.f32.mrb[87].mxu1  ;;  %v3180_v48 = vmax.f32 %v5503_v55, %v2005_v28 }
 0x198   : > { %3584 = vst.msk [vmem:[%s5995_s29 + $0x10] sm:$0xff] %vm3581_vm4, %v3503_v11  ;;  %v3425_v47 = vadd.f32 %v5985_v57, %v3338_v60  ;;  %v3260_v12 = vmax.f32 %v5506_v56, %v2805_v37 }
 0x199   : > { %v3506_v38 = vmax.f32 %v3426_v45, 0.0  ;;  %v3341_v44 = vmax.f32 %v3181_v46, %v3261_v9  ;;  %v4560_v26 = vpop.f32.mrb[88].mxu0 }
 0x19a   : > { %v3505_v58 = vmax.f32 %v3425_v47, 0.0  ;;  %v3340_v25 = vmax.f32 %v3180_v48, %v3260_v12  ;;  %v4800_v10 = vpop.f32.mrb[88].mxu1  ;;  %v3183_v54 = vmax.f32 %v5515_v61, %v4560_v26  ;;  %v2015_v59 = vpop.f32.mrb[89].mxu0 }
 0x19b   : > { %3587 = vst.msk [vmem:[%s5995_s29 + $0x28] sm:$0xff] %vm3581_vm4, %v3506_v38  ;;  %v3428_v53 = vadd.f32 %v5985_v57, %v3341_v44  ;;  %v3263_v27 = vmax.f32 %v5517_v62, %v4800_v10  ;;  %v2815_v39 = vpop.f32.mrb[89].mxu1  ;;  %v3182_v56 = vmax.f32 %v5519_v63, %v2015_v59 }
 0x19c   : > { %3586 = vst.msk [vmem:[%s5995_s29 + $0x20] sm:$0xff] %vm3581_vm4, %v3505_v58  ;;  %v3427_v55 = vadd.f32 %v5985_v57, %v3340_v25  ;;  %v3262_v40 = vmax.f32 %v5522_v0, %v2815_v39 }
 0x19d   : > { %v3508_v43 = vmax.f32 %v3428_v53, 0.0  ;;  %v3343_v29 = vmax.f32 %v3183_v54, %v3263_v27  ;;  %v4563_v60 = vpop.f32.mrb[90].mxu0 }
 0x19e   : > { %v3507_v30 = vmax.f32 %v3427_v55, 0.0  ;;  %v3342_v11 = vmax.f32 %v3182_v56, %v3262_v40  ;;  %v4803_v31 = vpop.f32.mrb[90].mxu1  ;;  %v3185_v62 = vmax.f32 %v5531_v5, %v4563_v60  ;;  %v2025_v45 = vpop.f32.mrb[91].mxu0 }
 0x19f   : > { %3589 = vst.msk [vmem:[%s5995_s29 + $0x38] sm:$0xff] %vm3581_vm4, %v3508_v43  ;;  %v3430_v61 = vadd.f32 %v5985_v57, %v3343_v29  ;;  %v3265_v32 = vmax.f32 %v5533_v6, %v4803_v31  ;;  %v2825_v46 = vpop.f32.mrb[91].mxu1  ;;  %v3184_v0 = vmax.f32 %v5535_v7, %v2025_v45 }
 0x1a0   : > { %3588 = vst.msk [vmem:[%s5995_s29 + $0x30] sm:$0xff] %vm3581_vm4, %v3507_v30  ;;  %v3429_v63 = vadd.f32 %v5985_v57, %v3342_v11  ;;  %v3264_v9 = vmax.f32 %v5538_v8, %v2825_v46 }
 0x1a1   : > { %v3510_v28 = vmax.f32 %v3430_v61, 0.0  ;;  %v3345_v37 = vmax.f32 %v3185_v62, %v3265_v32  ;;  %v4566_v12 = vpop.f32.mrb[92].mxu0 }
 0x1a2   : > { %v3509_v47 = vmax.f32 %v3429_v63, 0.0  ;;  %v3344_v48 = vmax.f32 %v3184_v0, %v3264_v9  ;;  %v4806_v38 = vpop.f32.mrb[92].mxu1  ;;  %v3187_v6 = vmax.f32 %v5547_v13, %v4566_v12  ;;  %v2035_v58 = vpop.f32.mrb[93].mxu0 }
 0x1a3   : > { %3591 = vst.msk [vmem:[%s5995_s29 + $0x48] sm:$0xff] %vm3581_vm4, %v3510_v28  ;;  %v3432_v5 = vadd.f32 %v5985_v57, %v3345_v37  ;;  %v3267_v44 = vmax.f32 %v5549_v14, %v4806_v38  ;;  %v2835_v25 = vpop.f32.mrb[93].mxu1  ;;  %v3186_v8 = vmax.f32 %v5551_v15, %v2035_v58 }
 0x1a4   : > { %3590 = vst.msk [vmem:[%s5995_s29 + $0x40] sm:$0xff] %vm3581_vm4, %v3509_v47  ;;  %v3431_v7 = vadd.f32 %v5985_v57, %v3344_v48  ;;  %v3266_v26 = vmax.f32 %v5554_v16, %v2835_v25 }
 0x1a5   : > { %v3512_v10 = vmax.f32 %v3432_v5, 0.0  ;;  %v3347_v53 = vmax.f32 %v3187_v6, %v3267_v44  ;;  %v4569_v59 = vpop.f32.mrb[94].mxu0 }
 0x1a6   : > { %v3511_v54 = vmax.f32 %v3431_v7, 0.0  ;;  %v3346_v27 = vmax.f32 %v3186_v8, %v3266_v26  ;;  %v4809_v39 = vpop.f32.mrb[94].mxu1  ;;  %v3189_v14 = vmax.f32 %v5563_v21, %v4569_v59  ;;  %v2045_v56 = vpop.f32.mrb[95].mxu0 }
 0x1a7   : > { %3593 = vst.msk [vmem:[%s5995_s29 + $0x58] sm:$0xff] %vm3581_vm4, %v3512_v10  ;;  %v3434_v13 = vadd.f32 %v5985_v57, %v3347_v53  ;;  %v3269_v55 = vmax.f32 %v5565_v22, %v4809_v39  ;;  %v2845_v40 = vpop.f32.mrb[95].mxu1  ;;  %v3188_v16 = vmax.f32 %v5567_v23, %v2045_v56 }
 0x1a8   : > { %3592 = vst.msk [vmem:[%s5995_s29 + $0x50] sm:$0xff] %vm3581_vm4, %v3511_v54  ;;  %v3433_v15 = vadd.f32 %v5985_v57, %v3346_v27  ;;  %v3268_v43 = vmax.f32 %v5570_v24, %v2845_v40 }
 0x1a9   : > { %v3514_v29 = vmax.f32 %v3434_v13, 0.0  ;;  %v3349_v30 = vmax.f32 %v3189_v14, %v3269_v55  ;;  %v4572_v31 = vpop.f32.mrb[96].mxu0 }
 0x1aa   : > { %v3513_v11 = vmax.f32 %v3433_v15, 0.0  ;;  %v3348_v60 = vmax.f32 %v3188_v16, %v3268_v43  ;;  %v4812_v61 = vpop.f32.mrb[96].mxu1  ;;  %v3191_v22 = vmax.f32 %v5579_v33, %v4572_v31  ;;  %v2055_v32 = vpop.f32.mrb[97].mxu0 }
 0x1ab   : > { %3595 = vst.msk [vmem:[%s5995_s29 + $0x68] sm:$0xff] %vm3581_vm4, %v3514_v29  ;;  %v3436_v21 = vadd.f32 %v5985_v57, %v3349_v30  ;;  %v3271_v62 = vmax.f32 %v5581_v34, %v4812_v61  ;;  %v2855_v45 = vpop.f32.mrb[97].mxu1  ;;  %v3190_v24 = vmax.f32 %v5583_v35, %v2055_v32  ;;  %v6519_v32 = vld [vmem:[#allocation3_spill] sm:$0xff] }
 0x1ac   : > { %3594 = vst.msk [vmem:[%s5995_s29 + $0x60] sm:$0xff] %vm3581_vm4, %v3513_v11  ;;  %v3435_v23 = vadd.f32 %v5985_v57, %v3348_v60  ;;  %v3270_v46 = vmax.f32 %v5586_v36, %v2855_v45 }
 0x1ad   : > { %v3516_v63 = vmax.f32 %v3436_v21, 0.0  ;;  %v3351_v0 = vmax.f32 %v3191_v22, %v3271_v62  ;;  %v4575_v37 = vpop.f32.mrb[98].mxu0 }
 0x1ae   : > { %v3515_v9 = vmax.f32 %v3435_v23, 0.0  ;;  %v3350_v28 = vmax.f32 %v3190_v24, %v3270_v46  ;;  %v4815_v47 = vpop.f32.mrb[98].mxu1  ;;  %v3193_v34 = vmax.f32 %v5595_v49, %v4575_v37  ;;  %v2065_v12 = vpop.f32.mrb[99].mxu0  ;;  %v6521_v37 = vld [vmem:[#allocation5_spill] sm:$0xff] }
 0x1af   : > { %3597 = vst.msk [vmem:[%s5995_s29 + $0x78] sm:$0xff] %vm3581_vm4, %v3516_v63  ;;  %v3438_v33 = vadd.f32 %v5985_v57, %v3351_v0  ;;  %v3273_v48 = vmax.f32 %v5597_v50, %v4815_v47  ;;  %v2865_v38 = vpop.f32.mrb[99].mxu1  ;;  %v3192_v36 = vmax.f32 %v5599_v51, %v2065_v12  ;;  %v6522_v12 = vld [vmem:[#allocation6_spill] sm:$0xff] }
 0x1b0   : > { %3596 = vst.msk [vmem:[%s5995_s29 + $0x70] sm:$0xff] %vm3581_vm4, %v3515_v9  ;;  %v3437_v35 = vadd.f32 %v5985_v57, %v3350_v28  ;;  %v3272_v5 = vmax.f32 %v5602_v52, %v2865_v38 }
 0x1b1   : > { %v3518_v6 = vmax.f32 %v3438_v33, 0.0  ;;  %v3353_v44 = vmax.f32 %v3193_v34, %v3273_v48  ;;  %v4578_v7 = vpop.f32.mrb[100].mxu0 }
 0x1b2   : > { %v3517_v58 = vmax.f32 %v3437_v35, 0.0  ;;  %v3352_v25 = vmax.f32 %v3192_v36, %v3272_v5  ;;  %v4818_v8 = vpop.f32.mrb[100].mxu1  ;;  %v3195_v50 = vmax.f32 %v5611_v1, %v4578_v7  ;;  %v2075_v10 = vpop.f32.mrb[101].mxu0  ;;  %v6523_v35 = vld [vmem:[#allocation7_spill] sm:$0xff] }
 0x1b3   : > { %3599 = vst.msk [vmem:[%s5995_s29 + $0x88] sm:$0xff] %vm3581_vm4, %v3518_v6  ;;  %v3440_v49 = vadd.f32 %v5985_v57, %v3353_v44  ;;  %v3275_v26 = vmax.f32 %v5613_v2, %v4818_v8  ;;  %v2875_v53 = vpop.f32.mrb[101].mxu1  ;;  %v3194_v52 = vmax.f32 %v5615_v3, %v2075_v10 }
 0x1b4   : > { %3598 = vst.msk [vmem:[%s5995_s29 + $0x80] sm:$0xff] %vm3581_vm4, %v3517_v58  ;;  %v3439_v51 = vadd.f32 %v5985_v57, %v3352_v25  ;;  %v3274_v54 = vmax.f32 %v5618_v4, %v2875_v53 }
 0x1b5   : > { %v3520_v27 = vmax.f32 %v3440_v49, 0.0  ;;  %v3355_v59 = vmax.f32 %v3195_v50, %v3275_v26  ;;  %v4581_v14 = vpop.f32.mrb[102].mxu0  ;;  %v6524_v49 = vld [vmem:[#allocation8_spill] sm:$0xff]  ;;  %v6525_v26 = vld [vmem:[#allocation9_spill] sm:$0xff] }
 0x1b6   : > { %v3519_v39 = vmax.f32 %v3439_v51, 0.0  ;;  %v3354_v13 = vmax.f32 %v3194_v52, %v3274_v54  ;;  %v4821_v55 = vpop.f32.mrb[102].mxu1  ;;  %v3197_v2 = vmax.f32 %v5627_v17, %v4581_v14  ;;  %v2085_v40 = vpop.f32.mrb[103].mxu0  ;;  %v6526_v54 = vld [vmem:[#allocation10_spill] sm:$0xff] }
 0x1b7   : > { %3601 = vst.msk [vmem:[%s5995_s29 + $0x98] sm:$0xff] %vm3581_vm4, %v3520_v27  ;;  %v3442_v1 = vadd.f32 %v5985_v57, %v3355_v59  ;;  %v3277_v56 = vmax.f32 %v5629_v18, %v4821_v55  ;;  %v2885_v15 = vpop.f32.mrb[103].mxu1  ;;  %v3196_v4 = vmax.f32 %v5631_v19, %v2085_v40  ;;  %v6527_v59 = vld [vmem:[#allocation11_spill] sm:$0xff] }
 0x1b8   : > { %3600 = vst.msk [vmem:[%s5995_s29 + $0x90] sm:$0xff] %vm3581_vm4, %v3519_v39  ;;  %v3441_v3 = vadd.f32 %v5985_v57, %v3354_v13  ;;  %v3276_v16 = vmax.f32 %v5634_v20, %v2885_v15  ;;  %v6518_v20 = vld [vmem:[#allocation2_spill] sm:$0xff]  ;;  %v6528_v15 = vld [vmem:[#allocation12_spill] sm:$0xff] }
 0x1b9   : > { %v3522_v43 = vmax.f32 %v3442_v1, 0.0  ;;  %v3357_v29 = vmax.f32 %v3197_v2, %v3277_v56  ;;  %v4584_v60 = vpop.f32.mrb[104].mxu0 }
 0x1ba   : > { %v3521_v30 = vmax.f32 %v3441_v3, 0.0  ;;  %v3356_v11 = vmax.f32 %v3196_v4, %v3276_v16  ;;  %v4824_v31 = vpop.f32.mrb[104].mxu1  ;;  %v3199_v18 = vmax.f32 %v5643_v41, %v4584_v60  ;;  %v2095_v21 = vpop.f32.mrb[105].mxu0  ;;  %v6529_v4 = vld [vmem:[#allocation13_spill] sm:$0xff] }
 0x1bb   : > { %3603 = vst.msk [vmem:[%s5995_s29 + $0xa8] sm:$0xff] %vm3581_vm4, %v3522_v43  ;;  %v3444_v17 = vadd.f32 %v5985_v57, %v3357_v29  ;;  %v3279_v61 = vmax.f32 %v5645_v42, %v4824_v31  ;;  %v2895_v22 = vpop.f32.mrb[105].mxu1  ;;  %v3198_v62 = vmax.f32 %v6518_v20, %v2095_v21  ;;  %v6520_v42 = vld [vmem:[#allocation4_spill] sm:$0xff]  ;;  %v6531_v31 = vld [vmem:[#allocation15_spill] sm:$0xff] }
 0x1bc   : > { %3602 = vst.msk [vmem:[%s5995_s29 + $0xa0] sm:$0xff] %vm3581_vm4, %v3521_v30  ;;  %v3443_v19 = vadd.f32 %v5985_v57, %v3356_v11  ;;  %v3278_v45 = vmax.f32 %v6519_v32, %v2895_v22  ;;  %v6530_v11 = vld [vmem:[#allocation14_spill] sm:$0xff]  ;;  %v6532_v32 = vld [vmem:[#allocation16_spill] sm:$0xff] }
 0x1bd   : > { %v3524_v23 = vmax.f32 %v3444_v17, 0.0  ;;  %v3359_v24 = vmax.f32 %v3199_v18, %v3279_v61  ;;  %v4587_v0 = vpop.f32.mrb[106].mxu0 }
 0x1be   : > { %v3523_v46 = vmax.f32 %v3443_v19, 0.0  ;;  %v3358_v63 = vmax.f32 %v3198_v62, %v3278_v45  ;;  %v4827_v9 = vpop.f32.mrb[106].mxu1  ;;  %v3201_v28 = vmax.f32 %v6520_v42, %v4587_v0  ;;  %v2105_v33 = vpop.f32.mrb[107].mxu0  ;;  %v6535_v42 = vld [vmem:[#allocation19_spill] sm:$0xff] }
 0x1bf   : > { %3605 = vst.msk [vmem:[%s5995_s29 + $0xb8] sm:$0xff] %vm3581_vm4, %v3524_v23  ;;  %v3446_v41 = vadd.f32 %v5985_v57, %v3359_v24  ;;  %v3281_v47 = vmax.f32 %v6521_v37, %v4827_v9  ;;  %v2905_v34 = vpop.f32.mrb[107].mxu1  ;;  %v3200_v38 = vmax.f32 %v6522_v12, %v2105_v33  ;;  %v6533_v23 = vld [vmem:[#allocation17_spill] sm:$0xff]  ;;  %v6534_v9 = vld [vmem:[#allocation18_spill] sm:$0xff] }
 0x1c0   : > { %3604 = vst.msk [vmem:[%s5995_s29 + $0xb0] sm:$0xff] %vm3581_vm4, %v3523_v46  ;;  %v3445_v48 = vadd.f32 %v5985_v57, %v3358_v63  ;;  %v3280_v36 = vmax.f32 %v6523_v35, %v2905_v34  ;;  %v6536_v35 = vld [vmem:[#allocation20_spill] sm:$0xff] }
 0x1c1   : > { %v3526_v5 = vmax.f32 %v3446_v41, 0.0  ;;  %v3361_v6 = vmax.f32 %v3201_v28, %v3281_v47  ;;  %v4590_v25 = vpop.f32.mrb[108].mxu0 }
 0x1c2   : > { %v3525_v44 = vmax.f32 %v3445_v48, 0.0  ;;  %v3360_v58 = vmax.f32 %v3200_v38, %v3280_v36  ;;  %v4830_v7 = vpop.f32.mrb[108].mxu1  ;;  %v3203_v50 = vmax.f32 %v6524_v49, %v4590_v25  ;;  %v2115_v53 = vpop.f32.mrb[109].mxu0  ;;  %v6539_v49 = vld [vmem:[#allocation23_spill] sm:$0xff] }
 0x1c3   : > { %3607 = vst.msk [vmem:[%s5995_s29 + $0xc8] sm:$0xff] %vm3581_vm4, %v3526_v5  ;;  %v3448_v8 = vadd.f32 %v5985_v57, %v3361_v6  ;;  %v3283_v10 = vmax.f32 %v6525_v26, %v4830_v7  ;;  %v2915_v51 = vpop.f32.mrb[109].mxu1  ;;  %v3202_v27 = vmax.f32 %v6526_v54, %v2115_v53  ;;  %v6537_v5 = vld [vmem:[#allocation21_spill] sm:$0xff]  ;;  %v6538_v7 = vld [vmem:[#allocation22_spill] sm:$0xff] }
 0x1c4   : > { %3606 = vst.msk [vmem:[%s5995_s29 + $0xc0] sm:$0xff] %vm3581_vm4, %v3525_v44  ;;  %v3447_v52 = vadd.f32 %v5985_v57, %v3360_v58  ;;  %v3282_v39 = vmax.f32 %v6527_v59, %v2915_v51  ;;  %v6540_v59 = vld [vmem:[#allocation24_spill] sm:$0xff] }
 0x1c5   : > { %v3528_v13 = vmax.f32 %v3448_v8, 0.0  ;;  %v3363_v14 = vmax.f32 %v3203_v50, %v3283_v10  ;;  %v4593_v2 = vpop.f32.mrb[110].mxu0 }
 0x1c6   : > { %v3527_v55 = vmax.f32 %v3447_v52, 0.0  ;;  %v3362_v1 = vmax.f32 %v3202_v27, %v3282_v39  ;;  %v4833_v56 = vpop.f32.mrb[110].mxu1  ;;  %v3205_v3 = vmax.f32 %v6528_v15, %v4593_v2  ;;  %v2125_v43 = vpop.f32.mrb[111].mxu0  ;;  %v6543_v15 = vld [vmem:[#allocation27_spill] sm:$0xff] }
 0x1c7   : > { %3609 = vst.msk [vmem:[%s5995_s29 + $0xd8] sm:$0xff] %vm3581_vm4, %v3528_v13  ;;  %v3450_v40 = vadd.f32 %v5985_v57, %v3363_v14  ;;  %v3285_v16 = vmax.f32 %v6529_v4, %v4833_v56  ;;  %v2925_v29 = vpop.f32.mrb[111].mxu1  ;;  %v3204_v60 = vmax.f32 %v6530_v11, %v2125_v43  ;;  %v6541_v13 = vld [vmem:[#allocation25_spill] sm:$0xff]  ;;  %v6542_v56 = vld [vmem:[#allocation26_spill] sm:$0xff] }
 0x1c8   : > { %3608 = vst.msk [vmem:[%s5995_s29 + $0xd0] sm:$0xff] %vm3581_vm4, %v3527_v55  ;;  %v3449_v30 = vadd.f32 %v5985_v57, %v3362_v1  ;;  %v3284_v17 = vmax.f32 %v6531_v31, %v2925_v29  ;;  %v6544_v31 = vld [vmem:[#allocation28_spill] sm:$0xff] }
 0x1c9   : > { %v3530_v18 = vmax.f32 %v3450_v40, 0.0  ;;  %v3365_v61 = vmax.f32 %v3205_v3, %v3285_v16  ;;  %v4596_v19 = vpop.f32.mrb[112].mxu0 }
 0x1ca   : > { %v3529_v21 = vmax.f32 %v3449_v30, 0.0  ;;  %v3364_v22 = vmax.f32 %v3204_v60, %v3284_v17  ;;  %v4836_v20 = vpop.f32.mrb[112].mxu1  ;;  %v3207_v45 = vmax.f32 %v6532_v32, %v4596_v19  ;;  %v2135_v46 = vpop.f32.mrb[113].mxu0  ;;  %v6547_v32 = vld [vmem:[#allocation31_spill] sm:$0xff] }
 0x1cb   : > { %3611 = vst.msk [vmem:[%s5995_s29 + $0xe8] sm:$0xff] %vm3581_vm4, %v3530_v18  ;;  %v3452_v62 = vadd.f32 %v5985_v57, %v3365_v61  ;;  %v3287_v24 = vmax.f32 %v6533_v23, %v4836_v20  ;;  %v2935_v63 = vpop.f32.mrb[113].mxu1  ;;  %v3206_v41 = vmax.f32 %v6534_v9, %v2135_v46  ;;  %v6545_v18 = vld [vmem:[#allocation29_spill] sm:$0xff]  ;;  %v6546_v20 = vld [vmem:[#allocation30_spill] sm:$0xff] }
 0x1cc   : > { %3610 = vst.msk [vmem:[%s5995_s29 + $0xe0] sm:$0xff] %vm3581_vm4, %v3529_v21  ;;  %v3451_v0 = vadd.f32 %v5985_v57, %v3364_v22  ;;  %v3286_v28 = vmax.f32 %v6535_v42, %v2935_v63  ;;  %v6548_v42 = vld [vmem:[#allocation32_spill] sm:$0xff] }
 0x1cd   : > { %v3532_v37 = vmax.f32 %v3452_v62, 0.0  ;;  %v3367_v47 = vmax.f32 %v3207_v45, %v3287_v24  ;;  %v4599_v48 = vpop.f32.mrb[114].mxu0 }
 0x1ce   : > { %v3531_v33 = vmax.f32 %v3451_v0, 0.0  ;;  %v3366_v34 = vmax.f32 %v3206_v41, %v3286_v28  ;;  %v4839_v12 = vpop.f32.mrb[114].mxu1  ;;  %v3209_v36 = vmax.f32 %v6536_v35, %v4599_v48  ;;  %v2145_v44 = vpop.f32.mrb[115].mxu0  ;;  %v6551_v35 = vld [vmem:[#allocation35_spill] sm:$0xff] }
 0x1cf   : > { %3613 = vst.msk [vmem:[%s5995_s29 + $0xf8] sm:$0xff] %vm3581_vm4, %v3532_v37  ;;  %v3454_v38 = vadd.f32 %v5985_v57, %v3367_v47  ;;  %v3289_v6 = vmax.f32 %v6537_v5, %v4839_v12  ;;  %v2945_v58 = vpop.f32.mrb[115].mxu1  ;;  %v3208_v8 = vmax.f32 %v6538_v7, %v2145_v44  ;;  %v6549_v37 = vld [vmem:[#allocation33_spill] sm:$0xff]  ;;  %v6550_v12 = vld [vmem:[#allocation34_spill] sm:$0xff] }
 0x1d0   : > { %3612 = vst.msk [vmem:[%s5995_s29 + $0xf0] sm:$0xff] %vm3581_vm4, %v3531_v33  ;;  %v3453_v25 = vadd.f32 %v5985_v57, %v3366_v34  ;;  %v3288_v50 = vmax.f32 %v6539_v49, %v2945_v58  ;;  %v6552_v49 = vld [vmem:[#allocation36_spill] sm:$0xff] }
 0x1d1   : > { %v3534_v26 = vmax.f32 %v3454_v38, 0.0  ;;  %v3369_v10 = vmax.f32 %v3209_v36, %v3289_v6  ;;  %v4602_v52 = vpop.f32.mrb[116].mxu0 }
 0x1d2   : > { %v3533_v53 = vmax.f32 %v3453_v25, 0.0  ;;  %v3368_v51 = vmax.f32 %v3208_v8, %v3288_v50  ;;  %v4842_v54 = vpop.f32.mrb[116].mxu1  ;;  %v3211_v39 = vmax.f32 %v6540_v59, %v4602_v52  ;;  %v2155_v55 = vpop.f32.mrb[117].mxu0  ;;  %v6555_v59 = vld [vmem:[#allocation39_spill] sm:$0xff] }
 0x1d3   : > { %3615 = vst.msk [vmem:[%s5995_s29 + $0x108] sm:$0xff] %vm3581_vm4, %v3534_v26  ;;  %v3456_v27 = vadd.f32 %v5985_v57, %v3369_v10  ;;  %v3291_v14 = vmax.f32 %v6541_v13, %v4842_v54  ;;  %v2955_v1 = vpop.f32.mrb[117].mxu1  ;;  %v3210_v40 = vmax.f32 %v6542_v56, %v2155_v55  ;;  %v6553_v26 = vld [vmem:[#allocation37_spill] sm:$0xff]  ;;  %v6554_v54 = vld [vmem:[#allocation38_spill] sm:$0xff] }
 0x1d4   : > { %3614 = vst.msk [vmem:[%s5995_s29 + $0x100] sm:$0xff] %vm3581_vm4, %v3533_v53  ;;  %v3455_v2 = vadd.f32 %v5985_v57, %v3368_v51  ;;  %v3290_v3 = vmax.f32 %v6543_v15, %v2955_v1  ;;  %v6556_v15 = vld [vmem:[#allocation40_spill] sm:$0xff] }
 0x1d5   : > { %v3536_v4 = vmax.f32 %v3456_v27, 0.0  ;;  %v3371_v16 = vmax.f32 %v3211_v39, %v3291_v14  ;;  %v4605_v30 = vpop.f32.mrb[118].mxu0 }
 0x1d6   : > { %v3535_v43 = vmax.f32 %v3455_v2, 0.0  ;;  %v3370_v29 = vmax.f32 %v3210_v40, %v3290_v3  ;;  %v4845_v11 = vpop.f32.mrb[118].mxu1  ;;  %v3213_v17 = vmax.f32 %v6544_v31, %v4605_v30  ;;  %v2165_v21 = vpop.f32.mrb[119].mxu0  ;;  %v6559_v31 = vld [vmem:[#allocation43_spill] sm:$0xff] }
 0x1d7   : > { %3617 = vst.msk [vmem:[%s5995_s29 + $0x118] sm:$0xff] %vm3581_vm4, %v3536_v4  ;;  %v3458_v60 = vadd.f32 %v5985_v57, %v3371_v16  ;;  %v3293_v61 = vmax.f32 %v6545_v18, %v4845_v11  ;;  %v2965_v22 = vpop.f32.mrb[119].mxu1  ;;  %v3212_v62 = vmax.f32 %v6546_v20, %v2165_v21  ;;  %v6557_v4 = vld [vmem:[#allocation41_spill] sm:$0xff]  ;;  %v6558_v11 = vld [vmem:[#allocation42_spill] sm:$0xff] }
 0x1d8   : > { %3616 = vst.msk [vmem:[%s5995_s29 + $0x110] sm:$0xff] %vm3581_vm4, %v3535_v43  ;;  %v3457_v19 = vadd.f32 %v5985_v57, %v3370_v29  ;;  %v3292_v45 = vmax.f32 %v6547_v32, %v2965_v22  ;;  %v6560_v32 = vld [vmem:[#allocation44_spill] sm:$0xff] }
 0x1d9   : > { %v3538_v23 = vmax.f32 %v3458_v60, 0.0  ;;  %v3373_v24 = vmax.f32 %v3213_v17, %v3293_v61  ;;  %v4608_v0 = vpop.f32.mrb[120].mxu0 }
 0x1da   : > { %v3537_v46 = vmax.f32 %v3457_v19, 0.0  ;;  %v3372_v63 = vmax.f32 %v3212_v62, %v3292_v45  ;;  %v4848_v9 = vpop.f32.mrb[120].mxu1  ;;  %v3215_v28 = vmax.f32 %v6548_v42, %v4608_v0  ;;  %v2175_v33 = vpop.f32.mrb[121].mxu0  ;;  %v6563_v42 = vld [vmem:[#allocation47_spill] sm:$0xff] }
 0x1db   : > { %3619 = vst.msk [vmem:[%s5995_s29 + $0x128] sm:$0xff] %vm3581_vm4, %v3538_v23  ;;  %v3460_v41 = vadd.f32 %v5985_v57, %v3373_v24  ;;  %v3295_v47 = vmax.f32 %v6549_v37, %v4848_v9  ;;  %v2975_v34 = vpop.f32.mrb[121].mxu1  ;;  %v3214_v38 = vmax.f32 %v6550_v12, %v2175_v33  ;;  %v6561_v23 = vld [vmem:[#allocation45_spill] sm:$0xff]  ;;  %v6562_v9 = vld [vmem:[#allocation46_spill] sm:$0xff] }
 0x1dc   : > { %3618 = vst.msk [vmem:[%s5995_s29 + $0x120] sm:$0xff] %vm3581_vm4, %v3537_v46  ;;  %v3459_v48 = vadd.f32 %v5985_v57, %v3372_v63  ;;  %v3294_v36 = vmax.f32 %v6551_v35, %v2975_v34  ;;  %v6564_v35 = vld [vmem:[#allocation48_spill] sm:$0xff] }
 0x1dd   : > { %v3540_v5 = vmax.f32 %v3460_v41, 0.0  ;;  %v3375_v6 = vmax.f32 %v3215_v28, %v3295_v47  ;;  %v4611_v25 = vpop.f32.mrb[122].mxu0 }
 0x1de   : > { %v3539_v44 = vmax.f32 %v3459_v48, 0.0  ;;  %v3374_v58 = vmax.f32 %v3214_v38, %v3294_v36  ;;  %v4851_v7 = vpop.f32.mrb[122].mxu1  ;;  %v3217_v50 = vmax.f32 %v6552_v49, %v4611_v25  ;;  %v2185_v53 = vpop.f32.mrb[123].mxu0  ;;  %v6567_v49 = vld [vmem:[#allocation51_spill] sm:$0xff] }
 0x1df   : > { %3621 = vst.msk [vmem:[%s5995_s29 + $0x138] sm:$0xff] %vm3581_vm4, %v3540_v5  ;;  %v3462_v8 = vadd.f32 %v5985_v57, %v3375_v6  ;;  %v3297_v10 = vmax.f32 %v6553_v26, %v4851_v7  ;;  %v2985_v51 = vpop.f32.mrb[123].mxu1  ;;  %v3216_v27 = vmax.f32 %v6554_v54, %v2185_v53  ;;  %v6565_v5 = vld [vmem:[#allocation49_spill] sm:$0xff]  ;;  %v6566_v7 = vld [vmem:[#allocation50_spill] sm:$0xff] }
 0x1e0   : > { %3620 = vst.msk [vmem:[%s5995_s29 + $0x130] sm:$0xff] %vm3581_vm4, %v3539_v44  ;;  %v3461_v52 = vadd.f32 %v5985_v57, %v3374_v58  ;;  %v3296_v39 = vmax.f32 %v6555_v59, %v2985_v51  ;;  %v6568_v59 = vld [vmem:[#allocation52_spill] sm:$0xff] }
 0x1e1   : > { %v3542_v13 = vmax.f32 %v3462_v8, 0.0  ;;  %v3377_v14 = vmax.f32 %v3217_v50, %v3297_v10  ;;  %v4614_v2 = vpop.f32.mrb[124].mxu0 }
 0x1e2   : > { %v3541_v55 = vmax.f32 %v3461_v52, 0.0  ;;  %v3376_v1 = vmax.f32 %v3216_v27, %v3296_v39  ;;  %v4854_v56 = vpop.f32.mrb[124].mxu1  ;;  %v3219_v3 = vmax.f32 %v6556_v15, %v4614_v2  ;;  %v2195_v43 = vpop.f32.mrb[125].mxu0  ;;  %v6571_v15 = vld [vmem:[#allocation55_spill] sm:$0xff] }
 0x1e3   : > { %3623 = vst.msk [vmem:[%s5995_s29 + $0x148] sm:$0xff] %vm3581_vm4, %v3542_v13  ;;  %v3464_v40 = vadd.f32 %v5985_v57, %v3377_v14  ;;  %v3299_v16 = vmax.f32 %v6557_v4, %v4854_v56  ;;  %v2995_v29 = vpop.f32.mrb[125].mxu1  ;;  %v3218_v60 = vmax.f32 %v6558_v11, %v2195_v43  ;;  %v6569_v13 = vld [vmem:[#allocation53_spill] sm:$0xff]  ;;  %v6570_v56 = vld [vmem:[#allocation54_spill] sm:$0xff] }
 0x1e4   : > { %3622 = vst.msk [vmem:[%s5995_s29 + $0x140] sm:$0xff] %vm3581_vm4, %v3541_v55  ;;  %v3463_v30 = vadd.f32 %v5985_v57, %v3376_v1  ;;  %v3298_v17 = vmax.f32 %v6559_v31, %v2995_v29  ;;  %v6572_v31 = vld [vmem:[#allocation56_spill] sm:$0xff] }
 0x1e5   : > { %v3544_v18 = vmax.f32 %v3464_v40, 0.0  ;;  %v3379_v61 = vmax.f32 %v3219_v3, %v3299_v16  ;;  %v4617_v19 = vpop.f32.mrb[126].mxu0 }
 0x1e6   : > { %v3543_v21 = vmax.f32 %v3463_v30, 0.0  ;;  %v3378_v22 = vmax.f32 %v3218_v60, %v3298_v17  ;;  %v4857_v20 = vpop.f32.mrb[126].mxu1  ;;  %v3221_v45 = vmax.f32 %v6560_v32, %v4617_v19  ;;  %v2205_v46 = vpop.f32.mrb[127].mxu0  ;;  %v6575_v32 = vld [vmem:[#allocation59_spill] sm:$0xff] }
 0x1e7   : > { %3625 = vst.msk [vmem:[%s5995_s29 + $0x158] sm:$0xff] %vm3581_vm4, %v3544_v18  ;;  %v3466_v62 = vadd.f32 %v5985_v57, %v3379_v61  ;;  %v3301_v24 = vmax.f32 %v6561_v23, %v4857_v20  ;;  %v3005_v63 = vpop.f32.mrb[127].mxu1  ;;  %v3220_v41 = vmax.f32 %v6562_v9, %v2205_v46  ;;  %v6573_v18 = vld [vmem:[#allocation57_spill] sm:$0xff]  ;;  %v6574_v20 = vld [vmem:[#allocation58_spill] sm:$0xff] }
 0x1e8   : > { %3624 = vst.msk [vmem:[%s5995_s29 + $0x150] sm:$0xff] %vm3581_vm4, %v3543_v21  ;;  %v3465_v0 = vadd.f32 %v5985_v57, %v3378_v22  ;;  %v3300_v28 = vmax.f32 %v6563_v42, %v3005_v63  ;;  %v6576_v42 = vld [vmem:[#allocation60_spill] sm:$0xff] }
 0x1e9   : > { %v3546_v37 = vmax.f32 %v3466_v62, 0.0  ;;  %v3381_v47 = vmax.f32 %v3221_v45, %v3301_v24  ;;  %v4620_v48 = vpop.f32.mrb[128].mxu0 }
 0x1ea   : > { %v3545_v33 = vmax.f32 %v3465_v0, 0.0  ;;  %v3380_v34 = vmax.f32 %v3220_v41, %v3300_v28  ;;  %v4860_v12 = vpop.f32.mrb[128].mxu1  ;;  %v3223_v36 = vmax.f32 %v6564_v35, %v4620_v48  ;;  %v2215_v44 = vpop.f32.mrb[129].mxu0  ;;  %v6579_v35 = vld [vmem:[#allocation63_spill] sm:$0xff] }
 0x1eb   : > { %3627 = vst.msk [vmem:[%s5995_s29 + $0x168] sm:$0xff] %vm3581_vm4, %v3546_v37  ;;  %v3468_v38 = vadd.f32 %v5985_v57, %v3381_v47  ;;  %v3303_v6 = vmax.f32 %v6565_v5, %v4860_v12  ;;  %v3015_v58 = vpop.f32.mrb[129].mxu1  ;;  %v3222_v8 = vmax.f32 %v6566_v7, %v2215_v44  ;;  %v6577_v37 = vld [vmem:[#allocation61_spill] sm:$0xff]  ;;  %v6578_v12 = vld [vmem:[#allocation62_spill] sm:$0xff] }
 0x1ec   : > { %3626 = vst.msk [vmem:[%s5995_s29 + $0x160] sm:$0xff] %vm3581_vm4, %v3545_v33  ;;  %v3467_v25 = vadd.f32 %v5985_v57, %v3380_v34  ;;  %v3302_v50 = vmax.f32 %v6567_v49, %v3015_v58  ;;  %v6580_v49 = vld [vmem:[#allocation64_spill] sm:$0xff] }
 0x1ed   : > { %v3548_v26 = vmax.f32 %v3468_v38, 0.0  ;;  %v3383_v10 = vmax.f32 %v3223_v36, %v3303_v6  ;;  %v4623_v52 = vpop.f32.mrb[130].mxu0 }
 0x1ee   : > { %v3547_v53 = vmax.f32 %v3467_v25, 0.0  ;;  %v3382_v51 = vmax.f32 %v3222_v8, %v3302_v50  ;;  %v4863_v54 = vpop.f32.mrb[130].mxu1  ;;  %v3225_v39 = vmax.f32 %v6568_v59, %v4623_v52  ;;  %v2225_v55 = vpop.f32.mrb[131].mxu0  ;;  %v6583_v59 = vld [vmem:[#allocation67_spill] sm:$0xff] }
 0x1ef   : > { %3629 = vst.msk [vmem:[%s5995_s29 + $0x178] sm:$0xff] %vm3581_vm4, %v3548_v26  ;;  %v3470_v27 = vadd.f32 %v5985_v57, %v3383_v10  ;;  %v3305_v14 = vmax.f32 %v6569_v13, %v4863_v54  ;;  %v3025_v1 = vpop.f32.mrb[131].mxu1  ;;  %v3224_v40 = vmax.f32 %v6570_v56, %v2225_v55  ;;  %v6581_v26 = vld [vmem:[#allocation65_spill] sm:$0xff]  ;;  %v6582_v54 = vld [vmem:[#allocation66_spill] sm:$0xff] }
 0x1f0   : > { %3628 = vst.msk [vmem:[%s5995_s29 + $0x170] sm:$0xff] %vm3581_vm4, %v3547_v53  ;;  %v3469_v2 = vadd.f32 %v5985_v57, %v3382_v51  ;;  %v3304_v3 = vmax.f32 %v6571_v15, %v3025_v1  ;;  %v6584_v15 = vld [vmem:[#allocation68_spill] sm:$0xff] }
 0x1f1   : > { %v3550_v4 = vmax.f32 %v3470_v27, 0.0  ;;  %v3385_v16 = vmax.f32 %v3225_v39, %v3305_v14  ;;  %v4626_v30 = vpop.f32.mrb[132].mxu0 }
 0x1f2   : > { %v3549_v43 = vmax.f32 %v3469_v2, 0.0  ;;  %v3384_v29 = vmax.f32 %v3224_v40, %v3304_v3  ;;  %v4866_v11 = vpop.f32.mrb[132].mxu1  ;;  %v3227_v17 = vmax.f32 %v6572_v31, %v4626_v30  ;;  %v2235_v21 = vpop.f32.mrb[133].mxu0  ;;  %v6587_v31 = vld [vmem:[#allocation71_spill] sm:$0xff] }
 0x1f3   : > { %3631 = vst.msk [vmem:[%s5995_s29 + $0x188] sm:$0xff] %vm3581_vm4, %v3550_v4  ;;  %v3472_v60 = vadd.f32 %v5985_v57, %v3385_v16  ;;  %v3307_v61 = vmax.f32 %v6573_v18, %v4866_v11  ;;  %v3035_v22 = vpop.f32.mrb[133].mxu1  ;;  %v3226_v62 = vmax.f32 %v6574_v20, %v2235_v21  ;;  %v6585_v4 = vld [vmem:[#allocation69_spill] sm:$0xff]  ;;  %v6586_v11 = vld [vmem:[#allocation70_spill] sm:$0xff] }
 0x1f4   : > { %3630 = vst.msk [vmem:[%s5995_s29 + $0x180] sm:$0xff] %vm3581_vm4, %v3549_v43  ;;  %v3471_v19 = vadd.f32 %v5985_v57, %v3384_v29  ;;  %v3306_v45 = vmax.f32 %v6575_v32, %v3035_v22  ;;  %v6588_v32 = vld [vmem:[#allocation72_spill] sm:$0xff] }
 0x1f5   : > { %v3552_v23 = vmax.f32 %v3472_v60, 0.0  ;;  %v3387_v24 = vmax.f32 %v3227_v17, %v3307_v61  ;;  %v4629_v0 = vpop.f32.mrb[134].mxu0 }
 0x1f6   : > { %v3551_v46 = vmax.f32 %v3471_v19, 0.0  ;;  %v3386_v63 = vmax.f32 %v3226_v62, %v3306_v45  ;;  %v4869_v9 = vpop.f32.mrb[134].mxu1  ;;  %v3229_v28 = vmax.f32 %v6576_v42, %v4629_v0  ;;  %v2245_v33 = vpop.f32.mrb[135].mxu0  ;;  %v6591_v42 = vld [vmem:[#allocation75_spill] sm:$0xff] }
 0x1f7   : > { %3633 = vst.msk [vmem:[%s5995_s29 + $0x198] sm:$0xff] %vm3581_vm4, %v3552_v23  ;;  %v3474_v41 = vadd.f32 %v5985_v57, %v3387_v24  ;;  %v3309_v47 = vmax.f32 %v6577_v37, %v4869_v9  ;;  %v3045_v34 = vpop.f32.mrb[135].mxu1  ;;  %v3228_v38 = vmax.f32 %v6578_v12, %v2245_v33  ;;  %v6589_v23 = vld [vmem:[#allocation73_spill] sm:$0xff]  ;;  %v6590_v9 = vld [vmem:[#allocation74_spill] sm:$0xff] }
 0x1f8   : > { %3632 = vst.msk [vmem:[%s5995_s29 + $0x190] sm:$0xff] %vm3581_vm4, %v3551_v46  ;;  %v3473_v48 = vadd.f32 %v5985_v57, %v3386_v63  ;;  %v3308_v36 = vmax.f32 %v6579_v35, %v3045_v34  ;;  %v6592_v35 = vld [vmem:[#allocation76_spill] sm:$0xff] }
 0x1f9   : > { %v3554_v5 = vmax.f32 %v3474_v41, 0.0  ;;  %v3389_v6 = vmax.f32 %v3229_v28, %v3309_v47  ;;  %v4632_v25 = vpop.f32.mrb[136].mxu0 }
 0x1fa   : > { %v3553_v44 = vmax.f32 %v3473_v48, 0.0  ;;  %v3388_v58 = vmax.f32 %v3228_v38, %v3308_v36  ;;  %v4872_v7 = vpop.f32.mrb[136].mxu1  ;;  %v3231_v50 = vmax.f32 %v6580_v49, %v4632_v25  ;;  %v2255_v53 = vpop.f32.mrb[137].mxu0  ;;  %v6595_v49 = vld [vmem:[#allocation79_spill] sm:$0xff] }
 0x1fb   : > { %3635 = vst.msk [vmem:[%s5995_s29 + $0x1a8] sm:$0xff] %vm3581_vm4, %v3554_v5  ;;  %v3476_v8 = vadd.f32 %v5985_v57, %v3389_v6  ;;  %v3311_v10 = vmax.f32 %v6581_v26, %v4872_v7  ;;  %v3055_v51 = vpop.f32.mrb[137].mxu1  ;;  %v3230_v27 = vmax.f32 %v6582_v54, %v2255_v53  ;;  %v6593_v5 = vld [vmem:[#allocation77_spill] sm:$0xff]  ;;  %v6594_v7 = vld [vmem:[#allocation78_spill] sm:$0xff] }
 0x1fc   : > { %3634 = vst.msk [vmem:[%s5995_s29 + $0x1a0] sm:$0xff] %vm3581_vm4, %v3553_v44  ;;  %v3475_v52 = vadd.f32 %v5985_v57, %v3388_v58  ;;  %v3310_v39 = vmax.f32 %v6583_v59, %v3055_v51  ;;  %v6596_v59 = vld [vmem:[#allocation80_spill] sm:$0xff] }
 0x1fd   : > { %v3556_v13 = vmax.f32 %v3476_v8, 0.0  ;;  %v3391_v14 = vmax.f32 %v3231_v50, %v3311_v10  ;;  %v4635_v2 = vpop.f32.mrb[138].mxu0 }
 0x1fe   : > { %v3555_v55 = vmax.f32 %v3475_v52, 0.0  ;;  %v3390_v1 = vmax.f32 %v3230_v27, %v3310_v39  ;;  %v4875_v56 = vpop.f32.mrb[138].mxu1  ;;  %v3233_v3 = vmax.f32 %v6584_v15, %v4635_v2  ;;  %v2265_v43 = vpop.f32.mrb[139].mxu0  ;;  %v6599_v15 = vld [vmem:[#allocation83_spill] sm:$0xff] }
 0x1ff   : > { %3637 = vst.msk [vmem:[%s5995_s29 + $0x1b8] sm:$0xff] %vm3581_vm4, %v3556_v13  ;;  %v3478_v40 = vadd.f32 %v5985_v57, %v3391_v14  ;;  %v3313_v16 = vmax.f32 %v6585_v4, %v4875_v56  ;;  %v3065_v29 = vpop.f32.mrb[139].mxu1  ;;  %v3232_v60 = vmax.f32 %v6586_v11, %v2265_v43  ;;  %v6597_v13 = vld [vmem:[#allocation81_spill] sm:$0xff]  ;;  %v6598_v56 = vld [vmem:[#allocation82_spill] sm:$0xff] }
 0x200   : > { %3636 = vst.msk [vmem:[%s5995_s29 + $0x1b0] sm:$0xff] %vm3581_vm4, %v3555_v55  ;;  %v3477_v30 = vadd.f32 %v5985_v57, %v3390_v1  ;;  %v3312_v17 = vmax.f32 %v6587_v31, %v3065_v29  ;;  %v6600_v31 = vld [vmem:[#allocation84_spill] sm:$0xff] }
 0x201   : > { %v3558_v18 = vmax.f32 %v3478_v40, 0.0  ;;  %v3393_v61 = vmax.f32 %v3233_v3, %v3313_v16  ;;  %v4638_v19 = vpop.f32.mrb[140].mxu0 }
 0x202   : > { %v3557_v21 = vmax.f32 %v3477_v30, 0.0  ;;  %v3392_v22 = vmax.f32 %v3232_v60, %v3312_v17  ;;  %v4878_v20 = vpop.f32.mrb[140].mxu1  ;;  %v3235_v45 = vmax.f32 %v6588_v32, %v4638_v19  ;;  %v2275_v46 = vpop.f32.mrb[141].mxu0  ;;  %v6315_v60 = vld [vmem:[%s6406_s2] ss:$0 sm:$0xff]  ;;  %v6603_v32 = vld [vmem:[#allocation87_spill] sm:$0xff] }
 0x203   : > { %3639 = vst.msk [vmem:[%s5995_s29 + $0x1c8] sm:$0xff] %vm3581_vm4, %v3558_v18  ;;  %v3480_v62 = vadd.f32 %v5985_v57, %v3393_v61  ;;  %v3315_v24 = vmax.f32 %v6589_v23, %v4878_v20  ;;  %v3075_v63 = vpop.f32.mrb[141].mxu1  ;;  %v3234_v41 = vmax.f32 %v6590_v9, %v2275_v46  ;;  %v6601_v18 = vld [vmem:[#allocation85_spill] sm:$0xff]  ;;  %v6602_v20 = vld [vmem:[#allocation86_spill] sm:$0xff] }
 0x204   : > { %3638 = vst.msk [vmem:[%s5995_s29 + $0x1c0] sm:$0xff] %vm3581_vm4, %v3557_v21  ;;  %v3479_v0 = vadd.f32 %v5985_v57, %v3392_v22  ;;  %v3314_v28 = vmax.f32 %v6591_v42, %v3075_v63  ;;  %v6604_v42 = vld [vmem:[#allocation88_spill] sm:$0xff] }
 0x205   : > { %v3560_v37 = vmax.f32 %v3480_v62, 0.0  ;;  %v3395_v47 = vmax.f32 %v3235_v45, %v3315_v24  ;;  %v4641_v48 = vpop.f32.mrb[142].mxu0 }
 0x206   : > { %v3559_v33 = vmax.f32 %v3479_v0, 0.0  ;;  %v3394_v34 = vmax.f32 %v3234_v41, %v3314_v28  ;;  %v4881_v12 = vpop.f32.mrb[142].mxu1  ;;  %v3237_v36 = vmax.f32 %v6592_v35, %v4641_v48  ;;  %v2285_v44 = vpop.f32.mrb[143].mxu0  ;;  %v6607_v35 = vld [vmem:[#allocation91_spill] sm:$0xff] }
 0x207   : > { %3641 = vst.msk [vmem:[%s5995_s29 + $0x1d8] sm:$0xff] %vm3581_vm4, %v3560_v37  ;;  %v3482_v38 = vadd.f32 %v5985_v57, %v3395_v47  ;;  %v3317_v6 = vmax.f32 %v6593_v5, %v4881_v12  ;;  %v3085_v58 = vpop.f32.mrb[143].mxu1  ;;  %v3236_v8 = vmax.f32 %v6594_v7, %v2285_v44  ;;  %v6605_v37 = vld [vmem:[#allocation89_spill] sm:$0xff]  ;;  %v6606_v12 = vld [vmem:[#allocation90_spill] sm:$0xff] }
 0x208   : > { %3640 = vst.msk [vmem:[%s5995_s29 + $0x1d0] sm:$0xff] %vm3581_vm4, %v3559_v33  ;;  %v3481_v25 = vadd.f32 %v5985_v57, %v3394_v34  ;;  %v3316_v50 = vmax.f32 %v6595_v49, %v3085_v58  ;;  %v6608_v49 = vld [vmem:[#allocation92_spill] sm:$0xff] }
 0x209   : > { %v3562_v26 = vmax.f32 %v3482_v38, 0.0  ;;  %v3397_v10 = vmax.f32 %v3237_v36, %v3317_v6  ;;  %v4644_v52 = vpop.f32.mrb[144].mxu0 }
 0x20a   : > { %v3561_v53 = vmax.f32 %v3481_v25, 0.0  ;;  %v3396_v51 = vmax.f32 %v3236_v8, %v3316_v50  ;;  %v4884_v54 = vpop.f32.mrb[144].mxu1  ;;  %v3239_v39 = vmax.f32 %v6596_v59, %v4644_v52  ;;  %v2295_v55 = vpop.f32.mrb[145].mxu0  ;;  %v6611_v59 = vld [vmem:[#allocation95_spill] sm:$0xff] }
 0x20b   : > { %3643 = vst.msk [vmem:[%s5995_s29 + $0x1e8] sm:$0xff] %vm3581_vm4, %v3562_v26  ;;  %v3484_v27 = vadd.f32 %v5985_v57, %v3397_v10  ;;  %v3319_v14 = vmax.f32 %v6597_v13, %v4884_v54  ;;  %v3095_v1 = vpop.f32.mrb[145].mxu1  ;;  %v3238_v40 = vmax.f32 %v6598_v56, %v2295_v55  ;;  %v6609_v26 = vld [vmem:[#allocation93_spill] sm:$0xff]  ;;  %v6610_v54 = vld [vmem:[#allocation94_spill] sm:$0xff] }
 0x20c   : > { %3642 = vst.msk [vmem:[%s5995_s29 + $0x1e0] sm:$0xff] %vm3581_vm4, %v3561_v53  ;;  %v3483_v2 = vadd.f32 %v5985_v57, %v3396_v51  ;;  %v3318_v3 = vmax.f32 %v6599_v15, %v3095_v1  ;;  %v6612_v15 = vld [vmem:[#allocation96_spill] sm:$0xff] }
 0x20d   : > { %v3564_v4 = vmax.f32 %v3484_v27, 0.0  ;;  %v3399_v16 = vmax.f32 %v3239_v39, %v3319_v14  ;;  %v4647_v30 = vpop.f32.mrb[146].mxu0 }
 0x20e   : > { %v3563_v43 = vmax.f32 %v3483_v2, 0.0  ;;  %v3398_v29 = vmax.f32 %v3238_v40, %v3318_v3  ;;  %v4887_v11 = vpop.f32.mrb[146].mxu1  ;;  %v3241_v17 = vmax.f32 %v6600_v31, %v4647_v30  ;;  %v2305_v21 = vpop.f32.mrb[147].mxu0  ;;  %v6615_v31 = vld [vmem:[#allocation99_spill] sm:$0xff] }
 0x20f   : > { %3645 = vst.msk [vmem:[%s5995_s29 + $0x1f8] sm:$0xff] %vm3581_vm4, %v3564_v4  ;;  %v3486_v57 = vadd.f32 %v6315_v60, %v3399_v16  ;;  %v3321_v61 = vmax.f32 %v6601_v18, %v4887_v11  ;;  %v3105_v22 = vpop.f32.mrb[147].mxu1  ;;  %v3240_v62 = vmax.f32 %v6602_v20, %v2305_v21  ;;  %v6613_v4 = vld [vmem:[#allocation97_spill] sm:$0xff]  ;;  %v6614_v11 = vld [vmem:[#allocation98_spill] sm:$0xff] }
 0x210   : > { %3644 = vst.msk [vmem:[%s5995_s29 + $0x1f0] sm:$0xff] %vm3581_vm4, %v3563_v43  ;;  %v3485_v19 = vadd.f32 %v6315_v60, %v3398_v29  ;;  %v3320_v45 = vmax.f32 %v6603_v32, %v3105_v22  ;;  %v6616_v32 = vld [vmem:[#allocation100_spill] sm:$0xff] }
 0x211   : > { %v3566_v23 = vmax.f32 %v3486_v57, 0.0  ;;  %v3401_v24 = vmax.f32 %v3241_v17, %v3321_v61  ;;  %v4650_v0 = vpop.f32.mrb[148].mxu0 }
 0x212   : > { %v3565_v46 = vmax.f32 %v3485_v19, 0.0  ;;  %v3400_v63 = vmax.f32 %v3240_v62, %v3320_v45  ;;  %v4890_v9 = vpop.f32.mrb[148].mxu1  ;;  %v3243_v28 = vmax.f32 %v6604_v42, %v4650_v0  ;;  %v2315_v33 = vpop.f32.mrb[149].mxu0  ;;  %v6619_v42 = vld [vmem:[#allocation103_spill] sm:$0xff] }
 0x213   : > { %3647 = vst.msk [vmem:[%s5995_s29 + $0x208] sm:$0xff] %vm3581_vm4, %v3566_v23  ;;  %v3488_v41 = vadd.f32 %v6315_v60, %v3401_v24  ;;  %v3323_v47 = vmax.f32 %v6605_v37, %v4890_v9  ;;  %v3115_v34 = vpop.f32.mrb[149].mxu1  ;;  %v3242_v38 = vmax.f32 %v6606_v12, %v2315_v33  ;;  %v6617_v23 = vld [vmem:[#allocation101_spill] sm:$0xff]  ;;  %v6618_v9 = vld [vmem:[#allocation102_spill] sm:$0xff] }
 0x214   : > { %3646 = vst.msk [vmem:[%s5995_s29 + $0x200] sm:$0xff] %vm3581_vm4, %v3565_v46  ;;  %v3487_v48 = vadd.f32 %v6315_v60, %v3400_v63  ;;  %v3322_v36 = vmax.f32 %v6607_v35, %v3115_v34  ;;  %v6620_v35 = vld [vmem:[#allocation104_spill] sm:$0xff] }
 0x215   : > { %v3568_v5 = vmax.f32 %v3488_v41, 0.0  ;;  %v3403_v6 = vmax.f32 %v3243_v28, %v3323_v47  ;;  %v4653_v25 = vpop.f32.mrb[150].mxu0 }
 0x216   : > { %v3567_v44 = vmax.f32 %v3487_v48, 0.0  ;;  %v3402_v58 = vmax.f32 %v3242_v38, %v3322_v36  ;;  %v4893_v7 = vpop.f32.mrb[150].mxu1  ;;  %v3245_v50 = vmax.f32 %v6608_v49, %v4653_v25  ;;  %v2325_v53 = vpop.f32.mrb[151].mxu0  ;;  %v6623_v49 = vld [vmem:[#allocation107_spill] sm:$0xff] }
 0x217   : > { %3649 = vst.msk [vmem:[%s5995_s29 + $0x218] sm:$0xff] %vm3581_vm4, %v3568_v5  ;;  %v3490_v8 = vadd.f32 %v6315_v60, %v3403_v6  ;;  %v3325_v10 = vmax.f32 %v6609_v26, %v4893_v7  ;;  %v3125_v51 = vpop.f32.mrb[151].mxu1  ;;  %v3244_v27 = vmax.f32 %v6610_v54, %v2325_v53  ;;  %v6621_v5 = vld [vmem:[#allocation105_spill] sm:$0xff]  ;;  %v6622_v7 = vld [vmem:[#allocation106_spill] sm:$0xff] }
 0x218   : > { %3648 = vst.msk [vmem:[%s5995_s29 + $0x210] sm:$0xff] %vm3581_vm4, %v3567_v44  ;;  %v3489_v52 = vadd.f32 %v6315_v60, %v3402_v58  ;;  %v3324_v39 = vmax.f32 %v6611_v59, %v3125_v51  ;;  %v6624_v59 = vld [vmem:[#allocation108_spill] sm:$0xff] }
 0x219   : > { %v3570_v13 = vmax.f32 %v3490_v8, 0.0  ;;  %v3405_v14 = vmax.f32 %v3245_v50, %v3325_v10  ;;  %v4656_v2 = vpop.f32.mrb[152].mxu0 }
 0x21a   : > { %v3569_v55 = vmax.f32 %v3489_v52, 0.0  ;;  %v3404_v1 = vmax.f32 %v3244_v27, %v3324_v39  ;;  %v4896_v56 = vpop.f32.mrb[152].mxu1  ;;  %v3247_v3 = vmax.f32 %v6612_v15, %v4656_v2  ;;  %v2335_v43 = vpop.f32.mrb[153].mxu0  ;;  %v6627_v15 = vld [vmem:[#allocation111_spill] sm:$0xff] }
 0x21b   : > { %3651 = vst.msk [vmem:[%s5995_s29 + $0x228] sm:$0xff] %vm3581_vm4, %v3570_v13  ;;  %v3492_v40 = vadd.f32 %v6315_v60, %v3405_v14  ;;  %v3327_v16 = vmax.f32 %v6613_v4, %v4896_v56  ;;  %v3135_v29 = vpop.f32.mrb[153].mxu1  ;;  %v3246_v57 = vmax.f32 %v6614_v11, %v2335_v43  ;;  %v6625_v13 = vld [vmem:[#allocation109_spill] sm:$0xff]  ;;  %v6626_v56 = vld [vmem:[#allocation110_spill] sm:$0xff] }
 0x21c   : > { %3650 = vst.msk [vmem:[%s5995_s29 + $0x220] sm:$0xff] %vm3581_vm4, %v3569_v55  ;;  %v3491_v30 = vadd.f32 %v6315_v60, %v3404_v1  ;;  %v3326_v17 = vmax.f32 %v6615_v31, %v3135_v29 }
 0x21d   : > { %v3572_v18 = vmax.f32 %v3492_v40, 0.0  ;;  %v3407_v61 = vmax.f32 %v3247_v3, %v3327_v16  ;;  %v4659_v19 = vpop.f32.mrb[154].mxu0 }
 0x21e   : > { %v3571_v21 = vmax.f32 %v3491_v30, 0.0  ;;  %v3406_v22 = vmax.f32 %v3246_v57, %v3326_v17  ;;  %v4899_v20 = vpop.f32.mrb[154].mxu1  ;;  %v3249_v45 = vmax.f32 %v6616_v32, %v4659_v19  ;;  %v2345_v46 = vpop.f32.mrb[155].mxu0 }
 0x21f   : > { %3653 = vst.msk [vmem:[%s5995_s29 + $0x238] sm:$0xff] %vm3581_vm4, %v3572_v18  ;;  %v3494_v62 = vadd.f32 %v6315_v60, %v3407_v61  ;;  %v3329_v24 = vmax.f32 %v6617_v23, %v4899_v20  ;;  %v3145_v63 = vpop.f32.mrb[155].mxu1  ;;  %v3248_v41 = vmax.f32 %v6618_v9, %v2345_v46 }
 0x220   : > { %3652 = vst.msk [vmem:[%s5995_s29 + $0x230] sm:$0xff] %vm3581_vm4, %v3571_v21  ;;  %v3493_v0 = vadd.f32 %v6315_v60, %v3406_v22  ;;  %v3328_v28 = vmax.f32 %v6619_v42, %v3145_v63 }
 0x221   : > { %v3574_v37 = vmax.f32 %v3494_v62, 0.0  ;;  %v3409_v47 = vmax.f32 %v3249_v45, %v3329_v24  ;;  %v4662_v48 = vpop.f32.mrb[156].mxu0 }
 0x222   : > { %v3573_v33 = vmax.f32 %v3493_v0, 0.0  ;;  %v3408_v34 = vmax.f32 %v3248_v41, %v3328_v28  ;;  %v4902_v12 = vpop.f32.mrb[156].mxu1  ;;  %v3251_v36 = vmax.f32 %v6620_v35, %v4662_v48  ;;  %v2355_v44 = vpop.f32.mrb[157].mxu0 }
 0x223   : > { %3655 = vst.msk [vmem:[%s5995_s29 + $0x248] sm:$0xff] %vm3581_vm4, %v3574_v37  ;;  %v3496_v38 = vadd.f32 %v6315_v60, %v3409_v47  ;;  %v3331_v6 = vmax.f32 %v6621_v5, %v4902_v12  ;;  %v3155_v58 = vpop.f32.mrb[157].mxu1  ;;  %v3250_v8 = vmax.f32 %v6622_v7, %v2355_v44 }
 0x224   : > { %3654 = vst.msk [vmem:[%s5995_s29 + $0x240] sm:$0xff] %vm3581_vm4, %v3573_v33  ;;  %v3495_v25 = vadd.f32 %v6315_v60, %v3408_v34  ;;  %v3330_v50 = vmax.f32 %v6623_v49, %v3155_v58 }
 0x225   : > { %v3576_v26 = vmax.f32 %v3496_v38, 0.0  ;;  %v3411_v10 = vmax.f32 %v3251_v36, %v3331_v6  ;;  %v4665_v52 = vpop.f32.mrb[158].mxu0 }
 0x226   : > { %v3575_v53 = vmax.f32 %v3495_v25, 0.0  ;;  %v3410_v51 = vmax.f32 %v3250_v8, %v3330_v50  ;;  %v4905_v54 = vpop.f32.mrb[158].mxu1  ;;  %v3253_v39 = vmax.f32 %v6624_v59, %v4665_v52  ;;  %v2365_v55 = vpop.f32.mrb[159].mxu0 }
 0x227   : > { %3657 = vst.msk [vmem:[%s5995_s29 + $0x258] sm:$0xff] %vm3581_vm4, %v3576_v26  ;;  %v3498_v27 = vadd.f32 %v6315_v60, %v3411_v10  ;;  %v3333_v14 = vmax.f32 %v6625_v13, %v4905_v54  ;;  %v3165_v1 = vpop.f32.mrb[159].mxu1  ;;  %v3252_v40 = vmax.f32 %v6626_v56, %v2365_v55 }
 0x228   : > { %3656 = vst.msk [vmem:[%s5995_s29 + $0x250] sm:$0xff] %vm3581_vm4, %v3575_v53  ;;  %v3497_v2 = vadd.f32 %v6315_v60, %v3410_v51  ;;  %v3332_v3 = vmax.f32 %v6627_v15, %v3165_v1 }
 0x229   : > { %v3578_v4 = vmax.f32 %v3498_v27, 0.0  ;;  %v3413_v16 = vmax.f32 %v3253_v39, %v3333_v14 }
 0x22a   : > { %v3577_v43 = vmax.f32 %v3497_v2, 0.0  ;;  %v3412_v29 = vmax.f32 %v3252_v40, %v3332_v3 }
 0x22b   : > { %3659 = vst.msk [vmem:[%s5995_s29 + $0x268] sm:$0xff] %vm3581_vm4, %v3578_v4  ;;  %v3500_v30 = vadd.f32 %v6315_v60, %v3413_v16 }
 0x22c   : > { %3658 = vst.msk [vmem:[%s5995_s29 + $0x260] sm:$0xff] %vm3581_vm4, %v3577_v43  ;;  %v3499_v11 = vadd.f32 %v6315_v60, %v3412_v29 }
 0x22d   : > { %v3580_v57 = vmax.f32 %v3500_v30, 0.0 }
 0x22e   : > { %v3579_v31 = vmax.f32 %v3499_v11, 0.0 }
 0x22f   : > { %3661 = vst.msk [vmem:[%s5995_s29 + $0x278] sm:$0xff] %vm3581_vm4, %v3580_v57 }
 0x230   : > { %3660 = vst.msk [vmem:[%s5995_s29 + $0x270] sm:$0xff] %vm3581_vm4, %v3579_v31 }
 0x231 PF: > { %s13_s14 = sadd.s32 1, %s4964_s14   ;;  %s6628_s12 = smov %s4960_s13 }
 0x232   : > { %p10_p5 = scmp.ge.s32.totalorder %s13_s14, 4   ;;  %s6629_s13 = smov %s6631_s15 }
 0x234   :  { %12 = sbr.rel (!%p10_p5) target bundleno = 2 (0x2), region = 68 }

// kernel: voice_auth_cnn_forward.6
= control target key start
LH: loop header
LB: loop body
LE: loop exit
PB: predicated region body
PF: predicated region fallthrough
CT: control target
= control target key end

     0   :  { %s2366_s12 = smov 0   ;;  %s2368_s13 = smov 0   ;;  %s3292_s0 = inlined_call_operand.vmem [shape: f32[2,640,288], index: 0, kind: input, shape index: {}]   ;;  %s3293_s1 = inlined_call_operand.vmem [shape: f32[288,64], index: 1, kind: input, shape index: {}]   ;;  %s3294_s2 = inlined_call_operand.vmem [shape: f32[1,64], index: 2, kind: input, shape index: {}]   ;;  %s3295_s3 = inlined_call_operand.vmem [shape: f32[2,160,64], index: 3, kind: output, shape index: {}]  }
   0x1   :  { %s2370_s14 = smov 0  }
   0x2 LB: > { %s25_s15 = sadd.s32 1, %s2339_s13  ;;  %p1908_p0 = scmp.ge.s32.totalorder %s2343_s14, 1  ;;  %s2343_s14 = sphi %s2370_s14, %s13_s14   ;;  %s2339_s13 = sphi %s2368_s13, %s3391_s13   ;;  %s2335_s12 = sphi %s2366_s12, %s3390_s12  }
   0x3   : > { %p27_p1 = scmp.ge.s32.totalorder %s25_s15, 2  ;;  %p168_p2 = scmp.lt.s32.totalorder %s2343_s14, 3 }
   0x5   : > { %s3393_s15 = smov (%p27_p1, %s25_s15), 0  ;;  %p169_p3 = pnand %p1908_p0, %p168_p2 }
   0x7   : > { %172 = sbr.rel (%p169_p3) target bundleno = 540 (0x21c), region = 32 }
   0xe   : > { %v462_v0 = vld [vmem:[%s3293_s1] sm:$0xff]  ;;  %v463_v1 = vld [vmem:[%s3293_s1 + $0x8] sm:$0xff]  ;;  %v464_v2 = vld [vmem:[%s3293_s1 + $0x10] sm:$0xff]  ;;  %p202_p4 = scmp.lt.s32.totalorder %s2335_s12, 1  ;;  %v2345_v3 = vmov 0.0|0.0   ;;  %vm498_vm0 = vcmask 261120  }
   0xf   : > { %2206 = vmatprep.subr.bf16.mxu0 %v2345_v3  ;;  %2262 = vmatprep.subr.bf16.mxu1 %v2345_v3  ;;  %v2207_v4 = vpack.c.bf16 %v463_v1, %v462_v0  ;;  %v465_v5 = vld [vmem:[%s3293_s1 + $0x18] sm:$0xff]  ;;  %v466_v7 = vld [vmem:[%s3293_s1 + $0x20] sm:$0xff]  ;;  %v467_v8 = vld [vmem:[%s3293_s1 + $0x28] sm:$0xff]  ;;  %vm1776_vm1 = vcmask 523264  }
  0x10   : > { %s3395_s12 = smov (!%p202_p4, %s2335_s12), 1  ;;  %v2210_v6 = vpack.c.bf16 %v465_v5, %v464_v2  ;;  %v2213_v9 = vpack.c.bf16 %v467_v8, %v466_v7  ;;  %v468_v10 = vld [vmem:[%s3293_s1 + $0x30] sm:$0xff]  ;;  %v469_v11 = vld [vmem:[%s3293_s1 + $0x38] sm:$0xff]  ;;  %v470_v15 = vld [vmem:[%s3293_s1 + $0x40] sm:$0xff] }
  0x11   : > { %2208 = vmatpush1.bf16.msra.mxu0 %v2207_v4  ;;  %2278 = vmatpush1.bf16.msra.mxu1 %v2207_v4  ;;  %s2294_s28 = smul.u32 1920, %s3395_s12  ;;  %v2216_v13 = vpack.c.bf16 %v469_v11, %v468_v10  ;;  %v471_v16 = vld [vmem:[%s3293_s1 + $0x48] sm:$0xff]  ;;  %v472_v18 = vld [vmem:[%s3293_s1 + $0x50] sm:$0xff]  ;;  %v473_v19 = vld [vmem:[%s3293_s1 + $0x58] sm:$0xff] }
  0x12   : > { %2209 = vmatprep.subr.bf16.mxu0 %v2345_v3  ;;  %2263 = vmatprep.subr.bf16.mxu1 %v2345_v3  ;;  %v2219_v17 = vpack.c.bf16 %v471_v16, %v470_v15  ;;  %v2222_v20 = vpack.c.bf16 %v473_v19, %v472_v18  ;;  %v474_v21 = vld [vmem:[%s3293_s1 + $0x60] sm:$0xff]  ;;  %v475_v22 = vld [vmem:[%s3293_s1 + $0x68] sm:$0xff]  ;;  %v476_v24 = vld [vmem:[%s3293_s1 + $0x70] sm:$0xff] }
  0x13   : > { %s2412_s4 = scalar_lea.vmem %s3292_s0, %s2294_s28  ;;  %v2225_v23 = vpack.c.bf16 %v475_v22, %v474_v21  ;;  %v477_v25 = vld [vmem:[%s3293_s1 + $0x78] sm:$0xff]  ;;  %v478_v27 = vld [vmem:[%s3293_s1 + $0x80] sm:$0xff]  ;;  %v479_v28 = vld [vmem:[%s3293_s1 + $0x88] sm:$0xff] }
  0x14   : > { %v223_v12 = vld [vmem:[%s2412_s4 + $0x8] sm:$0xff]  ;;  %v2228_v26 = vpack.c.bf16 %v477_v25, %v476_v24  ;;  %v2231_v29 = vpack.c.bf16 %v479_v28, %v478_v27  ;;  %v480_v30 = vld [vmem:[%s3293_s1 + $0x90] sm:$0xff]  ;;  %v481_v31 = vld [vmem:[%s3293_s1 + $0x98] sm:$0xff] }
  0x15   : > { %2211 = vmatpush1.bf16.msra.mxu0 %v2210_v6  ;;  %2279 = vmatpush1.bf16.msra.mxu1 %v2210_v6  ;;  %v403_v14 = vld [vmem:[%s2412_s4 + $0x5a8] sm:$0xff]  ;;  %v2234_v32 = vpack.c.bf16 %v481_v31, %v480_v30  ;;  %v482_v33 = vld [vmem:[%s3293_s1 + $0xa0] sm:$0xff]  ;;  %v484_v36 = vld [vmem:[%s3293_s1 + $0xb0] sm:$0xff] }
  0x16   : > { %2212 = vmatprep.subr.bf16.mxu0 %v2345_v3  ;;  %2264 = vmatprep.subr.bf16.mxu1 %v2345_v3  ;;  %v483_v34 = vld [vmem:[%s3293_s1 + $0xa8] sm:$0xff]  ;;  %v485_v37 = vld [vmem:[%s3293_s1 + $0xb8] sm:$0xff]  ;;  %v486_v39 = vld [vmem:[%s3293_s1 + $0xc0] sm:$0xff] }
  0x17   : > { %803 = vmatprep.mubr.f32.mxu0 %v223_v12  ;;  %1103 = vmatprep.mubr.f32.mxu1 %v403_v14  ;;  %v2237_v35 = vpack.c.bf16 %v483_v34, %v482_v33  ;;  %v2240_v38 = vpack.c.bf16 %v485_v37, %v484_v36  ;;  %v487_v40 = vld [vmem:[%s3293_s1 + $0xc8] sm:$0xff]  ;;  %v488_v42 = vld [vmem:[%s3293_s1 + $0xd0] sm:$0xff]  ;;  %v489_v43 = vld [vmem:[%s3293_s1 + $0xd8] sm:$0xff] }
  0x18   : > { %v2243_v41 = vpack.c.bf16 %v487_v40, %v486_v39  ;;  %v2246_v44 = vpack.c.bf16 %v489_v43, %v488_v42  ;;  %v490_v45 = vld [vmem:[%s3293_s1 + $0xe0] sm:$0xff]  ;;  %v491_v46 = vld [vmem:[%s3293_s1 + $0xe8] sm:$0xff]  ;;  %v492_v48 = vld [vmem:[%s3293_s1 + $0xf0] sm:$0xff] }
  0x19   : > { %2214 = vmatpush1.bf16.msra.mxu0 %v2213_v9  ;;  %2280 = vmatpush1.bf16.msra.mxu1 %v2213_v9  ;;  %v2249_v47 = vpack.c.bf16 %v491_v46, %v490_v45  ;;  %v493_v49 = vld [vmem:[%s3293_s1 + $0xf8] sm:$0xff]  ;;  %v494_v50 = vld [vmem:[%s3293_s1 + $0x100] sm:$0xff]  ;;  %v495_v51 = vld [vmem:[%s3293_s1 + $0x108] sm:$0xff] }
  0x1a   : > { %2215 = vmatprep.subr.bf16.mxu0 %v2345_v3  ;;  %2265 = vmatprep.subr.bf16.mxu1 %v2345_v3  ;;  %v2252_v52 = vpack.c.bf16 %v493_v49, %v492_v48  ;;  %v2254_v53 = vpack.c.bf16 %v495_v51, %v494_v50  ;;  %v496_v54 = vld [vmem:[%s3293_s1 + $0x110] sm:$0xff]  ;;  %v497_v55 = vld [vmem:[%s3293_s1 + $0x118] sm:$0xff]  ;;  %v222_v56 = vld [vmem:[%s2412_s4] sm:$0xff] }
  0x1b   : > { %v402_v57 = vld [vmem:[%s2412_s4 + $0x5a0] sm:$0xff]  ;;  %v2258_v59 = vpack.c.bf16 %v497_v55, %v496_v54  ;;  %v225_v61 = vld [vmem:[%s2412_s4 + $0x18] sm:$0xff]  ;;  %v228_v1 = vld [vmem:[%s2412_s4 + $0x30] sm:$0xff] }
  0x1c   : > { %v226_v58 = vld [vmem:[%s2412_s4 + $0x20] sm:$0xff]  ;;  %v405_v62 = vld [vmem:[%s2412_s4 + $0x5b8] sm:$0xff]  ;;  %v408_v2 = vld [vmem:[%s2412_s4 + $0x5d0] sm:$0xff] }
  0x1d   : > { %2217 = vmatpush1.bf16.msra.mxu0 %v2216_v13  ;;  %2281 = vmatpush1.bf16.msra.mxu1 %v2216_v13  ;;  %v406_v60 = vld [vmem:[%s2412_s4 + $0x5c0] sm:$0xff]  ;;  %v229_v63 = vld [vmem:[%s2412_s4 + $0x38] sm:$0xff]  ;;  %v412_v4 = vld [vmem:[%s2412_s4 + $0x5f0] sm:$0xff] }
  0x1e   : > { %2218 = vmatprep.subr.bf16.mxu0 %v2345_v3  ;;  %2266 = vmatprep.subr.bf16.mxu1 %v2345_v3  ;;  %v409_v0 = vld [vmem:[%s2412_s4 + $0x5d8] sm:$0xff]  ;;  %v231_v5 = vld [vmem:[%s2412_s4 + $0x48] sm:$0xff]  ;;  %v234_v9 = vld [vmem:[%s2412_s4 + $0x60] sm:$0xff] }
  0x1f   : > { %v411_v6 = vld [vmem:[%s2412_s4 + $0x5e8] sm:$0xff]  ;;  %v414_v10 = vld [vmem:[%s2412_s4 + $0x600] sm:$0xff]  ;;  %v237_v13 = vld [vmem:[%s2412_s4 + $0x78] sm:$0xff] }
  0x20   : > { %v235_v7 = vld [vmem:[%s2412_s4 + $0x68] sm:$0xff]  ;;  %v238_v11 = vld [vmem:[%s2412_s4 + $0x80] sm:$0xff]  ;;  %v417_v14 = vld [vmem:[%s2412_s4 + $0x618] sm:$0xff] }
  0x21   : > { %2220 = vmatpush1.bf16.msra.mxu0 %v2219_v17  ;;  %2282 = vmatpush1.bf16.msra.mxu1 %v2219_v17  ;;  %v415_v8 = vld [vmem:[%s2412_s4 + $0x608] sm:$0xff]  ;;  %v418_v12 = vld [vmem:[%s2412_s4 + $0x620] sm:$0xff]  ;;  %v241_v15 = vld [vmem:[%s2412_s4 + $0x98] sm:$0xff] }
  0x22   : > { %2221 = vmatprep.subr.bf16.mxu0 %v2345_v3  ;;  %2267 = vmatprep.subr.bf16.mxu1 %v2345_v3  ;;  %v421_v16 = vld [vmem:[%s2412_s4 + $0x638] sm:$0xff]  ;;  %v240_v17 = vld [vmem:[%s2412_s4 + $0x90] sm:$0xff]  ;;  %v243_v21 = vld [vmem:[%s2412_s4 + $0xa8] sm:$0xff] }
  0x23   : > { %v420_v18 = vld [vmem:[%s2412_s4 + $0x630] sm:$0xff]  ;;  %v423_v22 = vld [vmem:[%s2412_s4 + $0x648] sm:$0xff]  ;;  %v246_v25 = vld [vmem:[%s2412_s4 + $0xc0] sm:$0xff] }
  0x24   : > { %v244_v19 = vld [vmem:[%s2412_s4 + $0xb0] sm:$0xff]  ;;  %v427_v24 = vld [vmem:[%s2412_s4 + $0x668] sm:$0xff]  ;;  %v250_v27 = vld [vmem:[%s2412_s4 + $0xe0] sm:$0xff] }
  0x25   : > { %2223 = vmatpush1.bf16.msra.mxu0 %v2222_v20  ;;  %2283 = vmatpush1.bf16.msra.mxu1 %v2222_v20  ;;  %v424_v20 = vld [vmem:[%s2412_s4 + $0x650] sm:$0xff]  ;;  %v430_v28 = vld [vmem:[%s2412_s4 + $0x680] sm:$0xff]  ;;  %v429_v30 = vld [vmem:[%s2412_s4 + $0x678] sm:$0xff] }
  0x26   : > { %2224 = vmatprep.subr.bf16.mxu0 %v2345_v3  ;;  %2268 = vmatprep.subr.bf16.mxu1 %v2345_v3  ;;  %v253_v31 = vld [vmem:[%s2412_s4 + $0xf8] sm:$0xff]  ;;  %v252_v33 = vld [vmem:[%s2412_s4 + $0xf0] sm:$0xff]  ;;  %v255_v37 = vld [vmem:[%s2412_s4 + $0x108] sm:$0xff] }
  0x27   : > { %v432_v34 = vld [vmem:[%s2412_s4 + $0x690] sm:$0xff]  ;;  %v259_v39 = vld [vmem:[%s2412_s4 + $0x128] sm:$0xff]  ;;  %v438_v42 = vld [vmem:[%s2412_s4 + $0x6c0] sm:$0xff] }
  0x28   : > { %v436_v36 = vld [vmem:[%s2412_s4 + $0x6b0] sm:$0xff]  ;;  %v439_v40 = vld [vmem:[%s2412_s4 + $0x6c8] sm:$0xff]  ;;  %v262_v43 = vld [vmem:[%s2412_s4 + $0x140] sm:$0xff] }
  0x29   : > { %2226 = vmatpush1.bf16.msra.mxu0 %v2225_v23  ;;  %2284 = vmatpush1.bf16.msra.mxu1 %v2225_v23  ;;  %v247_v23 = vld [vmem:[%s2412_s4 + $0xc8] sm:$0xff]  ;;  %v261_v45 = vld [vmem:[%s2412_s4 + $0x138] sm:$0xff]  ;;  %v264_v49 = vld [vmem:[%s2412_s4 + $0x150] sm:$0xff] }
  0x2a   : > { %2227 = vmatprep.subr.bf16.mxu0 %v2345_v3  ;;  %2269 = vmatprep.subr.bf16.mxu1 %v2345_v3  ;;  %v441_v46 = vld [vmem:[%s2412_s4 + $0x6d8] sm:$0xff]  ;;  %v444_v50 = vld [vmem:[%s2412_s4 + $0x6f0] sm:$0xff]  ;;  %v447_v54 = vld [vmem:[%s2412_s4 + $0x708] sm:$0xff] }
  0x2b   : > { %v445_v48 = vld [vmem:[%s2412_s4 + $0x6f8] sm:$0xff]  ;;  %v268_v51 = vld [vmem:[%s2412_s4 + $0x170] sm:$0xff]  ;;  %v271_v55 = vld [vmem:[%s2412_s4 + $0x188] sm:$0xff] }
  0x2d   : > { %2229 = vmatpush1.bf16.msra.mxu0 %v2228_v26  ;;  %2285 = vmatpush1.bf16.msra.mxu1 %v2228_v26  ;;  %v426_v26 = vld [vmem:[%s2412_s4 + $0x660] sm:$0xff] }
  0x2e   : > { %2230 = vmatprep.subr.bf16.mxu0 %v2345_v3  ;;  %2270 = vmatprep.subr.bf16.mxu1 %v2345_v3 }
  0x31   : > { %2232 = vmatpush1.bf16.msra.mxu0 %v2231_v29  ;;  %2286 = vmatpush1.bf16.msra.mxu1 %v2231_v29  ;;  %v249_v29 = vld [vmem:[%s2412_s4 + $0xd8] sm:$0xff] }
  0x32   : > { %2233 = vmatprep.subr.bf16.mxu0 %v2345_v3  ;;  %2271 = vmatprep.subr.bf16.mxu1 %v2345_v3 }
  0x35   : > { %2235 = vmatpush1.bf16.msra.mxu0 %v2234_v32  ;;  %2287 = vmatpush1.bf16.msra.mxu1 %v2234_v32  ;;  %v433_v32 = vld [vmem:[%s2412_s4 + $0x698] sm:$0xff] }
  0x36   : > { %2236 = vmatprep.subr.bf16.mxu0 %v2345_v3  ;;  %2272 = vmatprep.subr.bf16.mxu1 %v2345_v3 }
  0x39   : > { %2238 = vmatpush1.bf16.msra.mxu0 %v2237_v35  ;;  %2288 = vmatpush1.bf16.msra.mxu1 %v2237_v35  ;;  %v256_v35 = vld [vmem:[%s2412_s4 + $0x110] sm:$0xff] }
  0x3a   : > { %2239 = vmatprep.subr.bf16.mxu0 %v2345_v3  ;;  %2273 = vmatprep.subr.bf16.mxu1 %v2345_v3 }
  0x3d   : > { %2241 = vmatpush1.bf16.msra.mxu0 %v2240_v38  ;;  %2289 = vmatpush1.bf16.msra.mxu1 %v2240_v38  ;;  %v435_v38 = vld [vmem:[%s2412_s4 + $0x6a8] sm:$0xff] }
  0x3e   : > { %2242 = vmatprep.subr.bf16.mxu0 %v2345_v3  ;;  %2274 = vmatprep.subr.bf16.mxu1 %v2345_v3 }
  0x41   : > { %2244 = vmatpush1.bf16.msra.mxu0 %v2243_v41  ;;  %2290 = vmatpush1.bf16.msra.mxu1 %v2243_v41  ;;  %v258_v41 = vld [vmem:[%s2412_s4 + $0x120] sm:$0xff] }
  0x42   : > { %2245 = vmatprep.subr.bf16.mxu0 %v2345_v3  ;;  %2275 = vmatprep.subr.bf16.mxu1 %v2345_v3 }
  0x45   : > { %2247 = vmatpush1.bf16.msra.mxu0 %v2246_v44  ;;  %2291 = vmatpush1.bf16.msra.mxu1 %v2246_v44  ;;  %v442_v44 = vld [vmem:[%s2412_s4 + $0x6e0] sm:$0xff] }
  0x46   : > { %2248 = vmatprep.subr.bf16.mxu0 %v2345_v3  ;;  %2276 = vmatprep.subr.bf16.mxu1 %v2345_v3 }
  0x49   : > { %2250 = vmatpush1.bf16.msra.mxu0 %v2249_v47  ;;  %2292 = vmatpush1.bf16.msra.mxu1 %v2249_v47  ;;  %v265_v47 = vld [vmem:[%s2412_s4 + $0x158] sm:$0xff] }
  0x4a   : > { %2251 = vmatprep.subr.bf16.mxu0 %v2345_v3  ;;  %2277 = vmatprep.subr.bf16.mxu1 %v2345_v3  ;;  %v232_v3 = vld [vmem:[%s2412_s4 + $0x50] sm:$0xff] }
  0x4d   : > { %2253 = vmatpush1.bf16.msra.mxu0 %v2252_v52  ;;  %2293 = vmatpush1.bf16.msra.mxu1 %v2252_v52  ;;  %v448_v52 = vld [vmem:[%s2412_s4 + $0x710] sm:$0xff] }
  0x4e   : > { %2255 = vmatprep.subr.bf16.mxu1 %v2254_v53 }
  0x50   : > { %804 = vmatmul.mubr.f32.vlgmr.msra.gmra.mrb[0].mxu0 %v222_v56  ;;  %1104 = vmatmul.mubr.f32.vlgmr.msra.gmra.mrb[0].mxu1 %v402_v57  ;;  %v451_v56 = vld [vmem:[%s2412_s4 + $0x728] sm:$0xff]  ;;  %v270_v57 = vld [vmem:[%s2412_s4 + $0x180] sm:$0xff] }
  0x51   : > { %2257 = vmatpush3.bf16.msra.mxu1 %v2254_v53  ;;  %808 = vmatprep.mubr.f32.mxu0 %v226_v58  ;;  %v267_v53 = vld [vmem:[%s2412_s4 + $0x168] sm:$0xff]  ;;  %v450_v58 = vld [vmem:[%s2412_s4 + $0x720] sm:$0xff] }
  0x52   : > { %1108 = vmatprep.mubr.f32.mxu1 %v406_v60  ;;  %2259 = vmatprep.subr.bf16.mxu1 %v2258_v59  ;;  %v454_v60 = vld [vmem:[%s2412_s4 + $0x740] sm:$0xff] }
  0x54   : > { %809 = vmatmul.mubr.f32.gmra.mrb[2].mxu0 %v225_v61  ;;  %1109 = vmatmul.mubr.f32.gmra.mrb[2].mxu1 %v405_v62  ;;  %v273_v61 = vld [vmem:[%s2412_s4 + $0x198] sm:$0xff] }
  0x55   : > { %813 = vmatprep.mubr.f32.mxu0 %v229_v63  ;;  %1113 = vmatprep.mubr.f32.mxu1 %v409_v0  ;;  %v453_v62 = vld [vmem:[%s2412_s4 + $0x738] sm:$0xff] }
  0x56   : > { %2261 = vmatpush3.bf16.msra.mxu1 %v2258_v59  ;;  %v274_v59 = vld [vmem:[%s2412_s4 + $0x1a0] sm:$0xff]  ;;  %v277_v63 = vld [vmem:[%s2412_s4 + $0x1b8] sm:$0xff] }
  0x57   : > { %v457_v0 = vld [vmem:[%s2412_s4 + $0x758] sm:$0xff] }
  0x58   : > { %814 = vmatmul.mubr.f32.gmra.mrb[4].mxu0 %v228_v1  ;;  %1114 = vmatmul.mubr.f32.gmra.mrb[4].mxu1 %v408_v2  ;;  %v276_v1 = vld [vmem:[%s2412_s4 + $0x1b0] sm:$0xff] }
  0x59   : > { %818 = vmatprep.mubr.f32.mxu0 %v232_v3  ;;  %1118 = vmatprep.mubr.f32.mxu1 %v412_v4  ;;  %v456_v2 = vld [vmem:[%s2412_s4 + $0x750] sm:$0xff] }
  0x5a   : > { %v280_v3 = vld [vmem:[%s2412_s4 + $0x1d0] sm:$0xff] }
  0x5b   : > { %v460_v4 = vld [vmem:[%s2412_s4 + $0x770] sm:$0xff] }
  0x5c   : > { %819 = vmatmul.mubr.f32.gmra.mrb[6].mxu0 %v231_v5  ;;  %1119 = vmatmul.mubr.f32.gmra.mrb[6].mxu1 %v411_v6  ;;  %v279_v5 = vld [vmem:[%s2412_s4 + $0x1c8] sm:$0xff] }
  0x5d   : > { %823 = vmatprep.mubr.f32.mxu0 %v235_v7  ;;  %1123 = vmatprep.mubr.f32.mxu1 %v415_v8  ;;  %v459_v6 = vld [vmem:[%s2412_s4 + $0x768] sm:$0xff]  ;;  %v224_v8 = vld [vmem:[%s2412_s4 + $0x10] sm:$0xff] }
  0x5e   : > { %v283_v7 = vld [vmem:[%s2412_s4 + $0x1e8] sm:$0xff] }
  0x60   : > { %824 = vmatmul.mubr.f32.gmra.mrb[8].mxu0 %v234_v9  ;;  %1124 = vmatmul.mubr.f32.gmra.mrb[8].mxu1 %v414_v10  ;;  %v282_v9 = vld [vmem:[%s2412_s4 + $0x1e0] sm:$0xff]  ;;  %v227_v10 = vld [vmem:[%s2412_s4 + $0x28] sm:$0xff] }
  0x61   : > { %828 = vmatprep.mubr.f32.mxu0 %v238_v11  ;;  %1128 = vmatprep.mubr.f32.mxu1 %v418_v12  ;;  %v286_v11 = vld [vmem:[%s2412_s4 + $0x200] sm:$0xff] }
  0x62   : > { %v230_v12 = vld [vmem:[%s2412_s4 + $0x40] sm:$0xff] }
  0x64   : > { %829 = vmatmul.mubr.f32.gmra.mrb[10].mxu0 %v237_v13  ;;  %1129 = vmatmul.mubr.f32.gmra.mrb[10].mxu1 %v417_v14  ;;  %v285_v13 = vld [vmem:[%s2412_s4 + $0x1f8] sm:$0xff] }
  0x65   : > { %833 = vmatprep.mubr.f32.mxu0 %v241_v15  ;;  %1133 = vmatprep.mubr.f32.mxu1 %v421_v16  ;;  %v233_v14 = vld [vmem:[%s2412_s4 + $0x58] sm:$0xff]  ;;  %v236_v16 = vld [vmem:[%s2412_s4 + $0x70] sm:$0xff] }
  0x66   : > { %v289_v15 = vld [vmem:[%s2412_s4 + $0x218] sm:$0xff] }
  0x68   : > { %834 = vmatmul.mubr.f32.gmra.mrb[12].mxu0 %v240_v17  ;;  %1134 = vmatmul.mubr.f32.gmra.mrb[12].mxu1 %v420_v18  ;;  %v288_v17 = vld [vmem:[%s2412_s4 + $0x210] sm:$0xff]  ;;  %v239_v18 = vld [vmem:[%s2412_s4 + $0x88] sm:$0xff] }
  0x69   : > { %838 = vmatprep.mubr.f32.mxu0 %v244_v19  ;;  %1138 = vmatprep.mubr.f32.mxu1 %v424_v20  ;;  %v292_v19 = vld [vmem:[%s2412_s4 + $0x230] sm:$0xff]  ;;  %v242_v20 = vld [vmem:[%s2412_s4 + $0xa0] sm:$0xff] }
  0x6c   : > { %839 = vmatmul.mubr.f32.gmra.mrb[14].mxu0 %v243_v21  ;;  %1139 = vmatmul.mubr.f32.gmra.mrb[14].mxu1 %v423_v22  ;;  %v291_v21 = vld [vmem:[%s2412_s4 + $0x228] sm:$0xff]  ;;  %v245_v22 = vld [vmem:[%s2412_s4 + $0xb8] sm:$0xff] }
  0x6d   : > { %843 = vmatprep.mubr.f32.mxu0 %v247_v23  ;;  %1143 = vmatprep.mubr.f32.mxu1 %v427_v24  ;;  %v295_v23 = vld [vmem:[%s2412_s4 + $0x248] sm:$0xff]  ;;  %v248_v24 = vld [vmem:[%s2412_s4 + $0xd0] sm:$0xff] }
  0x70   : > { %844 = vmatmul.mubr.f32.gmra.mrb[16].mxu0 %v246_v25  ;;  %1144 = vmatmul.mubr.f32.gmra.mrb[16].mxu1 %v426_v26  ;;  %v294_v25 = vld [vmem:[%s2412_s4 + $0x240] sm:$0xff]  ;;  %v251_v26 = vld [vmem:[%s2412_s4 + $0xe8] sm:$0xff] }
  0x71   : > { %848 = vmatprep.mubr.f32.mxu0 %v250_v27  ;;  %1148 = vmatprep.mubr.f32.mxu1 %v430_v28  ;;  %v298_v27 = vld [vmem:[%s2412_s4 + $0x260] sm:$0xff] }
  0x72   : > { %v254_v28 = vld [vmem:[%s2412_s4 + $0x100] sm:$0xff] }
  0x74   : > { %849 = vmatmul.mubr.f32.gmra.mrb[18].mxu0 %v249_v29  ;;  %1149 = vmatmul.mubr.f32.gmra.mrb[18].mxu1 %v429_v30  ;;  %v297_v29 = vld [vmem:[%s2412_s4 + $0x258] sm:$0xff] }
  0x75   : > { %853 = vmatprep.mubr.f32.mxu0 %v253_v31  ;;  %1153 = vmatprep.mubr.f32.mxu1 %v433_v32  ;;  %v257_v30 = vld [vmem:[%s2412_s4 + $0x118] sm:$0xff]  ;;  %v260_v32 = vld [vmem:[%s2412_s4 + $0x130] sm:$0xff] }
  0x76   : > { %v301_v31 = vld [vmem:[%s2412_s4 + $0x278] sm:$0xff] }
  0x78   : > { %854 = vmatmul.mubr.f32.gmra.mrb[20].mxu0 %v252_v33  ;;  %1154 = vmatmul.mubr.f32.gmra.mrb[20].mxu1 %v432_v34  ;;  %v300_v33 = vld [vmem:[%s2412_s4 + $0x270] sm:$0xff]  ;;  %v263_v34 = vld [vmem:[%s2412_s4 + $0x148] sm:$0xff] }
  0x79   : > { %858 = vmatprep.mubr.f32.mxu0 %v256_v35  ;;  %1158 = vmatprep.mubr.f32.mxu1 %v436_v36  ;;  %v304_v35 = vld [vmem:[%s2412_s4 + $0x290] sm:$0xff]  ;;  %v266_v36 = vld [vmem:[%s2412_s4 + $0x160] sm:$0xff] }
  0x7c   : > { %859 = vmatmul.mubr.f32.gmra.mrb[22].mxu0 %v255_v37  ;;  %1159 = vmatmul.mubr.f32.gmra.mrb[22].mxu1 %v435_v38  ;;  %v303_v37 = vld [vmem:[%s2412_s4 + $0x288] sm:$0xff]  ;;  %v269_v38 = vld [vmem:[%s2412_s4 + $0x178] sm:$0xff] }
  0x7d   : > { %863 = vmatprep.mubr.f32.mxu0 %v259_v39  ;;  %1163 = vmatprep.mubr.f32.mxu1 %v439_v40  ;;  %v307_v39 = vld [vmem:[%s2412_s4 + $0x2a8] sm:$0xff]  ;;  %v272_v40 = vld [vmem:[%s2412_s4 + $0x190] sm:$0xff] }
  0x80   : > { %864 = vmatmul.mubr.f32.gmra.mrb[24].mxu0 %v258_v41  ;;  %1164 = vmatmul.mubr.f32.gmra.mrb[24].mxu1 %v438_v42  ;;  %v306_v41 = vld [vmem:[%s2412_s4 + $0x2a0] sm:$0xff]  ;;  %v275_v42 = vld [vmem:[%s2412_s4 + $0x1a8] sm:$0xff] }
  0x81   : > { %868 = vmatprep.mubr.f32.mxu0 %v262_v43  ;;  %1168 = vmatprep.mubr.f32.mxu1 %v442_v44  ;;  %v310_v43 = vld [vmem:[%s2412_s4 + $0x2c0] sm:$0xff] }
  0x82   : > { %v278_v44 = vld [vmem:[%s2412_s4 + $0x1c0] sm:$0xff] }
  0x84   : > { %869 = vmatmul.mubr.f32.gmra.mrb[26].mxu0 %v261_v45  ;;  %1169 = vmatmul.mubr.f32.gmra.mrb[26].mxu1 %v441_v46  ;;  %v309_v45 = vld [vmem:[%s2412_s4 + $0x2b8] sm:$0xff] }
  0x85   : > { %873 = vmatprep.mubr.f32.mxu0 %v265_v47  ;;  %1173 = vmatprep.mubr.f32.mxu1 %v445_v48  ;;  %v281_v46 = vld [vmem:[%s2412_s4 + $0x1d8] sm:$0xff]  ;;  %v284_v48 = vld [vmem:[%s2412_s4 + $0x1f0] sm:$0xff] }
  0x86   : > { %v313_v47 = vld [vmem:[%s2412_s4 + $0x2d8] sm:$0xff] }
  0x88   : > { %874 = vmatmul.mubr.f32.gmra.mrb[28].mxu0 %v264_v49  ;;  %1174 = vmatmul.mubr.f32.gmra.mrb[28].mxu1 %v444_v50  ;;  %v312_v49 = vld [vmem:[%s2412_s4 + $0x2d0] sm:$0xff]  ;;  %v287_v50 = vld [vmem:[%s2412_s4 + $0x208] sm:$0xff] }
  0x89   : > { %878 = vmatprep.mubr.f32.mxu0 %v268_v51  ;;  %1178 = vmatprep.mubr.f32.mxu1 %v448_v52  ;;  %v316_v51 = vld [vmem:[%s2412_s4 + $0x2f0] sm:$0xff]  ;;  %v290_v52 = vld [vmem:[%s2412_s4 + $0x220] sm:$0xff] }
  0x8c   : > { %879 = vmatmul.mubr.f32.gmra.mrb[30].mxu0 %v267_v53  ;;  %1179 = vmatmul.mubr.f32.gmra.mrb[30].mxu1 %v447_v54  ;;  %v315_v53 = vld [vmem:[%s2412_s4 + $0x2e8] sm:$0xff]  ;;  %v293_v54 = vld [vmem:[%s2412_s4 + $0x238] sm:$0xff] }
  0x8d   : > { %883 = vmatprep.mubr.f32.mxu0 %v271_v55  ;;  %1183 = vmatprep.mubr.f32.mxu1 %v451_v56  ;;  %v319_v55 = vld [vmem:[%s2412_s4 + $0x308] sm:$0xff]  ;;  %v296_v56 = vld [vmem:[%s2412_s4 + $0x250] sm:$0xff] }
  0x90   : > { %884 = vmatmul.mubr.f32.gmra.mrb[32].mxu0 %v270_v57  ;;  %1184 = vmatmul.mubr.f32.gmra.mrb[32].mxu1 %v450_v58  ;;  %v318_v57 = vld [vmem:[%s2412_s4 + $0x300] sm:$0xff]  ;;  %v299_v58 = vld [vmem:[%s2412_s4 + $0x268] sm:$0xff] }
  0x91   : > { %888 = vmatprep.mubr.f32.mxu0 %v274_v59  ;;  %1188 = vmatprep.mubr.f32.mxu1 %v454_v60  ;;  %v322_v59 = vld [vmem:[%s2412_s4 + $0x320] sm:$0xff] }
  0x92   : > { %v302_v60 = vld [vmem:[%s2412_s4 + $0x280] sm:$0xff] }
  0x94   : > { %889 = vmatmul.mubr.f32.gmra.mrb[34].mxu0 %v273_v61  ;;  %1189 = vmatmul.mubr.f32.gmra.mrb[34].mxu1 %v453_v62  ;;  %v321_v61 = vld [vmem:[%s2412_s4 + $0x318] sm:$0xff] }
  0x95   : > { %893 = vmatprep.mubr.f32.mxu0 %v277_v63  ;;  %1193 = vmatprep.mubr.f32.mxu1 %v457_v0  ;;  %v305_v62 = vld [vmem:[%s2412_s4 + $0x298] sm:$0xff]  ;;  %v308_v0 = vld [vmem:[%s2412_s4 + $0x2b0] sm:$0xff] }
  0x96   : > { %v325_v63 = vld [vmem:[%s2412_s4 + $0x338] sm:$0xff] }
  0x98   : > { %894 = vmatmul.mubr.f32.gmra.mrb[36].mxu0 %v276_v1  ;;  %1194 = vmatmul.mubr.f32.gmra.mrb[36].mxu1 %v456_v2  ;;  %v324_v1 = vld [vmem:[%s2412_s4 + $0x330] sm:$0xff]  ;;  %v311_v2 = vld [vmem:[%s2412_s4 + $0x2c8] sm:$0xff] }
  0x99   : > { %898 = vmatprep.mubr.f32.mxu0 %v280_v3  ;;  %1198 = vmatprep.mubr.f32.mxu1 %v460_v4  ;;  %v328_v3 = vld [vmem:[%s2412_s4 + $0x350] sm:$0xff]  ;;  %v314_v4 = vld [vmem:[%s2412_s4 + $0x2e0] sm:$0xff] }
  0x9c   : > { %899 = vmatmul.mubr.f32.gmra.mrb[38].mxu0 %v279_v5  ;;  %1199 = vmatmul.mubr.f32.gmra.mrb[38].mxu1 %v459_v6  ;;  %v327_v5 = vld [vmem:[%s2412_s4 + $0x348] sm:$0xff]  ;;  %v317_v6 = vld [vmem:[%s2412_s4 + $0x2f8] sm:$0xff] }
  0x9d   : > { %903 = vmatprep.mubr.f32.mxu0 %v283_v7  ;;  %2086 = vmatprep.mubr.msk.f32.mxu1 %vm498_vm0, %v224_v8  ;;  %v331_v7 = vld [vmem:[%s2412_s4 + $0x368] sm:$0xff]  ;;  %v320_v8 = vld [vmem:[%s2412_s4 + $0x310] sm:$0xff] }
  0xa0   : > { %904 = vmatmul.mubr.f32.gmra.mrb[40].mxu0 %v282_v9  ;;  %2087 = vmatmul.mubr.msk.f32.vlgmr.msra.gmra.mrb[40].mxu1 %vm498_vm0, %v227_v10  ;;  %v330_v9 = vld [vmem:[%s2412_s4 + $0x360] sm:$0xff]  ;;  %v323_v10 = vld [vmem:[%s2412_s4 + $0x328] sm:$0xff] }
  0xa1   : > { %908 = vmatprep.mubr.f32.mxu0 %v286_v11  ;;  %2089 = vmatprep.mubr.msk.f32.mxu1 %vm498_vm0, %v230_v12  ;;  %v334_v11 = vld [vmem:[%s2412_s4 + $0x380] sm:$0xff] }
  0xa2   : > { %v326_v12 = vld [vmem:[%s2412_s4 + $0x340] sm:$0xff] }
  0xa4   : > { %909 = vmatmul.mubr.f32.gmra.mrb[42].mxu0 %v285_v13  ;;  %2090 = vmatmul.mubr.msk.f32.gmra.mrb[42].mxu1 %vm498_vm0, %v233_v14  ;;  %v333_v13 = vld [vmem:[%s2412_s4 + $0x378] sm:$0xff] }
  0xa5   : > { %913 = vmatprep.mubr.f32.mxu0 %v289_v15  ;;  %2092 = vmatprep.mubr.msk.f32.mxu1 %vm498_vm0, %v236_v16  ;;  %v329_v14 = vld [vmem:[%s2412_s4 + $0x358] sm:$0xff]  ;;  %v332_v16 = vld [vmem:[%s2412_s4 + $0x370] sm:$0xff] }
  0xa6   : > { %v337_v15 = vld [vmem:[%s2412_s4 + $0x398] sm:$0xff] }
  0xa8   : > { %914 = vmatmul.mubr.f32.gmra.mrb[44].mxu0 %v288_v17  ;;  %2093 = vmatmul.mubr.msk.f32.gmra.mrb[44].mxu1 %vm498_vm0, %v239_v18  ;;  %v336_v17 = vld [vmem:[%s2412_s4 + $0x390] sm:$0xff]  ;;  %v335_v18 = vld [vmem:[%s2412_s4 + $0x388] sm:$0xff] }
  0xa9   : > { %918 = vmatprep.mubr.f32.mxu0 %v292_v19  ;;  %2095 = vmatprep.mubr.msk.f32.mxu1 %vm498_vm0, %v242_v20  ;;  %v340_v19 = vld [vmem:[%s2412_s4 + $0x3b0] sm:$0xff]  ;;  %v338_v20 = vld [vmem:[%s2412_s4 + $0x3a0] sm:$0xff] }
  0xac   : > { %919 = vmatmul.mubr.f32.gmra.mrb[46].mxu0 %v291_v21  ;;  %2096 = vmatmul.mubr.msk.f32.gmra.mrb[46].mxu1 %vm498_vm0, %v245_v22  ;;  %v339_v21 = vld [vmem:[%s2412_s4 + $0x3a8] sm:$0xff]  ;;  %v341_v22 = vld [vmem:[%s2412_s4 + $0x3b8] sm:$0xff] }
  0xad   : > { %923 = vmatprep.mubr.f32.mxu0 %v295_v23  ;;  %2098 = vmatprep.mubr.msk.f32.mxu1 %vm498_vm0, %v248_v24  ;;  %v343_v23 = vld [vmem:[%s2412_s4 + $0x3c8] sm:$0xff]  ;;  %v344_v24 = vld [vmem:[%s2412_s4 + $0x3d0] sm:$0xff] }
  0xb0   : > { %924 = vmatmul.mubr.f32.gmra.mrb[48].mxu0 %v294_v25  ;;  %2099 = vmatmul.mubr.msk.f32.gmra.mrb[48].mxu1 %vm498_vm0, %v251_v26  ;;  %v342_v25 = vld [vmem:[%s2412_s4 + $0x3c0] sm:$0xff]  ;;  %v347_v26 = vld [vmem:[%s2412_s4 + $0x3e8] sm:$0xff] }
  0xb1   : > { %928 = vmatprep.mubr.f32.mxu0 %v298_v27  ;;  %2101 = vmatprep.mubr.msk.f32.mxu1 %vm498_vm0, %v254_v28  ;;  %v346_v27 = vld [vmem:[%s2412_s4 + $0x3e0] sm:$0xff] }
  0xb2   : > { %v350_v28 = vld [vmem:[%s2412_s4 + $0x400] sm:$0xff] }
  0xb4   : > { %929 = vmatmul.mubr.f32.gmra.mrb[50].mxu0 %v297_v29  ;;  %2102 = vmatmul.mubr.msk.f32.gmra.mrb[50].mxu1 %vm498_vm0, %v257_v30  ;;  %v345_v29 = vld [vmem:[%s2412_s4 + $0x3d8] sm:$0xff] }
  0xb5   : > { %933 = vmatprep.mubr.f32.mxu0 %v301_v31  ;;  %2104 = vmatprep.mubr.msk.f32.mxu1 %vm498_vm0, %v260_v32  ;;  %v353_v30 = vld [vmem:[%s2412_s4 + $0x418] sm:$0xff]  ;;  %v356_v32 = vld [vmem:[%s2412_s4 + $0x430] sm:$0xff] }
  0xb6   : > { %v349_v31 = vld [vmem:[%s2412_s4 + $0x3f8] sm:$0xff] }
  0xb8   : > { %934 = vmatmul.mubr.f32.gmra.mrb[52].mxu0 %v300_v33  ;;  %2105 = vmatmul.mubr.msk.f32.gmra.mrb[52].mxu1 %vm498_vm0, %v263_v34  ;;  %v348_v33 = vld [vmem:[%s2412_s4 + $0x3f0] sm:$0xff]  ;;  %v359_v34 = vld [vmem:[%s2412_s4 + $0x448] sm:$0xff] }
  0xb9   : > { %938 = vmatprep.mubr.f32.mxu0 %v304_v35  ;;  %2107 = vmatprep.mubr.msk.f32.mxu1 %vm498_vm0, %v266_v36  ;;  %v352_v35 = vld [vmem:[%s2412_s4 + $0x410] sm:$0xff]  ;;  %v362_v36 = vld [vmem:[%s2412_s4 + $0x460] sm:$0xff] }
  0xbc   : > { %939 = vmatmul.mubr.f32.gmra.mrb[54].mxu0 %v303_v37  ;;  %2108 = vmatmul.mubr.msk.f32.gmra.mrb[54].mxu1 %vm498_vm0, %v269_v38  ;;  %v351_v37 = vld [vmem:[%s2412_s4 + $0x408] sm:$0xff]  ;;  %v365_v38 = vld [vmem:[%s2412_s4 + $0x478] sm:$0xff] }
  0xbd   : > { %943 = vmatprep.mubr.f32.mxu0 %v307_v39  ;;  %2110 = vmatprep.mubr.msk.f32.mxu1 %vm498_vm0, %v272_v40  ;;  %v355_v39 = vld [vmem:[%s2412_s4 + $0x428] sm:$0xff]  ;;  %v368_v40 = vld [vmem:[%s2412_s4 + $0x490] sm:$0xff] }
  0xc0   : > { %944 = vmatmul.mubr.f32.gmra.mrb[56].mxu0 %v306_v41  ;;  %2111 = vmatmul.mubr.msk.f32.gmra.mrb[56].mxu1 %vm498_vm0, %v275_v42  ;;  %v354_v41 = vld [vmem:[%s2412_s4 + $0x420] sm:$0xff]  ;;  %v371_v42 = vld [vmem:[%s2412_s4 + $0x4a8] sm:$0xff] }
  0xc1   : > { %948 = vmatprep.mubr.f32.mxu0 %v310_v43  ;;  %2113 = vmatprep.mubr.msk.f32.mxu1 %vm498_vm0, %v278_v44  ;;  %v358_v43 = vld [vmem:[%s2412_s4 + $0x440] sm:$0xff] }
  0xc2   : > { %v374_v44 = vld [vmem:[%s2412_s4 + $0x4c0] sm:$0xff] }
  0xc4   : > { %949 = vmatmul.mubr.f32.gmra.mrb[58].mxu0 %v309_v45  ;;  %2114 = vmatmul.mubr.msk.f32.gmra.mrb[58].mxu1 %vm498_vm0, %v281_v46  ;;  %v357_v45 = vld [vmem:[%s2412_s4 + $0x438] sm:$0xff] }
  0xc5   : > { %953 = vmatprep.mubr.f32.mxu0 %v313_v47  ;;  %2116 = vmatprep.mubr.msk.f32.mxu1 %vm498_vm0, %v284_v48  ;;  %v377_v46 = vld [vmem:[%s2412_s4 + $0x4d8] sm:$0xff]  ;;  %v380_v48 = vld [vmem:[%s2412_s4 + $0x4f0] sm:$0xff] }
  0xc6   : > { %v361_v47 = vld [vmem:[%s2412_s4 + $0x458] sm:$0xff] }
  0xc8   : > { %954 = vmatmul.mubr.f32.gmra.mrb[60].mxu0 %v312_v49  ;;  %2117 = vmatmul.mubr.msk.f32.gmra.mrb[60].mxu1 %vm498_vm0, %v287_v50  ;;  %v360_v49 = vld [vmem:[%s2412_s4 + $0x450] sm:$0xff]  ;;  %v383_v50 = vld [vmem:[%s2412_s4 + $0x508] sm:$0xff] }
  0xc9   : > { %958 = vmatprep.mubr.f32.mxu0 %v316_v51  ;;  %2119 = vmatprep.mubr.msk.f32.mxu1 %vm498_vm0, %v290_v52  ;;  %v364_v51 = vld [vmem:[%s2412_s4 + $0x470] sm:$0xff]  ;;  %v386_v52 = vld [vmem:[%s2412_s4 + $0x520] sm:$0xff] }
  0xcc   : > { %959 = vmatmul.mubr.f32.gmra.mrb[62].mxu0 %v315_v53  ;;  %2120 = vmatmul.mubr.msk.f32.gmra.mrb[62].mxu1 %vm498_vm0, %v293_v54  ;;  %v363_v53 = vld [vmem:[%s2412_s4 + $0x468] sm:$0xff]  ;;  %v389_v54 = vld [vmem:[%s2412_s4 + $0x538] sm:$0xff] }
  0xcd   : > { %963 = vmatprep.mubr.f32.mxu0 %v319_v55  ;;  %2122 = vmatprep.mubr.msk.f32.mxu1 %vm498_vm0, %v296_v56  ;;  %v367_v55 = vld [vmem:[%s2412_s4 + $0x488] sm:$0xff]  ;;  %v392_v56 = vld [vmem:[%s2412_s4 + $0x550] sm:$0xff] }
  0xd0   : > { %964 = vmatmul.mubr.f32.gmra.mrb[64].mxu0 %v318_v57  ;;  %2123 = vmatmul.mubr.msk.f32.gmra.mrb[64].mxu1 %vm498_vm0, %v299_v58  ;;  %v366_v57 = vld [vmem:[%s2412_s4 + $0x480] sm:$0xff]  ;;  %v395_v58 = vld [vmem:[%s2412_s4 + $0x568] sm:$0xff] }
  0xd1   : > { %968 = vmatprep.mubr.f32.mxu0 %v322_v59  ;;  %2125 = vmatprep.mubr.msk.f32.mxu1 %vm498_vm0, %v302_v60  ;;  %v370_v59 = vld [vmem:[%s2412_s4 + $0x4a0] sm:$0xff] }
  0xd2   : > { %v398_v60 = vld [vmem:[%s2412_s4 + $0x580] sm:$0xff] }
  0xd4   : > { %969 = vmatmul.mubr.f32.gmra.mrb[66].mxu0 %v321_v61  ;;  %2126 = vmatmul.mubr.msk.f32.gmra.mrb[66].mxu1 %vm498_vm0, %v305_v62  ;;  %v369_v61 = vld [vmem:[%s2412_s4 + $0x498] sm:$0xff] }
  0xd5   : > { %973 = vmatprep.mubr.f32.mxu0 %v325_v63  ;;  %2128 = vmatprep.mubr.msk.f32.mxu1 %vm498_vm0, %v308_v0  ;;  %v401_v62 = vld [vmem:[%s2412_s4 + $0x598] sm:$0xff]  ;;  %v404_v0 = vld [vmem:[%s2412_s4 + $0x5b0] sm:$0xff] }
  0xd6   : > { %v373_v63 = vld [vmem:[%s2412_s4 + $0x4b8] sm:$0xff] }
  0xd8   : > { %974 = vmatmul.mubr.f32.gmra.mrb[68].mxu0 %v324_v1  ;;  %2129 = vmatmul.mubr.msk.f32.gmra.mrb[68].mxu1 %vm498_vm0, %v311_v2  ;;  %v372_v1 = vld [vmem:[%s2412_s4 + $0x4b0] sm:$0xff]  ;;  %v407_v2 = vld [vmem:[%s2412_s4 + $0x5c8] sm:$0xff] }
  0xd9   : > { %978 = vmatprep.mubr.f32.mxu0 %v328_v3  ;;  %2131 = vmatprep.mubr.msk.f32.mxu1 %vm498_vm0, %v314_v4  ;;  %v376_v3 = vld [vmem:[%s2412_s4 + $0x4d0] sm:$0xff]  ;;  %v410_v4 = vld [vmem:[%s2412_s4 + $0x5e0] sm:$0xff] }
  0xdc   : > { %979 = vmatmul.mubr.f32.gmra.mrb[70].mxu0 %v327_v5  ;;  %2132 = vmatmul.mubr.msk.f32.gmra.mrb[70].mxu1 %vm498_vm0, %v317_v6  ;;  %v375_v5 = vld [vmem:[%s2412_s4 + $0x4c8] sm:$0xff]  ;;  %v413_v6 = vld [vmem:[%s2412_s4 + $0x5f8] sm:$0xff] }
  0xdd   : > { %983 = vmatprep.mubr.f32.mxu0 %v331_v7  ;;  %2134 = vmatprep.mubr.msk.f32.mxu1 %vm498_vm0, %v320_v8  ;;  %v379_v7 = vld [vmem:[%s2412_s4 + $0x4e8] sm:$0xff]  ;;  %v416_v8 = vld [vmem:[%s2412_s4 + $0x610] sm:$0xff] }
  0xe0   : > { %984 = vmatmul.mubr.f32.gmra.mrb[72].mxu0 %v330_v9  ;;  %2135 = vmatmul.mubr.msk.f32.gmra.mrb[72].mxu1 %vm498_vm0, %v323_v10  ;;  %v378_v9 = vld [vmem:[%s2412_s4 + $0x4e0] sm:$0xff]  ;;  %v419_v10 = vld [vmem:[%s2412_s4 + $0x628] sm:$0xff] }
  0xe1   : > { %988 = vmatprep.mubr.f32.mxu0 %v334_v11  ;;  %2137 = vmatprep.mubr.msk.f32.mxu1 %vm498_vm0, %v326_v12  ;;  %v382_v11 = vld [vmem:[%s2412_s4 + $0x500] sm:$0xff] }
  0xe2   : > { %v422_v12 = vld [vmem:[%s2412_s4 + $0x640] sm:$0xff] }
  0xe4   : > { %989 = vmatmul.mubr.f32.gmra.mrb[74].mxu0 %v333_v13  ;;  %2138 = vmatmul.mubr.msk.f32.gmra.mrb[74].mxu1 %vm498_vm0, %v329_v14  ;;  %v381_v13 = vld [vmem:[%s2412_s4 + $0x4f8] sm:$0xff] }
  0xe5   : > { %993 = vmatprep.mubr.f32.mxu0 %v337_v15  ;;  %2140 = vmatprep.mubr.msk.f32.mxu1 %vm498_vm0, %v332_v16  ;;  %v425_v14 = vld [vmem:[%s2412_s4 + $0x658] sm:$0xff]  ;;  %v428_v16 = vld [vmem:[%s2412_s4 + $0x670] sm:$0xff] }
  0xe6   : > { %v385_v15 = vld [vmem:[%s2412_s4 + $0x518] sm:$0xff] }
  0xe8   : > { %994 = vmatmul.mubr.f32.gmra.mrb[76].mxu0 %v336_v17  ;;  %2141 = vmatmul.mubr.msk.f32.gmra.mrb[76].mxu1 %vm498_vm0, %v335_v18 }
  0xe9   : > { %998 = vmatprep.mubr.f32.mxu0 %v340_v19  ;;  %2143 = vmatprep.mubr.msk.f32.mxu1 %vm498_vm0, %v338_v20 }
  0xec   : > { %999 = vmatmul.mubr.f32.gmra.mrb[78].mxu0 %v339_v21  ;;  %2144 = vmatmul.mubr.msk.f32.gmra.mrb[78].mxu1 %vm498_vm0, %v341_v22  ;;  %v384_v21 = vld [vmem:[%s2412_s4 + $0x510] sm:$0xff]  ;;  %v431_v22 = vld [vmem:[%s2412_s4 + $0x688] sm:$0xff] }
  0xed   : > { %1003 = vmatprep.mubr.f32.mxu0 %v343_v23  ;;  %2146 = vmatprep.mubr.msk.f32.mxu1 %vm498_vm0, %v344_v24  ;;  %v388_v23 = vld [vmem:[%s2412_s4 + $0x530] sm:$0xff]  ;;  %v434_v24 = vld [vmem:[%s2412_s4 + $0x6a0] sm:$0xff] }
  0xf0   : > { %1004 = vmatmul.mubr.f32.gmra.mrb[80].mxu0 %v342_v25  ;;  %2147 = vmatmul.mubr.msk.f32.gmra.mrb[80].mxu1 %vm498_vm0, %v347_v26 }
  0xf1   : > { %1008 = vmatprep.mubr.f32.mxu0 %v346_v27  ;;  %2149 = vmatprep.mubr.msk.f32.mxu1 %vm498_vm0, %v350_v28 }
  0xf4   : > { %1009 = vmatmul.mubr.f32.gmra.mrb[82].mxu0 %v345_v29  ;;  %2150 = vmatmul.mubr.msk.f32.gmra.mrb[82].mxu1 %vm498_vm0, %v353_v30  ;;  %v387_v29 = vld [vmem:[%s2412_s4 + $0x528] sm:$0xff]  ;;  %v437_v30 = vld [vmem:[%s2412_s4 + $0x6b8] sm:$0xff] }
  0xf5   : > { %1013 = vmatprep.mubr.f32.mxu0 %v349_v31  ;;  %2152 = vmatprep.mubr.msk.f32.mxu1 %vm498_vm0, %v356_v32  ;;  %v391_v31 = vld [vmem:[%s2412_s4 + $0x548] sm:$0xff]  ;;  %v440_v32 = vld [vmem:[%s2412_s4 + $0x6d0] sm:$0xff] }
  0xf8   : > { %1014 = vmatmul.mubr.f32.gmra.mrb[84].mxu0 %v348_v33  ;;  %2153 = vmatmul.mubr.msk.f32.gmra.mrb[84].mxu1 %vm498_vm0, %v359_v34 }
  0xf9   : > { %1018 = vmatprep.mubr.f32.mxu0 %v352_v35  ;;  %2155 = vmatprep.mubr.msk.f32.mxu1 %vm498_vm0, %v362_v36 }
  0xfc   : > { %1019 = vmatmul.mubr.f32.gmra.mrb[86].mxu0 %v351_v37  ;;  %2156 = vmatmul.mubr.msk.f32.gmra.mrb[86].mxu1 %vm498_vm0, %v365_v38  ;;  %v390_v37 = vld [vmem:[%s2412_s4 + $0x540] sm:$0xff]  ;;  %v443_v38 = vld [vmem:[%s2412_s4 + $0x6e8] sm:$0xff] }
  0xfd   : > { %1023 = vmatprep.mubr.f32.mxu0 %v355_v39  ;;  %2158 = vmatprep.mubr.msk.f32.mxu1 %vm498_vm0, %v368_v40  ;;  %v394_v39 = vld [vmem:[%s2412_s4 + $0x560] sm:$0xff] }
  0xfe   : > { %v446_v40 = vld [vmem:[%s2412_s4 + $0x700] sm:$0xff] }
 0x100   : > { %1024 = vmatmul.mubr.f32.gmra.mrb[88].mxu0 %v354_v41  ;;  %2159 = vmatmul.mubr.msk.f32.gmra.mrb[88].mxu1 %vm498_vm0, %v371_v42 }
 0x101   : > { %1028 = vmatprep.mubr.f32.mxu0 %v358_v43  ;;  %2161 = vmatprep.mubr.msk.f32.mxu1 %vm498_vm0, %v374_v44 }
 0x104   : > { %1029 = vmatmul.mubr.f32.gmra.mrb[90].mxu0 %v357_v45  ;;  %2162 = vmatmul.mubr.msk.f32.gmra.mrb[90].mxu1 %vm498_vm0, %v377_v46  ;;  %v393_v45 = vld [vmem:[%s2412_s4 + $0x558] sm:$0xff] }
 0x105   : > { %1033 = vmatprep.mubr.f32.mxu0 %v361_v47  ;;  %2164 = vmatprep.mubr.msk.f32.mxu1 %vm498_vm0, %v380_v48  ;;  %v449_v46 = vld [vmem:[%s2412_s4 + $0x718] sm:$0xff]  ;;  %v452_v48 = vld [vmem:[%s2412_s4 + $0x730] sm:$0xff] }
 0x106   : > { %v397_v47 = vld [vmem:[%s2412_s4 + $0x578] sm:$0xff] }
 0x108   : > { %1034 = vmatmul.mubr.f32.gmra.mrb[92].mxu0 %v360_v49  ;;  %2165 = vmatmul.mubr.msk.f32.gmra.mrb[92].mxu1 %vm498_vm0, %v383_v50 }
 0x109   : > { %1038 = vmatprep.mubr.f32.mxu0 %v364_v51  ;;  %2167 = vmatprep.mubr.msk.f32.mxu1 %vm498_vm0, %v386_v52 }
 0x10c   : > { %1039 = vmatmul.mubr.f32.gmra.mrb[94].mxu0 %v363_v53  ;;  %2168 = vmatmul.mubr.msk.f32.gmra.mrb[94].mxu1 %vm498_vm0, %v389_v54  ;;  %v396_v53 = vld [vmem:[%s2412_s4 + $0x570] sm:$0xff]  ;;  %v455_v54 = vld [vmem:[%s2412_s4 + $0x748] sm:$0xff] }
 0x10d   : > { %1043 = vmatprep.mubr.f32.mxu0 %v367_v55  ;;  %2170 = vmatprep.mubr.msk.f32.mxu1 %vm498_vm0, %v392_v56  ;;  %v400_v55 = vld [vmem:[%s2412_s4 + $0x590] sm:$0xff]  ;;  %v458_v56 = vld [vmem:[%s2412_s4 + $0x760] sm:$0xff] }
 0x110   : > { %1044 = vmatmul.mubr.f32.gmra.mrb[96].mxu0 %v366_v57  ;;  %2171 = vmatmul.mubr.msk.f32.gmra.mrb[96].mxu1 %vm498_vm0, %v395_v58 }
 0x111   : > { %1048 = vmatprep.mubr.f32.mxu0 %v370_v59  ;;  %2173 = vmatprep.mubr.msk.f32.mxu1 %vm498_vm0, %v398_v60 }
 0x114   : > { %1049 = vmatmul.mubr.f32.gmra.mrb[98].mxu0 %v369_v61  ;;  %2174 = vmatmul.mubr.msk.f32.gmra.mrb[98].mxu1 %vm498_vm0, %v401_v62  ;;  %v399_v61 = vld [vmem:[%s2412_s4 + $0x588] sm:$0xff]  ;;  %v461_v62 = vld [vmem:[%s2412_s4 + $0x778] sm:$0xff]  ;;  %s2295_s4 = smul.u32 160, %s3395_s12 }
 0x115   : > { %1053 = vmatprep.mubr.f32.mxu0 %v373_v63  ;;  %2176 = vmatprep.mubr.msk.f32.mxu1 %vm498_vm0, %v404_v0 }
 0x116   : > { %s3127_s28 = scalar_lea.vmem %s3295_s3, %s2295_s4 }
 0x118   : > { %1054 = vmatmul.mubr.f32.gmra.mrb[100].mxu0 %v372_v1  ;;  %2177 = vmatmul.mubr.msk.f32.gmra.mrb[100].mxu1 %vm498_vm0, %v407_v2 }
 0x119   : > { %1058 = vmatprep.mubr.f32.mxu0 %v376_v3  ;;  %2179 = vmatprep.mubr.msk.f32.mxu1 %vm498_vm0, %v410_v4 }
 0x11c   : > { %1059 = vmatmul.mubr.f32.gmra.mrb[102].mxu0 %v375_v5  ;;  %2180 = vmatmul.mubr.msk.f32.gmra.mrb[102].mxu1 %vm498_vm0, %v413_v6 }
 0x11d   : > { %1063 = vmatprep.mubr.f32.mxu0 %v379_v7  ;;  %2182 = vmatprep.mubr.msk.f32.mxu1 %vm498_vm0, %v416_v8 }
 0x120   : > { %1064 = vmatmul.mubr.f32.gmra.mrb[104].mxu0 %v378_v9  ;;  %2183 = vmatmul.mubr.msk.f32.gmra.mrb[104].mxu1 %vm498_vm0, %v419_v10 }
 0x121   : > { %1068 = vmatprep.mubr.f32.mxu0 %v382_v11  ;;  %2185 = vmatprep.mubr.msk.f32.mxu1 %vm498_vm0, %v422_v12 }
 0x123   : > { %v2817_v17 = vpop.f32.mrb[0].mxu1  ;;  %v2819_v18 = vpop.f32.mrb[0].mxu0 }
 0x124   : > { %1069 = vmatmul.mubr.f32.gmra.mrb[106].mxu0 %v381_v13  ;;  %v1107_v19 = vpop.f32.mrb[1].mxu1  ;;  %2186 = vmatmul.mubr.msk.f32.gmra.mrb[106].mxu1 %vm498_vm0, %v425_v14  ;;  %v807_v20 = vpop.f32.mrb[1].mxu0 }
 0x125   : > { %1073 = vmatprep.mubr.f32.mxu0 %v385_v15  ;;  %2188 = vmatprep.mubr.msk.f32.mxu1 %vm498_vm0, %v428_v16 }
 0x127   : > { %v2827_v25 = vpop.f32.mrb[2].mxu1  ;;  %v2829_v26 = vpop.f32.mrb[2].mxu0 }
 0x128   : > { %1074 = vmatmul.mubr.f32.gmra.mrb[108].mxu0 %v384_v21  ;;  %v1112_v27 = vpop.f32.mrb[3].mxu1  ;;  %2189 = vmatmul.mubr.msk.f32.gmra.mrb[108].mxu1 %vm498_vm0, %v431_v22  ;;  %v812_v28 = vpop.f32.mrb[3].mxu0 }
 0x129   : > { %1078 = vmatprep.mubr.f32.mxu0 %v388_v23  ;;  %2191 = vmatprep.mubr.msk.f32.mxu1 %vm498_vm0, %v434_v24 }
 0x12b   : > { %v2837_v33 = vpop.f32.mrb[4].mxu1  ;;  %v2839_v34 = vpop.f32.mrb[4].mxu0 }
 0x12c   : > { %1079 = vmatmul.mubr.f32.gmra.mrb[110].mxu0 %v387_v29  ;;  %v1117_v35 = vpop.f32.mrb[5].mxu1  ;;  %2192 = vmatmul.mubr.msk.f32.gmra.mrb[110].mxu1 %vm498_vm0, %v437_v30  ;;  %v817_v36 = vpop.f32.mrb[5].mxu0 }
 0x12d   : > { %1083 = vmatprep.mubr.f32.mxu0 %v391_v31  ;;  %2194 = vmatprep.mubr.msk.f32.mxu1 %vm498_vm0, %v440_v32 }
 0x12f   : > { %v2847_v41 = vpop.f32.mrb[6].mxu1  ;;  %v2849_v42 = vpop.f32.mrb[6].mxu0 }
 0x130   : > { %1084 = vmatmul.mubr.f32.gmra.mrb[112].mxu0 %v390_v37  ;;  %v1122_v43 = vpop.f32.mrb[7].mxu1  ;;  %2195 = vmatmul.mubr.msk.f32.gmra.mrb[112].mxu1 %vm498_vm0, %v443_v38  ;;  %v822_v44 = vpop.f32.mrb[7].mxu0 }
 0x131   : > { %1088 = vmatprep.mubr.f32.mxu0 %v394_v39  ;;  %2197 = vmatprep.mubr.msk.f32.mxu1 %vm498_vm0, %v446_v40 }
 0x133   : > { %v2857_v49 = vpop.f32.mrb[8].mxu1  ;;  %v2859_v50 = vpop.f32.mrb[8].mxu0 }
 0x134   : > { %1089 = vmatmul.mubr.f32.gmra.mrb[114].mxu0 %v393_v45  ;;  %v1127_v51 = vpop.f32.mrb[9].mxu1  ;;  %2198 = vmatmul.mubr.msk.f32.gmra.mrb[114].mxu1 %vm498_vm0, %v449_v46  ;;  %v827_v52 = vpop.f32.mrb[9].mxu0 }
 0x135   : > { %1093 = vmatprep.mubr.f32.mxu0 %v397_v47  ;;  %2200 = vmatprep.mubr.msk.f32.mxu1 %vm498_vm0, %v452_v48 }
 0x137   : > { %v2867_v57 = vpop.f32.mrb[10].mxu1  ;;  %v2869_v58 = vpop.f32.mrb[10].mxu0 }
 0x138   : > { %1094 = vmatmul.mubr.f32.gmra.mrb[116].mxu0 %v396_v53  ;;  %v1132_v59 = vpop.f32.mrb[11].mxu1  ;;  %2201 = vmatmul.mubr.msk.f32.gmra.mrb[116].mxu1 %vm498_vm0, %v455_v54  ;;  %v832_v60 = vpop.f32.mrb[11].mxu0 }
 0x139   : > { %1098 = vmatprep.mubr.f32.mxu0 %v400_v55  ;;  %2203 = vmatprep.mubr.msk.f32.mxu1 %vm498_vm0, %v458_v56 }
 0x13b   : > { %v2875_v63 = vpop.f32.mrb[12].mxu1  ;;  %v2877_v0 = vpop.f32.mrb[12].mxu0 }
 0x13c   : > { %1099 = vmatmul.mubr.f32.gmra.mrb[118].mxu0 %v399_v61  ;;  %v1137_v1 = vpop.f32.mrb[13].mxu1  ;;  %2204 = vmatmul.mubr.msk.f32.gmra.mrb[118].mxu1 %vm498_vm0, %v461_v62  ;;  %v837_v2 = vpop.f32.mrb[13].mxu0 }
 0x13f   : > { %v2880_v3 = vpop.f32.mrb[14].mxu1  ;;  %v2882_v4 = vpop.f32.mrb[14].mxu0 }
 0x140   : > { %v1142_v5 = vpop.f32.mrb[15].mxu1  ;;  %v842_v6 = vpop.f32.mrb[15].mxu0 }
 0x143   : > { %v2884_v7 = vpop.f32.mrb[16].mxu1  ;;  %v2886_v8 = vpop.f32.mrb[16].mxu0 }
 0x144   : > { %v1147_v9 = vpop.f32.mrb[17].mxu1  ;;  %v847_v10 = vpop.f32.mrb[17].mxu0 }
 0x147   : > { %v2888_v11 = vpop.f32.mrb[18].mxu1  ;;  %v2890_v12 = vpop.f32.mrb[18].mxu0 }
 0x148   : > { %v1152_v13 = vpop.f32.mrb[19].mxu1  ;;  %v852_v14 = vpop.f32.mrb[19].mxu0 }
 0x14b   : > { %v2892_v15 = vpop.f32.mrb[20].mxu1  ;;  %v2894_v16 = vpop.f32.mrb[20].mxu0 }
 0x14c   : > { %v1157_v19 = vpop.f32.mrb[21].mxu1  ;;  %v857_v20 = vpop.f32.mrb[21].mxu0 }
 0x14f   : > { %v2896_v21 = vpop.f32.mrb[22].mxu1  ;;  %v2898_v22 = vpop.f32.mrb[22].mxu0 }
 0x150   : > { %v1162_v23 = vpop.f32.mrb[23].mxu1  ;;  %v862_v24 = vpop.f32.mrb[23].mxu0 }
 0x153   : > { %v2900_v27 = vpop.f32.mrb[24].mxu1  ;;  %v2902_v28 = vpop.f32.mrb[24].mxu0 }
 0x154   : > { %3314 = vst [vmem:[#allocation2_spill] sm:$0xff] %v2900_v27  ;;  %v1167_v29 = vpop.f32.mrb[25].mxu1  ;;  %v867_v30 = vpop.f32.mrb[25].mxu0 }
 0x157   : > { %v2904_v31 = vpop.f32.mrb[26].mxu1  ;;  %v2906_v32 = vpop.f32.mrb[26].mxu0 }
 0x158   : > { %3315 = vst [vmem:[#allocation3_spill] sm:$0xff] %v2904_v31  ;;  %v1172_v35 = vpop.f32.mrb[27].mxu1  ;;  %v872_v36 = vpop.f32.mrb[27].mxu0 }
 0x15b   : > { %v2908_v37 = vpop.f32.mrb[28].mxu1  ;;  %v2910_v38 = vpop.f32.mrb[28].mxu0 }
 0x15c   : > { %3316 = vst [vmem:[#allocation4_spill] sm:$0xff] %v2908_v37  ;;  %v1177_v39 = vpop.f32.mrb[29].mxu1  ;;  %v877_v40 = vpop.f32.mrb[29].mxu0 }
 0x15f   : > { %v2912_v43 = vpop.f32.mrb[30].mxu1  ;;  %v2914_v44 = vpop.f32.mrb[30].mxu0 }
 0x160   : > { %3317 = vst [vmem:[#allocation5_spill] sm:$0xff] %v2912_v43  ;;  %v1182_v45 = vpop.f32.mrb[31].mxu1  ;;  %v882_v46 = vpop.f32.mrb[31].mxu0 }
 0x163   : > { %v2916_v47 = vpop.f32.mrb[32].mxu1  ;;  %v2918_v48 = vpop.f32.mrb[32].mxu0 }
 0x164   : > { %3318 = vst [vmem:[#allocation6_spill] sm:$0xff] %v2916_v47  ;;  %v1187_v51 = vpop.f32.mrb[33].mxu1  ;;  %v887_v52 = vpop.f32.mrb[33].mxu0 }
 0x167   : > { %v2920_v53 = vpop.f32.mrb[34].mxu1  ;;  %v890_v54 = vpop.f32.mrb[34].mxu0 }
 0x168   : > { %3319 = vst [vmem:[#allocation7_spill] sm:$0xff] %v2920_v53  ;;  %v1192_v55 = vpop.f32.mrb[35].mxu1  ;;  %v892_v56 = vpop.f32.mrb[35].mxu0 }
 0x16b   : > { %v2922_v59 = vpop.f32.mrb[36].mxu1  ;;  %v2924_v60 = vpop.f32.mrb[36].mxu0 }
 0x16c   : > { %3320 = vst [vmem:[#allocation8_spill] sm:$0xff] %v2922_v59  ;;  %v1197_v61 = vpop.f32.mrb[37].mxu1  ;;  %v897_v62 = vpop.f32.mrb[37].mxu0 }
 0x16f   : > { %v2926_v1 = vpop.f32.mrb[38].mxu1  ;;  %v900_v2 = vpop.f32.mrb[38].mxu0 }
 0x170   : > { %3321 = vst [vmem:[#allocation9_spill] sm:$0xff] %v2926_v1  ;;  %v1202_v5 = vpop.f32.mrb[39].mxu1  ;;  %v902_v6 = vpop.f32.mrb[39].mxu0 }
 0x173   : > { %v2088_v9 = vpop.f32.mrb[40].mxu1  ;;  %v2928_v10 = vpop.f32.mrb[40].mxu0 }
 0x174   : > { %v2931_v13 = vadd.f32 %v2088_v9, %v2829_v26  ;;  %v1270_v14 = vpop.f32.mrb[41].mxu1  ;;  %v907_v19 = vpop.f32.mrb[41].mxu0 }
 0x175   : > { %v2934_v20 = vadd.f32 %v1270_v14, %v2819_v18 }
 0x177   : > { %v2091_v23 = vpop.f32.mrb[42].mxu1  ;;  %v910_v24 = vpop.f32.mrb[42].mxu0 }
 0x178   : > { %v2937_v29 = vadd.f32 %v2091_v23, %v2849_v42  ;;  %v1280_v30 = vpop.f32.mrb[43].mxu1  ;;  %v912_v35 = vpop.f32.mrb[43].mxu0 }
 0x179   : > { %v2940_v36 = vadd.f32 %v1280_v30, %v2839_v34 }
 0x17b   : > { %v2094_v39 = vpop.f32.mrb[44].mxu1  ;;  %v915_v40 = vpop.f32.mrb[44].mxu0 }
 0x17c   : > { %v2943_v26 = vadd.f32 %v2094_v39, %v2869_v58  ;;  %v1290_v45 = vpop.f32.mrb[45].mxu1  ;;  %v917_v46 = vpop.f32.mrb[45].mxu0 }
 0x17d   : > { %v2946_v18 = vadd.f32 %v1290_v45, %v2859_v50 }
 0x17f   : > { %v2097_v51 = vpop.f32.mrb[46].mxu1  ;;  %v920_v52 = vpop.f32.mrb[46].mxu0 }
 0x180   : > { %v2949_v42 = vadd.f32 %v2097_v51, %v2882_v4  ;;  %v1300_v55 = vpop.f32.mrb[47].mxu1  ;;  %v922_v56 = vpop.f32.mrb[47].mxu0 }
 0x181   : > { %v2952_v34 = vadd.f32 %v1300_v55, %v2877_v0 }
 0x183   : > { %v2100_v61 = vpop.f32.mrb[48].mxu1  ;;  %v925_v62 = vpop.f32.mrb[48].mxu0 }
 0x184   : > { %v2955_v58 = vadd.f32 %v2100_v61, %v2890_v12  ;;  %v1310_v5 = vpop.f32.mrb[49].mxu1  ;;  %v927_v6 = vpop.f32.mrb[49].mxu0 }
 0x185   : > { %v2958_v50 = vadd.f32 %v1310_v5, %v2886_v8 }
 0x187   : > { %v2103_v9 = vpop.f32.mrb[50].mxu1  ;;  %v930_v14 = vpop.f32.mrb[50].mxu0 }
 0x188   : > { %v2961_v4 = vadd.f32 %v2103_v9, %v2898_v22  ;;  %v1320_v19 = vpop.f32.mrb[51].mxu1  ;;  %v932_v23 = vpop.f32.mrb[51].mxu0 }
 0x189   : > { %v2964_v0 = vadd.f32 %v1320_v19, %v2894_v16 }
 0x18b   : > { %3322 = vst [vmem:[#allocation10_spill] sm:$0xff] %v2964_v0  ;;  %v2106_v30 = vpop.f32.mrb[52].mxu1  ;;  %v935_v35 = vpop.f32.mrb[52].mxu0 }
 0x18c   : > { %v2967_v12 = vadd.f32 %v2106_v30, %v2906_v32  ;;  %v1330_v39 = vpop.f32.mrb[53].mxu1  ;;  %v937_v45 = vpop.f32.mrb[53].mxu0 }
 0x18d   : > { %v2970_v8 = vadd.f32 %v1330_v39, %v2902_v28 }
 0x18e   : > { %3323 = vst [vmem:[#allocation11_spill] sm:$0xff] %v2967_v12 }
 0x18f   : > { %3324 = vst [vmem:[#allocation12_spill] sm:$0xff] %v2970_v8  ;;  %v2109_v46 = vpop.f32.mrb[54].mxu1  ;;  %v940_v51 = vpop.f32.mrb[54].mxu0 }
 0x190   : > { %v2973_v22 = vadd.f32 %v2109_v46, %v2914_v44  ;;  %v1340_v55 = vpop.f32.mrb[55].mxu1  ;;  %v942_v56 = vpop.f32.mrb[55].mxu0 }
 0x191   : > { %v2976_v16 = vadd.f32 %v1340_v55, %v2910_v38 }
 0x192   : > { %3325 = vst [vmem:[#allocation13_spill] sm:$0xff] %v2973_v22 }
 0x193   : > { %3326 = vst [vmem:[#allocation14_spill] sm:$0xff] %v2976_v16  ;;  %v2112_v61 = vpop.f32.mrb[56].mxu1  ;;  %v945_v5 = vpop.f32.mrb[56].mxu0 }
 0x194   : > { %v2978_v6 = vadd.f32 %v2112_v61, %v890_v54  ;;  %v1350_v32 = vpop.f32.mrb[57].mxu1  ;;  %v947_v9 = vpop.f32.mrb[57].mxu0 }
 0x195   : > { %v2981_v19 = vadd.f32 %v1350_v32, %v2918_v48 }
 0x196   : > { %3327 = vst [vmem:[#allocation15_spill] sm:$0xff] %v2978_v6 }
 0x197   : > { %3328 = vst [vmem:[#allocation16_spill] sm:$0xff] %v2981_v19  ;;  %v2115_v28 = vpop.f32.mrb[58].mxu1  ;;  %v950_v23 = vpop.f32.mrb[58].mxu0 }
 0x198   : > { %v2983_v30 = vadd.f32 %v2115_v28, %v900_v2  ;;  %v1360_v44 = vpop.f32.mrb[59].mxu1  ;;  %v952_v39 = vpop.f32.mrb[59].mxu0 }
 0x199   : > { %v2986_v45 = vadd.f32 %v1360_v44, %v2924_v60 }
 0x19a   : > { %3329 = vst [vmem:[#allocation17_spill] sm:$0xff] %v2983_v30 }
 0x19b   : > { %3330 = vst [vmem:[#allocation18_spill] sm:$0xff] %v2986_v45  ;;  %v2118_v38 = vpop.f32.mrb[60].mxu1  ;;  %v955_v46 = vpop.f32.mrb[60].mxu0 }
 0x19c   : > { %v2988_v55 = vadd.f32 %v2118_v38, %v910_v24  ;;  %v1370_v54 = vpop.f32.mrb[61].mxu1  ;;  %v957_v56 = vpop.f32.mrb[61].mxu0 }
 0x19d   : > { %v2991_v61 = vadd.f32 %v1370_v54, %v2928_v10 }
 0x19f   : > { %v2121_v32 = vpop.f32.mrb[62].mxu1  ;;  %v960_v9 = vpop.f32.mrb[62].mxu0 }
 0x1a0   : > { %v2997_v28 = vadd.f32 %v2121_v32, %v920_v52  ;;  %v1380_v60 = vpop.f32.mrb[63].mxu1  ;;  %v962_v44 = vpop.f32.mrb[63].mxu0 }
 0x1a1   : > { %v2999_v39 = vadd.f32 %v1380_v60, %v915_v40 }
 0x1a3   : > { %v2124_v38 = vpop.f32.mrb[64].mxu1  ;;  %v965_v54 = vpop.f32.mrb[64].mxu0 }
 0x1a4   : > { %v3005_v56 = vadd.f32 %v2124_v38, %v930_v14  ;;  %v1390_v48 = vpop.f32.mrb[65].mxu1  ;;  %v967_v2 = vpop.f32.mrb[65].mxu0 }
 0x1a5   : > { %v3007_v59 = vadd.f32 %v1390_v48, %v925_v62 }
 0x1a7   : > { %v2127_v32 = vpop.f32.mrb[66].mxu1  ;;  %v970_v60 = vpop.f32.mrb[66].mxu0 }
 0x1a8   : > { %v3013_v44 = vadd.f32 %v2127_v32, %v940_v51  ;;  %v1400_v24 = vpop.f32.mrb[67].mxu1  ;;  %v972_v10 = vpop.f32.mrb[67].mxu0 }
 0x1a9   : > { %v3015_v1 = vadd.f32 %v1400_v24, %v935_v35 }
 0x1ab   : > { %v2130_v48 = vpop.f32.mrb[68].mxu1  ;;  %v975_v2 = vpop.f32.mrb[68].mxu0 }
 0x1ac   : > { %v3021_v38 = vadd.f32 %v2130_v48, %v950_v23  ;;  %v1410_v52 = vpop.f32.mrb[69].mxu1  ;;  %v977_v40 = vpop.f32.mrb[69].mxu0 }
 0x1ad   : > { %v3023_v47 = vadd.f32 %v1410_v52, %v945_v5 }
 0x1af   : > { %v2133_v24 = vpop.f32.mrb[70].mxu1  ;;  %v980_v10 = vpop.f32.mrb[70].mxu0 }
 0x1b0   : > { %v3029_v32 = vadd.f32 %v2133_v24, %v960_v9  ;;  %v1420_v14 = vpop.f32.mrb[71].mxu1  ;;  %v982_v62 = vpop.f32.mrb[71].mxu0 }
 0x1b1   : > { %v3031_v53 = vadd.f32 %v1420_v14, %v955_v46 }
 0x1b3   : > { %3331 = vst [vmem:[#allocation19_spill] sm:$0xff] %v3031_v53  ;;  %v2136_v52 = vpop.f32.mrb[72].mxu1  ;;  %v985_v40 = vpop.f32.mrb[72].mxu0 }
 0x1b4   : > { %v3037_v48 = vadd.f32 %v2136_v52, %v970_v60  ;;  %v1430_v51 = vpop.f32.mrb[73].mxu1  ;;  %v987_v35 = vpop.f32.mrb[73].mxu0 }
 0x1b5   : > { %v3039_v37 = vadd.f32 %v1430_v51, %v965_v54 }
 0x1b6   : > { %3332 = vst [vmem:[#allocation20_spill] sm:$0xff] %v3037_v48 }
 0x1b7   : > { %3333 = vst [vmem:[#allocation21_spill] sm:$0xff] %v3039_v37  ;;  %v2139_v14 = vpop.f32.mrb[74].mxu1  ;;  %v990_v62 = vpop.f32.mrb[74].mxu0 }
 0x1b8   : > { %v3045_v24 = vadd.f32 %v2139_v14, %v980_v10  ;;  %v1440_v23 = vpop.f32.mrb[75].mxu1  ;;  %v992_v5 = vpop.f32.mrb[75].mxu0 }
 0x1b9   : > { %v3047_v43 = vadd.f32 %v1440_v23, %v975_v2 }
 0x1ba   : > { %3334 = vst [vmem:[#allocation22_spill] sm:$0xff] %v3045_v24 }
 0x1bb   : > { %3335 = vst [vmem:[#allocation23_spill] sm:$0xff] %v3047_v43  ;;  %v2142_v51 = vpop.f32.mrb[76].mxu1  ;;  %v995_v35 = vpop.f32.mrb[76].mxu0 }
 0x1bc   : > { %v3053_v52 = vadd.f32 %v2142_v51, %v990_v62  ;;  %v1450_v9 = vpop.f32.mrb[77].mxu1  ;;  %v997_v46 = vpop.f32.mrb[77].mxu0 }
 0x1bd   : > { %v3055_v37 = vadd.f32 %v1450_v9, %v985_v40 }
 0x1be   : > { %3336 = vst [vmem:[#allocation24_spill] sm:$0xff] %v3053_v52 }
 0x1bf   : > { %3337 = vst [vmem:[#allocation25_spill] sm:$0xff] %v3055_v37  ;;  %v1000_v23 = vpop.f32.mrb[78].mxu0  ;;  %v2145_v5 = vpop.f32.mrb[78].mxu1 }
 0x1c0   : > { %v3061_v14 = vadd.f32 %v2145_v5, %v1000_v23  ;;  %v1460_v60 = vpop.f32.mrb[79].mxu1  ;;  %v1002_v54 = vpop.f32.mrb[79].mxu0 }
 0x1c1   : > { %v3063_v43 = vadd.f32 %v1460_v60, %v995_v35 }
 0x1c2   : > { %3338 = vst [vmem:[#allocation26_spill] sm:$0xff] %v3061_v14 }
 0x1c3   : > { %3339 = vst [vmem:[#allocation27_spill] sm:$0xff] %v3063_v43  ;;  %v2148_v9 = vpop.f32.mrb[80].mxu1  ;;  %v1005_v46 = vpop.f32.mrb[80].mxu0 }
 0x1c4   : > { %v1470_v51 = vpop.f32.mrb[81].mxu1  ;;  %v1007_v10 = vpop.f32.mrb[81].mxu0 }
 0x1c5   : > { %v3069_v52 = vadd.f32 %v1470_v51, %v1005_v46 }
 0x1c7   : > { %v1010_v2 = vpop.f32.mrb[82].mxu0  ;;  %v2151_v37 = vpop.f32.mrb[82].mxu1 }
 0x1c8   : > { %v1476_v23 = vadd.f32 %v2148_v9, %v1010_v2  ;;  %v1480_v5 = vpop.f32.mrb[83].mxu1  ;;  %v1012_v19 = vpop.f32.mrb[83].mxu0 }
 0x1cb   : > { %v1015_v54 = vpop.f32.mrb[84].mxu0  ;;  %v2154_v60 = vpop.f32.mrb[84].mxu1 }
 0x1cc   : > { %v3071_v35 = vadd.f32 %v1480_v5, %v1015_v54  ;;  %v1490_v6 = vpop.f32.mrb[85].mxu1  ;;  %v1017_v62 = vpop.f32.mrb[85].mxu0 }
 0x1cf   : > { %v1020_v14 = vpop.f32.mrb[86].mxu0  ;;  %v2157_v30 = vpop.f32.mrb[86].mxu1 }
 0x1d0   : > { %v3073_v40 = vadd.f32 %v2151_v37, %v1020_v14  ;;  %v1500_v43 = vpop.f32.mrb[87].mxu1  ;;  %v1022_v45 = vpop.f32.mrb[87].mxu0 }
 0x1d3   : > { %v1025_v10 = vpop.f32.mrb[88].mxu0  ;;  %v2160_v46 = vpop.f32.mrb[88].mxu1 }
 0x1d4   : > { %v3075_v51 = vadd.f32 %v1490_v6, %v1025_v10  ;;  %v1510_v16 = vpop.f32.mrb[89].mxu1  ;;  %v1027_v2 = vpop.f32.mrb[89].mxu0 }
 0x1d7   : > { %v1030_v9 = vpop.f32.mrb[90].mxu0  ;;  %v2163_v19 = vpop.f32.mrb[90].mxu1 }
 0x1d8   : > { %v3077_v24 = vadd.f32 %v2154_v60, %v1030_v9  ;;  %v1520_v5 = vpop.f32.mrb[91].mxu1  ;;  %v1032_v54 = vpop.f32.mrb[91].mxu0 }
 0x1db   : > { %v1035_v22 = vpop.f32.mrb[92].mxu0  ;;  %v3079_v62 = vpop.f32.mrb[92].mxu1 }
 0x1dc   : > { %v3081_v8 = vadd.f32 %v1500_v43, %v1035_v22  ;;  %v1530_v37 = vpop.f32.mrb[93].mxu1  ;;  %v1037_v14 = vpop.f32.mrb[93].mxu0 }
 0x1df   : > { %v1040_v45 = vpop.f32.mrb[94].mxu0  ;;  %v3083_v48 = vpop.f32.mrb[94].mxu1 }
 0x1e0   : > { %v3085_v6 = vadd.f32 %v2157_v30, %v1040_v45  ;;  %v3087_v10 = vpop.f32.mrb[95].mxu1  ;;  %v1042_v2 = vpop.f32.mrb[95].mxu0 }
 0x1e3   : > { %v1045_v12 = vpop.f32.mrb[96].mxu0  ;;  %v3089_v60 = vpop.f32.mrb[96].mxu1 }
 0x1e4   : > { %3340 = vst [vmem:[#allocation28_spill] sm:$0xff] %v3089_v60  ;;  %v3091_v9 = vadd.f32 %v1510_v16, %v1045_v12  ;;  %v3093_v54 = vpop.f32.mrb[97].mxu1  ;;  %v1047_v43 = vpop.f32.mrb[97].mxu0 }
 0x1e5   : > { %3341 = vst [vmem:[#allocation29_spill] sm:$0xff] %v3093_v54 }
 0x1e7   : > { %v1050_v22 = vpop.f32.mrb[98].mxu0  ;;  %v3095_v27 = vpop.f32.mrb[98].mxu1 }
 0x1e8   : > { %v3097_v14 = vadd.f32 %v2160_v46, %v1050_v22  ;;  %v3099_v53 = vpop.f32.mrb[99].mxu1  ;;  %v1052_v30 = vpop.f32.mrb[99].mxu0  ;;  %v3109_v46 = vld [vmem:[%s3294_s2] ss:$0 sm:$0xff] }
 0x1eb   : > { %v1055_v45 = vpop.f32.mrb[100].mxu0  ;;  %v2178_v0 = vpop.f32.mrb[100].mxu1 }
 0x1ec   : > { %v3101_v2 = vadd.f32 %v1520_v5, %v1055_v45  ;;  %v1576_v60 = vadd.f32 %v2178_v0, %v2827_v25  ;;  %v1570_v12 = vpop.f32.mrb[101].mxu1  ;;  %v1057_v16 = vpop.f32.mrb[101].mxu0  ;;  %v3342_v5 = vmax.f32 %v2931_v13, %v2988_v55 }
 0x1ed   : > { %v1571_v31 = vadd.f32 %v1570_v12, %v2817_v17 }
 0x1ee   : > { %v1690_v54 = vmax.f32 %v1476_v23, %v1576_v60  ;;  %v3343_v60 = vmax.f32 %v2934_v20, %v2991_v61 }
 0x1ef   : > { %v1689_v43 = vmax.f32 %v3069_v52, %v1571_v31  ;;  %v1060_v22 = vpop.f32.mrb[102].mxu0  ;;  %v2181_v30 = vpop.f32.mrb[102].mxu1 }
 0x1f0   : > { %v1710_v45 = vmax.f32 %v3342_v5, %v1690_v54  ;;  %v3115_v25 = vadd.f32 %v2163_v19, %v1060_v22  ;;  %v1586_v0 = vadd.f32 %v2181_v30, %v2847_v41  ;;  %v1580_v17 = vpop.f32.mrb[103].mxu1  ;;  %v1062_v23 = vpop.f32.mrb[103].mxu0  ;;  %v3345_v5 = vmax.f32 %v2940_v36, %v2999_v39 }
 0x1f1   : > { %v1709_v12 = vmax.f32 %v3343_v60, %v1689_v43  ;;  %v1581_v16 = vadd.f32 %v1580_v17, %v2837_v33  ;;  %v3344_v33 = vmax.f32 %v2937_v29, %v2997_v28 }
 0x1f2   : > { %v1737_v31 = vadd.f32 %v3109_v46, %v1710_v45  ;;  %v1692_v52 = vmax.f32 %v3073_v40, %v1586_v0 }
 0x1f3   : > { %v1736_v41 = vadd.f32 %v3109_v46, %v1709_v12  ;;  %v1691_v13 = vmax.f32 %v3071_v35, %v1581_v16  ;;  %v1065_v20 = vpop.f32.mrb[104].mxu0  ;;  %v2184_v55 = vpop.f32.mrb[104].mxu1 }
 0x1f4   : > { %v1757_v61 = vmax.f32 %v1737_v31, 0.0  ;;  %v1712_v19 = vmax.f32 %v3344_v33, %v1692_v52  ;;  %v3134_v40 = vadd.f32 %v1530_v37, %v1065_v20  ;;  %v1596_v54 = vadd.f32 %v2184_v55, %v2867_v57  ;;  %v1590_v43 = vpop.f32.mrb[105].mxu1  ;;  %v1067_v22 = vpop.f32.mrb[105].mxu0 }
 0x1f5   : > { %v1756_v30 = vmax.f32 %v1736_v41, 0.0  ;;  %v1711_v45 = vmax.f32 %v3345_v5, %v1691_v13  ;;  %v1591_v35 = vadd.f32 %v1590_v43, %v2857_v49  ;;  %v3346_v49 = vmax.f32 %v2943_v26, %v3005_v56 }
 0x1f6   : > { %1778 = vst.msk [vmem:[%s3127_s28 + $0x8] sm:$0xff] %vm1776_vm1, %v1757_v61  ;;  %v1739_v0 = vadd.f32 %v3109_v46, %v1712_v19  ;;  %v1694_v29 = vmax.f32 %v3077_v24, %v1596_v54  ;;  %v3347_v31 = vmax.f32 %v2946_v18, %v3007_v59  ;;  %v3349_v19 = vmax.f32 %v2952_v34, %v3015_v1 }
 0x1f7   : > { %1777 = vst.msk [vmem:[%s3127_s28] sm:$0xff] %vm1776_vm1, %v1756_v30  ;;  %v1738_v57 = vadd.f32 %v3109_v46, %v1711_v45  ;;  %v1693_v28 = vmax.f32 %v3075_v51, %v1591_v35  ;;  %v1070_v37 = vpop.f32.mrb[106].mxu0  ;;  %v2187_v17 = vpop.f32.mrb[106].mxu1 }
 0x1f8   : > { %v1759_v36 = vmax.f32 %v1739_v0, 0.0  ;;  %v1714_v39 = vmax.f32 %v3346_v49, %v1694_v29  ;;  %v3153_v23 = vadd.f32 %v3079_v62, %v1070_v37  ;;  %v1606_v60 = vadd.f32 %v2187_v17, %v2880_v3  ;;  %v1600_v24 = vpop.f32.mrb[107].mxu1  ;;  %v1072_v12 = vpop.f32.mrb[107].mxu0  ;;  %v3353_v37 = vld [vmem:[#allocation29_spill] sm:$0xff] }
 0x1f9   : > { %v1758_v16 = vmax.f32 %v1738_v57, 0.0  ;;  %v1713_v52 = vmax.f32 %v3347_v31, %v1693_v28  ;;  %v1601_v51 = vadd.f32 %v1600_v24, %v2875_v63  ;;  %v3348_v63 = vmax.f32 %v2949_v42, %v3013_v44  ;;  %v3355_v24 = vld [vmem:[#allocation10_spill] sm:$0xff]  ;;  %v3356_v12 = vld [vmem:[#allocation19_spill] sm:$0xff] }
 0x1fa   : > { %1780 = vst.msk [vmem:[%s3127_s28 + $0x18] sm:$0xff] %vm1776_vm1, %v1759_v36  ;;  %v1741_v41 = vadd.f32 %v3109_v46, %v1714_v39  ;;  %v1696_v26 = vmax.f32 %v3085_v6, %v1606_v60  ;;  %v3351_v0 = vmax.f32 %v2958_v50, %v3023_v47  ;;  %v3354_v36 = vld [vmem:[#allocation3_spill] sm:$0xff] }
 0x1fb   : > { %1779 = vst.msk [vmem:[%s3127_s28 + $0x10] sm:$0xff] %vm1776_vm1, %v1758_v16  ;;  %v1740_v3 = vadd.f32 %v3109_v46, %v1713_v52  ;;  %v1695_v56 = vmax.f32 %v3081_v8, %v1601_v51  ;;  %v1075_v62 = vpop.f32.mrb[108].mxu0  ;;  %v2190_v13 = vpop.f32.mrb[108].mxu1  ;;  %v3357_v16 = vmax.f32 %v3355_v24, %v3356_v12  ;;  %v3358_v52 = vld [vmem:[#allocation2_spill] sm:$0xff]  ;;  %v3377_v24 = vld [vmem:[#allocation24_spill] sm:$0xff] }
 0x1fc   : > { %v1761_v59 = vmax.f32 %v1741_v41, 0.0  ;;  %v1716_v18 = vmax.f32 %v3348_v63, %v1696_v26  ;;  %v3172_v20 = vadd.f32 %v3087_v10, %v1075_v62  ;;  %v1616_v55 = vadd.f32 %v2190_v13, %v2888_v11  ;;  %v1610_v6 = vpop.f32.mrb[109].mxu1  ;;  %v1077_v61 = vpop.f32.mrb[109].mxu0  ;;  %v3359_v62 = vld [vmem:[#allocation11_spill] sm:$0xff]  ;;  %v3360_v13 = vld [vmem:[#allocation20_spill] sm:$0xff] }
 0x1fd   : > { %v1760_v33 = vmax.f32 %v1740_v3, 0.0  ;;  %v1715_v54 = vmax.f32 %v3349_v19, %v1695_v56  ;;  %v1611_v8 = vadd.f32 %v1610_v6, %v2884_v7  ;;  %v3350_v7 = vmax.f32 %v2955_v58, %v3021_v38  ;;  %v3363_v6 = vld [vmem:[#allocation5_spill] sm:$0xff] }
 0x1fe   : > { %1782 = vst.msk [vmem:[%s3127_s28 + $0x28] sm:$0xff] %vm1776_vm1, %v1761_v59  ;;  %v1743_v43 = vadd.f32 %v3109_v46, %v1716_v18  ;;  %v1698_v42 = vmax.f32 %v3097_v14, %v1616_v55  ;;  %v3361_v59 = vmax.f32 %v3359_v62, %v3360_v13  ;;  %v3362_v18 = vld [vmem:[#allocation28_spill] sm:$0xff] }
 0x1ff   : > { %1781 = vst.msk [vmem:[%s3127_s28 + $0x20] sm:$0xff] %vm1776_vm1, %v1760_v33  ;;  %v1742_v11 = vadd.f32 %v3109_v46, %v1715_v54  ;;  %v1697_v44 = vmax.f32 %v3091_v9, %v1611_v8  ;;  %v1080_v10 = vpop.f32.mrb[110].mxu0  ;;  %v2193_v22 = vpop.f32.mrb[110].mxu1  ;;  %v3364_v54 = vld [vmem:[#allocation12_spill] sm:$0xff]  ;;  %v3365_v8 = vld [vmem:[#allocation21_spill] sm:$0xff] }
 0x200   : > { %v1763_v1 = vmax.f32 %v1743_v43, 0.0  ;;  %v1718_v34 = vmax.f32 %v3350_v7, %v1698_v42  ;;  %v1546_v30 = vadd.f32 %v3083_v48, %v1080_v10  ;;  %v1626_v5 = vadd.f32 %v2193_v22, %v2896_v21  ;;  %v1620_v45 = vpop.f32.mrb[111].mxu1  ;;  %v1082_v14 = vpop.f32.mrb[111].mxu0 }
 0x201   : > { %v1762_v35 = vmax.f32 %v1742_v11, 0.0  ;;  %v1717_v29 = vmax.f32 %v3351_v0, %v1697_v44  ;;  %v1621_v9 = vadd.f32 %v1620_v45, %v2892_v15  ;;  %v3352_v15 = vmax.f32 %v2961_v4, %v3029_v32  ;;  %v3367_v11 = vld [vmem:[#allocation4_spill] sm:$0xff]  ;;  %v3368_v45 = vld [vmem:[#allocation13_spill] sm:$0xff]  ;;  %v3369_v14 = vld [vmem:[#allocation22_spill] sm:$0xff] }
 0x202   : > { %1784 = vst.msk [vmem:[%s3127_s28 + $0x38] sm:$0xff] %vm1776_vm1, %v1763_v1  ;;  %v1745_v57 = vadd.f32 %v3109_v46, %v1718_v34  ;;  %v1700_v58 = vmax.f32 %v3115_v25, %v1626_v5  ;;  %v3366_v43 = vmax.f32 %v3364_v54, %v3365_v8  ;;  %v3388_v54 = vld [vmem:[#allocation27_spill] sm:$0xff] }
 0x203   : > { %1783 = vst.msk [vmem:[%s3127_s28 + $0x30] sm:$0xff] %vm1776_vm1, %v1762_v35  ;;  %v1744_v21 = vadd.f32 %v3109_v46, %v1717_v29  ;;  %v1699_v38 = vmax.f32 %v3101_v2, %v1621_v9  ;;  %v1085_v48 = vpop.f32.mrb[112].mxu0  ;;  %v2196_v28 = vpop.f32.mrb[112].mxu1  ;;  %v3370_v35 = vmax.f32 %v3368_v45, %v3369_v14  ;;  %v3371_v9 = vld [vmem:[#allocation7_spill] sm:$0xff] }
 0x204   : > { %v1765_v47 = vmax.f32 %v1745_v57, 0.0  ;;  %v1720_v50 = vmax.f32 %v3352_v15, %v1700_v58  ;;  %v1551_v17 = vadd.f32 %v3353_v37, %v1085_v48  ;;  %v1636_v49 = vadd.f32 %v2196_v28, %v3354_v36  ;;  %v1630_v39 = vpop.f32.mrb[113].mxu1  ;;  %v1087_v25 = vpop.f32.mrb[113].mxu0  ;;  %v3373_v48 = vld [vmem:[#allocation23_spill] sm:$0xff]  ;;  %v3375_v15 = vld [vmem:[#allocation6_spill] sm:$0xff] }
 0x205   : > { %v1764_v60 = vmax.f32 %v1744_v21, 0.0  ;;  %v1719_v31 = vmax.f32 %v3357_v16, %v1699_v38  ;;  %v1631_v2 = vadd.f32 %v1630_v39, %v3358_v52  ;;  %v3372_v38 = vld [vmem:[#allocation14_spill] sm:$0xff]  ;;  %v3379_v52 = vld [vmem:[#allocation9_spill] sm:$0xff] }
 0x206   : > { %1786 = vst.msk [vmem:[%s3127_s28 + $0x48] sm:$0xff] %vm1776_vm1, %v1765_v47  ;;  %v1747_v51 = vadd.f32 %v3109_v46, %v1720_v50  ;;  %v1702_v4 = vmax.f32 %v3153_v23, %v1636_v49  ;;  %v3374_v28 = vmax.f32 %v3372_v38, %v3373_v48 }
 0x207   : > { %1785 = vst.msk [vmem:[%s3127_s28 + $0x40] sm:$0xff] %vm1776_vm1, %v1764_v60  ;;  %v1746_v32 = vadd.f32 %v3109_v46, %v1719_v31  ;;  %v1701_v41 = vmax.f32 %v3134_v40, %v1631_v2  ;;  %v1090_v26 = vpop.f32.mrb[114].mxu0  ;;  %v2199_v3 = vpop.f32.mrb[114].mxu1  ;;  %v3376_v60 = vld [vmem:[#allocation15_spill] sm:$0xff] }
 0x208   : > { %v1767_v56 = vmax.f32 %v1747_v51, 0.0  ;;  %v1722_v63 = vmax.f32 %v3361_v59, %v1702_v4  ;;  %v1556_v55 = vadd.f32 %v3362_v18, %v1090_v26  ;;  %v1646_v61 = vadd.f32 %v2199_v3, %v3363_v6  ;;  %v1640_v33 = vpop.f32.mrb[115].mxu1  ;;  %v1092_v23 = vpop.f32.mrb[115].mxu0  ;;  %v3381_v26 = vld [vmem:[#allocation25_spill] sm:$0xff]  ;;  %v3385_v6 = vld [vmem:[#allocation26_spill] sm:$0xff] }
 0x209   : > { %v1766_v19 = vmax.f32 %v1746_v32, 0.0  ;;  %v1721_v42 = vmax.f32 %v3366_v43, %v1701_v41  ;;  %v1641_v40 = vadd.f32 %v1640_v33, %v3367_v11  ;;  %v3378_v12 = vmax.f32 %v3376_v60, %v3377_v24  ;;  %v3380_v41 = vld [vmem:[#allocation16_spill] sm:$0xff] }
 0x20a   : > { %1788 = vst.msk [vmem:[%s3127_s28 + $0x58] sm:$0xff] %vm1776_vm1, %v1767_v56  ;;  %v1749_v44 = vadd.f32 %v3109_v46, %v1722_v63  ;;  %v1704_v10 = vmax.f32 %v1546_v30, %v1646_v61  ;;  %v3382_v3 = vmax.f32 %v3380_v41, %v3381_v26  ;;  %v3383_v56 = vld [vmem:[#allocation8_spill] sm:$0xff] }
 0x20b   : > { %1787 = vst.msk [vmem:[%s3127_s28 + $0x50] sm:$0xff] %vm1776_vm1, %v1766_v19  ;;  %v1748_v22 = vadd.f32 %v3109_v46, %v1721_v42  ;;  %v1703_v1 = vmax.f32 %v3172_v20, %v1641_v40  ;;  %v1095_v7 = vpop.f32.mrb[116].mxu0  ;;  %v2202_v34 = vpop.f32.mrb[116].mxu1  ;;  %v3387_v19 = vld [vmem:[#allocation18_spill] sm:$0xff] }
 0x20c   : > { %v1769_v5 = vmax.f32 %v1749_v44, 0.0  ;;  %v1724_v0 = vmax.f32 %v3370_v35, %v1704_v10  ;;  %v1561_v29 = vadd.f32 %v3099_v53, %v1095_v7  ;;  %v1656_v57 = vadd.f32 %v2202_v34, %v3371_v9  ;;  %v1650_v58 = vpop.f32.mrb[117].mxu1  ;;  %v1097_v30 = vpop.f32.mrb[117].mxu0 }
 0x20d   : > { %v1768_v21 = vmax.f32 %v1748_v22, 0.0  ;;  %v1723_v47 = vmax.f32 %v3374_v28, %v1703_v1  ;;  %v1651_v20 = vadd.f32 %v1650_v58, %v3375_v15  ;;  %v3389_v8 = vmax.f32 %v3387_v19, %v3388_v54 }
 0x20e   : > { %1790 = vst.msk [vmem:[%s3127_s28 + $0x68] sm:$0xff] %vm1776_vm1, %v1769_v5  ;;  %v1751_v50 = vadd.f32 %v3109_v46, %v1724_v0  ;;  %v1706_v37 = vmax.f32 %v1556_v55, %v1656_v57  ;;  %v3384_v55 = vld [vmem:[#allocation17_spill] sm:$0xff] }
 0x20f   : > { %1789 = vst.msk [vmem:[%s3127_s28 + $0x60] sm:$0xff] %vm1776_vm1, %v1768_v21  ;;  %v1750_v53 = vadd.f32 %v3109_v46, %v1723_v47  ;;  %v1705_v36 = vmax.f32 %v1551_v17, %v1651_v20  ;;  %v1100_v49 = vpop.f32.mrb[118].mxu0  ;;  %v2205_v39 = vpop.f32.mrb[118].mxu1  ;;  %v3386_v61 = vmax.f32 %v3384_v55, %v3385_v6 }
 0x210   : > { %v1771_v25 = vmax.f32 %v1751_v50, 0.0  ;;  %v1726_v16 = vmax.f32 %v3378_v12, %v1706_v37  ;;  %v1566_v31 = vadd.f32 %v3095_v27, %v1100_v49  ;;  %v1666_v2 = vadd.f32 %v2205_v39, %v3379_v52  ;;  %v1660_v51 = vpop.f32.mrb[119].mxu1  ;;  %v1102_v4 = vpop.f32.mrb[119].mxu0 }
 0x211   : > { %v1770_v32 = vmax.f32 %v1750_v53, 0.0  ;;  %v1725_v17 = vmax.f32 %v3382_v3, %v1705_v36  ;;  %v1661_v62 = vadd.f32 %v1660_v51, %v3383_v56 }
 0x212   : > { %1792 = vst.msk [vmem:[%s3127_s28 + $0x78] sm:$0xff] %vm1776_vm1, %v1771_v25  ;;  %v1753_v13 = vadd.f32 %v3109_v46, %v1726_v16  ;;  %v1708_v27 = vmax.f32 %v1566_v31, %v1666_v2 }
 0x213   : > { %1791 = vst.msk [vmem:[%s3127_s28 + $0x70] sm:$0xff] %vm1776_vm1, %v1770_v32  ;;  %v1752_v59 = vadd.f32 %v3109_v46, %v1725_v17  ;;  %v1707_v63 = vmax.f32 %v1561_v29, %v1661_v62 }
 0x214   : > { %v1773_v18 = vmax.f32 %v1753_v13, 0.0  ;;  %v1728_v33 = vmax.f32 %v3386_v61, %v1708_v27 }
 0x215   : > { %v1772_v23 = vmax.f32 %v1752_v59, 0.0  ;;  %v1727_v43 = vmax.f32 %v3389_v8, %v1707_v63 }
 0x216   : > { %1794 = vst.msk [vmem:[%s3127_s28 + $0x88] sm:$0xff] %vm1776_vm1, %v1773_v18  ;;  %v1755_v42 = vadd.f32 %v3109_v46, %v1728_v33 }
 0x217   : > { %1793 = vst.msk [vmem:[%s3127_s28 + $0x80] sm:$0xff] %vm1776_vm1, %v1772_v23  ;;  %v1754_v11 = vadd.f32 %v3109_v46, %v1727_v43 }
 0x218   : > { %v1775_v40 = vmax.f32 %v1755_v42, 0.0 }
 0x219   : > { %v1774_v44 = vmax.f32 %v1754_v11, 0.0 }
 0x21a   : > { %1796 = vst.msk [vmem:[%s3127_s28 + $0x98] sm:$0xff] %vm1776_vm1, %v1775_v40 }
 0x21b   : > { %1795 = vst.msk [vmem:[%s3127_s28 + $0x90] sm:$0xff] %vm1776_vm1, %v1774_v44 }
 0x21c PF: > { %s13_s14 = sadd.s32 1, %s2343_s14   ;;  %s3390_s12 = smov %s2339_s13 }
 0x21d   : > { %p10_p5 = scmp.ge.s32.totalorder %s13_s14, 4   ;;  %s3391_s13 = smov %s3393_s15 }
 0x21f   :  { %12 = sbr.rel (!%p10_p5) target bundleno = 2 (0x2), region = 68 }

// kernel: voice_auth_cnn_forward.7
= control target key start
LH: loop header
LB: loop body
LE: loop exit
PB: predicated region body
PF: predicated region fallthrough
CT: control target
= control target key end

     0   :  { %s1405_s12 = smov 0   ;;  %s1407_s13 = smov 0   ;;  %s1789_s0 = inlined_call_operand.vmem [shape: f32[2,128,576], index: 0, kind: input, shape index: {}]   ;;  %s1790_s1 = inlined_call_operand.vmem [shape: f32[576,128], index: 1, kind: input, shape index: {}]   ;;  %s1791_s2 = inlined_call_operand.vmem [shape: f32[1,128], index: 2, kind: input, shape index: {}]   ;;  %s1792_s3 = inlined_call_operand.vmem [shape: f32[2,32,128], index: 3, kind: output, shape index: {}]  }
   0x1   :  { %s1409_s14 = smov 0  }
   0x2 LB: > { %s25_s15 = sadd.s32 1, %s1379_s13  ;;  %p1000_p0 = scmp.ge.s32.totalorder %s1383_s14, 1  ;;  %s1383_s14 = sphi %s1409_s14, %s13_s14   ;;  %s1379_s13 = sphi %s1407_s13, %s1794_s13   ;;  %s1375_s12 = sphi %s1405_s12, %s1793_s12  }
   0x3   : > { %p27_p1 = scmp.ge.s32.totalorder %s25_s15, 2  ;;  %p168_p2 = scmp.lt.s32.totalorder %s1383_s14, 3 }
   0x5   : > { %s1796_s15 = smov (%p27_p1, %s25_s15), 0  ;;  %p169_p3 = pnand %p1000_p0, %p168_p2 }
   0x6   : > { %v318_v0 = vld [vmem:[%s1790_s1 + $0x80] sm:$0xff] (!%p169_p3)  ;;  %v319_v1 = vld [vmem:[%s1790_s1 + $0x88] sm:$0xff] (!%p169_p3)  ;;  %v320_v11 = vld [vmem:[%s1790_s1 + $0x90] sm:$0xff] (!%p169_p3)  ;;  %p202_p4 = scmp.lt.s32.totalorder (!%p169_p3), %s1375_s12, 1  ;;  %vm374_vm0 = vcmask (!%p169_p3), 523264  }
   0x7   : > { %172 = sbr.rel (%p169_p3) target bundleno = 343 (0x157), region = 32  ;;  %v350_v2 = vld [vmem:[%s1790_s1 + $0x180] sm:$0xff] (!%p169_p3)  ;;  %v1248_v3 = vpack.c.bf16 (!%p169_p3), %v319_v1, %v318_v0  ;;  %v351_v4 = vld [vmem:[%s1790_s1 + $0x188] sm:$0xff] (!%p169_p3)  ;;  %v321_v13 = vld [vmem:[%s1790_s1 + $0x98] sm:$0xff] (!%p169_p3) }
   0x8   : > { %v302_v5 = vld [vmem:[%s1790_s1] sm:$0xff] (!%p169_p3)  ;;  %v303_v6 = vld [vmem:[%s1790_s1 + $0x8] sm:$0xff] (!%p169_p3)  ;;  %v1280_v7 = vpack.c.bf16 (!%p169_p3), %v351_v4, %v350_v2  ;;  %v352_v14 = vld [vmem:[%s1790_s1 + $0x190] sm:$0xff] (!%p169_p3)  ;;  %v1252_v16 = vpack.c.bf16 (!%p169_p3), %v321_v13, %v320_v11 }
   0x9   : > { %v1250_v8 = vpack.c.bf16 (!%p169_p3), %v303_v6, %v302_v5  ;;  %v334_v9 = vld [vmem:[%s1790_s1 + $0x100] sm:$0xff] (!%p169_p3)  ;;  %v335_v10 = vld [vmem:[%s1790_s1 + $0x108] sm:$0xff] (!%p169_p3)  ;;  %1249 = vmatprep.subr.bf16.mxu0 (!%p169_p3), %v1248_v3  ;;  %v353_v15 = vld [vmem:[%s1790_s1 + $0x198] sm:$0xff] (!%p169_p3) }
   0xa   : > { %v1282_v12 = vpack.c.bf16 (!%p169_p3), %v335_v10, %v334_v9  ;;  %1281 = vmatprep.subr.bf16.mxu1 (!%p169_p3), %v1280_v7  ;;  %v1284_v17 = vpack.c.bf16 (!%p169_p3), %v353_v15, %v352_v14  ;;  %v304_v18 = vld [vmem:[%s1790_s1 + $0x10] sm:$0xff] (!%p169_p3)  ;;  %v305_v19 = vld [vmem:[%s1790_s1 + $0x18] sm:$0xff] (!%p169_p3)  ;;  %v322_v23 = vld [vmem:[%s1790_s1 + $0xa0] sm:$0xff] (!%p169_p3) }
   0xb   : > { %1251 = vmatpush3.bf16.msra.mxu0 (!%p169_p3), %v1250_v8  ;;  %v336_v20 = vld [vmem:[%s1790_s1 + $0x110] sm:$0xff] (!%p169_p3)  ;;  %v1254_v21 = vpack.c.bf16 (!%p169_p3), %v305_v19, %v304_v18  ;;  %v337_v22 = vld [vmem:[%s1790_s1 + $0x118] sm:$0xff] (!%p169_p3)  ;;  %v323_v24 = vld [vmem:[%s1790_s1 + $0xa8] sm:$0xff] (!%p169_p3) }
   0xc   : > { %1283 = vmatpush3.bf16.msra.mxu1 (!%p169_p3), %v1282_v12  ;;  %1253 = vmatprep.subr.bf16.mxu0 (!%p169_p3), %v1252_v16  ;;  %v1286_v25 = vpack.c.bf16 (!%p169_p3), %v337_v22, %v336_v20  ;;  %v1256_v26 = vpack.c.bf16 (!%p169_p3), %v323_v24, %v322_v23  ;;  %v354_v27 = vld [vmem:[%s1790_s1 + $0x1a0] sm:$0xff] (!%p169_p3)  ;;  %v355_v28 = vld [vmem:[%s1790_s1 + $0x1a8] sm:$0xff] (!%p169_p3)  ;;  %v324_v35 = vld [vmem:[%s1790_s1 + $0xb0] sm:$0xff] (!%p169_p3) }
   0xd   : > { %1285 = vmatprep.subr.bf16.mxu1 (!%p169_p3), %v1284_v17  ;;  %v306_v29 = vld [vmem:[%s1790_s1 + $0x20] sm:$0xff] (!%p169_p3)  ;;  %v1288_v30 = vpack.c.bf16 (!%p169_p3), %v355_v28, %v354_v27  ;;  %v307_v31 = vld [vmem:[%s1790_s1 + $0x28] sm:$0xff] (!%p169_p3)  ;;  %v325_v36 = vld [vmem:[%s1790_s1 + $0xb8] sm:$0xff] (!%p169_p3) }
   0xe   : > { %v338_v32 = vld [vmem:[%s1790_s1 + $0x120] sm:$0xff]  ;;  %v339_v33 = vld [vmem:[%s1790_s1 + $0x128] sm:$0xff]  ;;  %v1258_v34 = vpack.c.bf16 %v307_v31, %v306_v29  ;;  %v356_v37 = vld [vmem:[%s1790_s1 + $0x1b0] sm:$0xff]  ;;  %v1260_v39 = vpack.c.bf16 %v325_v36, %v324_v35  ;;  %s1798_s12 = smov (!%p202_p4, %s1375_s12), 1 }
   0xf   : > { %1255 = vmatpush3.bf16.msra.mxu0 %v1254_v21  ;;  %v1290_v38 = vpack.c.bf16 %v339_v33, %v338_v32  ;;  %v357_v40 = vld [vmem:[%s1790_s1 + $0x1b8] sm:$0xff]  ;;  %v308_v41 = vld [vmem:[%s1790_s1 + $0x30] sm:$0xff]  ;;  %v326_v46 = vld [vmem:[%s1790_s1 + $0xc0] sm:$0xff]  ;;  %s1336_s4 = smul.u32 640, %s1798_s12  ;;  %s1023_s29 = sshll.u32 %s1798_s12, 5 }
  0x10   : > { %1287 = vmatpush3.bf16.msra.mxu1 %v1286_v25  ;;  %1257 = vmatprep.subr.bf16.mxu0 %v1256_v26  ;;  %v309_v42 = vld [vmem:[%s1790_s1 + $0x38] sm:$0xff]  ;;  %v1292_v43 = vpack.c.bf16 %v357_v40, %v356_v37  ;;  %v340_v44 = vld [vmem:[%s1790_s1 + $0x130] sm:$0xff]  ;;  %v327_v47 = vld [vmem:[%s1790_s1 + $0xc8] sm:$0xff]  ;;  %s221_s6 = scalar_lea.vmem %s1792_s3, %s1023_s29 }
  0x11   : > { %1289 = vmatprep.subr.bf16.mxu1 %v1288_v30  ;;  %v341_v45 = vld [vmem:[%s1790_s1 + $0x138] sm:$0xff]  ;;  %v358_v48 = vld [vmem:[%s1790_s1 + $0x1c0] sm:$0xff]  ;;  %v359_v49 = vld [vmem:[%s1790_s1 + $0x1c8] sm:$0xff]  ;;  %v1262_v50 = vpack.c.bf16 %v309_v42, %v308_v41  ;;  %v1264_v52 = vpack.c.bf16 %v327_v47, %v326_v46  ;;  %s1585_s27 = scalar_lea.vmem %s1789_s0, %s1336_s4 }
  0x12   : > { %v1294_v51 = vpack.c.bf16 %v341_v45, %v340_v44  ;;  %v310_v53 = vld [vmem:[%s1790_s1 + $0x40] sm:$0xff]  ;;  %v311_v54 = vld [vmem:[%s1790_s1 + $0x48] sm:$0xff]  ;;  %v1296_v56 = vpack.c.bf16 %v359_v49, %v358_v48  ;;  %v328_v58 = vld [vmem:[%s1790_s1 + $0xd0] sm:$0xff] }
  0x13   : > { %1259 = vmatpush3.bf16.msra.mxu0 %v1258_v34  ;;  %v342_v55 = vld [vmem:[%s1790_s1 + $0x140] sm:$0xff]  ;;  %v343_v57 = vld [vmem:[%s1790_s1 + $0x148] sm:$0xff]  ;;  %v329_v59 = vld [vmem:[%s1790_s1 + $0xd8] sm:$0xff]  ;;  %v1266_v62 = vpack.c.bf16 %v311_v54, %v310_v53 }
  0x14   : > { %1291 = vmatpush3.bf16.msra.mxu1 %v1290_v38  ;;  %1261 = vmatprep.subr.bf16.mxu0 %v1260_v39  ;;  %v360_v60 = vld [vmem:[%s1790_s1 + $0x1d0] sm:$0xff]  ;;  %v361_v61 = vld [vmem:[%s1790_s1 + $0x1d8] sm:$0xff]  ;;  %v1298_v63 = vpack.c.bf16 %v343_v57, %v342_v55  ;;  %v1268_v0 = vpack.c.bf16 %v329_v59, %v328_v58  ;;  %v330_v6 = vld [vmem:[%s1790_s1 + $0xe0] sm:$0xff] }
  0x15   : > { %1293 = vmatprep.subr.bf16.mxu1 %v1292_v43  ;;  %v312_v1 = vld [vmem:[%s1790_s1 + $0x50] sm:$0xff]  ;;  %v313_v2 = vld [vmem:[%s1790_s1 + $0x58] sm:$0xff]  ;;  %v1300_v4 = vpack.c.bf16 %v361_v61, %v360_v60  ;;  %v331_v7 = vld [vmem:[%s1790_s1 + $0xe8] sm:$0xff] }
  0x16   : > { %v344_v3 = vld [vmem:[%s1790_s1 + $0x150] sm:$0xff]  ;;  %v345_v5 = vld [vmem:[%s1790_s1 + $0x158] sm:$0xff]  ;;  %v362_v8 = vld [vmem:[%s1790_s1 + $0x1e0] sm:$0xff]  ;;  %v1270_v10 = vpack.c.bf16 %v313_v2, %v312_v1  ;;  %v1272_v14 = vpack.c.bf16 %v331_v7, %v330_v6 }
  0x17   : > { %1263 = vmatpush3.bf16.msra.mxu0 %v1262_v50  ;;  %v363_v9 = vld [vmem:[%s1790_s1 + $0x1e8] sm:$0xff]  ;;  %v314_v11 = vld [vmem:[%s1790_s1 + $0x60] sm:$0xff]  ;;  %v1302_v13 = vpack.c.bf16 %v345_v5, %v344_v3  ;;  %v225_v17 = vld [vmem:[%s1585_s27 + $0x18] sm:$0xff] }
  0x18   : > { %1295 = vmatpush3.bf16.msra.mxu1 %v1294_v51  ;;  %1265 = vmatprep.subr.bf16.mxu0 %v1264_v52  ;;  %v315_v12 = vld [vmem:[%s1790_s1 + $0x68] sm:$0xff]  ;;  %v346_v15 = vld [vmem:[%s1790_s1 + $0x160] sm:$0xff]  ;;  %v1304_v18 = vpack.c.bf16 %v363_v9, %v362_v8  ;;  %v332_v20 = vld [vmem:[%s1790_s1 + $0xf0] sm:$0xff] }
  0x19   : > { %1297 = vmatprep.subr.bf16.mxu1 %v1296_v56  ;;  %v223_v16 = vld [vmem:[%s1585_s27 + $0x8] sm:$0xff]  ;;  %v333_v21 = vld [vmem:[%s1790_s1 + $0xf8] sm:$0xff]  ;;  %v364_v22 = vld [vmem:[%s1790_s1 + $0x1f0] sm:$0xff]  ;;  %632 = vmatprep.mubr.f32.mxu1 %v225_v17  ;;  %v1274_v24 = vpack.c.bf16 %v315_v12, %v314_v11 }
  0x1a   : > { %v347_v19 = vld [vmem:[%s1790_s1 + $0x168] sm:$0xff]  ;;  %487 = vmatprep.mubr.f32.mxu0 %v223_v16  ;;  %v365_v23 = vld [vmem:[%s1790_s1 + $0x1f8] sm:$0xff]  ;;  %v1276_v26 = vpack.c.bf16 %v333_v21, %v332_v20  ;;  %v316_v27 = vld [vmem:[%s1790_s1 + $0x70] sm:$0xff] }
  0x1b   : > { %1267 = vmatpush3.bf16.msra.mxu0 %v1266_v62  ;;  %v1306_v25 = vpack.c.bf16 %v347_v19, %v346_v15  ;;  %v317_v28 = vld [vmem:[%s1790_s1 + $0x78] sm:$0xff]  ;;  %v348_v29 = vld [vmem:[%s1790_s1 + $0x170] sm:$0xff]  ;;  %v1308_v30 = vpack.c.bf16 %v365_v23, %v364_v22  ;;  %v366_v32 = vld [vmem:[%s1790_s1 + $0x200] sm:$0xff] }
  0x1c   : > { %1299 = vmatpush3.bf16.msra.mxu1 %v1298_v63  ;;  %1269 = vmatprep.subr.bf16.mxu0 %v1268_v0  ;;  %v349_v31 = vld [vmem:[%s1790_s1 + $0x178] sm:$0xff]  ;;  %v367_v33 = vld [vmem:[%s1790_s1 + $0x208] sm:$0xff]  ;;  %v1278_v34 = vpack.c.bf16 %v317_v28, %v316_v27  ;;  %v368_v37 = vld [vmem:[%s1790_s1 + $0x210] sm:$0xff] }
  0x1d   : > { %1301 = vmatprep.subr.bf16.mxu1 %v1300_v4  ;;  %v1310_v35 = vpack.c.bf16 %v349_v31, %v348_v29  ;;  %v1312_v36 = vpack.c.bf16 %v367_v33, %v366_v32  ;;  %v369_v38 = vld [vmem:[%s1790_s1 + $0x218] sm:$0xff]  ;;  %v222_v39 = vld [vmem:[%s1585_s27] sm:$0xff]  ;;  %v224_v40 = vld [vmem:[%s1585_s27 + $0x10] sm:$0xff] }
  0x1e   : > { %v228_v41 = vld [vmem:[%s1585_s27 + $0x30] sm:$0xff]  ;;  %v1316_v42 = vpack.c.bf16 %v369_v38, %v368_v37  ;;  %v230_v43 = vld [vmem:[%s1585_s27 + $0x40] sm:$0xff]  ;;  %v371_v45 = vld [vmem:[%s1790_s1 + $0x228] sm:$0xff] }
  0x1f   : > { %1271 = vmatpush3.bf16.msra.mxu0 %v1270_v10  ;;  %v370_v44 = vld [vmem:[%s1790_s1 + $0x220] sm:$0xff]  ;;  %v227_v46 = vld [vmem:[%s1585_s27 + $0x28] sm:$0xff]  ;;  %v229_v47 = vld [vmem:[%s1585_s27 + $0x38] sm:$0xff] }
  0x20   : > { %1303 = vmatpush3.bf16.msra.mxu1 %v1302_v13  ;;  %1273 = vmatprep.subr.bf16.mxu0 %v1272_v14  ;;  %v233_v48 = vld [vmem:[%s1585_s27 + $0x58] sm:$0xff]  ;;  %v235_v49 = vld [vmem:[%s1585_s27 + $0x68] sm:$0xff]  ;;  %v1320_v50 = vpack.c.bf16 %v371_v45, %v370_v44  ;;  %v232_v51 = vld [vmem:[%s1585_s27 + $0x50] sm:$0xff] }
  0x21   : > { %1305 = vmatprep.subr.bf16.mxu1 %v1304_v18  ;;  %v372_v52 = vld [vmem:[%s1790_s1 + $0x230] sm:$0xff]  ;;  %v234_v53 = vld [vmem:[%s1585_s27 + $0x60] sm:$0xff]  ;;  %v373_v55 = vld [vmem:[%s1790_s1 + $0x238] sm:$0xff] }
  0x22   : > { %v238_v54 = vld [vmem:[%s1585_s27 + $0x80] sm:$0xff]  ;;  %v240_v56 = vld [vmem:[%s1585_s27 + $0x90] sm:$0xff]  ;;  %v1324_v57 = vpack.c.bf16 %v373_v55, %v372_v52  ;;  %v237_v58 = vld [vmem:[%s1585_s27 + $0x78] sm:$0xff] }
  0x23   : > { %1275 = vmatpush3.bf16.msra.mxu0 %v1274_v24  ;;  %v239_v59 = vld [vmem:[%s1585_s27 + $0x88] sm:$0xff]  ;;  %v245_v61 = vld [vmem:[%s1585_s27 + $0xb8] sm:$0xff]  ;;  %v242_v62 = vld [vmem:[%s1585_s27 + $0xa0] sm:$0xff] }
  0x24   : > { %1307 = vmatpush3.bf16.msra.mxu1 %v1306_v25  ;;  %1277 = vmatprep.subr.bf16.mxu0 %v1276_v26  ;;  %v243_v60 = vld [vmem:[%s1585_s27 + $0xa8] sm:$0xff]  ;;  %v244_v63 = vld [vmem:[%s1585_s27 + $0xb0] sm:$0xff]  ;;  %v250_v1 = vld [vmem:[%s1585_s27 + $0xe0] sm:$0xff] }
  0x25   : > { %1309 = vmatprep.subr.bf16.mxu1 %v1308_v30  ;;  %v248_v0 = vld [vmem:[%s1585_s27 + $0xd0] sm:$0xff]  ;;  %v247_v2 = vld [vmem:[%s1585_s27 + $0xc8] sm:$0xff]  ;;  %v249_v3 = vld [vmem:[%s1585_s27 + $0xd8] sm:$0xff] }
  0x26   : > { %v253_v4 = vld [vmem:[%s1585_s27 + $0xf8] sm:$0xff]  ;;  %v255_v5 = vld [vmem:[%s1585_s27 + $0x108] sm:$0xff]  ;;  %v252_v6 = vld [vmem:[%s1585_s27 + $0xf0] sm:$0xff] }
  0x27   : > { %1279 = vmatpush3.bf16.msra.mxu0 %v1278_v34  ;;  %v254_v7 = vld [vmem:[%s1585_s27 + $0x100] sm:$0xff]  ;;  %v260_v9 = vld [vmem:[%s1585_s27 + $0x130] sm:$0xff]  ;;  %v257_v10 = vld [vmem:[%s1585_s27 + $0x118] sm:$0xff] }
  0x28   : > { %1311 = vmatpush3.bf16.msra.mxu1 %v1310_v35  ;;  %1313 = vmatprep.subr.bf16.mxu0 %v1312_v36  ;;  %v258_v8 = vld [vmem:[%s1585_s27 + $0x120] sm:$0xff]  ;;  %v259_v11 = vld [vmem:[%s1585_s27 + $0x128] sm:$0xff]  ;;  %v265_v13 = vld [vmem:[%s1585_s27 + $0x158] sm:$0xff] }
  0x29   : > { %1328 = vmatprep.subr.bf16.mxu1 %v1312_v36  ;;  %v263_v12 = vld [vmem:[%s1585_s27 + $0x148] sm:$0xff]  ;;  %v262_v14 = vld [vmem:[%s1585_s27 + $0x140] sm:$0xff]  ;;  %v264_v15 = vld [vmem:[%s1585_s27 + $0x150] sm:$0xff] }
  0x2a   : > { %488 = vmatmul.mubr.f32.vlgmr.msra.gmra.mrb[0].mxu0 %v222_v39  ;;  %v268_v16 = vld [vmem:[%s1585_s27 + $0x170] sm:$0xff]  ;;  %v270_v17 = vld [vmem:[%s1585_s27 + $0x180] sm:$0xff]  ;;  %v267_v18 = vld [vmem:[%s1585_s27 + $0x168] sm:$0xff] }
  0x2b   : > { %633 = vmatmul.mubr.f32.vlgmr.msra.gmra.mrb[0].mxu1 %v224_v40  ;;  %1315 = vmatpush3.bf16.msra.mxu0 %v1312_v36  ;;  %v269_v19 = vld [vmem:[%s1585_s27 + $0x178] sm:$0xff]  ;;  %v275_v21 = vld [vmem:[%s1585_s27 + $0x1a8] sm:$0xff]  ;;  %v272_v22 = vld [vmem:[%s1585_s27 + $0x190] sm:$0xff] }
  0x2c   : > { %1332 = vmatpush3.bf16.msra.mxu1 %v1312_v36  ;;  %492 = vmatprep.mubr.f32.mxu0 %v228_v41  ;;  %v273_v20 = vld [vmem:[%s1585_s27 + $0x198] sm:$0xff]  ;;  %v274_v23 = vld [vmem:[%s1585_s27 + $0x1a0] sm:$0xff]  ;;  %v280_v25 = vld [vmem:[%s1585_s27 + $0x1d0] sm:$0xff] }
  0x2d   : > { %637 = vmatprep.mubr.f32.mxu1 %v230_v43  ;;  %1317 = vmatprep.subr.bf16.mxu0 %v1316_v42  ;;  %v278_v24 = vld [vmem:[%s1585_s27 + $0x1c0] sm:$0xff]  ;;  %v277_v26 = vld [vmem:[%s1585_s27 + $0x1b8] sm:$0xff]  ;;  %v279_v27 = vld [vmem:[%s1585_s27 + $0x1c8] sm:$0xff] }
  0x2e   : > { %493 = vmatmul.mubr.f32.gmra.mrb[2].mxu0 %v227_v46  ;;  %1329 = vmatprep.subr.bf16.mxu1 %v1316_v42  ;;  %v283_v28 = vld [vmem:[%s1585_s27 + $0x1e8] sm:$0xff]  ;;  %v285_v29 = vld [vmem:[%s1585_s27 + $0x1f8] sm:$0xff]  ;;  %v282_v30 = vld [vmem:[%s1585_s27 + $0x1e0] sm:$0xff] }
  0x2f   : > { %638 = vmatmul.mubr.f32.gmra.mrb[2].mxu1 %v229_v47  ;;  %497 = vmatprep.mubr.f32.mxu0 %v233_v48  ;;  %v284_v31 = vld [vmem:[%s1585_s27 + $0x1f0] sm:$0xff]  ;;  %v290_v33 = vld [vmem:[%s1585_s27 + $0x220] sm:$0xff]  ;;  %v287_v34 = vld [vmem:[%s1585_s27 + $0x208] sm:$0xff] }
  0x30   : > { %642 = vmatprep.mubr.f32.mxu1 %v235_v49  ;;  %1319 = vmatpush3.bf16.msra.mxu0 %v1316_v42  ;;  %v288_v32 = vld [vmem:[%s1585_s27 + $0x210] sm:$0xff]  ;;  %v289_v35 = vld [vmem:[%s1585_s27 + $0x218] sm:$0xff]  ;;  %v295_v37 = vld [vmem:[%s1585_s27 + $0x248] sm:$0xff] }
  0x31   : > { %1333 = vmatpush3.bf16.msra.mxu1 %v1316_v42  ;;  %1321 = vmatprep.subr.bf16.mxu0 %v1320_v50  ;;  %v293_v36 = vld [vmem:[%s1585_s27 + $0x238] sm:$0xff]  ;;  %v292_v38 = vld [vmem:[%s1585_s27 + $0x230] sm:$0xff]  ;;  %v294_v39 = vld [vmem:[%s1585_s27 + $0x240] sm:$0xff] }
  0x32   : > { %498 = vmatmul.mubr.f32.gmra.mrb[4].mxu0 %v232_v51  ;;  %1330 = vmatprep.subr.bf16.mxu1 %v1320_v50  ;;  %v298_v40 = vld [vmem:[%s1585_s27 + $0x260] sm:$0xff]  ;;  %v300_v41 = vld [vmem:[%s1585_s27 + $0x270] sm:$0xff]  ;;  %v297_v42 = vld [vmem:[%s1585_s27 + $0x258] sm:$0xff] }
  0x33   : > { %643 = vmatmul.mubr.f32.gmra.mrb[4].mxu1 %v234_v53  ;;  %502 = vmatprep.mubr.f32.mxu0 %v238_v54  ;;  %v299_v43 = vld [vmem:[%s1585_s27 + $0x268] sm:$0xff]  ;;  %v226_v44 = vld [vmem:[%s1585_s27 + $0x20] sm:$0xff]  ;;  %v236_v48 = vld [vmem:[%s1585_s27 + $0x70] sm:$0xff] }
  0x34   : > { %647 = vmatprep.mubr.f32.mxu1 %v240_v56  ;;  %1323 = vmatpush3.bf16.msra.mxu0 %v1320_v50  ;;  %v266_v45 = vld [vmem:[%s1585_s27 + $0x160] sm:$0xff]  ;;  %v231_v46 = vld [vmem:[%s1585_s27 + $0x48] sm:$0xff]  ;;  %v276_v49 = vld [vmem:[%s1585_s27 + $0x1b0] sm:$0xff] }
  0x35   : > { %1334 = vmatpush3.bf16.msra.mxu1 %v1320_v50  ;;  %1325 = vmatprep.subr.bf16.mxu0 %v1324_v57  ;;  %v271_v47 = vld [vmem:[%s1585_s27 + $0x188] sm:$0xff]  ;;  %v241_v50 = vld [vmem:[%s1585_s27 + $0x98] sm:$0xff]  ;;  %v246_v52 = vld [vmem:[%s1585_s27 + $0xc0] sm:$0xff] }
  0x36   : > { %503 = vmatmul.mubr.f32.gmra.mrb[6].mxu0 %v237_v58  ;;  %1331 = vmatprep.subr.bf16.mxu1 %v1324_v57  ;;  %v281_v51 = vld [vmem:[%s1585_s27 + $0x1d8] sm:$0xff]  ;;  %v286_v53 = vld [vmem:[%s1585_s27 + $0x200] sm:$0xff]  ;;  %v251_v54 = vld [vmem:[%s1585_s27 + $0xe8] sm:$0xff] }
  0x37   : > { %648 = vmatmul.mubr.f32.gmra.mrb[6].mxu1 %v239_v59  ;;  %507 = vmatprep.mubr.f32.mxu0 %v243_v60  ;;  %v291_v55 = vld [vmem:[%s1585_s27 + $0x228] sm:$0xff]  ;;  %v256_v56 = vld [vmem:[%s1585_s27 + $0x110] sm:$0xff]  ;;  %v261_v58 = vld [vmem:[%s1585_s27 + $0x138] sm:$0xff] }
  0x38   : > { %652 = vmatprep.mubr.f32.mxu1 %v245_v61  ;;  %1327 = vmatpush3.bf16.msra.mxu0 %v1324_v57  ;;  %v301_v59 = vld [vmem:[%s1585_s27 + $0x278] sm:$0xff] }
  0x39   : > { %1335 = vmatpush3.bf16.msra.mxu1 %v1324_v57  ;;  %v296_v57 = vld [vmem:[%s1585_s27 + $0x250] sm:$0xff] }
  0x3a   : > { %508 = vmatmul.mubr.f32.gmra.mrb[8].mxu0 %v242_v62 }
  0x3b   : > { %653 = vmatmul.mubr.f32.gmra.mrb[8].mxu1 %v244_v63  ;;  %512 = vmatprep.mubr.f32.mxu0 %v248_v0 }
  0x3c   : > { %657 = vmatprep.mubr.f32.mxu1 %v250_v1 }
  0x3e   : > { %513 = vmatmul.mubr.f32.gmra.mrb[10].mxu0 %v247_v2 }
  0x3f   : > { %658 = vmatmul.mubr.f32.gmra.mrb[10].mxu1 %v249_v3  ;;  %517 = vmatprep.mubr.f32.mxu0 %v253_v4 }
  0x40   : > { %662 = vmatprep.mubr.f32.mxu1 %v255_v5 }
  0x42   : > { %518 = vmatmul.mubr.f32.gmra.mrb[12].mxu0 %v252_v6 }
  0x43   : > { %663 = vmatmul.mubr.f32.gmra.mrb[12].mxu1 %v254_v7  ;;  %522 = vmatprep.mubr.f32.mxu0 %v258_v8 }
  0x44   : > { %667 = vmatprep.mubr.f32.mxu1 %v260_v9 }
  0x46   : > { %523 = vmatmul.mubr.f32.gmra.mrb[14].mxu0 %v257_v10 }
  0x47   : > { %668 = vmatmul.mubr.f32.gmra.mrb[14].mxu1 %v259_v11  ;;  %527 = vmatprep.mubr.f32.mxu0 %v263_v12 }
  0x48   : > { %672 = vmatprep.mubr.f32.mxu1 %v265_v13 }
  0x4a   : > { %528 = vmatmul.mubr.f32.gmra.mrb[16].mxu0 %v262_v14 }
  0x4b   : > { %673 = vmatmul.mubr.f32.gmra.mrb[16].mxu1 %v264_v15  ;;  %532 = vmatprep.mubr.f32.mxu0 %v268_v16 }
  0x4c   : > { %677 = vmatprep.mubr.f32.mxu1 %v270_v17 }
  0x4e   : > { %533 = vmatmul.mubr.f32.gmra.mrb[18].mxu0 %v267_v18 }
  0x4f   : > { %678 = vmatmul.mubr.f32.gmra.mrb[18].mxu1 %v269_v19  ;;  %537 = vmatprep.mubr.f32.mxu0 %v273_v20 }
  0x50   : > { %682 = vmatprep.mubr.f32.mxu1 %v275_v21 }
  0x52   : > { %538 = vmatmul.mubr.f32.gmra.mrb[20].mxu0 %v272_v22 }
  0x53   : > { %683 = vmatmul.mubr.f32.gmra.mrb[20].mxu1 %v274_v23  ;;  %542 = vmatprep.mubr.f32.mxu0 %v278_v24 }
  0x54   : > { %687 = vmatprep.mubr.f32.mxu1 %v280_v25 }
  0x56   : > { %543 = vmatmul.mubr.f32.gmra.mrb[22].mxu0 %v277_v26 }
  0x57   : > { %688 = vmatmul.mubr.f32.gmra.mrb[22].mxu1 %v279_v27  ;;  %547 = vmatprep.mubr.f32.mxu0 %v283_v28 }
  0x58   : > { %692 = vmatprep.mubr.f32.mxu1 %v285_v29 }
  0x5a   : > { %548 = vmatmul.mubr.f32.gmra.mrb[24].mxu0 %v282_v30 }
  0x5b   : > { %693 = vmatmul.mubr.f32.gmra.mrb[24].mxu1 %v284_v31  ;;  %552 = vmatprep.mubr.f32.mxu0 %v288_v32 }
  0x5c   : > { %697 = vmatprep.mubr.f32.mxu1 %v290_v33 }
  0x5e   : > { %553 = vmatmul.mubr.f32.gmra.mrb[26].mxu0 %v287_v34 }
  0x5f   : > { %698 = vmatmul.mubr.f32.gmra.mrb[26].mxu1 %v289_v35  ;;  %557 = vmatprep.mubr.f32.mxu0 %v293_v36 }
  0x60   : > { %702 = vmatprep.mubr.f32.mxu1 %v295_v37 }
  0x62   : > { %558 = vmatmul.mubr.f32.gmra.mrb[28].mxu0 %v292_v38 }
  0x63   : > { %703 = vmatmul.mubr.f32.gmra.mrb[28].mxu1 %v294_v39  ;;  %562 = vmatprep.mubr.f32.mxu0 %v298_v40 }
  0x64   : > { %707 = vmatprep.mubr.f32.mxu1 %v300_v41 }
  0x66   : > { %563 = vmatmul.mubr.f32.gmra.mrb[30].mxu0 %v297_v42 }
  0x67   : > { %708 = vmatmul.mubr.f32.gmra.mrb[30].mxu1 %v299_v43  ;;  %1224 = vmatprep.mubr.msk.f32.mxu0 %vm374_vm0, %v226_v44 }
  0x68   : > { %1236 = vmatprep.mubr.msk.f32.mxu1 %vm374_vm0, %v266_v45 }
  0x6a   : > { %1225 = vmatmul.mubr.msk.f32.vlgmr.msra.gmra.mrb[32].mxu0 %vm374_vm0, %v231_v46 }
  0x6b   : > { %1237 = vmatmul.mubr.msk.f32.vlgmr.msra.gmra.mrb[32].mxu1 %vm374_vm0, %v271_v47  ;;  %1227 = vmatprep.mubr.msk.f32.mxu0 %vm374_vm0, %v236_v48 }
  0x6c   : > { %1239 = vmatprep.mubr.msk.f32.mxu1 %vm374_vm0, %v276_v49 }
  0x6e   : > { %1228 = vmatmul.mubr.msk.f32.gmra.mrb[34].mxu0 %vm374_vm0, %v241_v50 }
  0x6f   : > { %1240 = vmatmul.mubr.msk.f32.gmra.mrb[34].mxu1 %vm374_vm0, %v281_v51  ;;  %1230 = vmatprep.mubr.msk.f32.mxu0 %vm374_vm0, %v246_v52 }
  0x70   : > { %1242 = vmatprep.mubr.msk.f32.mxu1 %vm374_vm0, %v286_v53 }
  0x72   : > { %1231 = vmatmul.mubr.msk.f32.gmra.mrb[36].mxu0 %vm374_vm0, %v251_v54 }
  0x73   : > { %1243 = vmatmul.mubr.msk.f32.gmra.mrb[36].mxu1 %vm374_vm0, %v291_v55  ;;  %1233 = vmatprep.mubr.msk.f32.mxu0 %vm374_vm0, %v256_v56 }
  0x74   : > { %1245 = vmatprep.mubr.msk.f32.mxu1 %vm374_vm0, %v296_v57 }
  0x76   : > { %1234 = vmatmul.mubr.msk.f32.gmra.mrb[38].mxu0 %vm374_vm0, %v261_v58 }
  0x77   : > { %1246 = vmatmul.mubr.msk.f32.gmra.mrb[38].mxu1 %vm374_vm0, %v301_v59 }
  0xfd   : > { %v1056_v60 = vpop.f32.mrb[0].mxu0 }
  0xfe   : > { %v1136_v61 = vpop.f32.mrb[0].mxu1  ;;  %v1057_v62 = vpop.f32.mrb[1].mxu0 }
  0xff   : > { %v1058_v63 = vadd.f32 %v1057_v62, %v1056_v60  ;;  %v1137_v0 = vpop.f32.mrb[1].mxu1 }
 0x100   : > { %v1138_v1 = vadd.f32 %v1137_v0, %v1136_v61 }
 0x101   : > { %v1059_v2 = vpop.f32.mrb[2].mxu0 }
 0x102   : > { %v1139_v3 = vpop.f32.mrb[2].mxu1  ;;  %v1060_v4 = vpop.f32.mrb[3].mxu0  ;;  %v1749_v5 = vadd.f32 %v1138_v1, %v1058_v63 }
 0x103   : > { %v1061_v6 = vadd.f32 %v1060_v4, %v1059_v2  ;;  %v1140_v7 = vpop.f32.mrb[3].mxu1 }
 0x104   : > { %v1141_v8 = vadd.f32 %v1140_v7, %v1139_v3 }
 0x105   : > { %v1062_v9 = vpop.f32.mrb[4].mxu0 }
 0x106   : > { %v1142_v10 = vpop.f32.mrb[4].mxu1  ;;  %v1063_v11 = vpop.f32.mrb[5].mxu0  ;;  %v1751_v12 = vadd.f32 %v1141_v8, %v1061_v6 }
 0x107   : > { %v1064_v13 = vadd.f32 %v1063_v11, %v1062_v9  ;;  %v1143_v14 = vpop.f32.mrb[5].mxu1 }
 0x108   : > { %v1144_v15 = vadd.f32 %v1143_v14, %v1142_v10 }
 0x109   : > { %v1065_v16 = vpop.f32.mrb[6].mxu0 }
 0x10a   : > { %v1145_v17 = vpop.f32.mrb[6].mxu1  ;;  %v1066_v18 = vpop.f32.mrb[7].mxu0  ;;  %v1753_v19 = vadd.f32 %v1144_v15, %v1064_v13 }
 0x10b   : > { %v1067_v20 = vadd.f32 %v1066_v18, %v1065_v16  ;;  %v1146_v21 = vpop.f32.mrb[7].mxu1 }
 0x10c   : > { %v1147_v22 = vadd.f32 %v1146_v21, %v1145_v17 }
 0x10d   : > { %v1068_v23 = vpop.f32.mrb[8].mxu0 }
 0x10e   : > { %v1148_v24 = vpop.f32.mrb[8].mxu1  ;;  %v1069_v25 = vpop.f32.mrb[9].mxu0  ;;  %v1755_v26 = vadd.f32 %v1147_v22, %v1067_v20 }
 0x10f   : > { %v1070_v27 = vadd.f32 %v1069_v25, %v1068_v23  ;;  %v1149_v28 = vpop.f32.mrb[9].mxu1 }
 0x110   : > { %v1150_v29 = vadd.f32 %v1149_v28, %v1148_v24 }
 0x111   : > { %v1071_v30 = vpop.f32.mrb[10].mxu0 }
 0x112   : > { %v1151_v31 = vpop.f32.mrb[10].mxu1  ;;  %v1072_v32 = vpop.f32.mrb[11].mxu0  ;;  %v1757_v33 = vadd.f32 %v1150_v29, %v1070_v27 }
 0x113   : > { %v1073_v34 = vadd.f32 %v1072_v32, %v1071_v30  ;;  %v1152_v35 = vpop.f32.mrb[11].mxu1 }
 0x114   : > { %v1153_v36 = vadd.f32 %v1152_v35, %v1151_v31 }
 0x115   : > { %v1074_v37 = vpop.f32.mrb[12].mxu0 }
 0x116   : > { %v1154_v38 = vpop.f32.mrb[12].mxu1  ;;  %v1075_v39 = vpop.f32.mrb[13].mxu0  ;;  %v1759_v40 = vadd.f32 %v1153_v36, %v1073_v34 }
 0x117   : > { %v1076_v41 = vadd.f32 %v1075_v39, %v1074_v37  ;;  %v1155_v42 = vpop.f32.mrb[13].mxu1 }
 0x118   : > { %v1156_v43 = vadd.f32 %v1155_v42, %v1154_v38 }
 0x119   : > { %v1077_v44 = vpop.f32.mrb[14].mxu0 }
 0x11a   : > { %v1157_v45 = vpop.f32.mrb[14].mxu1  ;;  %v1078_v46 = vpop.f32.mrb[15].mxu0  ;;  %v1761_v47 = vadd.f32 %v1156_v43, %v1076_v41 }
 0x11b   : > { %v1079_v48 = vadd.f32 %v1078_v46, %v1077_v44  ;;  %v1158_v49 = vpop.f32.mrb[15].mxu1 }
 0x11c   : > { %v1159_v50 = vadd.f32 %v1158_v49, %v1157_v45 }
 0x11d   : > { %v1080_v51 = vpop.f32.mrb[16].mxu0 }
 0x11e   : > { %v1160_v52 = vpop.f32.mrb[16].mxu1  ;;  %v1081_v53 = vpop.f32.mrb[17].mxu0  ;;  %v1763_v54 = vadd.f32 %v1159_v50, %v1079_v48 }
 0x11f   : > { %v1082_v55 = vadd.f32 %v1081_v53, %v1080_v51  ;;  %v1161_v56 = vpop.f32.mrb[17].mxu1 }
 0x120   : > { %v1162_v57 = vadd.f32 %v1161_v56, %v1160_v52 }
 0x121   : > { %v1083_v58 = vpop.f32.mrb[18].mxu0 }
 0x122   : > { %v1163_v59 = vpop.f32.mrb[18].mxu1  ;;  %v1084_v60 = vpop.f32.mrb[19].mxu0  ;;  %v675_v61 = vadd.f32 %v1162_v57, %v1082_v55 }
 0x123   : > { %v1085_v62 = vadd.f32 %v1084_v60, %v1083_v58  ;;  %v1164_v63 = vpop.f32.mrb[19].mxu1 }
 0x124   : > { %v1165_v0 = vadd.f32 %v1164_v63, %v1163_v59 }
 0x125   : > { %v1086_v1 = vpop.f32.mrb[20].mxu0 }
 0x126   : > { %v1166_v2 = vpop.f32.mrb[20].mxu1  ;;  %v1087_v3 = vpop.f32.mrb[21].mxu0  ;;  %v680_v4 = vadd.f32 %v1165_v0, %v1085_v62 }
 0x127   : > { %v1088_v6 = vadd.f32 %v1087_v3, %v1086_v1  ;;  %v1167_v7 = vpop.f32.mrb[21].mxu1 }
 0x128   : > { %v1168_v8 = vadd.f32 %v1167_v7, %v1166_v2 }
 0x129   : > { %v1089_v9 = vpop.f32.mrb[22].mxu0 }
 0x12a   : > { %v1169_v10 = vpop.f32.mrb[22].mxu1  ;;  %v1090_v11 = vpop.f32.mrb[23].mxu0  ;;  %v685_v13 = vadd.f32 %v1168_v8, %v1088_v6 }
 0x12b   : > { %v1091_v14 = vadd.f32 %v1090_v11, %v1089_v9  ;;  %v1170_v15 = vpop.f32.mrb[23].mxu1 }
 0x12c   : > { %v1171_v16 = vadd.f32 %v1170_v15, %v1169_v10 }
 0x12d   : > { %v1092_v17 = vpop.f32.mrb[24].mxu0 }
 0x12e   : > { %v1172_v18 = vpop.f32.mrb[24].mxu1  ;;  %v1093_v20 = vpop.f32.mrb[25].mxu0  ;;  %v690_v21 = vadd.f32 %v1171_v16, %v1091_v14 }
 0x12f   : > { %v1094_v22 = vadd.f32 %v1093_v20, %v1092_v17  ;;  %v1173_v23 = vpop.f32.mrb[25].mxu1 }
 0x130   : > { %v1174_v24 = vadd.f32 %v1173_v23, %v1172_v18 }
 0x131   : > { %v1095_v25 = vpop.f32.mrb[26].mxu0 }
 0x132   : > { %v1175_v27 = vpop.f32.mrb[26].mxu1  ;;  %v1096_v28 = vpop.f32.mrb[27].mxu0  ;;  %v695_v29 = vadd.f32 %v1174_v24, %v1094_v22 }
 0x133   : > { %v1097_v30 = vadd.f32 %v1096_v28, %v1095_v25  ;;  %v1176_v31 = vpop.f32.mrb[27].mxu1 }
 0x134   : > { %v1177_v32 = vadd.f32 %v1176_v31, %v1175_v27 }
 0x135   : > { %v1098_v34 = vpop.f32.mrb[28].mxu0 }
 0x136   : > { %v1178_v35 = vpop.f32.mrb[28].mxu1  ;;  %v1099_v36 = vpop.f32.mrb[29].mxu0  ;;  %v700_v37 = vadd.f32 %v1177_v32, %v1097_v30 }
 0x137   : > { %v1100_v38 = vadd.f32 %v1099_v36, %v1098_v34  ;;  %v1179_v39 = vpop.f32.mrb[29].mxu1 }
 0x138   : > { %v1180_v41 = vadd.f32 %v1179_v39, %v1178_v35 }
 0x139   : > { %v1101_v42 = vpop.f32.mrb[30].mxu0 }
 0x13a   : > { %v1181_v43 = vpop.f32.mrb[30].mxu1  ;;  %v1102_v44 = vpop.f32.mrb[31].mxu0  ;;  %v705_v45 = vadd.f32 %v1180_v41, %v1100_v38 }
 0x13b   : > { %v1103_v46 = vadd.f32 %v1102_v44, %v1101_v42  ;;  %v1182_v48 = vpop.f32.mrb[31].mxu1 }
 0x13c   : > { %v1183_v49 = vadd.f32 %v1182_v48, %v1181_v43 }
 0x13d   : > { %v1226_v50 = vpop.f32.mrb[32].mxu0 }
 0x13e   : > { %v785_v51 = vadd.f32 %v1226_v50, %v1751_v12  ;;  %v1238_v52 = vpop.f32.mrb[32].mxu1  ;;  %v779_v53 = vpop.f32.mrb[33].mxu0  ;;  %v710_v55 = vadd.f32 %v1183_v49, %v1103_v46 }
 0x13f   : > { %v825_v56 = vadd.f32 %v1238_v52, %v680_v4  ;;  %v780_v57 = vadd.f32 %v779_v53, %v1749_v5  ;;  %v819_v58 = vpop.f32.mrb[33].mxu1 }
 0x140   : > { %v820_v59 = vadd.f32 %v819_v58, %v675_v61 }
 0x141   : > { %v1229_v60 = vpop.f32.mrb[34].mxu0 }
 0x142   : > { %v795_v62 = vadd.f32 %v1229_v60, %v1755_v26  ;;  %v1241_v63 = vpop.f32.mrb[34].mxu1  ;;  %v789_v0 = vpop.f32.mrb[35].mxu0 }
 0x143   : > { %v835_v1 = vadd.f32 %v1241_v63, %v690_v21  ;;  %v790_v2 = vadd.f32 %v789_v0, %v1753_v19  ;;  %v829_v3 = vpop.f32.mrb[35].mxu1  ;;  %v1020_v19 = vld [vmem:[%s1791_s2] ss:$0 sm:$0xff] }
 0x144   : > { %v830_v6 = vadd.f32 %v829_v3, %v685_v13 }
 0x145   : > { %v1232_v7 = vpop.f32.mrb[36].mxu0 }
 0x146   : > { %v805_v12 = vadd.f32 %v1232_v7, %v1759_v40  ;;  %v1244_v8 = vpop.f32.mrb[36].mxu1  ;;  %v799_v4 = vpop.f32.mrb[37].mxu0 }
 0x147   : > { %v845_v9 = vadd.f32 %v1244_v8, %v700_v37  ;;  %v800_v5 = vadd.f32 %v799_v4, %v1757_v33  ;;  %v839_v61 = vpop.f32.mrb[37].mxu1 }
 0x148   : > { %v859_v10 = vmax.f32 %v785_v51, %v805_v12  ;;  %v840_v11 = vadd.f32 %v839_v61, %v695_v29 }
 0x149   : > { %v863_v26 = vmax.f32 %v825_v56, %v845_v9  ;;  %v858_v14 = vmax.f32 %v780_v57, %v800_v5  ;;  %v1235_v15 = vpop.f32.mrb[38].mxu0 }
 0x14a   : > { %v862_v13 = vmax.f32 %v820_v59, %v840_v11  ;;  %v815_v16 = vadd.f32 %v1235_v15, %v1763_v54  ;;  %v1247_v40 = vpop.f32.mrb[38].mxu1  ;;  %v809_v17 = vpop.f32.mrb[39].mxu0 }
 0x14b   : > { %v867_v18 = vmax.f32 %v859_v10, %v863_v26  ;;  %v855_v20 = vadd.f32 %v1247_v40, %v710_v55  ;;  %v810_v33 = vadd.f32 %v809_v17, %v1761_v47  ;;  %v849_v21 = vpop.f32.mrb[39].mxu1 }
 0x14c   : > { %v866_v22 = vmax.f32 %v858_v14, %v862_v13  ;;  %v861_v23 = vmax.f32 %v795_v62, %v815_v16  ;;  %v850_v24 = vadd.f32 %v849_v21, %v705_v45 }
 0x14d   : > { %v878_v25 = vadd.f32 %v1020_v19, %v867_v18  ;;  %v865_v27 = vmax.f32 %v835_v1, %v855_v20  ;;  %v860_v28 = vmax.f32 %v790_v2, %v810_v33 }
 0x14e   : > { %v877_v29 = vadd.f32 %v1020_v19, %v866_v22  ;;  %v864_v54 = vmax.f32 %v830_v6, %v850_v24 }
 0x14f   : > { %v882_v30 = vmax.f32 %v878_v25, 0.0  ;;  %v869_v31 = vmax.f32 %v861_v23, %v865_v27 }
 0x150   : > { %v881_v32 = vmax.f32 %v877_v29, 0.0  ;;  %v868_v34 = vmax.f32 %v860_v28, %v864_v54 }
 0x151   : > { %886 = vst [vmem:[%s221_s6 + $0x8] sm:$0xff] %v882_v30  ;;  %v880_v35 = vadd.f32 %v1020_v19, %v869_v31 }
 0x152   : > { %885 = vst [vmem:[%s221_s6] sm:$0xff] %v881_v32  ;;  %v879_v47 = vadd.f32 %v1020_v19, %v868_v34 }
 0x153   : > { %v884_v36 = vmax.f32 %v880_v35, 0.0 }
 0x154   : > { %v883_v37 = vmax.f32 %v879_v47, 0.0 }
 0x155   : > { %888 = vst [vmem:[%s221_s6 + $0x18] sm:$0xff] %v884_v36 }
 0x156   : > { %887 = vst [vmem:[%s221_s6 + $0x10] sm:$0xff] %v883_v37 }
 0x157 PF: > { %s13_s14 = sadd.s32 1, %s1383_s14   ;;  %s1793_s12 = smov %s1379_s13 }
 0x158   : > { %p10_p5 = scmp.ge.s32.totalorder %s13_s14, 4   ;;  %s1794_s13 = smov %s1796_s15 }
 0x15a   :  { %12 = sbr.rel (!%p10_p5) target bundleno = 2 (0x2), region = 68 }

// kernel: voice_auth_cnn_forward.8
= control target key start
LH: loop header
LB: loop body
LE: loop exit
PB: predicated region body
PF: predicated region fallthrough
CT: control target
= control target key end

     0   :  { %s2113_s12 = smov 0   ;;  %s2115_s13 = smov 0   ;;  %s2689_s0 = inlined_call_operand.vmem [shape: f32[2,32,1152], index: 0, kind: input, shape index: {}]   ;;  %s2690_s1 = inlined_call_operand.vmem [shape: f32[1152,256], index: 1, kind: input, shape index: {}]   ;;  %s2691_s2 = inlined_call_operand.vmem [shape: f32[1,256], index: 2, kind: input, shape index: {}]   ;;  %s2692_s3 = inlined_call_operand.vmem [shape: f32[2,8,256], index: 3, kind: output, shape index: {}]  }
   0x1   :  { %s2117_s14 = smov 0   ;;  %s2119_s15 = smov 0  }
   0x2   :  { %s2121_s16 = smov 0   ;;  %s2123_s17 = smov 0  }
   0x3   :  { %s2125_s18 = smov 0  }
   0x4 LB: > { %s22_s19 = sadd.s32 1, %s2083_s16  ;;  %s25_s20 = sadd.s32 1, %s2087_s17  ;;  %s2091_s18 = sphi %s2125_s18, %s13_s18   ;;  %s2087_s17 = sphi %s2123_s17, %s2698_s17   ;;  %s2083_s16 = sphi %s2121_s16, %s2697_s16   ;;  %s2079_s15 = sphi %s2119_s15, %s2696_s15   ;;  %s2075_s14 = sphi %s2117_s14, %s2695_s14   ;;  %s2071_s13 = sphi %s2115_s13, %s2694_s13   ;;  %s2067_s12 = sphi %s2113_s12, %s2693_s12  }
   0x5   : > { %p23_p0 = scmp.ge.s32.totalorder %s22_s19, 2  ;;  %s58_s21 = sadd.s32 1, %s2071_s13 }
   0x6   : > { %p65_p1 = scmp.ne.s32.totalorder %s2071_s13, %s2067_s12  ;;  %p66_p2 = scmp.eq.s32.totalorder %s2091_s18, 0 }
   0x7   : > { %s2700_s19 = smov (%p23_p0, %s22_s19), 0  ;;  %s2702_s20 = smov (!%p23_p0, %s25_s20), %s2087_s17 }
   0x8   : > { %s55_s22 = ssub.s32 %s2083_s16, %s2700_s19  ;;  %p67_p3 = por %p66_p2, %p65_p1 }
   0x9   : > { %p27_p4 = scmp.ge.s32.totalorder %s2702_s20, 2  ;;  %p56_p5 = scmp.eq.s32.totalorder %s55_s22, 0 }
   0xa   : > { %p1559_p6 = scmp.ge.s32.totalorder %s2091_s18, 4 }
   0xb   : > { %s2704_s20 = smov (%p27_p4, %s2702_s20), 0 }
   0xc   : > { %s2162_s23 = scalar_select %p56_p5, %s2071_s13, %s58_s21  }
   0xd   : > { %145 = sbr.rel (%p1559_p6) target bundleno = 96 (0x60), region = 16 }
  0x14   : > { %156 = sbr.rel (!%p67_p3) target bundleno = 96 (0x60), region = 24  ;;  %s158_s24 = sand.u32 (%p67_p3), 1, %s2071_s13  }
  0x15   : > { %s1560_s25 = sshll.u32 (%p67_p3), %s2083_s16, 3  ;;  %s1978_s26 = smul.u32 (%p67_p3), 1152, %s158_s24 }
  0x16   : > { %s2170_s29 = scalar_lea.vmem (%p67_p3), %s2690_s1, %s1560_s25 }
  0x17   : > { %v476_v0 = vld [vmem:[%s2170_s29] sm:$0xff] (%p67_p3)  ;;  %v478_v1 = vld [vmem:[%s2170_s29 + $0x10] sm:$0xff] (%p67_p3)  ;;  %s2178_s30 = scalar_lea.vmem (%p67_p3), [#allocation2], %s1978_s26 }
  0x18   : > { %v480_v2 = vld [vmem:[%s2170_s29 + $0x20] sm:$0xff] (%p67_p3)  ;;  %v482_v3 = vld [vmem:[%s2170_s29 + $0x30] sm:$0xff] (%p67_p3)  ;;  %477 = vst [vmem:[%s2178_s30] sm:$0xff] (%p67_p3), %v476_v0  ;;  %479 = vst [vmem:[%s2178_s30 + $0x8] sm:$0xff] (%p67_p3), %v478_v1 }
  0x19   : > { %v484_v4 = vld [vmem:[%s2170_s29 + $0x40] sm:$0xff] (%p67_p3)  ;;  %v486_v5 = vld [vmem:[%s2170_s29 + $0x50] sm:$0xff] (%p67_p3)  ;;  %481 = vst [vmem:[%s2178_s30 + $0x10] sm:$0xff] (%p67_p3), %v480_v2  ;;  %483 = vst [vmem:[%s2178_s30 + $0x18] sm:$0xff] (%p67_p3), %v482_v3 }
  0x1a   : > { %485 = vst [vmem:[%s2178_s30 + $0x20] sm:$0xff] (%p67_p3), %v484_v4  ;;  %487 = vst [vmem:[%s2178_s30 + $0x28] sm:$0xff] (%p67_p3), %v486_v5  ;;  %v488_v6 = vld [vmem:[%s2170_s29 + $0x60] sm:$0xff] (%p67_p3)  ;;  %v490_v7 = vld [vmem:[%s2170_s29 + $0x70] sm:$0xff] (%p67_p3) }
  0x1b   : > { %v492_v8 = vld [vmem:[%s2170_s29 + $0x80] sm:$0xff]  ;;  %489 = vst [vmem:[%s2178_s30 + $0x30] sm:$0xff] %v488_v6  ;;  %491 = vst [vmem:[%s2178_s30 + $0x38] sm:$0xff] %v490_v7  ;;  %v494_v9 = vld [vmem:[%s2170_s29 + $0x90] sm:$0xff] }
  0x1c   : > { %493 = vst [vmem:[%s2178_s30 + $0x40] sm:$0xff] %v492_v8  ;;  %v496_v10 = vld [vmem:[%s2170_s29 + $0xa0] sm:$0xff]  ;;  %v498_v11 = vld [vmem:[%s2170_s29 + $0xb0] sm:$0xff]  ;;  %495 = vst [vmem:[%s2178_s30 + $0x48] sm:$0xff] %v494_v9 }
  0x1d   : > { %497 = vst [vmem:[%s2178_s30 + $0x50] sm:$0xff] %v496_v10  ;;  %499 = vst [vmem:[%s2178_s30 + $0x58] sm:$0xff] %v498_v11  ;;  %v500_v12 = vld [vmem:[%s2170_s29 + $0xc0] sm:$0xff]  ;;  %v502_v13 = vld [vmem:[%s2170_s29 + $0xd0] sm:$0xff] }
  0x1e   : > { %v504_v14 = vld [vmem:[%s2170_s29 + $0xe0] sm:$0xff]  ;;  %501 = vst [vmem:[%s2178_s30 + $0x60] sm:$0xff] %v500_v12  ;;  %503 = vst [vmem:[%s2178_s30 + $0x68] sm:$0xff] %v502_v13  ;;  %v506_v15 = vld [vmem:[%s2170_s29 + $0xf0] sm:$0xff] }
  0x1f   : > { %505 = vst [vmem:[%s2178_s30 + $0x70] sm:$0xff] %v504_v14  ;;  %v508_v16 = vld [vmem:[%s2170_s29 + $0x100] sm:$0xff]  ;;  %v510_v17 = vld [vmem:[%s2170_s29 + $0x110] sm:$0xff]  ;;  %507 = vst [vmem:[%s2178_s30 + $0x78] sm:$0xff] %v506_v15 }
  0x20   : > { %509 = vst [vmem:[%s2178_s30 + $0x80] sm:$0xff] %v508_v16  ;;  %511 = vst [vmem:[%s2178_s30 + $0x88] sm:$0xff] %v510_v17  ;;  %v512_v18 = vld [vmem:[%s2170_s29 + $0x120] sm:$0xff]  ;;  %v514_v19 = vld [vmem:[%s2170_s29 + $0x130] sm:$0xff] }
  0x21   : > { %v516_v20 = vld [vmem:[%s2170_s29 + $0x140] sm:$0xff]  ;;  %513 = vst [vmem:[%s2178_s30 + $0x90] sm:$0xff] %v512_v18  ;;  %515 = vst [vmem:[%s2178_s30 + $0x98] sm:$0xff] %v514_v19  ;;  %v518_v21 = vld [vmem:[%s2170_s29 + $0x150] sm:$0xff] }
  0x22   : > { %517 = vst [vmem:[%s2178_s30 + $0xa0] sm:$0xff] %v516_v20  ;;  %v520_v22 = vld [vmem:[%s2170_s29 + $0x160] sm:$0xff]  ;;  %v522_v23 = vld [vmem:[%s2170_s29 + $0x170] sm:$0xff]  ;;  %519 = vst [vmem:[%s2178_s30 + $0xa8] sm:$0xff] %v518_v21 }
  0x23   : > { %521 = vst [vmem:[%s2178_s30 + $0xb0] sm:$0xff] %v520_v22  ;;  %523 = vst [vmem:[%s2178_s30 + $0xb8] sm:$0xff] %v522_v23  ;;  %v524_v24 = vld [vmem:[%s2170_s29 + $0x180] sm:$0xff]  ;;  %v526_v25 = vld [vmem:[%s2170_s29 + $0x190] sm:$0xff] }
  0x24   : > { %v528_v26 = vld [vmem:[%s2170_s29 + $0x1a0] sm:$0xff]  ;;  %525 = vst [vmem:[%s2178_s30 + $0xc0] sm:$0xff] %v524_v24  ;;  %527 = vst [vmem:[%s2178_s30 + $0xc8] sm:$0xff] %v526_v25  ;;  %v530_v27 = vld [vmem:[%s2170_s29 + $0x1b0] sm:$0xff] }
  0x25   : > { %529 = vst [vmem:[%s2178_s30 + $0xd0] sm:$0xff] %v528_v26  ;;  %v532_v28 = vld [vmem:[%s2170_s29 + $0x1c0] sm:$0xff]  ;;  %v534_v29 = vld [vmem:[%s2170_s29 + $0x1d0] sm:$0xff]  ;;  %531 = vst [vmem:[%s2178_s30 + $0xd8] sm:$0xff] %v530_v27 }
  0x26   : > { %533 = vst [vmem:[%s2178_s30 + $0xe0] sm:$0xff] %v532_v28  ;;  %535 = vst [vmem:[%s2178_s30 + $0xe8] sm:$0xff] %v534_v29  ;;  %v536_v30 = vld [vmem:[%s2170_s29 + $0x1e0] sm:$0xff]  ;;  %v538_v31 = vld [vmem:[%s2170_s29 + $0x1f0] sm:$0xff] }
  0x27   : > { %v540_v32 = vld [vmem:[%s2170_s29 + $0x200] sm:$0xff]  ;;  %537 = vst [vmem:[%s2178_s30 + $0xf0] sm:$0xff] %v536_v30  ;;  %539 = vst [vmem:[%s2178_s30 + $0xf8] sm:$0xff] %v538_v31  ;;  %v542_v33 = vld [vmem:[%s2170_s29 + $0x210] sm:$0xff] }
  0x28   : > { %541 = vst [vmem:[%s2178_s30 + $0x100] sm:$0xff] %v540_v32  ;;  %v544_v34 = vld [vmem:[%s2170_s29 + $0x220] sm:$0xff]  ;;  %v546_v35 = vld [vmem:[%s2170_s29 + $0x230] sm:$0xff]  ;;  %543 = vst [vmem:[%s2178_s30 + $0x108] sm:$0xff] %v542_v33 }
  0x29   : > { %545 = vst [vmem:[%s2178_s30 + $0x110] sm:$0xff] %v544_v34  ;;  %547 = vst [vmem:[%s2178_s30 + $0x118] sm:$0xff] %v546_v35  ;;  %v548_v36 = vld [vmem:[%s2170_s29 + $0x240] sm:$0xff]  ;;  %v550_v37 = vld [vmem:[%s2170_s29 + $0x250] sm:$0xff] }
  0x2a   : > { %v552_v38 = vld [vmem:[%s2170_s29 + $0x260] sm:$0xff]  ;;  %549 = vst [vmem:[%s2178_s30 + $0x120] sm:$0xff] %v548_v36  ;;  %551 = vst [vmem:[%s2178_s30 + $0x128] sm:$0xff] %v550_v37  ;;  %v554_v39 = vld [vmem:[%s2170_s29 + $0x270] sm:$0xff] }
  0x2b   : > { %553 = vst [vmem:[%s2178_s30 + $0x130] sm:$0xff] %v552_v38  ;;  %v556_v40 = vld [vmem:[%s2170_s29 + $0x280] sm:$0xff]  ;;  %v558_v41 = vld [vmem:[%s2170_s29 + $0x290] sm:$0xff]  ;;  %555 = vst [vmem:[%s2178_s30 + $0x138] sm:$0xff] %v554_v39 }
  0x2c   : > { %557 = vst [vmem:[%s2178_s30 + $0x140] sm:$0xff] %v556_v40  ;;  %559 = vst [vmem:[%s2178_s30 + $0x148] sm:$0xff] %v558_v41  ;;  %v560_v42 = vld [vmem:[%s2170_s29 + $0x2a0] sm:$0xff]  ;;  %v562_v43 = vld [vmem:[%s2170_s29 + $0x2b0] sm:$0xff] }
  0x2d   : > { %v564_v44 = vld [vmem:[%s2170_s29 + $0x2c0] sm:$0xff]  ;;  %561 = vst [vmem:[%s2178_s30 + $0x150] sm:$0xff] %v560_v42  ;;  %563 = vst [vmem:[%s2178_s30 + $0x158] sm:$0xff] %v562_v43  ;;  %v566_v45 = vld [vmem:[%s2170_s29 + $0x2d0] sm:$0xff] }
  0x2e   : > { %565 = vst [vmem:[%s2178_s30 + $0x160] sm:$0xff] %v564_v44  ;;  %v568_v46 = vld [vmem:[%s2170_s29 + $0x2e0] sm:$0xff]  ;;  %v570_v47 = vld [vmem:[%s2170_s29 + $0x2f0] sm:$0xff]  ;;  %567 = vst [vmem:[%s2178_s30 + $0x168] sm:$0xff] %v566_v45 }
  0x2f   : > { %569 = vst [vmem:[%s2178_s30 + $0x170] sm:$0xff] %v568_v46  ;;  %571 = vst [vmem:[%s2178_s30 + $0x178] sm:$0xff] %v570_v47  ;;  %v572_v48 = vld [vmem:[%s2170_s29 + $0x300] sm:$0xff]  ;;  %v574_v49 = vld [vmem:[%s2170_s29 + $0x310] sm:$0xff] }
  0x30   : > { %v576_v50 = vld [vmem:[%s2170_s29 + $0x320] sm:$0xff]  ;;  %573 = vst [vmem:[%s2178_s30 + $0x180] sm:$0xff] %v572_v48  ;;  %575 = vst [vmem:[%s2178_s30 + $0x188] sm:$0xff] %v574_v49  ;;  %v578_v51 = vld [vmem:[%s2170_s29 + $0x330] sm:$0xff] }
  0x31   : > { %577 = vst [vmem:[%s2178_s30 + $0x190] sm:$0xff] %v576_v50  ;;  %v580_v52 = vld [vmem:[%s2170_s29 + $0x340] sm:$0xff]  ;;  %v582_v53 = vld [vmem:[%s2170_s29 + $0x350] sm:$0xff]  ;;  %579 = vst [vmem:[%s2178_s30 + $0x198] sm:$0xff] %v578_v51 }
  0x32   : > { %581 = vst [vmem:[%s2178_s30 + $0x1a0] sm:$0xff] %v580_v52  ;;  %583 = vst [vmem:[%s2178_s30 + $0x1a8] sm:$0xff] %v582_v53  ;;  %v584_v54 = vld [vmem:[%s2170_s29 + $0x360] sm:$0xff]  ;;  %v586_v55 = vld [vmem:[%s2170_s29 + $0x370] sm:$0xff] }
  0x33   : > { %v588_v56 = vld [vmem:[%s2170_s29 + $0x380] sm:$0xff]  ;;  %585 = vst [vmem:[%s2178_s30 + $0x1b0] sm:$0xff] %v584_v54  ;;  %587 = vst [vmem:[%s2178_s30 + $0x1b8] sm:$0xff] %v586_v55  ;;  %v590_v57 = vld [vmem:[%s2170_s29 + $0x390] sm:$0xff] }
  0x34   : > { %589 = vst [vmem:[%s2178_s30 + $0x1c0] sm:$0xff] %v588_v56  ;;  %v592_v58 = vld [vmem:[%s2170_s29 + $0x3a0] sm:$0xff]  ;;  %v594_v59 = vld [vmem:[%s2170_s29 + $0x3b0] sm:$0xff]  ;;  %591 = vst [vmem:[%s2178_s30 + $0x1c8] sm:$0xff] %v590_v57 }
  0x35   : > { %593 = vst [vmem:[%s2178_s30 + $0x1d0] sm:$0xff] %v592_v58  ;;  %595 = vst [vmem:[%s2178_s30 + $0x1d8] sm:$0xff] %v594_v59  ;;  %v596_v60 = vld [vmem:[%s2170_s29 + $0x3c0] sm:$0xff]  ;;  %v598_v61 = vld [vmem:[%s2170_s29 + $0x3d0] sm:$0xff] }
  0x36   : > { %v600_v62 = vld [vmem:[%s2170_s29 + $0x3e0] sm:$0xff]  ;;  %597 = vst [vmem:[%s2178_s30 + $0x1e0] sm:$0xff] %v596_v60  ;;  %599 = vst [vmem:[%s2178_s30 + $0x1e8] sm:$0xff] %v598_v61  ;;  %v602_v63 = vld [vmem:[%s2170_s29 + $0x3f0] sm:$0xff] }
  0x37   : > { %601 = vst [vmem:[%s2178_s30 + $0x1f0] sm:$0xff] %v600_v62  ;;  %v604_v0 = vld [vmem:[%s2170_s29 + $0x400] sm:$0xff]  ;;  %v606_v1 = vld [vmem:[%s2170_s29 + $0x410] sm:$0xff]  ;;  %603 = vst [vmem:[%s2178_s30 + $0x1f8] sm:$0xff] %v602_v63 }
  0x38   : > { %605 = vst [vmem:[%s2178_s30 + $0x200] sm:$0xff] %v604_v0  ;;  %607 = vst [vmem:[%s2178_s30 + $0x208] sm:$0xff] %v606_v1  ;;  %v608_v2 = vld [vmem:[%s2170_s29 + $0x420] sm:$0xff]  ;;  %v610_v3 = vld [vmem:[%s2170_s29 + $0x430] sm:$0xff] }
  0x39   : > { %v612_v4 = vld [vmem:[%s2170_s29 + $0x440] sm:$0xff]  ;;  %609 = vst [vmem:[%s2178_s30 + $0x210] sm:$0xff] %v608_v2  ;;  %611 = vst [vmem:[%s2178_s30 + $0x218] sm:$0xff] %v610_v3  ;;  %v614_v5 = vld [vmem:[%s2170_s29 + $0x450] sm:$0xff] }
  0x3a   : > { %613 = vst [vmem:[%s2178_s30 + $0x220] sm:$0xff] %v612_v4  ;;  %v616_v6 = vld [vmem:[%s2170_s29 + $0x460] sm:$0xff]  ;;  %v618_v7 = vld [vmem:[%s2170_s29 + $0x470] sm:$0xff]  ;;  %615 = vst [vmem:[%s2178_s30 + $0x228] sm:$0xff] %v614_v5 }
  0x3b   : > { %617 = vst [vmem:[%s2178_s30 + $0x230] sm:$0xff] %v616_v6  ;;  %619 = vst [vmem:[%s2178_s30 + $0x238] sm:$0xff] %v618_v7  ;;  %v620_v8 = vld [vmem:[%s2170_s29 + $0x480] sm:$0xff]  ;;  %v622_v9 = vld [vmem:[%s2170_s29 + $0x490] sm:$0xff] }
  0x3c   : > { %v624_v10 = vld [vmem:[%s2170_s29 + $0x4a0] sm:$0xff]  ;;  %621 = vst [vmem:[%s2178_s30 + $0x240] sm:$0xff] %v620_v8  ;;  %623 = vst [vmem:[%s2178_s30 + $0x248] sm:$0xff] %v622_v9  ;;  %v626_v11 = vld [vmem:[%s2170_s29 + $0x4b0] sm:$0xff] }
  0x3d   : > { %625 = vst [vmem:[%s2178_s30 + $0x250] sm:$0xff] %v624_v10  ;;  %v628_v12 = vld [vmem:[%s2170_s29 + $0x4c0] sm:$0xff]  ;;  %v630_v13 = vld [vmem:[%s2170_s29 + $0x4d0] sm:$0xff]  ;;  %627 = vst [vmem:[%s2178_s30 + $0x258] sm:$0xff] %v626_v11 }
  0x3e   : > { %629 = vst [vmem:[%s2178_s30 + $0x260] sm:$0xff] %v628_v12  ;;  %631 = vst [vmem:[%s2178_s30 + $0x268] sm:$0xff] %v630_v13  ;;  %v632_v14 = vld [vmem:[%s2170_s29 + $0x4e0] sm:$0xff]  ;;  %v634_v15 = vld [vmem:[%s2170_s29 + $0x4f0] sm:$0xff] }
  0x3f   : > { %v636_v16 = vld [vmem:[%s2170_s29 + $0x500] sm:$0xff]  ;;  %633 = vst [vmem:[%s2178_s30 + $0x270] sm:$0xff] %v632_v14  ;;  %635 = vst [vmem:[%s2178_s30 + $0x278] sm:$0xff] %v634_v15  ;;  %v638_v17 = vld [vmem:[%s2170_s29 + $0x510] sm:$0xff] }
  0x40   : > { %637 = vst [vmem:[%s2178_s30 + $0x280] sm:$0xff] %v636_v16  ;;  %v640_v18 = vld [vmem:[%s2170_s29 + $0x520] sm:$0xff]  ;;  %v642_v19 = vld [vmem:[%s2170_s29 + $0x530] sm:$0xff]  ;;  %639 = vst [vmem:[%s2178_s30 + $0x288] sm:$0xff] %v638_v17 }
  0x41   : > { %641 = vst [vmem:[%s2178_s30 + $0x290] sm:$0xff] %v640_v18  ;;  %643 = vst [vmem:[%s2178_s30 + $0x298] sm:$0xff] %v642_v19  ;;  %v644_v20 = vld [vmem:[%s2170_s29 + $0x540] sm:$0xff]  ;;  %v646_v21 = vld [vmem:[%s2170_s29 + $0x550] sm:$0xff] }
  0x42   : > { %v648_v22 = vld [vmem:[%s2170_s29 + $0x560] sm:$0xff]  ;;  %645 = vst [vmem:[%s2178_s30 + $0x2a0] sm:$0xff] %v644_v20  ;;  %647 = vst [vmem:[%s2178_s30 + $0x2a8] sm:$0xff] %v646_v21  ;;  %v650_v23 = vld [vmem:[%s2170_s29 + $0x570] sm:$0xff] }
  0x43   : > { %649 = vst [vmem:[%s2178_s30 + $0x2b0] sm:$0xff] %v648_v22  ;;  %v652_v24 = vld [vmem:[%s2170_s29 + $0x580] sm:$0xff]  ;;  %v654_v25 = vld [vmem:[%s2170_s29 + $0x590] sm:$0xff]  ;;  %651 = vst [vmem:[%s2178_s30 + $0x2b8] sm:$0xff] %v650_v23 }
  0x44   : > { %653 = vst [vmem:[%s2178_s30 + $0x2c0] sm:$0xff] %v652_v24  ;;  %655 = vst [vmem:[%s2178_s30 + $0x2c8] sm:$0xff] %v654_v25  ;;  %v656_v26 = vld [vmem:[%s2170_s29 + $0x5a0] sm:$0xff]  ;;  %v658_v27 = vld [vmem:[%s2170_s29 + $0x5b0] sm:$0xff] }
  0x45   : > { %v660_v28 = vld [vmem:[%s2170_s29 + $0x5c0] sm:$0xff]  ;;  %657 = vst [vmem:[%s2178_s30 + $0x2d0] sm:$0xff] %v656_v26  ;;  %659 = vst [vmem:[%s2178_s30 + $0x2d8] sm:$0xff] %v658_v27  ;;  %v662_v29 = vld [vmem:[%s2170_s29 + $0x5d0] sm:$0xff] }
  0x46   : > { %661 = vst [vmem:[%s2178_s30 + $0x2e0] sm:$0xff] %v660_v28  ;;  %v664_v30 = vld [vmem:[%s2170_s29 + $0x5e0] sm:$0xff]  ;;  %v666_v31 = vld [vmem:[%s2170_s29 + $0x5f0] sm:$0xff]  ;;  %663 = vst [vmem:[%s2178_s30 + $0x2e8] sm:$0xff] %v662_v29 }
  0x47   : > { %665 = vst [vmem:[%s2178_s30 + $0x2f0] sm:$0xff] %v664_v30  ;;  %667 = vst [vmem:[%s2178_s30 + $0x2f8] sm:$0xff] %v666_v31  ;;  %v668_v32 = vld [vmem:[%s2170_s29 + $0x600] sm:$0xff]  ;;  %v670_v33 = vld [vmem:[%s2170_s29 + $0x610] sm:$0xff] }
  0x48   : > { %v672_v34 = vld [vmem:[%s2170_s29 + $0x620] sm:$0xff]  ;;  %669 = vst [vmem:[%s2178_s30 + $0x300] sm:$0xff] %v668_v32  ;;  %671 = vst [vmem:[%s2178_s30 + $0x308] sm:$0xff] %v670_v33  ;;  %v674_v35 = vld [vmem:[%s2170_s29 + $0x630] sm:$0xff] }
  0x49   : > { %673 = vst [vmem:[%s2178_s30 + $0x310] sm:$0xff] %v672_v34  ;;  %v676_v36 = vld [vmem:[%s2170_s29 + $0x640] sm:$0xff]  ;;  %v678_v37 = vld [vmem:[%s2170_s29 + $0x650] sm:$0xff]  ;;  %675 = vst [vmem:[%s2178_s30 + $0x318] sm:$0xff] %v674_v35 }
  0x4a   : > { %677 = vst [vmem:[%s2178_s30 + $0x320] sm:$0xff] %v676_v36  ;;  %679 = vst [vmem:[%s2178_s30 + $0x328] sm:$0xff] %v678_v37  ;;  %v680_v38 = vld [vmem:[%s2170_s29 + $0x660] sm:$0xff]  ;;  %v682_v39 = vld [vmem:[%s2170_s29 + $0x670] sm:$0xff] }
  0x4b   : > { %v684_v40 = vld [vmem:[%s2170_s29 + $0x680] sm:$0xff]  ;;  %681 = vst [vmem:[%s2178_s30 + $0x330] sm:$0xff] %v680_v38  ;;  %683 = vst [vmem:[%s2178_s30 + $0x338] sm:$0xff] %v682_v39  ;;  %v686_v41 = vld [vmem:[%s2170_s29 + $0x690] sm:$0xff] }
  0x4c   : > { %685 = vst [vmem:[%s2178_s30 + $0x340] sm:$0xff] %v684_v40  ;;  %v688_v42 = vld [vmem:[%s2170_s29 + $0x6a0] sm:$0xff]  ;;  %v690_v43 = vld [vmem:[%s2170_s29 + $0x6b0] sm:$0xff]  ;;  %687 = vst [vmem:[%s2178_s30 + $0x348] sm:$0xff] %v686_v41 }
  0x4d   : > { %689 = vst [vmem:[%s2178_s30 + $0x350] sm:$0xff] %v688_v42  ;;  %691 = vst [vmem:[%s2178_s30 + $0x358] sm:$0xff] %v690_v43  ;;  %v692_v44 = vld [vmem:[%s2170_s29 + $0x6c0] sm:$0xff]  ;;  %v694_v45 = vld [vmem:[%s2170_s29 + $0x6d0] sm:$0xff] }
  0x4e   : > { %v696_v46 = vld [vmem:[%s2170_s29 + $0x6e0] sm:$0xff]  ;;  %693 = vst [vmem:[%s2178_s30 + $0x360] sm:$0xff] %v692_v44  ;;  %695 = vst [vmem:[%s2178_s30 + $0x368] sm:$0xff] %v694_v45  ;;  %v698_v47 = vld [vmem:[%s2170_s29 + $0x6f0] sm:$0xff] }
  0x4f   : > { %697 = vst [vmem:[%s2178_s30 + $0x370] sm:$0xff] %v696_v46  ;;  %v700_v48 = vld [vmem:[%s2170_s29 + $0x700] sm:$0xff]  ;;  %v702_v49 = vld [vmem:[%s2170_s29 + $0x710] sm:$0xff]  ;;  %699 = vst [vmem:[%s2178_s30 + $0x378] sm:$0xff] %v698_v47 }
  0x50   : > { %701 = vst [vmem:[%s2178_s30 + $0x380] sm:$0xff] %v700_v48  ;;  %703 = vst [vmem:[%s2178_s30 + $0x388] sm:$0xff] %v702_v49  ;;  %v704_v50 = vld [vmem:[%s2170_s29 + $0x720] sm:$0xff]  ;;  %v706_v51 = vld [vmem:[%s2170_s29 + $0x730] sm:$0xff] }
  0x51   : > { %v708_v52 = vld [vmem:[%s2170_s29 + $0x740] sm:$0xff]  ;;  %705 = vst [vmem:[%s2178_s30 + $0x390] sm:$0xff] %v704_v50  ;;  %707 = vst [vmem:[%s2178_s30 + $0x398] sm:$0xff] %v706_v51  ;;  %v710_v53 = vld [vmem:[%s2170_s29 + $0x750] sm:$0xff] }
  0x52   : > { %709 = vst [vmem:[%s2178_s30 + $0x3a0] sm:$0xff] %v708_v52  ;;  %v712_v54 = vld [vmem:[%s2170_s29 + $0x760] sm:$0xff]  ;;  %v714_v55 = vld [vmem:[%s2170_s29 + $0x770] sm:$0xff]  ;;  %711 = vst [vmem:[%s2178_s30 + $0x3a8] sm:$0xff] %v710_v53 }
  0x53   : > { %713 = vst [vmem:[%s2178_s30 + $0x3b0] sm:$0xff] %v712_v54  ;;  %715 = vst [vmem:[%s2178_s30 + $0x3b8] sm:$0xff] %v714_v55  ;;  %v716_v56 = vld [vmem:[%s2170_s29 + $0x780] sm:$0xff]  ;;  %v718_v57 = vld [vmem:[%s2170_s29 + $0x790] sm:$0xff] }
  0x54   : > { %v720_v58 = vld [vmem:[%s2170_s29 + $0x7a0] sm:$0xff]  ;;  %717 = vst [vmem:[%s2178_s30 + $0x3c0] sm:$0xff] %v716_v56  ;;  %719 = vst [vmem:[%s2178_s30 + $0x3c8] sm:$0xff] %v718_v57  ;;  %v722_v59 = vld [vmem:[%s2170_s29 + $0x7b0] sm:$0xff] }
  0x55   : > { %721 = vst [vmem:[%s2178_s30 + $0x3d0] sm:$0xff] %v720_v58  ;;  %v724_v60 = vld [vmem:[%s2170_s29 + $0x7c0] sm:$0xff]  ;;  %v726_v61 = vld [vmem:[%s2170_s29 + $0x7d0] sm:$0xff]  ;;  %723 = vst [vmem:[%s2178_s30 + $0x3d8] sm:$0xff] %v722_v59 }
  0x56   : > { %725 = vst [vmem:[%s2178_s30 + $0x3e0] sm:$0xff] %v724_v60  ;;  %727 = vst [vmem:[%s2178_s30 + $0x3e8] sm:$0xff] %v726_v61  ;;  %v728_v62 = vld [vmem:[%s2170_s29 + $0x7e0] sm:$0xff]  ;;  %v730_v63 = vld [vmem:[%s2170_s29 + $0x7f0] sm:$0xff] }
  0x57   : > { %v732_v0 = vld [vmem:[%s2170_s29 + $0x800] sm:$0xff]  ;;  %729 = vst [vmem:[%s2178_s30 + $0x3f0] sm:$0xff] %v728_v62  ;;  %731 = vst [vmem:[%s2178_s30 + $0x3f8] sm:$0xff] %v730_v63  ;;  %v734_v1 = vld [vmem:[%s2170_s29 + $0x810] sm:$0xff] }
  0x58   : > { %733 = vst [vmem:[%s2178_s30 + $0x400] sm:$0xff] %v732_v0  ;;  %v736_v2 = vld [vmem:[%s2170_s29 + $0x820] sm:$0xff]  ;;  %v738_v3 = vld [vmem:[%s2170_s29 + $0x830] sm:$0xff]  ;;  %735 = vst [vmem:[%s2178_s30 + $0x408] sm:$0xff] %v734_v1 }
  0x59   : > { %737 = vst [vmem:[%s2178_s30 + $0x410] sm:$0xff] %v736_v2  ;;  %739 = vst [vmem:[%s2178_s30 + $0x418] sm:$0xff] %v738_v3  ;;  %v740_v4 = vld [vmem:[%s2170_s29 + $0x840] sm:$0xff]  ;;  %v742_v5 = vld [vmem:[%s2170_s29 + $0x850] sm:$0xff] }
  0x5a   : > { %v744_v6 = vld [vmem:[%s2170_s29 + $0x860] sm:$0xff]  ;;  %741 = vst [vmem:[%s2178_s30 + $0x420] sm:$0xff] %v740_v4  ;;  %743 = vst [vmem:[%s2178_s30 + $0x428] sm:$0xff] %v742_v5  ;;  %v746_v7 = vld [vmem:[%s2170_s29 + $0x870] sm:$0xff] }
  0x5b   : > { %745 = vst [vmem:[%s2178_s30 + $0x430] sm:$0xff] %v744_v6  ;;  %v748_v8 = vld [vmem:[%s2170_s29 + $0x880] sm:$0xff]  ;;  %v750_v9 = vld [vmem:[%s2170_s29 + $0x890] sm:$0xff]  ;;  %747 = vst [vmem:[%s2178_s30 + $0x438] sm:$0xff] %v746_v7 }
  0x5c   : > { %749 = vst [vmem:[%s2178_s30 + $0x440] sm:$0xff] %v748_v8  ;;  %751 = vst [vmem:[%s2178_s30 + $0x448] sm:$0xff] %v750_v9  ;;  %v752_v10 = vld [vmem:[%s2170_s29 + $0x8a0] sm:$0xff]  ;;  %v754_v11 = vld [vmem:[%s2170_s29 + $0x8b0] sm:$0xff] }
  0x5d   : > { %v756_v12 = vld [vmem:[%s2170_s29 + $0x8c0] sm:$0xff]  ;;  %753 = vst [vmem:[%s2178_s30 + $0x450] sm:$0xff] %v752_v10  ;;  %755 = vst [vmem:[%s2178_s30 + $0x458] sm:$0xff] %v754_v11  ;;  %v758_v13 = vld [vmem:[%s2170_s29 + $0x8d0] sm:$0xff] }
  0x5e   : > { %757 = vst [vmem:[%s2178_s30 + $0x460] sm:$0xff] %v756_v12  ;;  %v760_v14 = vld [vmem:[%s2170_s29 + $0x8e0] sm:$0xff]  ;;  %v762_v15 = vld [vmem:[%s2170_s29 + $0x8f0] sm:$0xff]  ;;  %759 = vst [vmem:[%s2178_s30 + $0x468] sm:$0xff] %v758_v13 }
  0x5f   : > { %761 = vst [vmem:[%s2178_s30 + $0x470] sm:$0xff] %v760_v14  ;;  %763 = vst [vmem:[%s2178_s30 + $0x478] sm:$0xff] %v762_v15 }
  0x60 PF: > { %p1561_p7 = scmp.ge.s32.totalorder %s2091_s18, 1  ;;  %p774_p8 = scmp.lt.s32.totalorder %s2091_s18, 5 }
  0x62   : > { %p775_p9 = pnand %p1561_p7, %p774_p8 }
  0x63   : > { %s781_s4 = sand.u32 (!%p775_p9), 1, %s2067_s12   ;;  %p815_p10 = scmp.lt.s32.totalorder (!%p775_p9), %s2079_s15, 1 }
  0x64   : > { %778 = sbr.rel (%p775_p9) target bundleno = 429 (0x1ad), region = 66  ;;  %p820_p11 = scmp.lt.s32.totalorder (!%p775_p9), %s2075_s14, 1 }
  0x65   : > { %s1979_s5 = smul.u32 (!%p775_p9), 1152, %s781_s4 }
  0x67   : > { %s2465_s6 = scalar_lea.vmem (!%p775_p9), [#allocation2], %s1979_s5 }
  0x68   : > { %v883_v16 = vld [vmem:[%s2465_s6 + $0x80] sm:$0xff] (!%p775_p9)  ;;  %v884_v17 = vld [vmem:[%s2465_s6 + $0x88] sm:$0xff] (!%p775_p9)  ;;  %v885_v27 = vld [vmem:[%s2465_s6 + $0x90] sm:$0xff] (!%p775_p9) }
  0x69   : > { %v915_v18 = vld [vmem:[%s2465_s6 + $0x180] sm:$0xff] (!%p775_p9)  ;;  %v1802_v19 = vpack.c.bf16 (!%p775_p9), %v884_v17, %v883_v16  ;;  %v916_v20 = vld [vmem:[%s2465_s6 + $0x188] sm:$0xff] (!%p775_p9)  ;;  %v886_v29 = vld [vmem:[%s2465_s6 + $0x98] sm:$0xff] (!%p775_p9) }
  0x6a   : > { %v867_v21 = vld [vmem:[%s2465_s6] sm:$0xff] (!%p775_p9)  ;;  %v868_v22 = vld [vmem:[%s2465_s6 + $0x8] sm:$0xff] (!%p775_p9)  ;;  %v1834_v23 = vpack.c.bf16 (!%p775_p9), %v916_v20, %v915_v18  ;;  %v917_v30 = vld [vmem:[%s2465_s6 + $0x190] sm:$0xff] (!%p775_p9)  ;;  %v1806_v32 = vpack.c.bf16 (!%p775_p9), %v886_v29, %v885_v27 }
  0x6b   : > { %v1804_v24 = vpack.c.bf16 %v868_v22, %v867_v21  ;;  %v899_v25 = vld [vmem:[%s2465_s6 + $0x100] sm:$0xff]  ;;  %v900_v26 = vld [vmem:[%s2465_s6 + $0x108] sm:$0xff]  ;;  %1803 = vmatprep.subr.bf16.mxu0 %v1802_v19  ;;  %v918_v31 = vld [vmem:[%s2465_s6 + $0x198] sm:$0xff]  ;;  %s2706_s15 = smov (!%p815_p10, %s2079_s15), 1  ;;  %s2708_s14 = smov (!%p820_p11, %s2075_s14), 1 }
  0x6c   : > { %v1836_v28 = vpack.c.bf16 %v900_v26, %v899_v25  ;;  %1835 = vmatprep.subr.bf16.mxu1 %v1834_v23  ;;  %v1838_v33 = vpack.c.bf16 %v918_v31, %v917_v30  ;;  %v869_v34 = vld [vmem:[%s2465_s6 + $0x10] sm:$0xff]  ;;  %v870_v35 = vld [vmem:[%s2465_s6 + $0x18] sm:$0xff]  ;;  %v887_v39 = vld [vmem:[%s2465_s6 + $0xa0] sm:$0xff]  ;;  %s1980_s7 = smul.u32 288, %s2706_s15  ;;  %s1563_s11 = sshll.u32 %s2706_s15, 1 }
  0x6d   : > { %1805 = vmatpush3.bf16.msra.mxu0 %v1804_v24  ;;  %v901_v36 = vld [vmem:[%s2465_s6 + $0x110] sm:$0xff]  ;;  %v1808_v37 = vpack.c.bf16 %v870_v35, %v869_v34  ;;  %v902_v38 = vld [vmem:[%s2465_s6 + $0x118] sm:$0xff]  ;;  %v888_v40 = vld [vmem:[%s2465_s6 + $0xa8] sm:$0xff]  ;;  %s822_s22 = scalar_lea.vmem %s2691_s2, %s2708_s14  ;;  %s828_s24 = sadd.s32 %s1563_s11, %s2708_s14 }
  0x6e   : > { %1837 = vmatpush3.bf16.msra.mxu1 %v1836_v28  ;;  %1807 = vmatprep.subr.bf16.mxu0 %v1806_v32  ;;  %v1840_v41 = vpack.c.bf16 %v902_v38, %v901_v36  ;;  %v1810_v42 = vpack.c.bf16 %v888_v40, %v887_v39  ;;  %v919_v43 = vld [vmem:[%s2465_s6 + $0x1a0] sm:$0xff]  ;;  %v920_v44 = vld [vmem:[%s2465_s6 + $0x1a8] sm:$0xff]  ;;  %v889_v51 = vld [vmem:[%s2465_s6 + $0xb0] sm:$0xff]  ;;  %s2527_s10 = scalar_lea.vmem %s2689_s0, %s1980_s7  ;;  %s1564_s25 = sshll.u32 %s828_s24, 3 }
  0x6f   : > { %1839 = vmatprep.subr.bf16.mxu1 %v1838_v33  ;;  %v871_v45 = vld [vmem:[%s2465_s6 + $0x20] sm:$0xff]  ;;  %v1842_v46 = vpack.c.bf16 %v920_v44, %v919_v43  ;;  %v872_v47 = vld [vmem:[%s2465_s6 + $0x28] sm:$0xff]  ;;  %v890_v52 = vld [vmem:[%s2465_s6 + $0xb8] sm:$0xff]  ;;  %s830_s28 = scalar_lea.vmem %s2692_s3, %s1564_s25 }
  0x70   : > { %v903_v48 = vld [vmem:[%s2465_s6 + $0x120] sm:$0xff]  ;;  %v904_v49 = vld [vmem:[%s2465_s6 + $0x128] sm:$0xff]  ;;  %v1812_v50 = vpack.c.bf16 %v872_v47, %v871_v45  ;;  %v921_v53 = vld [vmem:[%s2465_s6 + $0x1b0] sm:$0xff]  ;;  %v1814_v55 = vpack.c.bf16 %v890_v52, %v889_v51 }
  0x71   : > { %1809 = vmatpush3.bf16.msra.mxu0 %v1808_v37  ;;  %v1844_v54 = vpack.c.bf16 %v904_v49, %v903_v48  ;;  %v922_v56 = vld [vmem:[%s2465_s6 + $0x1b8] sm:$0xff]  ;;  %v873_v57 = vld [vmem:[%s2465_s6 + $0x30] sm:$0xff]  ;;  %v891_v62 = vld [vmem:[%s2465_s6 + $0xc0] sm:$0xff] }
  0x72   : > { %1841 = vmatpush3.bf16.msra.mxu1 %v1840_v41  ;;  %1811 = vmatprep.subr.bf16.mxu0 %v1810_v42  ;;  %v874_v58 = vld [vmem:[%s2465_s6 + $0x38] sm:$0xff]  ;;  %v1846_v59 = vpack.c.bf16 %v922_v56, %v921_v53  ;;  %v905_v60 = vld [vmem:[%s2465_s6 + $0x130] sm:$0xff]  ;;  %v892_v63 = vld [vmem:[%s2465_s6 + $0xc8] sm:$0xff] }
  0x73   : > { %1843 = vmatprep.subr.bf16.mxu1 %v1842_v46  ;;  %v906_v61 = vld [vmem:[%s2465_s6 + $0x138] sm:$0xff]  ;;  %v923_v0 = vld [vmem:[%s2465_s6 + $0x1c0] sm:$0xff]  ;;  %v924_v1 = vld [vmem:[%s2465_s6 + $0x1c8] sm:$0xff]  ;;  %v1816_v2 = vpack.c.bf16 %v874_v58, %v873_v57  ;;  %v1818_v4 = vpack.c.bf16 %v892_v63, %v891_v62 }
  0x74   : > { %v1848_v3 = vpack.c.bf16 %v906_v61, %v905_v60  ;;  %v875_v5 = vld [vmem:[%s2465_s6 + $0x40] sm:$0xff]  ;;  %v876_v6 = vld [vmem:[%s2465_s6 + $0x48] sm:$0xff]  ;;  %v1850_v8 = vpack.c.bf16 %v924_v1, %v923_v0  ;;  %v893_v10 = vld [vmem:[%s2465_s6 + $0xd0] sm:$0xff] }
  0x75   : > { %1813 = vmatpush3.bf16.msra.mxu0 %v1812_v50  ;;  %v907_v7 = vld [vmem:[%s2465_s6 + $0x140] sm:$0xff]  ;;  %v908_v9 = vld [vmem:[%s2465_s6 + $0x148] sm:$0xff]  ;;  %v894_v11 = vld [vmem:[%s2465_s6 + $0xd8] sm:$0xff]  ;;  %v1820_v14 = vpack.c.bf16 %v876_v6, %v875_v5 }
  0x76   : > { %1845 = vmatpush3.bf16.msra.mxu1 %v1844_v54  ;;  %1815 = vmatprep.subr.bf16.mxu0 %v1814_v55  ;;  %v925_v12 = vld [vmem:[%s2465_s6 + $0x1d0] sm:$0xff]  ;;  %v926_v13 = vld [vmem:[%s2465_s6 + $0x1d8] sm:$0xff]  ;;  %v1852_v15 = vpack.c.bf16 %v908_v9, %v907_v7  ;;  %v1822_v16 = vpack.c.bf16 %v894_v11, %v893_v10  ;;  %v895_v22 = vld [vmem:[%s2465_s6 + $0xe0] sm:$0xff] }
  0x77   : > { %1847 = vmatprep.subr.bf16.mxu1 %v1846_v59  ;;  %v877_v17 = vld [vmem:[%s2465_s6 + $0x50] sm:$0xff]  ;;  %v878_v18 = vld [vmem:[%s2465_s6 + $0x58] sm:$0xff]  ;;  %v1854_v20 = vpack.c.bf16 %v926_v13, %v925_v12  ;;  %v896_v23 = vld [vmem:[%s2465_s6 + $0xe8] sm:$0xff] }
  0x78   : > { %v909_v19 = vld [vmem:[%s2465_s6 + $0x150] sm:$0xff]  ;;  %v910_v21 = vld [vmem:[%s2465_s6 + $0x158] sm:$0xff]  ;;  %v927_v24 = vld [vmem:[%s2465_s6 + $0x1e0] sm:$0xff]  ;;  %v1824_v26 = vpack.c.bf16 %v878_v18, %v877_v17  ;;  %v1826_v30 = vpack.c.bf16 %v896_v23, %v895_v22 }
  0x79   : > { %1817 = vmatpush3.bf16.msra.mxu0 %v1816_v2  ;;  %v928_v25 = vld [vmem:[%s2465_s6 + $0x1e8] sm:$0xff]  ;;  %v879_v27 = vld [vmem:[%s2465_s6 + $0x60] sm:$0xff]  ;;  %v1856_v29 = vpack.c.bf16 %v910_v21, %v909_v19  ;;  %v834_v33 = vld [vmem:[%s2527_s10 + $0x18] sm:$0xff] }
  0x7a   : > { %1849 = vmatpush3.bf16.msra.mxu1 %v1848_v3  ;;  %1819 = vmatprep.subr.bf16.mxu0 %v1818_v4  ;;  %v880_v28 = vld [vmem:[%s2465_s6 + $0x68] sm:$0xff]  ;;  %v911_v31 = vld [vmem:[%s2465_s6 + $0x160] sm:$0xff]  ;;  %v1858_v34 = vpack.c.bf16 %v928_v25, %v927_v24  ;;  %v897_v36 = vld [vmem:[%s2465_s6 + $0xf0] sm:$0xff] }
  0x7b   : > { %1851 = vmatprep.subr.bf16.mxu1 %v1850_v8  ;;  %v832_v32 = vld [vmem:[%s2527_s10 + $0x8] sm:$0xff]  ;;  %v898_v37 = vld [vmem:[%s2465_s6 + $0xf8] sm:$0xff]  ;;  %v929_v38 = vld [vmem:[%s2465_s6 + $0x1f0] sm:$0xff]  ;;  %1160 = vmatprep.mubr.f32.mxu1 %v834_v33  ;;  %v1828_v40 = vpack.c.bf16 %v880_v28, %v879_v27 }
  0x7c   : > { %v912_v35 = vld [vmem:[%s2465_s6 + $0x168] sm:$0xff]  ;;  %1075 = vmatprep.mubr.f32.mxu0 %v832_v32  ;;  %v930_v39 = vld [vmem:[%s2465_s6 + $0x1f8] sm:$0xff]  ;;  %v1830_v42 = vpack.c.bf16 %v898_v37, %v897_v36  ;;  %v881_v43 = vld [vmem:[%s2465_s6 + $0x70] sm:$0xff] }
  0x7d   : > { %1821 = vmatpush3.bf16.msra.mxu0 %v1820_v14  ;;  %v1860_v41 = vpack.c.bf16 %v912_v35, %v911_v31  ;;  %v882_v44 = vld [vmem:[%s2465_s6 + $0x78] sm:$0xff]  ;;  %v913_v45 = vld [vmem:[%s2465_s6 + $0x170] sm:$0xff]  ;;  %v1862_v46 = vpack.c.bf16 %v930_v39, %v929_v38  ;;  %v947_v48 = vld [vmem:[%s2465_s6 + $0x280] sm:$0xff] }
  0x7e   : > { %1853 = vmatpush3.bf16.msra.mxu1 %v1852_v15  ;;  %1823 = vmatprep.subr.bf16.mxu0 %v1822_v16  ;;  %v914_v47 = vld [vmem:[%s2465_s6 + $0x178] sm:$0xff]  ;;  %v948_v49 = vld [vmem:[%s2465_s6 + $0x288] sm:$0xff]  ;;  %v979_v50 = vld [vmem:[%s2465_s6 + $0x380] sm:$0xff]  ;;  %v1832_v52 = vpack.c.bf16 %v882_v44, %v881_v43 }
  0x7f   : > { %1855 = vmatprep.subr.bf16.mxu1 %v1854_v20  ;;  %v980_v51 = vld [vmem:[%s2465_s6 + $0x388] sm:$0xff]  ;;  %v1864_v53 = vpack.c.bf16 %v914_v47, %v913_v45  ;;  %v1866_v54 = vpack.c.bf16 %v948_v49, %v947_v48  ;;  %v931_v55 = vld [vmem:[%s2465_s6 + $0x200] sm:$0xff]  ;;  %v949_v60 = vld [vmem:[%s2465_s6 + $0x290] sm:$0xff] }
  0x80   : > { %v932_v56 = vld [vmem:[%s2465_s6 + $0x208] sm:$0xff]  ;;  %v963_v57 = vld [vmem:[%s2465_s6 + $0x300] sm:$0xff]  ;;  %v1898_v58 = vpack.c.bf16 %v980_v51, %v979_v50  ;;  %v950_v61 = vld [vmem:[%s2465_s6 + $0x298] sm:$0xff] }
  0x81   : > { %1825 = vmatpush3.bf16.msra.mxu0 %v1824_v26  ;;  %v964_v59 = vld [vmem:[%s2465_s6 + $0x308] sm:$0xff]  ;;  %v981_v62 = vld [vmem:[%s2465_s6 + $0x390] sm:$0xff]  ;;  %v982_v63 = vld [vmem:[%s2465_s6 + $0x398] sm:$0xff]  ;;  %v1868_v2 = vpack.c.bf16 %v932_v56, %v931_v55  ;;  %v1870_v4 = vpack.c.bf16 %v950_v61, %v949_v60 }
  0x82   : > { %1857 = vmatpush3.bf16.msra.mxu1 %v1856_v29  ;;  %1827 = vmatprep.subr.bf16.mxu0 %v1826_v30  ;;  %v831_v0 = vld [vmem:[%s2527_s10] sm:$0xff]  ;;  %v833_v1 = vld [vmem:[%s2527_s10 + $0x10] sm:$0xff]  ;;  %v1900_v3 = vpack.c.bf16 %v964_v59, %v963_v57  ;;  %v934_v6 = vld [vmem:[%s2465_s6 + $0x218] sm:$0xff]  ;;  %v1902_v8 = vpack.c.bf16 %v982_v63, %v981_v62 }
  0x83   : > { %1859 = vmatprep.subr.bf16.mxu1 %v1858_v34  ;;  %v933_v5 = vld [vmem:[%s2465_s6 + $0x210] sm:$0xff]  ;;  %v966_v9 = vld [vmem:[%s2465_s6 + $0x318] sm:$0xff]  ;;  %v951_v10 = vld [vmem:[%s2465_s6 + $0x2a0] sm:$0xff] }
  0x84   : > { %v965_v7 = vld [vmem:[%s2465_s6 + $0x310] sm:$0xff]  ;;  %v952_v11 = vld [vmem:[%s2465_s6 + $0x2a8] sm:$0xff]  ;;  %v983_v12 = vld [vmem:[%s2465_s6 + $0x3a0] sm:$0xff]  ;;  %v1872_v15 = vpack.c.bf16 %v934_v6, %v933_v5 }
  0x85   : > { %1829 = vmatpush3.bf16.msra.mxu0 %v1828_v40  ;;  %v984_v13 = vld [vmem:[%s2465_s6 + $0x3a8] sm:$0xff]  ;;  %v935_v14 = vld [vmem:[%s2465_s6 + $0x220] sm:$0xff]  ;;  %v841_v16 = vld [vmem:[%s2527_s10 + $0x50] sm:$0xff]  ;;  %v1904_v19 = vpack.c.bf16 %v966_v9, %v965_v7  ;;  %v1874_v20 = vpack.c.bf16 %v952_v11, %v951_v10 }
  0x86   : > { %1861 = vmatpush3.bf16.msra.mxu1 %v1860_v41  ;;  %1831 = vmatprep.subr.bf16.mxu0 %v1830_v42  ;;  %v843_v17 = vld [vmem:[%s2527_s10 + $0x60] sm:$0xff]  ;;  %v840_v18 = vld [vmem:[%s2527_s10 + $0x48] sm:$0xff]  ;;  %v842_v23 = vld [vmem:[%s2527_s10 + $0x58] sm:$0xff]  ;;  %v1906_v24 = vpack.c.bf16 %v984_v13, %v983_v12 }
  0x87   : > { %1863 = vmatprep.subr.bf16.mxu1 %v1862_v46  ;;  %v936_v21 = vld [vmem:[%s2465_s6 + $0x228] sm:$0xff]  ;;  %v967_v22 = vld [vmem:[%s2465_s6 + $0x320] sm:$0xff]  ;;  %v953_v26 = vld [vmem:[%s2465_s6 + $0x2b0] sm:$0xff] }
  0x88   : > { %v968_v25 = vld [vmem:[%s2465_s6 + $0x328] sm:$0xff]  ;;  %v954_v27 = vld [vmem:[%s2465_s6 + $0x2b8] sm:$0xff]  ;;  %v985_v28 = vld [vmem:[%s2465_s6 + $0x3b0] sm:$0xff]  ;;  %v1876_v31 = vpack.c.bf16 %v936_v21, %v935_v14 }
  0x89   : > { %1833 = vmatpush3.bf16.msra.mxu0 %v1832_v52  ;;  %v986_v29 = vld [vmem:[%s2465_s6 + $0x3b8] sm:$0xff]  ;;  %v937_v30 = vld [vmem:[%s2465_s6 + $0x230] sm:$0xff]  ;;  %v852_v33 = vld [vmem:[%s2527_s10 + $0xa8] sm:$0xff]  ;;  %v1908_v35 = vpack.c.bf16 %v968_v25, %v967_v22  ;;  %v1878_v36 = vpack.c.bf16 %v954_v27, %v953_v26 }
  0x8a   : > { %1865 = vmatpush3.bf16.msra.mxu1 %v1864_v53  ;;  %1867 = vmatprep.subr.bf16.mxu0 %v1866_v54  ;;  %v850_v32 = vld [vmem:[%s2527_s10 + $0x98] sm:$0xff]  ;;  %v849_v34 = vld [vmem:[%s2527_s10 + $0x90] sm:$0xff]  ;;  %v851_v39 = vld [vmem:[%s2527_s10 + $0xa0] sm:$0xff]  ;;  %v1910_v40 = vpack.c.bf16 %v986_v29, %v985_v28 }
  0x8b   : > { %1899 = vmatprep.subr.bf16.mxu1 %v1898_v58  ;;  %v938_v37 = vld [vmem:[%s2465_s6 + $0x238] sm:$0xff]  ;;  %v969_v38 = vld [vmem:[%s2465_s6 + $0x330] sm:$0xff]  ;;  %v955_v42 = vld [vmem:[%s2465_s6 + $0x2c0] sm:$0xff] }
  0x8c   : > { %1076 = vmatmul.mubr.f32.vlgmr.msra.gmra.mrb[0].mxu0 %v831_v0  ;;  %v970_v41 = vld [vmem:[%s2465_s6 + $0x338] sm:$0xff]  ;;  %v956_v43 = vld [vmem:[%s2465_s6 + $0x2c8] sm:$0xff]  ;;  %v987_v44 = vld [vmem:[%s2465_s6 + $0x3c0] sm:$0xff]  ;;  %v1880_v47 = vpack.c.bf16 %v938_v37, %v937_v30 }
  0x8d   : > { %1161 = vmatmul.mubr.f32.vlgmr.msra.gmra.mrb[0].mxu1 %v833_v1  ;;  %1869 = vmatpush3.bf16.msra.mxu0 %v1868_v2  ;;  %v988_v45 = vld [vmem:[%s2465_s6 + $0x3c8] sm:$0xff]  ;;  %v939_v46 = vld [vmem:[%s2465_s6 + $0x240] sm:$0xff]  ;;  %v861_v49 = vld [vmem:[%s2527_s10 + $0xf0] sm:$0xff]  ;;  %v1912_v51 = vpack.c.bf16 %v970_v41, %v969_v38  ;;  %v1882_v52 = vpack.c.bf16 %v956_v43, %v955_v42 }
  0x8e   : > { %1901 = vmatpush3.bf16.msra.mxu1 %v1900_v3  ;;  %1871 = vmatprep.subr.bf16.mxu0 %v1870_v4  ;;  %v859_v48 = vld [vmem:[%s2527_s10 + $0xe0] sm:$0xff]  ;;  %v858_v50 = vld [vmem:[%s2527_s10 + $0xd8] sm:$0xff]  ;;  %v940_v53 = vld [vmem:[%s2465_s6 + $0x248] sm:$0xff]  ;;  %v1914_v56 = vpack.c.bf16 %v988_v45, %v987_v44 }
  0x8f   : > { %1903 = vmatprep.subr.bf16.mxu1 %v1902_v8  ;;  %1080 = vmatprep.mubr.f32.mxu0 %v841_v16  ;;  %v971_v54 = vld [vmem:[%s2465_s6 + $0x340] sm:$0xff]  ;;  %v860_v55 = vld [vmem:[%s2527_s10 + $0xe8] sm:$0xff]  ;;  %v957_v58 = vld [vmem:[%s2465_s6 + $0x2d0] sm:$0xff]  ;;  %v1884_v62 = vpack.c.bf16 %v940_v53, %v939_v46 }
  0x90   : > { %1165 = vmatprep.mubr.f32.mxu1 %v843_v17  ;;  %1081 = vmatmul.mubr.f32.gmra.mrb[2].mxu0 %v840_v18  ;;  %v972_v57 = vld [vmem:[%s2465_s6 + $0x348] sm:$0xff]  ;;  %v958_v59 = vld [vmem:[%s2465_s6 + $0x2d8] sm:$0xff]  ;;  %v989_v60 = vld [vmem:[%s2465_s6 + $0x3d0] sm:$0xff] }
  0x91   : > { %1873 = vmatpush3.bf16.msra.mxu0 %v1872_v15  ;;  %1166 = vmatmul.mubr.f32.gmra.mrb[2].mxu1 %v842_v23  ;;  %v990_v61 = vld [vmem:[%s2465_s6 + $0x3d8] sm:$0xff]  ;;  %v836_v63 = vld [vmem:[%s2527_s10 + $0x28] sm:$0xff]  ;;  %v1916_v1 = vpack.c.bf16 %v972_v57, %v971_v54  ;;  %v1886_v2 = vpack.c.bf16 %v958_v59, %v957_v58  ;;  %v941_v3 = vld [vmem:[%s2465_s6 + $0x250] sm:$0xff] }
  0x92   : > { %1905 = vmatpush3.bf16.msra.mxu1 %v1904_v19  ;;  %1875 = vmatprep.subr.bf16.mxu0 %v1874_v20  ;;  %v838_v0 = vld [vmem:[%s2527_s10 + $0x38] sm:$0xff]  ;;  %v973_v5 = vld [vmem:[%s2465_s6 + $0x350] sm:$0xff]  ;;  %v1918_v6 = vpack.c.bf16 %v990_v61, %v989_v60  ;;  %v959_v8 = vld [vmem:[%s2465_s6 + $0x2e0] sm:$0xff] }
  0x93   : > { %1907 = vmatprep.subr.bf16.mxu1 %v1906_v24  ;;  %1085 = vmatprep.mubr.f32.mxu0 %v850_v32  ;;  %v942_v4 = vld [vmem:[%s2465_s6 + $0x258] sm:$0xff]  ;;  %v960_v9 = vld [vmem:[%s2465_s6 + $0x2e8] sm:$0xff]  ;;  %v991_v10 = vld [vmem:[%s2465_s6 + $0x3e0] sm:$0xff] }
  0x94   : > { %1170 = vmatprep.mubr.f32.mxu1 %v852_v33  ;;  %1086 = vmatmul.mubr.f32.gmra.mrb[4].mxu0 %v849_v34  ;;  %v974_v7 = vld [vmem:[%s2465_s6 + $0x358] sm:$0xff]  ;;  %v992_v11 = vld [vmem:[%s2465_s6 + $0x3e8] sm:$0xff]  ;;  %v1888_v12 = vpack.c.bf16 %v942_v4, %v941_v3  ;;  %v1890_v14 = vpack.c.bf16 %v960_v9, %v959_v8  ;;  %v943_v15 = vld [vmem:[%s2465_s6 + $0x260] sm:$0xff] }
  0x95   : > { %1877 = vmatpush3.bf16.msra.mxu0 %v1876_v31  ;;  %1171 = vmatmul.mubr.f32.gmra.mrb[4].mxu1 %v851_v39  ;;  %v1920_v13 = vpack.c.bf16 %v974_v7, %v973_v5  ;;  %v944_v16 = vld [vmem:[%s2465_s6 + $0x268] sm:$0xff]  ;;  %v975_v17 = vld [vmem:[%s2465_s6 + $0x360] sm:$0xff]  ;;  %v1922_v18 = vpack.c.bf16 %v992_v11, %v991_v10  ;;  %v961_v20 = vld [vmem:[%s2465_s6 + $0x2f0] sm:$0xff] }
  0x96   : > { %1909 = vmatpush3.bf16.msra.mxu1 %v1908_v35  ;;  %1879 = vmatprep.subr.bf16.mxu0 %v1878_v36  ;;  %v976_v19 = vld [vmem:[%s2465_s6 + $0x368] sm:$0xff]  ;;  %v962_v21 = vld [vmem:[%s2465_s6 + $0x2f8] sm:$0xff]  ;;  %v993_v22 = vld [vmem:[%s2465_s6 + $0x3f0] sm:$0xff]  ;;  %v1892_v24 = vpack.c.bf16 %v944_v16, %v943_v15 }
  0x97   : > { %1911 = vmatprep.subr.bf16.mxu1 %v1910_v40  ;;  %1090 = vmatprep.mubr.f32.mxu0 %v859_v48  ;;  %v994_v23 = vld [vmem:[%s2465_s6 + $0x3f8] sm:$0xff]  ;;  %v1924_v25 = vpack.c.bf16 %v976_v19, %v975_v17  ;;  %v1894_v26 = vpack.c.bf16 %v962_v21, %v961_v20  ;;  %v945_v27 = vld [vmem:[%s2465_s6 + $0x270] sm:$0xff]  ;;  %v995_v32 = vld [vmem:[%s2465_s6 + $0x400] sm:$0xff] }
  0x98   : > { %1175 = vmatprep.mubr.f32.mxu1 %v861_v49  ;;  %1091 = vmatmul.mubr.f32.gmra.mrb[6].mxu0 %v858_v50  ;;  %v946_v28 = vld [vmem:[%s2465_s6 + $0x278] sm:$0xff]  ;;  %v977_v29 = vld [vmem:[%s2465_s6 + $0x370] sm:$0xff]  ;;  %v1926_v30 = vpack.c.bf16 %v994_v23, %v993_v22  ;;  %v996_v33 = vld [vmem:[%s2465_s6 + $0x408] sm:$0xff] }
  0x99   : > { %1881 = vmatpush3.bf16.msra.mxu0 %v1880_v47  ;;  %1176 = vmatmul.mubr.f32.gmra.mrb[6].mxu1 %v860_v55  ;;  %v978_v31 = vld [vmem:[%s2465_s6 + $0x378] sm:$0xff]  ;;  %v1896_v34 = vpack.c.bf16 %v946_v28, %v945_v27  ;;  %v1930_v36 = vpack.c.bf16 %v996_v33, %v995_v32  ;;  %v997_v37 = vld [vmem:[%s2465_s6 + $0x410] sm:$0xff]  ;;  %v835_v39 = vld [vmem:[%s2527_s10 + $0x20] sm:$0xff] }
  0x9a   : > { %1913 = vmatpush3.bf16.msra.mxu1 %v1912_v51  ;;  %1883 = vmatprep.subr.bf16.mxu0 %v1882_v52  ;;  %v1928_v35 = vpack.c.bf16 %v978_v31, %v977_v29  ;;  %v998_v38 = vld [vmem:[%s2465_s6 + $0x418] sm:$0xff]  ;;  %v837_v40 = vld [vmem:[%s2527_s10 + $0x30] sm:$0xff]  ;;  %v999_v43 = vld [vmem:[%s2465_s6 + $0x420] sm:$0xff] }
  0x9b   : > { %1915 = vmatprep.subr.bf16.mxu1 %v1914_v56  ;;  %1245 = vmatprep.mubr.f32.mxu0 %v836_v63  ;;  %v845_v41 = vld [vmem:[%s2527_s10 + $0x70] sm:$0xff]  ;;  %v1934_v42 = vpack.c.bf16 %v998_v38, %v997_v37  ;;  %v1000_v44 = vld [vmem:[%s2465_s6 + $0x428] sm:$0xff]  ;;  %v847_v46 = vld [vmem:[%s2527_s10 + $0x80] sm:$0xff] }
  0x9c   : > { %1330 = vmatprep.mubr.f32.mxu1 %v838_v0  ;;  %v844_v45 = vld [vmem:[%s2527_s10 + $0x68] sm:$0xff]  ;;  %v846_v47 = vld [vmem:[%s2527_s10 + $0x78] sm:$0xff]  ;;  %v1938_v49 = vpack.c.bf16 %v1000_v44, %v999_v43  ;;  %v1001_v50 = vld [vmem:[%s2465_s6 + $0x430] sm:$0xff] }
  0x9d   : > { %1885 = vmatpush3.bf16.msra.mxu0 %v1884_v62  ;;  %v854_v48 = vld [vmem:[%s2527_s10 + $0xb8] sm:$0xff]  ;;  %v853_v52 = vld [vmem:[%s2527_s10 + $0xb0] sm:$0xff]  ;;  %v856_v53 = vld [vmem:[%s2527_s10 + $0xc8] sm:$0xff] }
  0x9e   : > { %1917 = vmatpush3.bf16.msra.mxu1 %v1916_v1  ;;  %1887 = vmatprep.subr.bf16.mxu0 %v1886_v2  ;;  %v1002_v51 = vld [vmem:[%s2465_s6 + $0x438] sm:$0xff]  ;;  %v855_v54 = vld [vmem:[%s2527_s10 + $0xc0] sm:$0xff]  ;;  %v1004_v58 = vld [vmem:[%s2465_s6 + $0x448] sm:$0xff] }
  0x9f   : > { %1919 = vmatprep.subr.bf16.mxu1 %v1918_v6  ;;  %v863_v55 = vld [vmem:[%s2527_s10 + $0x100] sm:$0xff]  ;;  %v1942_v56 = vpack.c.bf16 %v1002_v51, %v1001_v50  ;;  %v862_v59 = vld [vmem:[%s2527_s10 + $0xf8] sm:$0xff]  ;;  %v865_v60 = vld [vmem:[%s2527_s10 + $0x110] sm:$0xff] }
  0xa0   : > { %v1003_v57 = vld [vmem:[%s2465_s6 + $0x440] sm:$0xff]  ;;  %v864_v61 = vld [vmem:[%s2527_s10 + $0x108] sm:$0xff]  ;;  %v1005_v63 = vld [vmem:[%s2465_s6 + $0x450] sm:$0xff] }
  0xa1   : > { %1889 = vmatpush3.bf16.msra.mxu0 %v1888_v12  ;;  %v1946_v62 = vpack.c.bf16 %v1004_v58, %v1003_v57  ;;  %v1006_v0 = vld [vmem:[%s2465_s6 + $0x458] sm:$0xff]  ;;  %v839_v1 = vld [vmem:[%s2527_s10 + $0x40] sm:$0xff]  ;;  %v857_v2 = vld [vmem:[%s2527_s10 + $0xd0] sm:$0xff] }
  0xa2   : > { %1921 = vmatpush3.bf16.msra.mxu1 %v1920_v13  ;;  %1891 = vmatprep.subr.bf16.mxu0 %v1890_v14  ;;  %v1950_v3 = vpack.c.bf16 %v1006_v0, %v1005_v63  ;;  %v1007_v4 = vld [vmem:[%s2465_s6 + $0x460] sm:$0xff]  ;;  %v1008_v5 = vld [vmem:[%s2465_s6 + $0x468] sm:$0xff]  ;;  %v1009_v7 = vld [vmem:[%s2465_s6 + $0x470] sm:$0xff] }
  0xa3   : > { %1923 = vmatprep.subr.bf16.mxu1 %v1922_v18  ;;  %v1954_v6 = vpack.c.bf16 %v1008_v5, %v1007_v4  ;;  %v1010_v8 = vld [vmem:[%s2465_s6 + $0x478] sm:$0xff]  ;;  %v848_v10 = vld [vmem:[%s2527_s10 + $0x88] sm:$0xff] }
  0xa4   : > { %v1958_v9 = vpack.c.bf16 %v1010_v8, %v1009_v7  ;;  %v866_v11 = vld [vmem:[%s2527_s10 + $0x118] sm:$0xff] }
  0xa5   : > { %1893 = vmatpush3.bf16.msra.mxu0 %v1892_v24 }
  0xa6   : > { %1925 = vmatpush3.bf16.msra.mxu1 %v1924_v25  ;;  %1895 = vmatprep.subr.bf16.mxu0 %v1894_v26 }
  0xa7   : > { %1927 = vmatprep.subr.bf16.mxu1 %v1926_v30 }
  0xa9   : > { %1897 = vmatpush3.bf16.msra.mxu0 %v1896_v34 }
  0xaa   : > { %1929 = vmatpush3.bf16.msra.mxu1 %v1928_v35  ;;  %1931 = vmatprep.subr.bf16.mxu0 %v1930_v36 }
  0xab   : > { %1962 = vmatprep.subr.bf16.mxu1 %v1930_v36 }
  0xac   : > { %1246 = vmatmul.mubr.f32.vlgmr.msra.gmra.mrb[8].mxu0 %v835_v39 }
  0xad   : > { %1331 = vmatmul.mubr.f32.vlgmr.msra.gmra.mrb[8].mxu1 %v837_v40  ;;  %1933 = vmatpush3.bf16.msra.mxu0 %v1930_v36 }
  0xae   : > { %1970 = vmatpush3.bf16.msra.mxu1 %v1930_v36  ;;  %1250 = vmatprep.mubr.f32.mxu0 %v845_v41 }
  0xaf   : > { %1935 = vmatprep.subr.bf16.mxu0 %v1934_v42  ;;  %1963 = vmatprep.subr.bf16.mxu1 %v1934_v42 }
  0xb0   : > { %1251 = vmatmul.mubr.f32.gmra.mrb[10].mxu0 %v844_v45  ;;  %1335 = vmatprep.mubr.f32.mxu1 %v847_v46 }
  0xb1   : > { %1937 = vmatpush3.bf16.msra.mxu0 %v1934_v42  ;;  %1336 = vmatmul.mubr.f32.gmra.mrb[10].mxu1 %v846_v47 }
  0xb2   : > { %1971 = vmatpush3.bf16.msra.mxu1 %v1934_v42  ;;  %1255 = vmatprep.mubr.f32.mxu0 %v854_v48 }
  0xb3   : > { %1939 = vmatprep.subr.bf16.mxu0 %v1938_v49  ;;  %1964 = vmatprep.subr.bf16.mxu1 %v1938_v49 }
  0xb4   : > { %1256 = vmatmul.mubr.f32.gmra.mrb[12].mxu0 %v853_v52  ;;  %1340 = vmatprep.mubr.f32.mxu1 %v856_v53 }
  0xb5   : > { %1941 = vmatpush3.bf16.msra.mxu0 %v1938_v49  ;;  %1341 = vmatmul.mubr.f32.gmra.mrb[12].mxu1 %v855_v54 }
  0xb6   : > { %1972 = vmatpush3.bf16.msra.mxu1 %v1938_v49  ;;  %1260 = vmatprep.mubr.f32.mxu0 %v863_v55 }
  0xb7   : > { %1943 = vmatprep.subr.bf16.mxu0 %v1942_v56  ;;  %1965 = vmatprep.subr.bf16.mxu1 %v1942_v56 }
  0xb8   : > { %1261 = vmatmul.mubr.f32.gmra.mrb[14].mxu0 %v862_v59  ;;  %1345 = vmatprep.mubr.f32.mxu1 %v865_v60 }
  0xb9   : > { %1945 = vmatpush3.bf16.msra.mxu0 %v1942_v56  ;;  %1346 = vmatmul.mubr.f32.gmra.mrb[14].mxu1 %v864_v61 }
  0xba   : > { %1973 = vmatpush3.bf16.msra.mxu1 %v1942_v56  ;;  %1947 = vmatprep.subr.bf16.mxu0 %v1946_v62 }
  0xbb   : > { %1966 = vmatprep.subr.bf16.mxu1 %v1946_v62  ;;  %1796 = vmatprep.mubr.f32.mxu0 %v839_v1 }
  0xbc   : > { %1799 = vmatprep.mubr.f32.mxu1 %v857_v2 }
  0xbd   : > { %1949 = vmatpush3.bf16.msra.mxu0 %v1946_v62 }
  0xbe   : > { %1974 = vmatpush3.bf16.msra.mxu1 %v1946_v62  ;;  %1951 = vmatprep.subr.bf16.mxu0 %v1950_v3 }
  0xbf   : > { %1967 = vmatprep.subr.bf16.mxu1 %v1950_v3 }
  0xc1   : > { %1953 = vmatpush3.bf16.msra.mxu0 %v1950_v3 }
  0xc2   : > { %1975 = vmatpush3.bf16.msra.mxu1 %v1950_v3  ;;  %1955 = vmatprep.subr.bf16.mxu0 %v1954_v6 }
  0xc3   : > { %1968 = vmatprep.subr.bf16.mxu1 %v1954_v6 }
  0xc5   : > { %1957 = vmatpush3.bf16.msra.mxu0 %v1954_v6 }
  0xc6   : > { %1976 = vmatpush3.bf16.msra.mxu1 %v1954_v6  ;;  %1959 = vmatprep.subr.bf16.mxu0 %v1958_v9 }
  0xc7   : > { %1969 = vmatprep.subr.bf16.mxu1 %v1958_v9 }
  0xc9   : > { %1961 = vmatpush3.bf16.msra.mxu0 %v1958_v9 }
  0xca   : > { %1977 = vmatpush3.bf16.msra.mxu1 %v1958_v9 }
  0xcc   : > { %1797 = vmatmul.mubr.f32.vlgmr.msra.gmra.mrb[16].mxu0 %v848_v10 }
  0xcd   : > { %1800 = vmatmul.mubr.f32.vlgmr.msra.gmra.mrb[16].mxu1 %v866_v11 }
 0x15f   : > { %v1600_v12 = vpop.f32.mrb[0].mxu0 }
 0x160   : > { %v1644_v13 = vpop.f32.mrb[0].mxu1  ;;  %v1601_v14 = vpop.f32.mrb[1].mxu0 }
 0x161   : > { %v1602_v15 = vadd.f32 %v1601_v14, %v1600_v12  ;;  %v1645_v16 = vpop.f32.mrb[1].mxu1 }
 0x162   : > { %v1646_v17 = vadd.f32 %v1645_v16, %v1644_v13 }
 0x163   : > { %v1603_v18 = vpop.f32.mrb[2].mxu0 }
 0x164   : > { %v1163_v19 = vadd.f32 %v1646_v17, %v1602_v15  ;;  %v1647_v20 = vpop.f32.mrb[2].mxu1  ;;  %v1604_v21 = vpop.f32.mrb[3].mxu0 }
 0x165   : > { %v1605_v22 = vadd.f32 %v1604_v21, %v1603_v18  ;;  %v1648_v23 = vpop.f32.mrb[3].mxu1  ;;  %v1565_v18 = vld [vmem:[%s822_s22] ss:$0 sm:$0xff] }
 0x166   : > { %v1649_v24 = vadd.f32 %v1648_v23, %v1647_v20 }
 0x167   : > { %v1606_v25 = vpop.f32.mrb[4].mxu0 }
 0x168   : > { %v1168_v26 = vadd.f32 %v1649_v24, %v1605_v22  ;;  %v1650_v27 = vpop.f32.mrb[4].mxu1  ;;  %v1607_v28 = vpop.f32.mrb[5].mxu0 }
 0x169   : > { %v1608_v29 = vadd.f32 %v1607_v28, %v1606_v25  ;;  %v1651_v30 = vpop.f32.mrb[5].mxu1 }
 0x16a   : > { %v1652_v31 = vadd.f32 %v1651_v30, %v1650_v27 }
 0x16b   : > { %v1609_v32 = vpop.f32.mrb[6].mxu0 }
 0x16c   : > { %v1173_v33 = vadd.f32 %v1652_v31, %v1608_v29  ;;  %v1653_v34 = vpop.f32.mrb[6].mxu1  ;;  %v1610_v35 = vpop.f32.mrb[7].mxu0 }
 0x16d   : > { %v1611_v36 = vadd.f32 %v1610_v35, %v1609_v32  ;;  %v1654_v37 = vpop.f32.mrb[7].mxu1 }
 0x16e   : > { %v1655_v38 = vadd.f32 %v1654_v37, %v1653_v34 }
 0x170   : > { %v1178_v39 = vadd.f32 %v1655_v38, %v1611_v36 }
 0x17f   : > { %v1688_v40 = vpop.f32.mrb[8].mxu0 }
 0x180   : > { %v1732_v41 = vpop.f32.mrb[8].mxu1  ;;  %v1689_v42 = vpop.f32.mrb[9].mxu0 }
 0x181   : > { %v1690_v43 = vadd.f32 %v1689_v42, %v1688_v40  ;;  %v1733_v44 = vpop.f32.mrb[9].mxu1 }
 0x182   : > { %v1734_v45 = vadd.f32 %v1733_v44, %v1732_v41 }
 0x183   : > { %v1248_v46 = vadd.f32 %v1690_v43, %v1163_v19  ;;  %v1691_v47 = vpop.f32.mrb[10].mxu0 }
 0x184   : > { %v1692_v48 = vpop.f32.mrb[11].mxu0  ;;  %v1735_v49 = vpop.f32.mrb[10].mxu1 }
 0x185   : > { %v1693_v50 = vadd.f32 %v1692_v48, %v1691_v47  ;;  %v1736_v51 = vpop.f32.mrb[11].mxu1  ;;  %v1333_v52 = vadd.f32 %v1734_v45, %v1248_v46 }
 0x186   : > { %v1737_v53 = vadd.f32 %v1736_v51, %v1735_v49 }
 0x187   : > { %v1253_v54 = vadd.f32 %v1693_v50, %v1168_v26  ;;  %v1694_v55 = vpop.f32.mrb[12].mxu0 }
 0x188   : > { %v1695_v56 = vpop.f32.mrb[13].mxu0  ;;  %v1738_v57 = vpop.f32.mrb[12].mxu1 }
 0x189   : > { %v1696_v58 = vadd.f32 %v1695_v56, %v1694_v55  ;;  %v1739_v59 = vpop.f32.mrb[13].mxu1  ;;  %v1338_v60 = vadd.f32 %v1737_v53, %v1253_v54 }
 0x18a   : > { %v1740_v61 = vadd.f32 %v1739_v59, %v1738_v57 }
 0x18b   : > { %v1258_v62 = vadd.f32 %v1696_v58, %v1173_v33  ;;  %v1697_v63 = vpop.f32.mrb[14].mxu0 }
 0x18c   : > { %v1698_v0 = vpop.f32.mrb[15].mxu0  ;;  %v1741_v1 = vpop.f32.mrb[14].mxu1 }
 0x18d   : > { %v1699_v2 = vadd.f32 %v1698_v0, %v1697_v63  ;;  %v1742_v3 = vpop.f32.mrb[15].mxu1  ;;  %v1343_v4 = vadd.f32 %v1740_v61, %v1258_v62 }
 0x18e   : > { %v1743_v5 = vadd.f32 %v1742_v3, %v1741_v1 }
 0x18f   : > { %v1263_v6 = vadd.f32 %v1699_v2, %v1178_v39 }
 0x191   : > { %v1348_v7 = vadd.f32 %v1743_v5, %v1263_v6 }
 0x19f   : > { %v1798_v8 = vpop.f32.mrb[16].mxu0 }
 0x1a0   : > { %v1423_v9 = vadd.f32 %v1798_v8, %v1338_v60  ;;  %v1801_v10 = vpop.f32.mrb[16].mxu1  ;;  %v1417_v11 = vpop.f32.mrb[17].mxu0 }
 0x1a1   : > { %v1433_v12 = vadd.f32 %v1801_v10, %v1348_v7  ;;  %v1418_v13 = vadd.f32 %v1417_v11, %v1333_v52  ;;  %v1427_v14 = vpop.f32.mrb[17].mxu1 }
 0x1a2   : > { %v1428_v15 = vadd.f32 %v1427_v14, %v1343_v4 }
 0x1a3   : > { %v1436_v16 = vmax.f32 %v1418_v13, %v1423_v9 }
 0x1a4   : > { %v1437_v17 = vmax.f32 %v1428_v15, %v1433_v12 }
 0x1a6   : > { %v1438_v19 = vmax.f32 %v1436_v16, %v1437_v17 }
 0x1a8   : > { %v1446_v20 = vadd.f32 %v1565_v18, %v1438_v19 }
 0x1aa   : > { %v1447_v21 = vmax.f32 %v1446_v20, 0.0 }
 0x1ac   : > { %1448 = vst [vmem:[%s830_s28] sm:$0xff] %v1447_v21 }
 0x1ad PF: > { %s13_s18 = sadd.s32 1, %s2091_s18   ;;  %s2693_s12 = smov %s2071_s13 }
 0x1ae   : > { %p10_p12 = scmp.ge.s32.totalorder %s13_s18, 6   ;;  %s2694_s13 = smov %s2162_s23 }
 0x1af   : > { %s2695_s14 = smov %s2083_s16  ;;  %s2696_s15 = smov %s2087_s17 }
 0x1b0   : > { %s2697_s16 = smov %s2700_s19  ;;  %s2698_s17 = smov %s2704_s20 }
 0x1b1   :  { %12 = sbr.rel (!%p10_p12) target bundleno = 4 (0x4), region = 111 }

// kernel: voice_auth_cnn_forward.9
= control target key start
LH: loop header
LB: loop body
LE: loop exit
PB: predicated region body
PF: predicated region fallthrough
CT: control target
= control target key end

     0   :  { %s7573_s0 = inlined_call_operand.vmem [shape: f32[2,2048], index: 0, kind: input, shape index: {}]   ;;  %s7574_s1 = inlined_call_operand.vmem [shape: f32[2048,512], index: 1, kind: input, shape index: {}]   ;;  %s7575_s2 = inlined_call_operand.vmem [shape: f32[1,512], index: 2, kind: input, shape index: {}]   ;;  %s7576_s3 = inlined_call_operand.vmem [shape: f32[512,256], index: 3, kind: input, shape index: {}]   ;;  %s7577_s4 = inlined_call_operand.vmem [shape: f32[1,256], index: 4, kind: input, shape index: {}]   ;;  %s7578_s5 = inlined_call_operand.vmem [shape: f32[1,256], index: 5, kind: input, shape index: {}]   ;;  %s7579_s6 = inlined_call_operand.vmem [shape: f32[1,256], index: 6, kind: input, shape index: {}]   ;;  %s7580_s7 = inlined_call_operand.hbm [shape: f32[2,256], index: 7, kind: output, shape index: {}]  }
   0x1   :  { %v32_v0 = vld [vmem:[%s7574_s1 + $0x8] sm:$0xff]  ;;  %v31_v5 = vld [vmem:[%s7574_s1] sm:$0xff] }
   0x2   :  { %v36_v1 = vld [vmem:[%s7574_s1 + $0x28] sm:$0xff]  ;;  %v35_v6 = vld [vmem:[%s7574_s1 + $0x20] sm:$0xff] }
   0x3   :  { %v160_v2 = vld [vmem:[%s7574_s1 + $0x408] sm:$0xff]  ;;  %v2675_v3 = vpack.c.bf16 %v36_v1, %v32_v0  ;;  %v2677_v8 = vpack.c.bf16 %v35_v6, %v31_v5  ;;  %v159_v9 = vld [vmem:[%s7574_s1 + $0x400] sm:$0xff] }
   0x4   :  { %v164_v4 = vld [vmem:[%s7574_s1 + $0x428] sm:$0xff]  ;;  %v163_v10 = vld [vmem:[%s7574_s1 + $0x420] sm:$0xff] }
   0x5   :  { %v2739_v7 = vpack.c.bf16 %v164_v4, %v160_v2  ;;  %v40_v11 = vld [vmem:[%s7574_s1 + $0x48] sm:$0xff]  ;;  %2676 = vmatprep.subr.bf16.mxu1 %v2675_v3  ;;  %v2741_v12 = vpack.c.bf16 %v163_v10, %v159_v9  ;;  %v39_v18 = vld [vmem:[%s7574_s1 + $0x40] sm:$0xff] }
   0x6   :  { %v44_v13 = vld [vmem:[%s7574_s1 + $0x68] sm:$0xff]  ;;  %2678 = vmatpush1.bf16.msra.mxu1 %v2677_v8  ;;  %v43_v19 = vld [vmem:[%s7574_s1 + $0x60] sm:$0xff] }
   0x7   :  { %v168_v14 = vld [vmem:[%s7574_s1 + $0x448] sm:$0xff]  ;;  %2740 = vmatprep.subr.bf16.mxu0 %v2739_v7  ;;  %v2679_v16 = vpack.c.bf16 %v44_v13, %v40_v11  ;;  %v167_v20 = vld [vmem:[%s7574_s1 + $0x440] sm:$0xff]  ;;  %v2681_v21 = vpack.c.bf16 %v43_v19, %v39_v18 }
   0x8   :  { %v172_v15 = vld [vmem:[%s7574_s1 + $0x468] sm:$0xff]  ;;  %2742 = vmatpush1.bf16.msra.mxu0 %v2741_v12  ;;  %v171_v22 = vld [vmem:[%s7574_s1 + $0x460] sm:$0xff] }
   0x9   :  { %v2743_v17 = vpack.c.bf16 %v172_v15, %v168_v14  ;;  %v48_v23 = vld [vmem:[%s7574_s1 + $0x88] sm:$0xff]  ;;  %2680 = vmatprep.subr.bf16.mxu1 %v2679_v16  ;;  %v2745_v25 = vpack.c.bf16 %v171_v22, %v167_v20  ;;  %v47_v29 = vld [vmem:[%s7574_s1 + $0x80] sm:$0xff] }
   0xa   :  { %v52_v24 = vld [vmem:[%s7574_s1 + $0xa8] sm:$0xff]  ;;  %v51_v31 = vld [vmem:[%s7574_s1 + $0xa0] sm:$0xff]  ;;  %2682 = vmatpush1.bf16.msra.mxu1 %v2681_v21 }
   0xb   :  { %2744 = vmatprep.subr.bf16.mxu0 %v2743_v17  ;;  %v2683_v26 = vpack.c.bf16 %v52_v24, %v48_v23  ;;  %v176_v27 = vld [vmem:[%s7574_s1 + $0x488] sm:$0xff]  ;;  %v175_v32 = vld [vmem:[%s7574_s1 + $0x480] sm:$0xff]  ;;  %v2685_v34 = vpack.c.bf16 %v51_v31, %v47_v29 }
   0xc   :  { %v180_v28 = vld [vmem:[%s7574_s1 + $0x4a8] sm:$0xff]  ;;  %v179_v33 = vld [vmem:[%s7574_s1 + $0x4a0] sm:$0xff]  ;;  %2746 = vmatpush1.bf16.msra.mxu0 %v2745_v25 }
   0xd   :  { %v2747_v30 = vpack.c.bf16 %v180_v28, %v176_v27  ;;  %v56_v35 = vld [vmem:[%s7574_s1 + $0xc8] sm:$0xff]  ;;  %2684 = vmatprep.subr.bf16.mxu1 %v2683_v26  ;;  %v2749_v38 = vpack.c.bf16 %v179_v33, %v175_v32  ;;  %v55_v41 = vld [vmem:[%s7574_s1 + $0xc0] sm:$0xff] }
   0xe   :  { %v60_v36 = vld [vmem:[%s7574_s1 + $0xe8] sm:$0xff]  ;;  %v59_v42 = vld [vmem:[%s7574_s1 + $0xe0] sm:$0xff]  ;;  %2686 = vmatpush1.bf16.msra.mxu1 %v2685_v34 }
   0xf   :  { %v184_v37 = vld [vmem:[%s7574_s1 + $0x4c8] sm:$0xff]  ;;  %v2687_v39 = vpack.c.bf16 %v60_v36, %v56_v35  ;;  %2748 = vmatprep.subr.bf16.mxu0 %v2747_v30  ;;  %v183_v44 = vld [vmem:[%s7574_s1 + $0x4c0] sm:$0xff]  ;;  %v2689_v50 = vpack.c.bf16 %v59_v42, %v55_v41 }
  0x10   :  { %v188_v40 = vld [vmem:[%s7574_s1 + $0x4e8] sm:$0xff]  ;;  %v187_v45 = vld [vmem:[%s7574_s1 + $0x4e0] sm:$0xff]  ;;  %2750 = vmatpush1.bf16.msra.mxu0 %v2749_v38 }
  0x11   :  { %v2751_v43 = vpack.c.bf16 %v188_v40, %v184_v37  ;;  %v64_v46 = vld [vmem:[%s7574_s1 + $0x108] sm:$0xff]  ;;  %2688 = vmatprep.subr.bf16.mxu1 %v2687_v39  ;;  %v2753_v51 = vpack.c.bf16 %v187_v45, %v183_v44  ;;  %v63_v53 = vld [vmem:[%s7574_s1 + $0x100] sm:$0xff] }
  0x12   :  { %v68_v47 = vld [vmem:[%s7574_s1 + $0x128] sm:$0xff]  ;;  %v67_v54 = vld [vmem:[%s7574_s1 + $0x120] sm:$0xff]  ;;  %2690 = vmatpush1.bf16.msra.mxu1 %v2689_v50 }
  0x13   :  { %v192_v48 = vld [vmem:[%s7574_s1 + $0x508] sm:$0xff]  ;;  %v2691_v52 = vpack.c.bf16 %v68_v47, %v64_v46  ;;  %v191_v55 = vld [vmem:[%s7574_s1 + $0x500] sm:$0xff]  ;;  %2752 = vmatprep.subr.bf16.mxu0 %v2751_v43  ;;  %v2693_v62 = vpack.c.bf16 %v67_v54, %v63_v53  ;;  %v1057_v46 = vlaneseq  ;;  %v3897_v47 = vmov 1983009808  }
  0x14   :  { %v196_v49 = vld [vmem:[%s7574_s1 + $0x528] sm:$0xff]  ;;  %v195_v57 = vld [vmem:[%s7574_s1 + $0x520] sm:$0xff]  ;;  %2754 = vmatpush1.bf16.msra.mxu0 %v2753_v51 }
  0x15   :  { %v2755_v56 = vpack.c.bf16 %v196_v49, %v192_v48  ;;  %v72_v58 = vld [vmem:[%s7574_s1 + $0x148] sm:$0xff]  ;;  %2692 = vmatprep.subr.bf16.mxu1 %v2691_v52  ;;  %v2757_v63 = vpack.c.bf16 %v195_v57, %v191_v55  ;;  %v71_v1 = vld [vmem:[%s7574_s1 + $0x140] sm:$0xff]  ;;  %v1083_v48 = vunpack.c.l.s4 %v3897_v47 }
  0x16   :  { %v76_v59 = vld [vmem:[%s7574_s1 + $0x168] sm:$0xff]  ;;  %v75_v2 = vld [vmem:[%s7574_s1 + $0x160] sm:$0xff]  ;;  %2694 = vmatpush1.bf16.msra.mxu1 %v2693_v62 }
  0x17   :  { %v200_v60 = vld [vmem:[%s7574_s1 + $0x548] sm:$0xff]  ;;  %v2695_v0 = vpack.c.bf16 %v76_v59, %v72_v58  ;;  %v199_v3 = vld [vmem:[%s7574_s1 + $0x540] sm:$0xff]  ;;  %2756 = vmatprep.subr.bf16.mxu0 %v2755_v56  ;;  %v2697_v10 = vpack.c.bf16 %v75_v2, %v71_v1  ;;  %v1084_v62 = vunpack.c.0.s8 %v1083_v48 }
  0x18   :  { %v204_v61 = vld [vmem:[%s7574_s1 + $0x568] sm:$0xff]  ;;  %v203_v5 = vld [vmem:[%s7574_s1 + $0x560] sm:$0xff]  ;;  %2758 = vmatpush1.bf16.msra.mxu0 %v2757_v63 }
  0x19   :  { %v2759_v4 = vpack.c.bf16 %v204_v61, %v200_v60  ;;  %v80_v6 = vld [vmem:[%s7574_s1 + $0x188] sm:$0xff]  ;;  %2696 = vmatprep.subr.bf16.mxu1 %v2695_v0  ;;  %v2761_v11 = vpack.c.bf16 %v203_v5, %v199_v3  ;;  %v79_v13 = vld [vmem:[%s7574_s1 + $0x180] sm:$0xff]  ;;  %v4191_v61 = vshrl.u32 %v1057_v46, 7 }
  0x1a   :  { %v84_v7 = vld [vmem:[%s7574_s1 + $0x1a8] sm:$0xff]  ;;  %v83_v14 = vld [vmem:[%s7574_s1 + $0x1a0] sm:$0xff]  ;;  %2698 = vmatpush1.bf16.msra.mxu1 %v2697_v10 }
  0x1b   :  { %v208_v8 = vld [vmem:[%s7574_s1 + $0x588] sm:$0xff]  ;;  %v2699_v12 = vpack.c.bf16 %v84_v7, %v80_v6  ;;  %v207_v15 = vld [vmem:[%s7574_s1 + $0x580] sm:$0xff]  ;;  %2760 = vmatprep.subr.bf16.mxu0 %v2759_v4  ;;  %v2701_v22 = vpack.c.bf16 %v83_v14, %v79_v13 }
  0x1c   :  { %v212_v9 = vld [vmem:[%s7574_s1 + $0x5a8] sm:$0xff]  ;;  %v211_v17 = vld [vmem:[%s7574_s1 + $0x5a0] sm:$0xff]  ;;  %2762 = vmatpush1.bf16.msra.mxu0 %v2761_v11  ;;  %v4218_v11 = vsub.s32 %v1084_v62, %v4191_v61 }
  0x1d   :  { %v2763_v16 = vpack.c.bf16 %v212_v9, %v208_v8  ;;  %v88_v18 = vld [vmem:[%s7574_s1 + $0x1c8] sm:$0xff]  ;;  %2700 = vmatprep.subr.bf16.mxu1 %v2699_v12  ;;  %v2765_v23 = vpack.c.bf16 %v211_v17, %v207_v15  ;;  %v87_v25 = vld [vmem:[%s7574_s1 + $0x1c0] sm:$0xff] }
  0x1e   :  { %v92_v19 = vld [vmem:[%s7574_s1 + $0x1e8] sm:$0xff]  ;;  %v91_v26 = vld [vmem:[%s7574_s1 + $0x1e0] sm:$0xff]  ;;  %2702 = vmatpush1.bf16.msra.mxu1 %v2701_v22 }
  0x1f   :  { %v216_v20 = vld [vmem:[%s7574_s1 + $0x5c8] sm:$0xff]  ;;  %v2703_v24 = vpack.c.bf16 %v92_v19, %v88_v18  ;;  %v215_v27 = vld [vmem:[%s7574_s1 + $0x5c0] sm:$0xff]  ;;  %2764 = vmatprep.subr.bf16.mxu0 %v2763_v16  ;;  %v2705_v34 = vpack.c.bf16 %v91_v26, %v87_v25 }
  0x20   :  { %v220_v21 = vld [vmem:[%s7574_s1 + $0x5e8] sm:$0xff]  ;;  %v219_v29 = vld [vmem:[%s7574_s1 + $0x5e0] sm:$0xff]  ;;  %2766 = vmatpush1.bf16.msra.mxu0 %v2765_v23 }
  0x21   :  { %v2767_v28 = vpack.c.bf16 %v220_v21, %v216_v20  ;;  %v96_v30 = vld [vmem:[%s7574_s1 + $0x208] sm:$0xff]  ;;  %2704 = vmatprep.subr.bf16.mxu1 %v2703_v24  ;;  %v2769_v35 = vpack.c.bf16 %v219_v29, %v215_v27  ;;  %v95_v37 = vld [vmem:[%s7574_s1 + $0x200] sm:$0xff] }
  0x22   :  { %v100_v31 = vld [vmem:[%s7574_s1 + $0x228] sm:$0xff]  ;;  %v99_v38 = vld [vmem:[%s7574_s1 + $0x220] sm:$0xff]  ;;  %2706 = vmatpush1.bf16.msra.mxu1 %v2705_v34 }
  0x23   :  { %v224_v32 = vld [vmem:[%s7574_s1 + $0x608] sm:$0xff]  ;;  %v2707_v36 = vpack.c.bf16 %v100_v31, %v96_v30  ;;  %v223_v39 = vld [vmem:[%s7574_s1 + $0x600] sm:$0xff]  ;;  %2768 = vmatprep.subr.bf16.mxu0 %v2767_v28  ;;  %v2709_v49 = vpack.c.bf16 %v99_v38, %v95_v37 }
  0x24   :  { %v228_v33 = vld [vmem:[%s7574_s1 + $0x628] sm:$0xff]  ;;  %v227_v41 = vld [vmem:[%s7574_s1 + $0x620] sm:$0xff]  ;;  %2770 = vmatpush1.bf16.msra.mxu0 %v2769_v35 }
  0x25   :  { %v2771_v40 = vpack.c.bf16 %v228_v33, %v224_v32  ;;  %v104_v42 = vld [vmem:[%s7574_s1 + $0x248] sm:$0xff]  ;;  %2708 = vmatprep.subr.bf16.mxu1 %v2707_v36  ;;  %v2773_v50 = vpack.c.bf16 %v227_v41, %v223_v39  ;;  %v103_v52 = vld [vmem:[%s7574_s1 + $0x240] sm:$0xff] }
  0x26   :  { %v108_v43 = vld [vmem:[%s7574_s1 + $0x268] sm:$0xff]  ;;  %v107_v53 = vld [vmem:[%s7574_s1 + $0x260] sm:$0xff]  ;;  %2710 = vmatpush1.bf16.msra.mxu1 %v2709_v49 }
  0x27   :  { %v232_v44 = vld [vmem:[%s7574_s1 + $0x648] sm:$0xff]  ;;  %v2711_v51 = vpack.c.bf16 %v108_v43, %v104_v42  ;;  %v231_v54 = vld [vmem:[%s7574_s1 + $0x640] sm:$0xff]  ;;  %2772 = vmatprep.subr.bf16.mxu0 %v2771_v40  ;;  %v2713_v63 = vpack.c.bf16 %v107_v53, %v103_v52 }
  0x28   :  { %v236_v45 = vld [vmem:[%s7574_s1 + $0x668] sm:$0xff]  ;;  %v235_v56 = vld [vmem:[%s7574_s1 + $0x660] sm:$0xff]  ;;  %2774 = vmatpush1.bf16.msra.mxu0 %v2773_v50 }
  0x29   :  { %v2775_v55 = vpack.c.bf16 %v236_v45, %v232_v44  ;;  %v112_v57 = vld [vmem:[%s7574_s1 + $0x288] sm:$0xff]  ;;  %2712 = vmatprep.subr.bf16.mxu1 %v2711_v51  ;;  %v2777_v0 = vpack.c.bf16 %v235_v56, %v231_v54  ;;  %v111_v2 = vld [vmem:[%s7574_s1 + $0x280] sm:$0xff] }
  0x2a   :  { %v116_v58 = vld [vmem:[%s7574_s1 + $0x2a8] sm:$0xff]  ;;  %v115_v3 = vld [vmem:[%s7574_s1 + $0x2a0] sm:$0xff]  ;;  %2714 = vmatpush1.bf16.msra.mxu1 %v2713_v63 }
  0x2b   :  { %v240_v59 = vld [vmem:[%s7574_s1 + $0x688] sm:$0xff]  ;;  %v2715_v1 = vpack.c.bf16 %v116_v58, %v112_v57  ;;  %v239_v4 = vld [vmem:[%s7574_s1 + $0x680] sm:$0xff]  ;;  %2776 = vmatprep.subr.bf16.mxu0 %v2775_v55  ;;  %v2717_v12 = vpack.c.bf16 %v115_v3, %v111_v2 }
  0x2c   :  { %v244_v60 = vld [vmem:[%s7574_s1 + $0x6a8] sm:$0xff]  ;;  %v243_v6 = vld [vmem:[%s7574_s1 + $0x6a0] sm:$0xff]  ;;  %2778 = vmatpush1.bf16.msra.mxu0 %v2777_v0 }
  0x2d   :  { %v2779_v5 = vpack.c.bf16 %v244_v60, %v240_v59  ;;  %v120_v7 = vld [vmem:[%s7574_s1 + $0x2c8] sm:$0xff]  ;;  %v119_v13 = vld [vmem:[%s7574_s1 + $0x2c0] sm:$0xff]  ;;  %2716 = vmatprep.subr.bf16.mxu1 %v2715_v1  ;;  %v2781_v14 = vpack.c.bf16 %v243_v6, %v239_v4 }
  0x2e   :  { %v124_v8 = vld [vmem:[%s7574_s1 + $0x2e8] sm:$0xff]  ;;  %v123_v16 = vld [vmem:[%s7574_s1 + $0x2e0] sm:$0xff]  ;;  %2718 = vmatpush1.bf16.msra.mxu1 %v2717_v12  ;;  %v34_v12 = vld [vmem:[%s7574_s1 + $0x18] sm:$0xff] }
  0x2f   :  { %v248_v9 = vld [vmem:[%s7574_s1 + $0x6c8] sm:$0xff]  ;;  %v2719_v15 = vpack.c.bf16 %v124_v8, %v120_v7  ;;  %v247_v17 = vld [vmem:[%s7574_s1 + $0x6c0] sm:$0xff]  ;;  %2780 = vmatprep.subr.bf16.mxu0 %v2779_v5  ;;  %v2721_v27 = vpack.c.bf16 %v123_v16, %v119_v13  ;;  %v38_v13 = vld [vmem:[%s7574_s1 + $0x38] sm:$0xff] }
  0x30   :  { %v252_v10 = vld [vmem:[%s7574_s1 + $0x6e8] sm:$0xff]  ;;  %v251_v18 = vld [vmem:[%s7574_s1 + $0x6e0] sm:$0xff]  ;;  %2782 = vmatpush1.bf16.msra.mxu0 %v2781_v14 }
  0x31   :  { %v2783_v19 = vpack.c.bf16 %v252_v10, %v248_v9  ;;  %v128_v20 = vld [vmem:[%s7574_s1 + $0x308] sm:$0xff]  ;;  %v27_v22 = vld [vmem:[%s7573_s0] sm:$0xff]  ;;  %v2785_v28 = vpack.c.bf16 %v251_v18, %v247_v17  ;;  %2720 = vmatprep.subr.bf16.mxu1 %v2719_v15  ;;  %v3187_v18 = vpack.c.bf16 %v38_v13, %v34_v12  ;;  %v74_v13 = vld [vmem:[%s7574_s1 + $0x158] sm:$0xff] }
  0x32   :  { %v132_v21 = vld [vmem:[%s7574_s1 + $0x328] sm:$0xff]  ;;  %v4248_v25 = vrot.slane %v27_v22, %v4218_v11  ;;  %v1081_v26 = vcombine.high %v27_v22, %v27_v22  ;;  %v127_v30 = vld [vmem:[%s7574_s1 + $0x300] sm:$0xff]  ;;  %2722 = vmatpush1.bf16.msra.mxu1 %v2721_v27 }
  0x33   :  { %v256_v23 = vld [vmem:[%s7574_s1 + $0x708] sm:$0xff]  ;;  %v2723_v29 = vpack.c.bf16 %v132_v21, %v128_v20  ;;  %v131_v31 = vld [vmem:[%s7574_s1 + $0x320] sm:$0xff]  ;;  %2784 = vmatprep.subr.bf16.mxu0 %v2783_v19  ;;  %v33_v20 = vld [vmem:[%s7574_s1 + $0x10] sm:$0xff] }
  0x34   :  { %v260_v24 = vld [vmem:[%s7574_s1 + $0x728] sm:$0xff]  ;;  %v255_v32 = vld [vmem:[%s7574_s1 + $0x700] sm:$0xff]  ;;  %v4261_v33 = vcombine.high %v4248_v25, %v4248_v25  ;;  %v4264_v34 = vrot.slane %v1081_v26, %v4218_v11  ;;  %v2725_v42 = vpack.c.bf16 %v131_v31, %v127_v30  ;;  %2786 = vmatpush1.bf16.msra.mxu0 %v2785_v28  ;;  %v37_v21 = vld [vmem:[%s7574_s1 + $0x30] sm:$0xff] }
  0x35   :  { %v2787_v35 = vpack.c.bf16 %v260_v24, %v256_v23  ;;  %v259_v36 = vld [vmem:[%s7574_s1 + $0x720] sm:$0xff]  ;;  %v136_v37 = vld [vmem:[%s7574_s1 + $0x348] sm:$0xff]  ;;  %2724 = vmatprep.subr.bf16.mxu1 %v2723_v29  ;;  %v42_v24 = vld [vmem:[%s7574_s1 + $0x58] sm:$0xff]  ;;  %v3189_v29 = vpack.c.bf16 %v37_v21, %v33_v20 }
  0x36   :  { %v140_v38 = vld [vmem:[%s7574_s1 + $0x368] sm:$0xff]  ;;  %1229 = vmatprep.mubr.f32.mxu1 %v4261_v33  ;;  %v4284_v41 = vcombine.high %v4264_v34, %v4264_v34  ;;  %v2789_v43 = vpack.c.bf16 %v259_v36, %v255_v32  ;;  %v135_v45 = vld [vmem:[%s7574_s1 + $0x340] sm:$0xff]  ;;  %2726 = vmatpush1.bf16.msra.mxu1 %v2725_v42  ;;  %v46_v26 = vld [vmem:[%s7574_s1 + $0x78] sm:$0xff] }
  0x37   :  { %v264_v39 = vld [vmem:[%s7574_s1 + $0x748] sm:$0xff]  ;;  %v2727_v44 = vpack.c.bf16 %v140_v38, %v136_v37  ;;  %v139_v46 = vld [vmem:[%s7574_s1 + $0x360] sm:$0xff]  ;;  %2788 = vmatprep.subr.bf16.mxu0 %v2787_v35  ;;  %v3191_v31 = vpack.c.bf16 %v46_v26, %v42_v24  ;;  %v41_v35 = vld [vmem:[%s7574_s1 + $0x50] sm:$0xff] }
  0x38   :  { %v268_v40 = vld [vmem:[%s7574_s1 + $0x768] sm:$0xff]  ;;  %v263_v47 = vld [vmem:[%s7574_s1 + $0x740] sm:$0xff]  ;;  %1300 = vmatprep.mubr.f32.mxu0 %v4284_v41  ;;  %v2729_v54 = vpack.c.bf16 %v139_v46, %v135_v45  ;;  %2790 = vmatpush1.bf16.msra.mxu0 %v2789_v43  ;;  %v45_v36 = vld [vmem:[%s7574_s1 + $0x70] sm:$0xff] }
  0x39   :  { %v2791_v48 = vpack.c.bf16 %v268_v40, %v264_v39  ;;  %v267_v49 = vld [vmem:[%s7574_s1 + $0x760] sm:$0xff]  ;;  %v144_v50 = vld [vmem:[%s7574_s1 + $0x388] sm:$0xff]  ;;  %2728 = vmatprep.subr.bf16.mxu1 %v2727_v44  ;;  %v50_v39 = vld [vmem:[%s7574_s1 + $0x98] sm:$0xff]  ;;  %v3193_v44 = vpack.c.bf16 %v45_v36, %v41_v35 }
  0x3a   :  { %v148_v51 = vld [vmem:[%s7574_s1 + $0x3a8] sm:$0xff]  ;;  %v2793_v55 = vpack.c.bf16 %v267_v49, %v263_v47  ;;  %v143_v57 = vld [vmem:[%s7574_s1 + $0x380] sm:$0xff]  ;;  %2730 = vmatpush1.bf16.msra.mxu1 %v2729_v54  ;;  %v54_v40 = vld [vmem:[%s7574_s1 + $0xb8] sm:$0xff] }
  0x3b   :  { %v272_v52 = vld [vmem:[%s7574_s1 + $0x788] sm:$0xff]  ;;  %v2731_v56 = vpack.c.bf16 %v148_v51, %v144_v50  ;;  %v147_v58 = vld [vmem:[%s7574_s1 + $0x3a0] sm:$0xff]  ;;  %2792 = vmatprep.subr.bf16.mxu0 %v2791_v48  ;;  %v3195_v46 = vpack.c.bf16 %v54_v40, %v50_v39  ;;  %v49_v48 = vld [vmem:[%s7574_s1 + $0x90] sm:$0xff] }
  0x3c   :  { %v276_v53 = vld [vmem:[%s7574_s1 + $0x7a8] sm:$0xff]  ;;  %v271_v59 = vld [vmem:[%s7574_s1 + $0x780] sm:$0xff]  ;;  %v2733_v3 = vpack.c.bf16 %v147_v58, %v143_v57  ;;  %2794 = vmatpush1.bf16.msra.mxu0 %v2793_v55  ;;  %v53_v49 = vld [vmem:[%s7574_s1 + $0xb0] sm:$0xff] }
  0x3d   :  { %v2795_v60 = vpack.c.bf16 %v276_v53, %v272_v52  ;;  %v275_v62 = vld [vmem:[%s7574_s1 + $0x7a0] sm:$0xff]  ;;  %v152_v63 = vld [vmem:[%s7574_s1 + $0x3c8] sm:$0xff]  ;;  %2732 = vmatprep.subr.bf16.mxu1 %v2731_v56  ;;  %v58_v52 = vld [vmem:[%s7574_s1 + $0xd8] sm:$0xff]  ;;  %v3197_v56 = vpack.c.bf16 %v53_v49, %v49_v48 }
  0x3e   :  { %v156_v0 = vld [vmem:[%s7574_s1 + $0x3e8] sm:$0xff]  ;;  %v2797_v4 = vpack.c.bf16 %v275_v62, %v271_v59  ;;  %v151_v6 = vld [vmem:[%s7574_s1 + $0x3c0] sm:$0xff]  ;;  %2734 = vmatpush1.bf16.msra.mxu1 %v2733_v3  ;;  %v62_v53 = vld [vmem:[%s7574_s1 + $0xf8] sm:$0xff] }
  0x3f   :  { %v280_v1 = vld [vmem:[%s7574_s1 + $0x7c8] sm:$0xff]  ;;  %v2735_v5 = vpack.c.bf16 %v156_v0, %v152_v63  ;;  %v155_v7 = vld [vmem:[%s7574_s1 + $0x3e0] sm:$0xff]  ;;  %2796 = vmatprep.subr.bf16.mxu0 %v2795_v60  ;;  %v3199_v58 = vpack.c.bf16 %v62_v53, %v58_v52  ;;  %v61_v60 = vld [vmem:[%s7574_s1 + $0xf0] sm:$0xff] }
  0x40   :  { %v284_v2 = vld [vmem:[%s7574_s1 + $0x7e8] sm:$0xff]  ;;  %v279_v8 = vld [vmem:[%s7574_s1 + $0x7c0] sm:$0xff]  ;;  %v2737_v16 = vpack.c.bf16 %v155_v7, %v151_v6  ;;  %2798 = vmatpush1.bf16.msra.mxu0 %v2797_v4  ;;  %v66_v0 = vld [vmem:[%s7574_s1 + $0x118] sm:$0xff] }
  0x41   :  { %v2799_v9 = vpack.c.bf16 %v284_v2, %v280_v1  ;;  %v283_v10 = vld [vmem:[%s7574_s1 + $0x7e0] sm:$0xff]  ;;  %v288_v14 = vld [vmem:[%s7574_s1 + $0x808] sm:$0xff]  ;;  %2736 = vmatprep.subr.bf16.mxu1 %v2735_v5  ;;  %v70_v1 = vld [vmem:[%s7574_s1 + $0x138] sm:$0xff] }
  0x42   :  { %v292_v15 = vld [vmem:[%s7574_s1 + $0x828] sm:$0xff]  ;;  %v2801_v17 = vpack.c.bf16 %v283_v10, %v279_v8  ;;  %v287_v19 = vld [vmem:[%s7574_s1 + $0x800] sm:$0xff]  ;;  %2738 = vmatpush1.bf16.msra.mxu1 %v2737_v16  ;;  %v3203_v6 = vpack.c.bf16 %v70_v1, %v66_v0  ;;  %v65_v8 = vld [vmem:[%s7574_s1 + $0x110] sm:$0xff] }
  0x43   :  { %2800 = vmatprep.subr.bf16.mxu0 %v2799_v9  ;;  %v2803_v22 = vpack.c.bf16 %v292_v15, %v288_v14  ;;  %v291_v23 = vld [vmem:[%s7574_s1 + $0x820] sm:$0xff]  ;;  %v296_v27 = vld [vmem:[%s7574_s1 + $0x848] sm:$0xff]  ;;  %3188 = vmatprep.subr.bf16.mxu1 %v3187_v18  ;;  %v69_v9 = vld [vmem:[%s7574_s1 + $0x130] sm:$0xff] }
  0x44   :  { %v300_v28 = vld [vmem:[%s7574_s1 + $0x868] sm:$0xff]  ;;  %2802 = vmatpush1.bf16.msra.mxu0 %v2801_v17  ;;  %v2805_v30 = vpack.c.bf16 %v291_v23, %v287_v19  ;;  %v295_v32 = vld [vmem:[%s7574_s1 + $0x840] sm:$0xff]  ;;  %v78_v14 = vld [vmem:[%s7574_s1 + $0x178] sm:$0xff]  ;;  %v3205_v17 = vpack.c.bf16 %v69_v9, %v65_v8 }
  0x45   :  { %2804 = vmatprep.subr.bf16.mxu0 %v2803_v22  ;;  %v2807_v37 = vpack.c.bf16 %v300_v28, %v296_v27  ;;  %v299_v38 = vld [vmem:[%s7574_s1 + $0x860] sm:$0xff]  ;;  %1230 = vmatmul.mubr.f32.vlgmr.msra.gmra.mrb[0].mxu1 %v4248_v25  ;;  %v304_v42 = vld [vmem:[%s7574_s1 + $0x888] sm:$0xff]  ;;  %v3207_v19 = vpack.c.bf16 %v78_v14, %v74_v13  ;;  %v73_v21 = vld [vmem:[%s7574_s1 + $0x150] sm:$0xff] }
  0x46   :  { %v308_v43 = vld [vmem:[%s7574_s1 + $0x8a8] sm:$0xff]  ;;  %3190 = vmatpush1.bf16.msra.mxu1 %v3189_v29  ;;  %v2809_v45 = vpack.c.bf16 %v299_v38, %v295_v32  ;;  %v303_v47 = vld [vmem:[%s7574_s1 + $0x880] sm:$0xff]  ;;  %1797 = vmatprep.mubr.f32.mxu1 %v4261_v33  ;;  %v57_v33 = vld [vmem:[%s7574_s1 + $0xd0] sm:$0xff] }
  0x47   :  { %1301 = vmatmul.mubr.f32.vlgmr.msra.gmra.mrb[0].mxu0 %v4264_v34  ;;  %3192 = vmatprep.subr.bf16.mxu1 %v3191_v31  ;;  %v2811_v50 = vpack.c.bf16 %v308_v43, %v304_v42  ;;  %v307_v51 = vld [vmem:[%s7574_s1 + $0x8a0] sm:$0xff]  ;;  %v312_v54 = vld [vmem:[%s7574_s1 + $0x8c8] sm:$0xff]  ;;  %v3201_v4 = vpack.c.bf16 %v61_v60, %v57_v33  ;;  %v77_v22 = vld [vmem:[%s7574_s1 + $0x170] sm:$0xff] }
  0x48   :  { %2806 = vmatpush1.bf16.msra.mxu0 %v2805_v30  ;;  %v316_v55 = vld [vmem:[%s7574_s1 + $0x8e8] sm:$0xff]  ;;  %v2813_v57 = vpack.c.bf16 %v307_v51, %v303_v47  ;;  %v311_v59 = vld [vmem:[%s7574_s1 + $0x8c0] sm:$0xff]  ;;  %v82_v26 = vld [vmem:[%s7574_s1 + $0x198] sm:$0xff]  ;;  %v3209_v30 = vpack.c.bf16 %v77_v22, %v73_v21 }
  0x49   :  { %2808 = vmatprep.subr.bf16.mxu0 %v2807_v37  ;;  %v2815_v62 = vpack.c.bf16 %v316_v55, %v312_v54  ;;  %v315_v63 = vld [vmem:[%s7574_s1 + $0x8e0] sm:$0xff]  ;;  %v320_v2 = vld [vmem:[%s7574_s1 + $0x908] sm:$0xff]  ;;  %v86_v27 = vld [vmem:[%s7574_s1 + $0x1b8] sm:$0xff] }
  0x4a   :  { %3194 = vmatpush1.bf16.msra.mxu1 %v3193_v44  ;;  %v324_v3 = vld [vmem:[%s7574_s1 + $0x928] sm:$0xff]  ;;  %v2817_v5 = vpack.c.bf16 %v315_v63, %v311_v59  ;;  %v319_v7 = vld [vmem:[%s7574_s1 + $0x900] sm:$0xff]  ;;  %v3211_v35 = vpack.c.bf16 %v86_v27, %v82_v26  ;;  %v81_v36 = vld [vmem:[%s7574_s1 + $0x190] sm:$0xff] }
  0x4b   :  { %3196 = vmatprep.subr.bf16.mxu1 %v3195_v46  ;;  %v2819_v10 = vpack.c.bf16 %v324_v3, %v320_v2  ;;  %v323_v12 = vld [vmem:[%s7574_s1 + $0x920] sm:$0xff]  ;;  %v328_v15 = vld [vmem:[%s7574_s1 + $0x948] sm:$0xff]  ;;  %v85_v37 = vld [vmem:[%s7574_s1 + $0x1b0] sm:$0xff] }
  0x4c   :  { %2810 = vmatpush1.bf16.msra.mxu0 %v2809_v45  ;;  %v332_v16 = vld [vmem:[%s7574_s1 + $0x968] sm:$0xff]  ;;  %v2821_v18 = vpack.c.bf16 %v323_v12, %v319_v7  ;;  %v327_v20 = vld [vmem:[%s7574_s1 + $0x940] sm:$0xff]  ;;  %v90_v42 = vld [vmem:[%s7574_s1 + $0x1d8] sm:$0xff]  ;;  %v3213_v47 = vpack.c.bf16 %v85_v37, %v81_v36 }
  0x4d   :  { %2812 = vmatprep.subr.bf16.mxu0 %v2811_v50  ;;  %v2823_v23 = vpack.c.bf16 %v332_v16, %v328_v15  ;;  %v331_v24 = vld [vmem:[%s7574_s1 + $0x960] sm:$0xff]  ;;  %v336_v28 = vld [vmem:[%s7574_s1 + $0x988] sm:$0xff]  ;;  %v94_v43 = vld [vmem:[%s7574_s1 + $0x1f8] sm:$0xff] }
  0x4e   :  { %3198 = vmatpush1.bf16.msra.mxu1 %v3197_v56  ;;  %v340_v29 = vld [vmem:[%s7574_s1 + $0x9a8] sm:$0xff]  ;;  %v335_v31 = vld [vmem:[%s7574_s1 + $0x980] sm:$0xff]  ;;  %v2825_v32 = vpack.c.bf16 %v331_v24, %v327_v20  ;;  %v3215_v50 = vpack.c.bf16 %v94_v43, %v90_v42  ;;  %v89_v52 = vld [vmem:[%s7574_s1 + $0x1d0] sm:$0xff] }
  0x4f   :  { %3200 = vmatprep.subr.bf16.mxu1 %v3199_v58  ;;  %v4518_v38 = vld [vmem:[%s7573_s0 + $0x8] sm:$0xff]  ;;  %v2827_v39 = vpack.c.bf16 %v340_v29, %v336_v28  ;;  %v339_v40 = vld [vmem:[%s7574_s1 + $0x9a0] sm:$0xff]  ;;  %v93_v53 = vld [vmem:[%s7574_s1 + $0x1f0] sm:$0xff] }
  0x50   :  { %2814 = vmatpush1.bf16.msra.mxu0 %v2813_v57  ;;  %v4531_v44 = vrot.slane %v4518_v38, %v4218_v11  ;;  %v344_v45 = vld [vmem:[%s7574_s1 + $0x9c8] sm:$0xff]  ;;  %v2829_v49 = vpack.c.bf16 %v339_v40, %v335_v31  ;;  %v343_v51 = vld [vmem:[%s7574_s1 + $0x9c0] sm:$0xff]  ;;  %v98_v56 = vld [vmem:[%s7574_s1 + $0x218] sm:$0xff]  ;;  %v3217_v33 = vpack.c.bf16 %v93_v53, %v89_v52 }
  0x51   :  { %2816 = vmatprep.subr.bf16.mxu0 %v2815_v62  ;;  %v348_v46 = vld [vmem:[%s7574_s1 + $0x9e8] sm:$0xff]  ;;  %v347_v55 = vld [vmem:[%s7574_s1 + $0x9e0] sm:$0xff]  ;;  %v102_v57 = vld [vmem:[%s7574_s1 + $0x238] sm:$0xff] }
  0x52   :  { %3202 = vmatpush1.bf16.msra.mxu1 %v3201_v4  ;;  %v4541_v48 = vcombine.high %v4531_v44, %v4531_v44  ;;  %v2831_v54 = vpack.c.bf16 %v348_v46, %v344_v45  ;;  %v352_v58 = vld [vmem:[%s7574_s1 + $0xa08] sm:$0xff]  ;;  %v2833_v60 = vpack.c.bf16 %v347_v55, %v343_v51  ;;  %v3219_v62 = vpack.c.bf16 %v102_v57, %v98_v56  ;;  %v351_v63 = vld [vmem:[%s7574_s1 + $0xa00] sm:$0xff]  ;;  %v97_v0 = vld [vmem:[%s7574_s1 + $0x210] sm:$0xff] }
  0x53   :  { %3204 = vmatprep.subr.bf16.mxu1 %v3203_v6  ;;  %v356_v59 = vld [vmem:[%s7574_s1 + $0xa28] sm:$0xff]  ;;  %v101_v1 = vld [vmem:[%s7574_s1 + $0x230] sm:$0xff]  ;;  %v355_v3 = vld [vmem:[%s7574_s1 + $0xa20] sm:$0xff] }
  0x54   :  { %2818 = vmatpush1.bf16.msra.mxu0 %v2817_v5  ;;  %1371 = vmatprep.mubr.f32.mxu0 %v4541_v48  ;;  %v2835_v2 = vpack.c.bf16 %v356_v59, %v352_v58  ;;  %v106_v4 = vld [vmem:[%s7574_s1 + $0x258] sm:$0xff]  ;;  %v360_v6 = vld [vmem:[%s7574_s1 + $0xa48] sm:$0xff]  ;;  %v3221_v8 = vpack.c.bf16 %v101_v1, %v97_v0  ;;  %v2837_v9 = vpack.c.bf16 %v355_v3, %v351_v63  ;;  %v359_v12 = vld [vmem:[%s7574_s1 + $0xa40] sm:$0xff] }
  0x55   :  { %2820 = vmatprep.subr.bf16.mxu0 %v2819_v10  ;;  %v110_v5 = vld [vmem:[%s7574_s1 + $0x278] sm:$0xff]  ;;  %v364_v7 = vld [vmem:[%s7574_s1 + $0xa68] sm:$0xff]  ;;  %v105_v13 = vld [vmem:[%s7574_s1 + $0x250] sm:$0xff] }
  0x56   :  { %3206 = vmatpush1.bf16.msra.mxu1 %v3205_v17  ;;  %v3223_v10 = vpack.c.bf16 %v110_v5, %v106_v4  ;;  %v109_v14 = vld [vmem:[%s7574_s1 + $0x270] sm:$0xff]  ;;  %v2839_v15 = vpack.c.bf16 %v364_v7, %v360_v6  ;;  %v363_v16 = vld [vmem:[%s7574_s1 + $0xa60] sm:$0xff]  ;;  %v114_v17 = vld [vmem:[%s7574_s1 + $0x298] sm:$0xff] }
  0x57   :  { %3208 = vmatprep.subr.bf16.mxu1 %v3207_v19  ;;  %v368_v19 = vld [vmem:[%s7574_s1 + $0xa88] sm:$0xff]  ;;  %v3225_v21 = vpack.c.bf16 %v109_v14, %v105_v13  ;;  %v2841_v22 = vpack.c.bf16 %v363_v16, %v359_v12  ;;  %v367_v24 = vld [vmem:[%s7574_s1 + $0xa80] sm:$0xff]  ;;  %v113_v26 = vld [vmem:[%s7574_s1 + $0x290] sm:$0xff] }
  0x58   :  { %2822 = vmatpush1.bf16.msra.mxu0 %v2821_v18  ;;  %v118_v18 = vld [vmem:[%s7574_s1 + $0x2b8] sm:$0xff]  ;;  %v372_v20 = vld [vmem:[%s7574_s1 + $0xaa8] sm:$0xff]  ;;  %v117_v27 = vld [vmem:[%s7574_s1 + $0x2b0] sm:$0xff] }
  0x59   :  { %2824 = vmatprep.subr.bf16.mxu0 %v2823_v23  ;;  %v3227_v23 = vpack.c.bf16 %v118_v18, %v114_v17  ;;  %v2843_v28 = vpack.c.bf16 %v372_v20, %v368_v19  ;;  %v371_v29 = vld [vmem:[%s7574_s1 + $0xaa0] sm:$0xff]  ;;  %v126_v31 = vld [vmem:[%s7574_s1 + $0x2f8] sm:$0xff]  ;;  %v3229_v36 = vpack.c.bf16 %v117_v27, %v113_v26  ;;  %v121_v42 = vld [vmem:[%s7574_s1 + $0x2d0] sm:$0xff] }
  0x5a   :  { %3210 = vmatpush1.bf16.msra.mxu1 %v3209_v30  ;;  %v122_v30 = vld [vmem:[%s7574_s1 + $0x2d8] sm:$0xff]  ;;  %v2845_v37 = vpack.c.bf16 %v371_v29, %v367_v24  ;;  %v375_v40 = vld [vmem:[%s7574_s1 + $0xac0] sm:$0xff]  ;;  %v125_v43 = vld [vmem:[%s7574_s1 + $0x2f0] sm:$0xff] }
  0x5b   :  { %3212 = vmatprep.subr.bf16.mxu1 %v3211_v35  ;;  %v380_v35 = vld [vmem:[%s7574_s1 + $0xae8] sm:$0xff]  ;;  %v379_v46 = vld [vmem:[%s7574_s1 + $0xae0] sm:$0xff]  ;;  %v3233_v52 = vpack.c.bf16 %v125_v43, %v121_v42  ;;  %v129_v56 = vld [vmem:[%s7574_s1 + $0x310] sm:$0xff] }
  0x5c   :  { %2826 = vmatpush1.bf16.msra.mxu0 %v2825_v32  ;;  %v376_v32 = vld [vmem:[%s7574_s1 + $0xac8] sm:$0xff]  ;;  %v2849_v53 = vpack.c.bf16 %v379_v46, %v375_v40  ;;  %v383_v55 = vld [vmem:[%s7574_s1 + $0xb00] sm:$0xff]  ;;  %v133_v57 = vld [vmem:[%s7574_s1 + $0x330] sm:$0xff] }
  0x5d   :  { %2828 = vmatprep.subr.bf16.mxu0 %v2827_v39  ;;  %v3231_v39 = vpack.c.bf16 %v126_v31, %v122_v30  ;;  %v2847_v45 = vpack.c.bf16 %v380_v35, %v376_v32  ;;  %v388_v51 = vld [vmem:[%s7574_s1 + $0xb28] sm:$0xff]  ;;  %v387_v59 = vld [vmem:[%s7574_s1 + $0xb20] sm:$0xff]  ;;  %v3237_v0 = vpack.c.bf16 %v133_v57, %v129_v56  ;;  %v137_v4 = vld [vmem:[%s7574_s1 + $0x350] sm:$0xff] }
  0x5e   :  { %3214 = vmatpush1.bf16.msra.mxu1 %v3213_v47  ;;  %v130_v47 = vld [vmem:[%s7574_s1 + $0x318] sm:$0xff]  ;;  %v396_v63 = vld [vmem:[%s7574_s1 + $0xb68] sm:$0xff]  ;;  %v2853_v1 = vpack.c.bf16 %v387_v59, %v383_v55  ;;  %v391_v3 = vld [vmem:[%s7574_s1 + $0xb40] sm:$0xff] }
  0x5f   :  { %3216 = vmatprep.subr.bf16.mxu1 %v3215_v50  ;;  %v384_v50 = vld [vmem:[%s7574_s1 + $0xb08] sm:$0xff]  ;;  %v141_v5 = vld [vmem:[%s7574_s1 + $0x370] sm:$0xff]  ;;  %v395_v7 = vld [vmem:[%s7574_s1 + $0xb60] sm:$0xff] }
  0x60   :  { %2830 = vmatpush1.bf16.msra.mxu0 %v2829_v49  ;;  %v134_v49 = vld [vmem:[%s7574_s1 + $0x338] sm:$0xff]  ;;  %v2851_v58 = vpack.c.bf16 %v388_v51, %v384_v50  ;;  %v404_v12 = vld [vmem:[%s7574_s1 + $0xba8] sm:$0xff]  ;;  %v3241_v13 = vpack.c.bf16 %v141_v5, %v137_v4  ;;  %v2857_v14 = vpack.c.bf16 %v395_v7, %v391_v3  ;;  %v399_v16 = vld [vmem:[%s7574_s1 + $0xb80] sm:$0xff] }
  0x61   :  { %2832 = vmatprep.subr.bf16.mxu0 %v2831_v54  ;;  %v3235_v54 = vpack.c.bf16 %v134_v49, %v130_v47  ;;  %v145_v17 = vld [vmem:[%s7574_s1 + $0x390] sm:$0xff]  ;;  %v403_v20 = vld [vmem:[%s7574_s1 + $0xba0] sm:$0xff]  ;;  %v412_v24 = vld [vmem:[%s7574_s1 + $0xbe8] sm:$0xff] }
  0x62   :  { %3218 = vmatpush1.bf16.msra.mxu1 %v3217_v33  ;;  %v138_v33 = vld [vmem:[%s7574_s1 + $0x358] sm:$0xff]  ;;  %v149_v18 = vld [vmem:[%s7574_s1 + $0x3b0] sm:$0xff]  ;;  %v2861_v27 = vpack.c.bf16 %v403_v20, %v399_v16  ;;  %v407_v29 = vld [vmem:[%s7574_s1 + $0xbc0] sm:$0xff] }
  0x63   :  { %3220 = vmatprep.subr.bf16.mxu1 %v3219_v62  ;;  %v392_v62 = vld [vmem:[%s7574_s1 + $0xb48] sm:$0xff]  ;;  %v3245_v26 = vpack.c.bf16 %v149_v18, %v145_v17  ;;  %v153_v30 = vld [vmem:[%s7574_s1 + $0x3d0] sm:$0xff]  ;;  %v411_v35 = vld [vmem:[%s7574_s1 + $0xbe0] sm:$0xff] }
  0x64   :  { %2834 = vmatpush1.bf16.msra.mxu0 %v2833_v60  ;;  %v142_v60 = vld [vmem:[%s7574_s1 + $0x378] sm:$0xff]  ;;  %v2855_v6 = vpack.c.bf16 %v396_v63, %v392_v62  ;;  %v157_v31 = vld [vmem:[%s7574_s1 + $0x3f0] sm:$0xff]  ;;  %v416_v40 = vld [vmem:[%s7574_s1 + $0xc08] sm:$0xff] }
  0x65   :  { %2836 = vmatprep.subr.bf16.mxu0 %v2835_v2  ;;  %v3239_v2 = vpack.c.bf16 %v142_v60, %v138_v33  ;;  %v420_v42 = vld [vmem:[%s7574_s1 + $0xc28] sm:$0xff]  ;;  %v3249_v43 = vpack.c.bf16 %v157_v31, %v153_v30  ;;  %v415_v47 = vld [vmem:[%s7574_s1 + $0xc00] sm:$0xff]  ;;  %v165_v49 = vld [vmem:[%s7574_s1 + $0x430] sm:$0xff] }
  0x66   :  { %3222 = vmatpush1.bf16.msra.mxu1 %v3221_v8  ;;  %v146_v8 = vld [vmem:[%s7574_s1 + $0x398] sm:$0xff]  ;;  %v2867_v50 = vpack.c.bf16 %v420_v42, %v416_v40  ;;  %v419_v51 = vld [vmem:[%s7574_s1 + $0xc20] sm:$0xff]  ;;  %v424_v55 = vld [vmem:[%s7574_s1 + $0xc48] sm:$0xff] }
  0x67   :  { %3224 = vmatprep.subr.bf16.mxu1 %v3223_v10  ;;  %v400_v10 = vld [vmem:[%s7574_s1 + $0xb88] sm:$0xff]  ;;  %v423_v33 = vld [vmem:[%s7574_s1 + $0xc40] sm:$0xff]  ;;  %v169_v60 = vld [vmem:[%s7574_s1 + $0x450] sm:$0xff] }
  0x68   :  { %2838 = vmatpush1.bf16.msra.mxu0 %v2837_v9  ;;  %v150_v9 = vld [vmem:[%s7574_s1 + $0x3b8] sm:$0xff]  ;;  %v2859_v19 = vpack.c.bf16 %v404_v12, %v400_v10  ;;  %v428_v56 = vld [vmem:[%s7574_s1 + $0xc68] sm:$0xff]  ;;  %v173_v62 = vld [vmem:[%s7574_s1 + $0x470] sm:$0xff] }
  0x69   :  { %2840 = vmatprep.subr.bf16.mxu0 %v2839_v15  ;;  %v3243_v15 = vpack.c.bf16 %v150_v9, %v146_v8  ;;  %v2871_v63 = vpack.c.bf16 %v428_v56, %v424_v55  ;;  %v432_v4 = vld [vmem:[%s7574_s1 + $0xc88] sm:$0xff]  ;;  %v177_v9 = vld [vmem:[%s7574_s1 + $0x490] sm:$0xff]  ;;  %v451_v40 = vld [vmem:[%s7574_s1 + $0xd20] sm:$0xff] }
  0x6a   :  { %3226 = vmatpush1.bf16.msra.mxu1 %v3225_v21  ;;  %v154_v21 = vld [vmem:[%s7574_s1 + $0x3d8] sm:$0xff]  ;;  %v436_v5 = vld [vmem:[%s7574_s1 + $0xca8] sm:$0xff]  ;;  %v181_v10 = vld [vmem:[%s7574_s1 + $0x4b0] sm:$0xff] }
  0x6b   :  { %3228 = vmatprep.subr.bf16.mxu1 %v3227_v23  ;;  %v408_v23 = vld [vmem:[%s7574_s1 + $0xbc8] sm:$0xff]  ;;  %v2875_v12 = vpack.c.bf16 %v436_v5, %v432_v4  ;;  %v3261_v18 = vpack.c.bf16 %v181_v10, %v177_v9  ;;  %v202_v42 = vld [vmem:[%s7574_s1 + $0x558] sm:$0xff]  ;;  %v459_v55 = vld [vmem:[%s7574_s1 + $0xd60] sm:$0xff] }
  0x6c   :  { %2842 = vmatpush1.bf16.msra.mxu0 %v2841_v22  ;;  %v158_v22 = vld [vmem:[%s7574_s1 + $0x3f8] sm:$0xff]  ;;  %v2863_v32 = vpack.c.bf16 %v412_v24, %v408_v23  ;;  %v440_v16 = vld [vmem:[%s7574_s1 + $0xcc8] sm:$0xff]  ;;  %v189_v23 = vld [vmem:[%s7574_s1 + $0x4f0] sm:$0xff] }
  0x6d   :  { %2844 = vmatprep.subr.bf16.mxu0 %v2843_v28  ;;  %v3247_v28 = vpack.c.bf16 %v158_v22, %v154_v21  ;;  %v444_v17 = vld [vmem:[%s7574_s1 + $0xce8] sm:$0xff]  ;;  %v439_v21 = vld [vmem:[%s7574_s1 + $0xcc0] sm:$0xff]  ;;  %v185_v22 = vld [vmem:[%s7574_s1 + $0x4d0] sm:$0xff] }
  0x6e   :  { %3230 = vmatpush1.bf16.msra.mxu1 %v3229_v36  ;;  %v162_v36 = vld [vmem:[%s7574_s1 + $0x418] sm:$0xff]  ;;  %v443_v24 = vld [vmem:[%s7574_s1 + $0xce0] sm:$0xff]  ;;  %v3265_v30 = vpack.c.bf16 %v189_v23, %v185_v22 }
  0x6f   :  { %3232 = vmatprep.subr.bf16.mxu1 %v3231_v39  ;;  %v1098_v39 = vcombine.high %v4518_v38, %v4518_v38  ;;  %v161_v38 = vld [vmem:[%s7574_s1 + $0x410] sm:$0xff]  ;;  %v2881_v31 = vpack.c.bf16 %v443_v24, %v439_v21  ;;  %v210_v56 = vld [vmem:[%s7574_s1 + $0x598] sm:$0xff]  ;;  %v467_v4 = vld [vmem:[%s7574_s1 + $0xda0] sm:$0xff] }
  0x70   :  { %2846 = vmatpush1.bf16.msra.mxu0 %v2845_v37  ;;  %v166_v37 = vld [vmem:[%s7574_s1 + $0x438] sm:$0xff]  ;;  %v3253_v57 = vpack.c.bf16 %v165_v49, %v161_v38  ;;  %v225_v24 = vld [vmem:[%s7574_s1 + $0x610] sm:$0xff] }
  0x71   :  { %2848 = vmatprep.subr.bf16.mxu0 %v2847_v45  ;;  %v2865_v45 = vpack.c.bf16 %v411_v35, %v407_v29  ;;  %v3251_v46 = vpack.c.bf16 %v166_v37, %v162_v36  ;;  %v452_v29 = vld [vmem:[%s7574_s1 + $0xd28] sm:$0xff]  ;;  %v447_v35 = vld [vmem:[%s7574_s1 + $0xd00] sm:$0xff]  ;;  %v193_v36 = vld [vmem:[%s7574_s1 + $0x510] sm:$0xff] }
  0x72   :  { %3234 = vmatpush1.bf16.msra.mxu1 %v3233_v52  ;;  %v170_v52 = vld [vmem:[%s7574_s1 + $0x458] sm:$0xff]  ;;  %v197_v37 = vld [vmem:[%s7574_s1 + $0x530] sm:$0xff]  ;;  %v2885_v38 = vpack.c.bf16 %v451_v40, %v447_v35 }
  0x73   :  { %3236 = vmatprep.subr.bf16.mxu1 %v3235_v54  ;;  %v4781_v54 = vrot.slane %v1098_v39, %v4218_v11  ;;  %v218_v5 = vld [vmem:[%s7574_s1 + $0x5d8] sm:$0xff]  ;;  %v233_v40 = vld [vmem:[%s7574_s1 + $0x650] sm:$0xff] }
  0x74   :  { %2850 = vmatpush1.bf16.msra.mxu0 %v2849_v53  ;;  %v174_v53 = vld [vmem:[%s7574_s1 + $0x478] sm:$0xff] }
  0x75   :  { %2852 = vmatprep.subr.bf16.mxu0 %v2851_v58  ;;  %v2869_v58 = vpack.c.bf16 %v419_v51, %v415_v47  ;;  %v3255_v59 = vpack.c.bf16 %v174_v53, %v170_v52  ;;  %v4809_v3 = vcombine.high %v4781_v54, %v4781_v54  ;;  %v3269_v47 = vpack.c.bf16 %v197_v37, %v193_v36  ;;  %v201_v51 = vld [vmem:[%s7574_s1 + $0x550] sm:$0xff] }
  0x76   :  { %3238 = vmatpush1.bf16.msra.mxu1 %v3237_v0  ;;  %v427_v0 = vld [vmem:[%s7574_s1 + $0xc60] sm:$0xff]  ;;  %v205_v52 = vld [vmem:[%s7574_s1 + $0x570] sm:$0xff] }
  0x77   :  { %3240 = vmatprep.subr.bf16.mxu1 %v3239_v2  ;;  %v182_v2 = vld [vmem:[%s7574_s1 + $0x4b8] sm:$0xff]  ;;  %v2873_v7 = vpack.c.bf16 %v427_v0, %v423_v33  ;;  %v3273_v33 = vpack.c.bf16 %v205_v52, %v201_v51  ;;  %v209_v0 = vld [vmem:[%s7574_s1 + $0x590] sm:$0xff] }
  0x78   :  { %2854 = vmatpush1.bf16.msra.mxu0 %v2853_v1  ;;  %v178_v1 = vld [vmem:[%s7574_s1 + $0x498] sm:$0xff] }
  0x79   :  { %2856 = vmatprep.subr.bf16.mxu0 %v2855_v6  ;;  %v3257_v6 = vpack.c.bf16 %v173_v62, %v169_v60  ;;  %v3259_v8 = vpack.c.bf16 %v182_v2, %v178_v1  ;;  %v213_v1 = vld [vmem:[%s7574_s1 + $0x5b0] sm:$0xff] }
  0x7a   :  { %3242 = vmatpush1.bf16.msra.mxu1 %v3241_v13  ;;  %v435_v13 = vld [vmem:[%s7574_s1 + $0xca0] sm:$0xff] }
  0x7b   :  { %3244 = vmatprep.subr.bf16.mxu1 %v3243_v15  ;;  %v190_v15 = vld [vmem:[%s7574_s1 + $0x4f8] sm:$0xff] }
  0x7c   :  { %2858 = vmatpush1.bf16.msra.mxu0 %v2857_v14  ;;  %v186_v14 = vld [vmem:[%s7574_s1 + $0x4d8] sm:$0xff] }
  0x7d   :  { %2860 = vmatprep.subr.bf16.mxu0 %v2859_v19  ;;  %v3263_v20 = vpack.c.bf16 %v190_v15, %v186_v14  ;;  %v221_v14 = vld [vmem:[%s7574_s1 + $0x5f0] sm:$0xff] }
  0x7e   :  { %3246 = vmatpush1.bf16.msra.mxu1 %v3245_v26  ;;  %v194_v26 = vld [vmem:[%s7574_s1 + $0x518] sm:$0xff] }
  0x7f   :  { %3248 = vmatprep.subr.bf16.mxu1 %v3247_v28  ;;  %v448_v28 = vld [vmem:[%s7574_s1 + $0xd08] sm:$0xff] }
  0x80   :  { %2862 = vmatpush1.bf16.msra.mxu0 %v2861_v27  ;;  %v198_v27 = vld [vmem:[%s7574_s1 + $0x538] sm:$0xff]  ;;  %v2883_v39 = vpack.c.bf16 %v452_v29, %v448_v28  ;;  %v483_v28 = vld [vmem:[%s7574_s1 + $0xe20] sm:$0xff] }
  0x81   :  { %2864 = vmatprep.subr.bf16.mxu0 %v2863_v32  ;;  %v3267_v32 = vpack.c.bf16 %v198_v27, %v194_v26  ;;  %v229_v26 = vld [vmem:[%s7574_s1 + $0x630] sm:$0xff]  ;;  %v234_v29 = vld [vmem:[%s7574_s1 + $0x658] sm:$0xff] }
  0x82   :  { %3250 = vmatpush1.bf16.msra.mxu1 %v3249_v43  ;;  %v206_v43 = vld [vmem:[%s7574_s1 + $0x578] sm:$0xff]  ;;  %v3285_v35 = vpack.c.bf16 %v229_v26, %v225_v24 }
  0x83   :  { %3252 = vmatprep.subr.bf16.mxu1 %v3251_v46  ;;  %v460_v46 = vld [vmem:[%s7574_s1 + $0xd68] sm:$0xff]  ;;  %v3271_v49 = vpack.c.bf16 %v206_v43, %v202_v42  ;;  %v237_v42 = vld [vmem:[%s7574_s1 + $0x670] sm:$0xff] }
  0x84   :  { %2866 = vmatpush1.bf16.msra.mxu0 %v2865_v45  ;;  %v456_v45 = vld [vmem:[%s7574_s1 + $0xd48] sm:$0xff] }
  0x85   :  { %2868 = vmatprep.subr.bf16.mxu0 %v2867_v50  ;;  %1798 = vmatmul.mubr.f32.vlgmr.msra.gmra.mrb[2].mxu1 %v4248_v25  ;;  %v431_v25 = vld [vmem:[%s7574_s1 + $0xc80] sm:$0xff]  ;;  %v2887_v53 = vpack.c.bf16 %v460_v46, %v456_v45  ;;  %v242_v46 = vld [vmem:[%s7574_s1 + $0x698] sm:$0xff] }
  0x86   :  { %3254 = vmatpush1.bf16.msra.mxu1 %v3253_v57  ;;  %1868 = vmatprep.mubr.f32.mxu1 %v4284_v41  ;;  %v2877_v19 = vpack.c.bf16 %v435_v13, %v431_v25  ;;  %v2879_v41 = vpack.c.bf16 %v444_v17, %v440_v16  ;;  %v455_v50 = vld [vmem:[%s7574_s1 + $0xd40] sm:$0xff]  ;;  %v214_v57 = vld [vmem:[%s7574_s1 + $0x5b8] sm:$0xff]  ;;  %v3277_v25 = vpack.c.bf16 %v213_v1, %v209_v0  ;;  %v217_v13 = vld [vmem:[%s7574_s1 + $0x5d0] sm:$0xff] }
  0x87   :  { %1372 = vmatmul.mubr.f32.vlgmr.msra.gmra.mrb[0].mxu0 %v4531_v44  ;;  %3256 = vmatprep.subr.bf16.mxu1 %v3255_v59  ;;  %v468_v59 = vld [vmem:[%s7574_s1 + $0xda8] sm:$0xff]  ;;  %v2889_v60 = vpack.c.bf16 %v459_v55, %v455_v50  ;;  %v3275_v62 = vpack.c.bf16 %v214_v57, %v210_v56  ;;  %v475_v16 = vld [vmem:[%s7574_s1 + $0xde0] sm:$0xff]  ;;  %v226_v17 = vld [vmem:[%s7574_s1 + $0x618] sm:$0xff]  ;;  %v3281_v21 = vpack.c.bf16 %v221_v14, %v217_v13 }
  0x88   :  { %2870 = vmatpush1.bf16.msra.mxu0 %v2869_v58  ;;  %1442 = vmatprep.mubr.f32.mxu0 %v4809_v3  ;;  %v464_v58 = vld [vmem:[%s7574_s1 + $0xd88] sm:$0xff]  ;;  %v491_v45 = vld [vmem:[%s7574_s1 + $0xe60] sm:$0xff]  ;;  %v3289_v50 = vpack.c.bf16 %v237_v42, %v233_v40  ;;  %v241_v55 = vld [vmem:[%s7574_s1 + $0x690] sm:$0xff] }
  0x89   :  { %2872 = vmatprep.subr.bf16.mxu0 %v2871_v63  ;;  %v463_v63 = vld [vmem:[%s7574_s1 + $0xd80] sm:$0xff]  ;;  %v2891_v2 = vpack.c.bf16 %v468_v59, %v464_v58  ;;  %v245_v56 = vld [vmem:[%s7574_s1 + $0x6b0] sm:$0xff]  ;;  %v250_v59 = vld [vmem:[%s7574_s1 + $0x6d8] sm:$0xff] }
  0x8a   :  { %3258 = vmatpush1.bf16.msra.mxu1 %v3257_v6  ;;  %v222_v6 = vld [vmem:[%s7574_s1 + $0x5f8] sm:$0xff]  ;;  %v2893_v9 = vpack.c.bf16 %v467_v4, %v463_v63  ;;  %v499_v58 = vld [vmem:[%s7574_s1 + $0xea0] sm:$0xff]  ;;  %v3293_v63 = vpack.c.bf16 %v245_v56, %v241_v55  ;;  %v249_v4 = vld [vmem:[%s7574_s1 + $0x6d0] sm:$0xff] }
  0x8b   :  { %3260 = vmatprep.subr.bf16.mxu1 %v3259_v8  ;;  %v476_v8 = vld [vmem:[%s7574_s1 + $0xde8] sm:$0xff]  ;;  %v3279_v10 = vpack.c.bf16 %v222_v6, %v218_v5  ;;  %v253_v5 = vld [vmem:[%s7574_s1 + $0x6f0] sm:$0xff] }
  0x8c   :  { %2874 = vmatpush1.bf16.msra.mxu0 %v2873_v7  ;;  %v472_v7 = vld [vmem:[%s7574_s1 + $0xdc8] sm:$0xff] }
  0x8d   :  { %2876 = vmatprep.subr.bf16.mxu0 %v2875_v12  ;;  %v471_v12 = vld [vmem:[%s7574_s1 + $0xdc0] sm:$0xff]  ;;  %v2895_v15 = vpack.c.bf16 %v476_v8, %v472_v7  ;;  %v258_v8 = vld [vmem:[%s7574_s1 + $0x718] sm:$0xff] }
  0x8e   :  { %3262 = vmatpush1.bf16.msra.mxu1 %v3261_v18  ;;  %v230_v18 = vld [vmem:[%s7574_s1 + $0x638] sm:$0xff]  ;;  %v2897_v22 = vpack.c.bf16 %v475_v16, %v471_v12  ;;  %v507_v7 = vld [vmem:[%s7574_s1 + $0xee0] sm:$0xff]  ;;  %v3297_v12 = vpack.c.bf16 %v253_v5, %v249_v4  ;;  %v257_v16 = vld [vmem:[%s7574_s1 + $0x710] sm:$0xff] }
  0x8f   :  { %3264 = vmatprep.subr.bf16.mxu1 %v3263_v20  ;;  %v484_v20 = vld [vmem:[%s7574_s1 + $0xe28] sm:$0xff]  ;;  %v3283_v23 = vpack.c.bf16 %v230_v18, %v226_v17  ;;  %v261_v17 = vld [vmem:[%s7574_s1 + $0x730] sm:$0xff] }
  0x90   :  { %2878 = vmatpush1.bf16.msra.mxu0 %v2877_v19  ;;  %v480_v19 = vld [vmem:[%s7574_s1 + $0xe08] sm:$0xff] }
  0x91   :  { %2880 = vmatprep.subr.bf16.mxu0 %v2879_v41  ;;  %v479_v41 = vld [vmem:[%s7574_s1 + $0xe00] sm:$0xff]  ;;  %v2899_v27 = vpack.c.bf16 %v484_v20, %v480_v19  ;;  %v266_v20 = vld [vmem:[%s7574_s1 + $0x758] sm:$0xff] }
  0x92   :  { %3266 = vmatpush1.bf16.msra.mxu1 %v3265_v30  ;;  %v238_v30 = vld [vmem:[%s7574_s1 + $0x678] sm:$0xff]  ;;  %v2901_v36 = vpack.c.bf16 %v483_v28, %v479_v41  ;;  %v515_v19 = vld [vmem:[%s7574_s1 + $0xf20] sm:$0xff]  ;;  %v3301_v41 = vpack.c.bf16 %v261_v17, %v257_v16  ;;  %v265_v28 = vld [vmem:[%s7574_s1 + $0x750] sm:$0xff] }
  0x93   :  { %3268 = vmatprep.subr.bf16.mxu1 %v3267_v32  ;;  %v492_v32 = vld [vmem:[%s7574_s1 + $0xe68] sm:$0xff]  ;;  %v3287_v37 = vpack.c.bf16 %v238_v30, %v234_v29  ;;  %v269_v29 = vld [vmem:[%s7574_s1 + $0x770] sm:$0xff] }
  0x94   :  { %2882 = vmatpush1.bf16.msra.mxu0 %v2881_v31  ;;  %v488_v31 = vld [vmem:[%s7574_s1 + $0xe48] sm:$0xff] }
  0x95   :  { %2884 = vmatprep.subr.bf16.mxu0 %v2883_v39  ;;  %v487_v39 = vld [vmem:[%s7574_s1 + $0xe40] sm:$0xff]  ;;  %v2903_v43 = vpack.c.bf16 %v492_v32, %v488_v31  ;;  %v274_v32 = vld [vmem:[%s7574_s1 + $0x798] sm:$0xff]  ;;  %v556_v16 = vld [vmem:[%s7574_s1 + $0x1068] sm:$0xff] }
  0x96   :  { %3270 = vmatpush1.bf16.msra.mxu1 %v3269_v47  ;;  %v246_v47 = vld [vmem:[%s7574_s1 + $0x6b8] sm:$0xff]  ;;  %v2905_v51 = vpack.c.bf16 %v491_v45, %v487_v39  ;;  %v523_v31 = vld [vmem:[%s7574_s1 + $0xf60] sm:$0xff]  ;;  %v3305_v39 = vpack.c.bf16 %v269_v29, %v265_v28  ;;  %v273_v45 = vld [vmem:[%s7574_s1 + $0x790] sm:$0xff] }
  0x97   :  { %3272 = vmatprep.subr.bf16.mxu1 %v3271_v49  ;;  %v500_v49 = vld [vmem:[%s7574_s1 + $0xea8] sm:$0xff]  ;;  %v3291_v52 = vpack.c.bf16 %v246_v47, %v242_v46  ;;  %v277_v46 = vld [vmem:[%s7574_s1 + $0x7b0] sm:$0xff] }
  0x98   :  { %2886 = vmatpush1.bf16.msra.mxu0 %v2885_v38  ;;  %v496_v38 = vld [vmem:[%s7574_s1 + $0xe88] sm:$0xff] }
  0x99   :  { %2888 = vmatprep.subr.bf16.mxu0 %v2887_v53  ;;  %v495_v53 = vld [vmem:[%s7574_s1 + $0xe80] sm:$0xff]  ;;  %v2907_v57 = vpack.c.bf16 %v500_v49, %v496_v38  ;;  %v282_v49 = vld [vmem:[%s7574_s1 + $0x7d8] sm:$0xff]  ;;  %v560_v28 = vld [vmem:[%s7574_s1 + $0x1088] sm:$0xff] }
  0x9a   :  { %3274 = vmatpush1.bf16.msra.mxu1 %v3273_v33  ;;  %v254_v33 = vld [vmem:[%s7574_s1 + $0x6f8] sm:$0xff]  ;;  %v2909_v0 = vpack.c.bf16 %v499_v58, %v495_v53  ;;  %v531_v38 = vld [vmem:[%s7574_s1 + $0xfa0] sm:$0xff]  ;;  %v3309_v53 = vpack.c.bf16 %v277_v46, %v273_v45  ;;  %v281_v58 = vld [vmem:[%s7574_s1 + $0x7d0] sm:$0xff] }
  0x9b   :  { %3276 = vmatprep.subr.bf16.mxu1 %v3275_v62  ;;  %v508_v62 = vld [vmem:[%s7574_s1 + $0xee8] sm:$0xff]  ;;  %v3295_v1 = vpack.c.bf16 %v254_v33, %v250_v59  ;;  %v285_v59 = vld [vmem:[%s7574_s1 + $0x7f0] sm:$0xff] }
  0x9c   :  { %2890 = vmatpush1.bf16.msra.mxu0 %v2889_v60  ;;  %v504_v60 = vld [vmem:[%s7574_s1 + $0xec8] sm:$0xff]  ;;  %v3313_v4 = vpack.c.bf16 %v285_v59, %v281_v58 }
  0x9d   :  { %2892 = vmatprep.subr.bf16.mxu0 %v2891_v2  ;;  %v503_v2 = vld [vmem:[%s7574_s1 + $0xec0] sm:$0xff]  ;;  %v2911_v6 = vpack.c.bf16 %v508_v62, %v504_v60  ;;  %v290_v62 = vld [vmem:[%s7574_s1 + $0x818] sm:$0xff]  ;;  %v564_v29 = vld [vmem:[%s7574_s1 + $0x10a8] sm:$0xff] }
  0x9e   :  { %3278 = vmatpush1.bf16.msra.mxu1 %v3277_v25  ;;  %v262_v25 = vld [vmem:[%s7574_s1 + $0x738] sm:$0xff]  ;;  %v2913_v13 = vpack.c.bf16 %v507_v7, %v503_v2  ;;  %v539_v60 = vld [vmem:[%s7574_s1 + $0xfe0] sm:$0xff]  ;;  %v5160_v2 = vld [vmem:[%s7573_s0 + $0x10] sm:$0xff] }
  0x9f   :  { %3280 = vmatprep.subr.bf16.mxu1 %v3279_v10  ;;  %v516_v10 = vld [vmem:[%s7574_s1 + $0xf28] sm:$0xff]  ;;  %v3299_v14 = vpack.c.bf16 %v262_v25, %v258_v8  ;;  %v543_v7 = vld [vmem:[%s7574_s1 + $0x1000] sm:$0xff]  ;;  %v289_v8 = vld [vmem:[%s7574_s1 + $0x810] sm:$0xff] }
  0xa0   :  { %2894 = vmatpush1.bf16.msra.mxu0 %v2893_v9  ;;  %v512_v9 = vld [vmem:[%s7574_s1 + $0xf08] sm:$0xff]  ;;  %v293_v25 = vld [vmem:[%s7574_s1 + $0x830] sm:$0xff] }
  0xa1   :  { %2896 = vmatprep.subr.bf16.mxu0 %v2895_v15  ;;  %v511_v15 = vld [vmem:[%s7574_s1 + $0xf00] sm:$0xff]  ;;  %v2915_v18 = vpack.c.bf16 %v516_v10, %v512_v9  ;;  %v3317_v17 = vpack.c.bf16 %v293_v25, %v289_v8  ;;  %v572_v45 = vld [vmem:[%s7574_s1 + $0x10e8] sm:$0xff] }
  0xa2   :  { %3282 = vmatpush1.bf16.msra.mxu1 %v3281_v21  ;;  %v270_v21 = vld [vmem:[%s7574_s1 + $0x778] sm:$0xff]  ;;  %v2917_v24 = vpack.c.bf16 %v515_v19, %v511_v15  ;;  %v547_v10 = vld [vmem:[%s7574_s1 + $0x1020] sm:$0xff]  ;;  %v552_v15 = vld [vmem:[%s7574_s1 + $0x1048] sm:$0xff] }
  0xa3   :  { %3284 = vmatprep.subr.bf16.mxu1 %v3283_v23  ;;  %v524_v23 = vld [vmem:[%s7574_s1 + $0xf68] sm:$0xff]  ;;  %v3303_v26 = vpack.c.bf16 %v270_v21, %v266_v20  ;;  %v551_v20 = vld [vmem:[%s7574_s1 + $0x1040] sm:$0xff]  ;;  %v297_v21 = vld [vmem:[%s7574_s1 + $0x850] sm:$0xff] }
  0xa4   :  { %2898 = vmatpush1.bf16.msra.mxu0 %v2897_v22  ;;  %v520_v22 = vld [vmem:[%s7574_s1 + $0xf48] sm:$0xff] }
  0xa5   :  { %2900 = vmatprep.subr.bf16.mxu0 %v2899_v27  ;;  %v519_v27 = vld [vmem:[%s7574_s1 + $0xf40] sm:$0xff]  ;;  %v2919_v30 = vpack.c.bf16 %v524_v23, %v520_v22  ;;  %v301_v22 = vld [vmem:[%s7574_s1 + $0x870] sm:$0xff]  ;;  %v2935_v23 = vpack.c.bf16 %v556_v16, %v552_v15 }
  0xa6   :  { %3286 = vmatpush1.bf16.msra.mxu1 %v3285_v35  ;;  %v278_v35 = vld [vmem:[%s7574_s1 + $0x7b8] sm:$0xff]  ;;  %v2921_v40 = vpack.c.bf16 %v523_v31, %v519_v27  ;;  %v587_v16 = vld [vmem:[%s7574_s1 + $0x1160] sm:$0xff] }
  0xa7   :  { %3288 = vmatprep.subr.bf16.mxu1 %v3287_v37  ;;  %v532_v37 = vld [vmem:[%s7574_s1 + $0xfa8] sm:$0xff]  ;;  %v3307_v42 = vpack.c.bf16 %v278_v35, %v274_v32  ;;  %v305_v35 = vld [vmem:[%s7574_s1 + $0x890] sm:$0xff] }
  0xa8   :  { %2902 = vmatpush1.bf16.msra.mxu0 %v2901_v36  ;;  %v528_v36 = vld [vmem:[%s7574_s1 + $0xf88] sm:$0xff] }
  0xa9   :  { %2904 = vmatprep.subr.bf16.mxu0 %v2903_v43  ;;  %v527_v43 = vld [vmem:[%s7574_s1 + $0xf80] sm:$0xff]  ;;  %v2923_v47 = vpack.c.bf16 %v532_v37, %v528_v36  ;;  %v309_v36 = vld [vmem:[%s7574_s1 + $0x8b0] sm:$0xff]  ;;  %v2939_v37 = vpack.c.bf16 %v564_v29, %v560_v28 }
  0xaa   :  { %3290 = vmatpush1.bf16.msra.mxu1 %v3289_v50  ;;  %v286_v50 = vld [vmem:[%s7574_s1 + $0x7f8] sm:$0xff]  ;;  %v2925_v55 = vpack.c.bf16 %v531_v38, %v527_v43  ;;  %v568_v43 = vld [vmem:[%s7574_s1 + $0x10c8] sm:$0xff]  ;;  %v3325_v46 = vpack.c.bf16 %v309_v36, %v305_v35  ;;  %v595_v29 = vld [vmem:[%s7574_s1 + $0x11a0] sm:$0xff] }
  0xab   :  { %3292 = vmatprep.subr.bf16.mxu1 %v3291_v52  ;;  %v540_v52 = vld [vmem:[%s7574_s1 + $0xfe8] sm:$0xff]  ;;  %v3311_v56 = vpack.c.bf16 %v286_v50, %v282_v49  ;;  %v567_v49 = vld [vmem:[%s7574_s1 + $0x10c0] sm:$0xff]  ;;  %v313_v50 = vld [vmem:[%s7574_s1 + $0x8d0] sm:$0xff] }
  0xac   :  { %2906 = vmatpush1.bf16.msra.mxu0 %v2905_v51  ;;  %v536_v51 = vld [vmem:[%s7574_s1 + $0xfc8] sm:$0xff] }
  0xad   :  { %2908 = vmatprep.subr.bf16.mxu0 %v2907_v57  ;;  %v535_v57 = vld [vmem:[%s7574_s1 + $0xfc0] sm:$0xff]  ;;  %v2927_v33 = vpack.c.bf16 %v540_v52, %v536_v51  ;;  %v317_v51 = vld [vmem:[%s7574_s1 + $0x8f0] sm:$0xff] }
  0xae   :  { %3294 = vmatpush1.bf16.msra.mxu1 %v3293_v63  ;;  %v294_v63 = vld [vmem:[%s7574_s1 + $0x838] sm:$0xff]  ;;  %v2929_v5 = vpack.c.bf16 %v539_v60, %v535_v57  ;;  %v571_v52 = vld [vmem:[%s7574_s1 + $0x10e0] sm:$0xff]  ;;  %v580_v57 = vld [vmem:[%s7574_s1 + $0x1128] sm:$0xff]  ;;  %v3329_v58 = vpack.c.bf16 %v317_v51, %v313_v50 }
  0xaf   :  { %3296 = vmatprep.subr.bf16.mxu1 %v3295_v1  ;;  %v548_v1 = vld [vmem:[%s7574_s1 + $0x1028] sm:$0xff]  ;;  %v2945_v59 = vpack.c.bf16 %v571_v52, %v567_v49  ;;  %v575_v60 = vld [vmem:[%s7574_s1 + $0x1100] sm:$0xff] }
  0xb0   :  { %2910 = vmatpush1.bf16.msra.mxu0 %v2909_v0  ;;  %v544_v0 = vld [vmem:[%s7574_s1 + $0x1008] sm:$0xff]  ;;  %v607_v52 = vld [vmem:[%s7574_s1 + $0x1200] sm:$0xff] }
  0xb1   :  { %2912 = vmatprep.subr.bf16.mxu0 %v2911_v6  ;;  %v3315_v6 = vpack.c.bf16 %v294_v63, %v290_v62  ;;  %v2931_v9 = vpack.c.bf16 %v548_v1, %v544_v0  ;;  %v321_v62 = vld [vmem:[%s7574_s1 + $0x910] sm:$0xff]  ;;  %v579_v1 = vld [vmem:[%s7574_s1 + $0x1120] sm:$0xff]  ;;  %v612_v49 = vld [vmem:[%s7574_s1 + $0x1228] sm:$0xff] }
  0xb2   :  { %3298 = vmatpush1.bf16.msra.mxu1 %v3297_v12  ;;  %v298_v12 = vld [vmem:[%s7574_s1 + $0x858] sm:$0xff]  ;;  %v325_v63 = vld [vmem:[%s7574_s1 + $0x930] sm:$0xff]  ;;  %v2949_v25 = vpack.c.bf16 %v579_v1, %v575_v60  ;;  %v620_v60 = vld [vmem:[%s7574_s1 + $0x1268] sm:$0xff] }
  0xb3   :  { %3300 = vmatprep.subr.bf16.mxu1 %v3299_v14  ;;  %v5182_v14 = vrot.slane %v5160_v2, %v4218_v11  ;;  %v3333_v8 = vpack.c.bf16 %v325_v63, %v321_v62  ;;  %v615_v1 = vld [vmem:[%s7574_s1 + $0x1240] sm:$0xff] }
  0xb4   :  { %2914 = vmatpush1.bf16.msra.mxu0 %v2913_v13  ;;  %v302_v13 = vld [vmem:[%s7574_s1 + $0x878] sm:$0xff] }
  0xb5   :  { %2916 = vmatprep.subr.bf16.mxu0 %v2915_v18  ;;  %v2933_v18 = vpack.c.bf16 %v547_v10, %v543_v7  ;;  %v3319_v19 = vpack.c.bf16 %v302_v13, %v298_v12  ;;  %v5210_v27 = vcombine.high %v5182_v14, %v5182_v14  ;;  %v588_v7 = vld [vmem:[%s7574_s1 + $0x1168] sm:$0xff]  ;;  %v583_v10 = vld [vmem:[%s7574_s1 + $0x1140] sm:$0xff]  ;;  %v329_v12 = vld [vmem:[%s7574_s1 + $0x950] sm:$0xff] }
  0xb6   :  { %3302 = vmatpush1.bf16.msra.mxu1 %v3301_v41  ;;  %v555_v41 = vld [vmem:[%s7574_s1 + $0x1060] sm:$0xff]  ;;  %v333_v13 = vld [vmem:[%s7574_s1 + $0x970] sm:$0xff] }
  0xb7   :  { %3304 = vmatprep.subr.bf16.mxu1 %v3303_v26  ;;  %v310_v26 = vld [vmem:[%s7574_s1 + $0x8b8] sm:$0xff]  ;;  %v2937_v31 = vpack.c.bf16 %v555_v41, %v551_v20  ;;  %v596_v20 = vld [vmem:[%s7574_s1 + $0x11a8] sm:$0xff]  ;;  %v591_v41 = vld [vmem:[%s7574_s1 + $0x1180] sm:$0xff] }
  0xb8   :  { %2918 = vmatpush1.bf16.msra.mxu0 %v2917_v24  ;;  %v306_v24 = vld [vmem:[%s7574_s1 + $0x898] sm:$0xff]  ;;  %v2957_v36 = vpack.c.bf16 %v595_v29, %v591_v41  ;;  %v636_v41 = vld [vmem:[%s7574_s1 + $0x12e8] sm:$0xff]  ;;  %v631_v29 = vld [vmem:[%s7574_s1 + $0x12c0] sm:$0xff] }
  0xb9   :  { %2920 = vmatprep.subr.bf16.mxu0 %v2919_v30  ;;  %v3321_v30 = vpack.c.bf16 %v301_v22, %v297_v21  ;;  %v3323_v32 = vpack.c.bf16 %v310_v26, %v306_v24  ;;  %v3337_v21 = vpack.c.bf16 %v333_v13, %v329_v12  ;;  %v2953_v22 = vpack.c.bf16 %v587_v16, %v583_v10  ;;  %v337_v24 = vld [vmem:[%s7574_s1 + $0x990] sm:$0xff]  ;;  %v628_v10 = vld [vmem:[%s7574_s1 + $0x12a8] sm:$0xff]  ;;  %v623_v16 = vld [vmem:[%s7574_s1 + $0x1280] sm:$0xff] }
  0xba   :  { %3306 = vmatpush1.bf16.msra.mxu1 %v3305_v39  ;;  %v563_v39 = vld [vmem:[%s7574_s1 + $0x10a0] sm:$0xff]  ;;  %v341_v26 = vld [vmem:[%s7574_s1 + $0x9b0] sm:$0xff] }
  0xbb   :  { %3308 = vmatprep.subr.bf16.mxu1 %v3307_v42  ;;  %v318_v42 = vld [vmem:[%s7574_s1 + $0x8f8] sm:$0xff]  ;;  %v3341_v35 = vpack.c.bf16 %v341_v26, %v337_v24 }
  0xbc   :  { %2922 = vmatpush1.bf16.msra.mxu0 %v2921_v40  ;;  %v314_v40 = vld [vmem:[%s7574_s1 + $0x8d8] sm:$0xff] }
  0xbd   :  { %2924 = vmatprep.subr.bf16.mxu0 %v2923_v47  ;;  %v3327_v38 = vpack.c.bf16 %v318_v42, %v314_v40  ;;  %v345_v40 = vld [vmem:[%s7574_s1 + $0x9d0] sm:$0xff] }
  0xbe   :  { %3310 = vmatpush1.bf16.msra.mxu1 %v3309_v53  ;;  %v322_v53 = vld [vmem:[%s7574_s1 + $0x918] sm:$0xff]  ;;  %v349_v42 = vld [vmem:[%s7574_s1 + $0x9f0] sm:$0xff] }
  0xbf   :  { %3312 = vmatprep.subr.bf16.mxu1 %v3311_v56  ;;  %v576_v56 = vld [vmem:[%s7574_s1 + $0x1108] sm:$0xff]  ;;  %v3345_v50 = vpack.c.bf16 %v349_v42, %v345_v40 }
  0xc0   :  { %2926 = vmatpush1.bf16.msra.mxu0 %v2925_v55  ;;  %v326_v55 = vld [vmem:[%s7574_s1 + $0x938] sm:$0xff]  ;;  %v2947_v0 = vpack.c.bf16 %v580_v57, %v576_v56  ;;  %v611_v57 = vld [vmem:[%s7574_s1 + $0x1220] sm:$0xff] }
  0xc1   :  { %2928 = vmatprep.subr.bf16.mxu0 %v2927_v33  ;;  %v3331_v33 = vpack.c.bf16 %v326_v55, %v322_v53  ;;  %v353_v53 = vld [vmem:[%s7574_s1 + $0xa10] sm:$0xff]  ;;  %v2965_v63 = vpack.c.bf16 %v611_v57, %v607_v52  ;;  %v652_v52 = vld [vmem:[%s7574_s1 + $0x1368] sm:$0xff]  ;;  %v647_v57 = vld [vmem:[%s7574_s1 + $0x1340] sm:$0xff] }
  0xc2   :  { %3314 = vmatpush1.bf16.msra.mxu1 %v3313_v4  ;;  %v330_v4 = vld [vmem:[%s7574_s1 + $0x958] sm:$0xff]  ;;  %v357_v55 = vld [vmem:[%s7574_s1 + $0xa30] sm:$0xff] }
  0xc3   :  { %3316 = vmatprep.subr.bf16.mxu1 %v3315_v6  ;;  %v584_v6 = vld [vmem:[%s7574_s1 + $0x1148] sm:$0xff]  ;;  %v3349_v62 = vpack.c.bf16 %v357_v55, %v353_v53 }
  0xc4   :  { %2930 = vmatpush1.bf16.msra.mxu0 %v2929_v5  ;;  %v334_v5 = vld [vmem:[%s7574_s1 + $0x978] sm:$0xff]  ;;  %v2951_v15 = vpack.c.bf16 %v588_v7, %v584_v6  ;;  %v619_v7 = vld [vmem:[%s7574_s1 + $0x1260] sm:$0xff] }
  0xc5   :  { %2932 = vmatprep.subr.bf16.mxu0 %v2931_v9  ;;  %1869 = vmatmul.mubr.f32.vlgmr.msra.gmra.mrb[2].mxu1 %v4264_v34  ;;  %v559_v34 = vld [vmem:[%s7574_s1 + $0x1080] sm:$0xff]  ;;  %v3335_v9 = vpack.c.bf16 %v334_v5, %v330_v4  ;;  %v361_v4 = vld [vmem:[%s7574_s1 + $0xa50] sm:$0xff]  ;;  %v2969_v13 = vpack.c.bf16 %v619_v7, %v615_v1  ;;  %v660_v1 = vld [vmem:[%s7574_s1 + $0x13a8] sm:$0xff] }
  0xc6   :  { %3318 = vmatpush1.bf16.msra.mxu1 %v3317_v17  ;;  %1939 = vmatprep.mubr.f32.mxu1 %v4541_v48  ;;  %v2941_v47 = vpack.c.bf16 %v563_v39, %v559_v34  ;;  %v2943_v48 = vpack.c.bf16 %v572_v45, %v568_v43  ;;  %v338_v17 = vld [vmem:[%s7574_s1 + $0x998] sm:$0xff]  ;;  %v604_v34 = vld [vmem:[%s7574_s1 + $0x11e8] sm:$0xff]  ;;  %v599_v39 = vld [vmem:[%s7574_s1 + $0x11c0] sm:$0xff] }
  0xc7   :  { %1443 = vmatmul.mubr.f32.vlgmr.msra.gmra.mrb[0].mxu0 %v4781_v54  ;;  %3320 = vmatprep.subr.bf16.mxu1 %v3319_v19  ;;  %v592_v19 = vld [vmem:[%s7574_s1 + $0x1188] sm:$0xff]  ;;  %v603_v45 = vld [vmem:[%s7574_s1 + $0x11e0] sm:$0xff]  ;;  %v365_v5 = vld [vmem:[%s7574_s1 + $0xa70] sm:$0xff] }
  0xc8   :  { %2934 = vmatpush1.bf16.msra.mxu0 %v2933_v18  ;;  %1513 = vmatprep.mubr.f32.mxu0 %v5210_v27  ;;  %v342_v18 = vld [vmem:[%s7574_s1 + $0x9b8] sm:$0xff]  ;;  %v2955_v28 = vpack.c.bf16 %v596_v20, %v592_v19  ;;  %v2961_v51 = vpack.c.bf16 %v603_v45, %v599_v39  ;;  %v3353_v12 = vpack.c.bf16 %v365_v5, %v361_v4  ;;  %v627_v20 = vld [vmem:[%s7574_s1 + $0x12a0] sm:$0xff]  ;;  %v644_v39 = vld [vmem:[%s7574_s1 + $0x1328] sm:$0xff] }
  0xc9   :  { %2936 = vmatprep.subr.bf16.mxu0 %v2935_v23  ;;  %v3339_v23 = vpack.c.bf16 %v342_v18, %v338_v17  ;;  %v369_v17 = vld [vmem:[%s7574_s1 + $0xa90] sm:$0xff]  ;;  %v2973_v26 = vpack.c.bf16 %v627_v20, %v623_v16  ;;  %v639_v45 = vld [vmem:[%s7574_s1 + $0x1300] sm:$0xff]  ;;  %v668_v16 = vld [vmem:[%s7574_s1 + $0x13e8] sm:$0xff] }
  0xca   :  { %3322 = vmatpush1.bf16.msra.mxu1 %v3321_v30  ;;  %v346_v30 = vld [vmem:[%s7574_s1 + $0x9d8] sm:$0xff]  ;;  %v373_v18 = vld [vmem:[%s7574_s1 + $0xab0] sm:$0xff]  ;;  %v655_v7 = vld [vmem:[%s7574_s1 + $0x1380] sm:$0xff] }
  0xcb   :  { %3324 = vmatprep.subr.bf16.mxu1 %v3323_v32  ;;  %v600_v32 = vld [vmem:[%s7574_s1 + $0x11c8] sm:$0xff]  ;;  %v3357_v24 = vpack.c.bf16 %v373_v18, %v369_v17  ;;  %v663_v20 = vld [vmem:[%s7574_s1 + $0x13c0] sm:$0xff] }
  0xcc   :  { %2938 = vmatpush1.bf16.msra.mxu0 %v2937_v31  ;;  %v350_v31 = vld [vmem:[%s7574_s1 + $0x9f8] sm:$0xff]  ;;  %v2959_v43 = vpack.c.bf16 %v604_v34, %v600_v32  ;;  %v635_v34 = vld [vmem:[%s7574_s1 + $0x12e0] sm:$0xff] }
  0xcd   :  { %2940 = vmatprep.subr.bf16.mxu0 %v2939_v37  ;;  %v3343_v37 = vpack.c.bf16 %v350_v31, %v346_v30  ;;  %v377_v30 = vld [vmem:[%s7574_s1 + $0xad0] sm:$0xff]  ;;  %v2977_v42 = vpack.c.bf16 %v635_v34, %v631_v29  ;;  %v672_v29 = vld [vmem:[%s7574_s1 + $0x1408] sm:$0xff] }
  0xce   :  { %3326 = vmatpush1.bf16.msra.mxu1 %v3325_v46  ;;  %v354_v46 = vld [vmem:[%s7574_s1 + $0xa18] sm:$0xff]  ;;  %v381_v31 = vld [vmem:[%s7574_s1 + $0xaf0] sm:$0xff] }
  0xcf   :  { %3328 = vmatprep.subr.bf16.mxu1 %v3327_v38  ;;  %v608_v38 = vld [vmem:[%s7574_s1 + $0x1208] sm:$0xff]  ;;  %v3361_v40 = vpack.c.bf16 %v381_v31, %v377_v30 }
  0xd0   :  { %2942 = vmatpush1.bf16.msra.mxu0 %v2941_v47  ;;  %v358_v47 = vld [vmem:[%s7574_s1 + $0xa38] sm:$0xff]  ;;  %v2963_v56 = vpack.c.bf16 %v612_v49, %v608_v38  ;;  %v643_v49 = vld [vmem:[%s7574_s1 + $0x1320] sm:$0xff]  ;;  %v676_v30 = vld [vmem:[%s7574_s1 + $0x1428] sm:$0xff] }
  0xd1   :  { %2944 = vmatprep.subr.bf16.mxu0 %v2943_v48  ;;  %v3347_v48 = vpack.c.bf16 %v358_v47, %v354_v46  ;;  %v385_v46 = vld [vmem:[%s7574_s1 + $0xb10] sm:$0xff]  ;;  %v2981_v55 = vpack.c.bf16 %v643_v49, %v639_v45  ;;  %v680_v45 = vld [vmem:[%s7574_s1 + $0x1448] sm:$0xff] }
  0xd2   :  { %3330 = vmatpush1.bf16.msra.mxu1 %v3329_v58  ;;  %v362_v58 = vld [vmem:[%s7574_s1 + $0xa58] sm:$0xff]  ;;  %v389_v47 = vld [vmem:[%s7574_s1 + $0xb30] sm:$0xff] }
  0xd3   :  { %3332 = vmatprep.subr.bf16.mxu1 %v3331_v33  ;;  %v616_v33 = vld [vmem:[%s7574_s1 + $0x1248] sm:$0xff]  ;;  %v3365_v53 = vpack.c.bf16 %v389_v47, %v385_v46 }
  0xd4   :  { %2946 = vmatpush1.bf16.msra.mxu0 %v2945_v59  ;;  %v366_v59 = vld [vmem:[%s7574_s1 + $0xa78] sm:$0xff]  ;;  %v2967_v6 = vpack.c.bf16 %v620_v60, %v616_v33  ;;  %v651_v60 = vld [vmem:[%s7574_s1 + $0x1360] sm:$0xff]  ;;  %v684_v46 = vld [vmem:[%s7574_s1 + $0x1468] sm:$0xff] }
  0xd5   :  { %2948 = vmatprep.subr.bf16.mxu0 %v2947_v0  ;;  %v3351_v0 = vpack.c.bf16 %v366_v59, %v362_v58  ;;  %v393_v58 = vld [vmem:[%s7574_s1 + $0xb50] sm:$0xff]  ;;  %v2985_v5 = vpack.c.bf16 %v651_v60, %v647_v57 }
  0xd6   :  { %3334 = vmatpush1.bf16.msra.mxu1 %v3333_v8  ;;  %v370_v8 = vld [vmem:[%s7574_s1 + $0xa98] sm:$0xff]  ;;  %v397_v59 = vld [vmem:[%s7574_s1 + $0xb70] sm:$0xff] }
  0xd7   :  { %3336 = vmatprep.subr.bf16.mxu1 %v3335_v9  ;;  %v624_v9 = vld [vmem:[%s7574_s1 + $0x1288] sm:$0xff]  ;;  %v3369_v4 = vpack.c.bf16 %v397_v59, %v393_v58 }
  0xd8   :  { %2950 = vmatpush1.bf16.msra.mxu0 %v2949_v25  ;;  %v374_v25 = vld [vmem:[%s7574_s1 + $0xab8] sm:$0xff]  ;;  %v2971_v19 = vpack.c.bf16 %v628_v10, %v624_v9  ;;  %v659_v10 = vld [vmem:[%s7574_s1 + $0x13a0] sm:$0xff]  ;;  %v688_v58 = vld [vmem:[%s7574_s1 + $0x1488] sm:$0xff] }
  0xd9   :  { %2952 = vmatprep.subr.bf16.mxu0 %v2951_v15  ;;  %v3355_v15 = vpack.c.bf16 %v374_v25, %v370_v8  ;;  %v401_v8 = vld [vmem:[%s7574_s1 + $0xb90] sm:$0xff]  ;;  %v2989_v18 = vpack.c.bf16 %v659_v10, %v655_v7  ;;  %v692_v59 = vld [vmem:[%s7574_s1 + $0x14a8] sm:$0xff] }
  0xda   :  { %3338 = vmatpush1.bf16.msra.mxu1 %v3337_v21  ;;  %v378_v21 = vld [vmem:[%s7574_s1 + $0xad8] sm:$0xff]  ;;  %v405_v25 = vld [vmem:[%s7574_s1 + $0xbb0] sm:$0xff] }
  0xdb   :  { %3340 = vmatprep.subr.bf16.mxu1 %v3339_v23  ;;  %v632_v23 = vld [vmem:[%s7574_s1 + $0x12c8] sm:$0xff]  ;;  %v3373_v17 = vpack.c.bf16 %v405_v25, %v401_v8 }
  0xdc   :  { %2954 = vmatpush1.bf16.msra.mxu0 %v2953_v22  ;;  %v382_v22 = vld [vmem:[%s7574_s1 + $0xaf8] sm:$0xff]  ;;  %v2975_v32 = vpack.c.bf16 %v636_v41, %v632_v23  ;;  %v667_v41 = vld [vmem:[%s7574_s1 + $0x13e0] sm:$0xff] }
  0xdd   :  { %2956 = vmatprep.subr.bf16.mxu0 %v2955_v28  ;;  %v3359_v28 = vpack.c.bf16 %v382_v22, %v378_v21  ;;  %v409_v21 = vld [vmem:[%s7574_s1 + $0xbd0] sm:$0xff] }
  0xde   :  { %3342 = vmatpush1.bf16.msra.mxu1 %v3341_v35  ;;  %v386_v35 = vld [vmem:[%s7574_s1 + $0xb18] sm:$0xff]  ;;  %v413_v22 = vld [vmem:[%s7574_s1 + $0xbf0] sm:$0xff] }
  0xdf   :  { %3344 = vmatprep.subr.bf16.mxu1 %v3343_v37  ;;  %v640_v37 = vld [vmem:[%s7574_s1 + $0x1308] sm:$0xff]  ;;  %v3377_v31 = vpack.c.bf16 %v413_v22, %v409_v21 }
  0xe0   :  { %2958 = vmatpush1.bf16.msra.mxu0 %v2957_v36  ;;  %v390_v36 = vld [vmem:[%s7574_s1 + $0xb38] sm:$0xff]  ;;  %v2979_v38 = vpack.c.bf16 %v644_v39, %v640_v37  ;;  %v2995_v37 = vpack.c.bf16 %v676_v30, %v672_v29  ;;  %v675_v39 = vld [vmem:[%s7574_s1 + $0x1420] sm:$0xff] }
  0xe1   :  { %2960 = vmatprep.subr.bf16.mxu0 %v2959_v43  ;;  %v3363_v43 = vpack.c.bf16 %v390_v36, %v386_v35  ;;  %v671_v35 = vld [vmem:[%s7574_s1 + $0x1400] sm:$0xff]  ;;  %v421_v36 = vld [vmem:[%s7574_s1 + $0xc30] sm:$0xff] }
  0xe2   :  { %3346 = vmatpush1.bf16.msra.mxu1 %v3345_v50  ;;  %v394_v50 = vld [vmem:[%s7574_s1 + $0xb58] sm:$0xff] }
  0xe3   :  { %3348 = vmatprep.subr.bf16.mxu1 %v3347_v48  ;;  %v648_v48 = vld [vmem:[%s7574_s1 + $0x1348] sm:$0xff] }
  0xe4   :  { %2962 = vmatpush1.bf16.msra.mxu0 %v2961_v51  ;;  %v398_v51 = vld [vmem:[%s7574_s1 + $0xb78] sm:$0xff]  ;;  %v2983_v33 = vpack.c.bf16 %v652_v52, %v648_v48  ;;  %v429_v48 = vld [vmem:[%s7574_s1 + $0xc70] sm:$0xff]  ;;  %v2999_v52 = vpack.c.bf16 %v684_v46, %v680_v45 }
  0xe5   :  { %2964 = vmatprep.subr.bf16.mxu0 %v2963_v56  ;;  %v3367_v56 = vpack.c.bf16 %v398_v51, %v394_v50  ;;  %v679_v50 = vld [vmem:[%s7574_s1 + $0x1440] sm:$0xff]  ;;  %v425_v51 = vld [vmem:[%s7574_s1 + $0xc50] sm:$0xff] }
  0xe6   :  { %3350 = vmatpush1.bf16.msra.mxu1 %v3349_v62  ;;  %v402_v62 = vld [vmem:[%s7574_s1 + $0xb98] sm:$0xff] }
  0xe7   :  { %3352 = vmatprep.subr.bf16.mxu1 %v3351_v0  ;;  %v656_v0 = vld [vmem:[%s7574_s1 + $0x1388] sm:$0xff] }
  0xe8   :  { %2966 = vmatpush1.bf16.msra.mxu0 %v2965_v63  ;;  %v406_v63 = vld [vmem:[%s7574_s1 + $0xbb8] sm:$0xff]  ;;  %v2987_v9 = vpack.c.bf16 %v660_v1, %v656_v0 }
  0xe9   :  { %2968 = vmatprep.subr.bf16.mxu0 %v2967_v6  ;;  %v3371_v6 = vpack.c.bf16 %v406_v63, %v402_v62 }
  0xea   :  { %3354 = vmatpush1.bf16.msra.mxu1 %v3353_v12  ;;  %v410_v12 = vld [vmem:[%s7574_s1 + $0xbd8] sm:$0xff] }
  0xeb   :  { %3356 = vmatprep.subr.bf16.mxu1 %v3355_v15  ;;  %v664_v15 = vld [vmem:[%s7574_s1 + $0x13c8] sm:$0xff] }
  0xec   :  { %2970 = vmatpush1.bf16.msra.mxu0 %v2969_v13  ;;  %v414_v13 = vld [vmem:[%s7574_s1 + $0xbf8] sm:$0xff]  ;;  %v2991_v23 = vpack.c.bf16 %v668_v16, %v664_v15 }
  0xed   :  { %2972 = vmatprep.subr.bf16.mxu0 %v2971_v19  ;;  %v3375_v19 = vpack.c.bf16 %v414_v13, %v410_v12 }
  0xee   :  { %3358 = vmatpush1.bf16.msra.mxu1 %v3357_v24  ;;  %v418_v24 = vld [vmem:[%s7574_s1 + $0xc18] sm:$0xff] }
  0xef   :  { %3360 = vmatprep.subr.bf16.mxu1 %v3359_v28  ;;  %v1115_v28 = vcombine.high %v5160_v2, %v5160_v2  ;;  %v417_v2 = vld [vmem:[%s7574_s1 + $0xc10] sm:$0xff] }
  0xf0   :  { %2974 = vmatpush1.bf16.msra.mxu0 %v2973_v26  ;;  %v422_v26 = vld [vmem:[%s7574_s1 + $0xc38] sm:$0xff]  ;;  %v3381_v47 = vpack.c.bf16 %v421_v36, %v417_v2 }
  0xf1   :  { %2976 = vmatprep.subr.bf16.mxu0 %v2975_v32  ;;  %v2993_v32 = vpack.c.bf16 %v667_v41, %v663_v20  ;;  %v3379_v34 = vpack.c.bf16 %v422_v26, %v418_v24 }
  0xf2   :  { %3362 = vmatpush1.bf16.msra.mxu1 %v3361_v40  ;;  %v426_v40 = vld [vmem:[%s7574_s1 + $0xc58] sm:$0xff] }
  0xf3   :  { %3364 = vmatprep.subr.bf16.mxu1 %v3363_v43  ;;  %v5579_v43 = vrot.slane %v1115_v28, %v4218_v11 }
  0xf4   :  { %2978 = vmatpush1.bf16.msra.mxu0 %v2977_v42  ;;  %v430_v42 = vld [vmem:[%s7574_s1 + $0xc78] sm:$0xff] }
  0xf5   :  { %2980 = vmatprep.subr.bf16.mxu0 %v2979_v38  ;;  %v2997_v38 = vpack.c.bf16 %v675_v39, %v671_v35  ;;  %v3383_v49 = vpack.c.bf16 %v430_v42, %v426_v40  ;;  %v5607_v57 = vcombine.high %v5579_v43, %v5579_v43 }
  0xf6   :  { %3366 = vmatpush1.bf16.msra.mxu1 %v3365_v53  ;;  %v683_v53 = vld [vmem:[%s7574_s1 + $0x1460] sm:$0xff] }
  0xf7   :  { %3368 = vmatprep.subr.bf16.mxu1 %v3367_v56  ;;  %v438_v56 = vld [vmem:[%s7574_s1 + $0xcb8] sm:$0xff] }
  0xf8   :  { %2982 = vmatpush1.bf16.msra.mxu0 %v2981_v55  ;;  %v434_v55 = vld [vmem:[%s7574_s1 + $0xc98] sm:$0xff] }
  0xf9   :  { %2984 = vmatprep.subr.bf16.mxu0 %v2983_v33  ;;  %v3385_v33 = vpack.c.bf16 %v429_v48, %v425_v51 }
  0xfa   :  { %3370 = vmatpush1.bf16.msra.mxu1 %v3369_v4 }
  0xfb   :  { %3372 = vmatprep.subr.bf16.mxu1 %v3371_v6 }
  0xfc   :  { %2986 = vmatpush1.bf16.msra.mxu0 %v2985_v5 }
  0xfd   :  { %2988 = vmatprep.subr.bf16.mxu0 %v2987_v9 }
  0xfe   :  { %3374 = vmatpush1.bf16.msra.mxu1 %v3373_v17 }
  0xff   :  { %3376 = vmatprep.subr.bf16.mxu1 %v3375_v19 }
 0x100   :  { %2990 = vmatpush1.bf16.msra.mxu0 %v2989_v18 }
 0x101   :  { %2992 = vmatprep.subr.bf16.mxu0 %v2991_v23 }
 0x102   :  { %3378 = vmatpush1.bf16.msra.mxu1 %v3377_v31 }
 0x103   :  { %3380 = vmatprep.subr.bf16.mxu1 %v3379_v34 }
 0x104   :  { %2994 = vmatpush1.bf16.msra.mxu0 %v2993_v32 }
 0x105   :  { %2996 = vmatprep.subr.bf16.mxu0 %v2995_v37  ;;  %1940 = vmatmul.mubr.f32.vlgmr.msra.gmra.mrb[2].mxu1 %v4531_v44 }
 0x106   :  { %3382 = vmatpush1.bf16.msra.mxu1 %v3381_v47 }
 0x107   :  { %1514 = vmatmul.mubr.f32.vlgmr.msra.gmra.mrb[0].mxu0 %v5182_v14 }
 0x108   :  { %12 = vsyncpa [#allocation3], 0  ;;  %2998 = vmatpush1.bf16.msra.mxu0 %v2997_v38  ;;  %3384 = vmatprep.subr.bf16.mxu1 %v3383_v49  ;;  %v3001_v60 = vpack.c.bf16 %v683_v53, %v679_v50  ;;  %v3387_v62 = vpack.c.bf16 %v438_v56, %v434_v55  ;;  %v687_v44 = vld [vmem:[%s7574_s1 + $0x1480] sm:$0xff]  ;;  %v433_v63 = vld [vmem:[%s7574_s1 + $0xc90] sm:$0xff]  ;;  %v3003_v1 = vpack.c.bf16 %v692_v59, %v688_v58  ;;  %vm2589_vm0 = vcmask 1041408   ;;  %s3898_s13 = smov [#allocation2]  }
 0x109   :  { %v437_v0 = vld [vmem:[%s7574_s1 + $0xcb0] sm:$0xff]  ;;  %3000 = vmatprep.subr.bf16.mxu0 %v2999_v52  ;;  %v691_v4 = vld [vmem:[%s7574_s1 + $0x14a0] sm:$0xff]  ;;  %v442_v5 = vld [vmem:[%s7574_s1 + $0xcd8] sm:$0xff]  ;;  %1584 = vmatprep.mubr.f32.mxu0 %v5607_v57  ;;  %s2666_s14 = sshll.u32 %s3898_s13, 4  ;;  %s2667_s14 = int_to_ptr.vmem [resolvable:$true] %s2666_s14 }
 0x10a   :  { %v446_v6 = vld [vmem:[%s7574_s1 + $0xcf8] sm:$0xff]  ;;  %v696_v7 = vld [vmem:[%s7574_s1 + $0x14c8] sm:$0xff]  ;;  %2010 = vmatprep.mubr.f32.mxu1 %v4809_v3  ;;  %3386 = vmatpush1.bf16.msra.mxu1 %v3385_v33  ;;  %v3389_v25 = vpack.c.bf16 %v437_v0, %v433_v63  ;;  %v3005_v9 = vpack.c.bf16 %v691_v4, %v687_v44  ;;  %v695_v12 = vld [vmem:[%s7574_s1 + $0x14c0] sm:$0xff]  ;;  %p3878_p1 = scmp.lt.s32.totalorder %s2667_s14, %s2667_s14 }
 0x10b   :  { %v700_v8 = vld [vmem:[%s7574_s1 + $0x14e8] sm:$0xff]  ;;  %3388 = vmatprep.subr.bf16.mxu1 %v3387_v62  ;;  %v3391_v10 = vpack.c.bf16 %v446_v6, %v442_v5  ;;  %v441_v13 = vld [vmem:[%s7574_s1 + $0xcd0] sm:$0xff]  ;;  %v699_v16 = vld [vmem:[%s7574_s1 + $0x14e0] sm:$0xff] }
 0x10c   :  { %3002 = vmatpush1.bf16.msra.mxu0 %v3001_v60  ;;  %v445_v15 = vld [vmem:[%s7574_s1 + $0xcf0] sm:$0xff]  ;;  %v3007_v3 = vpack.c.bf16 %v700_v8, %v696_v7  ;;  %v450_v17 = vld [vmem:[%s7574_s1 + $0xd18] sm:$0xff]  ;;  %v704_v19 = vld [vmem:[%s7574_s1 + $0x1508] sm:$0xff]  ;;  %v3009_v22 = vpack.c.bf16 %v699_v16, %v695_v12 }
 0x10d   :  { %3004 = vmatprep.subr.bf16.mxu0 %v3003_v1  ;;  %v454_v18 = vld [vmem:[%s7574_s1 + $0xd38] sm:$0xff]  ;;  %v708_v20 = vld [vmem:[%s7574_s1 + $0x1528] sm:$0xff]  ;;  %v3393_v21 = vpack.c.bf16 %v445_v15, %v441_v13  ;;  %v703_v41 = vld [vmem:[%s7574_s1 + $0x1500] sm:$0xff] }
 0x10e   :  { %3390 = vmatpush1.bf16.msra.mxu1 %v3389_v25  ;;  %v3395_v23 = vpack.c.bf16 %v454_v18, %v450_v17  ;;  %v449_v24 = vld [vmem:[%s7574_s1 + $0xd10] sm:$0xff]  ;;  %v3011_v28 = vpack.c.bf16 %v708_v20, %v704_v19  ;;  %v707_v29 = vld [vmem:[%s7574_s1 + $0x1520] sm:$0xff]  ;;  %v458_v30 = vld [vmem:[%s7574_s1 + $0xd58] sm:$0xff] }
 0x10f   :  { %3392 = vmatprep.subr.bf16.mxu1 %v3391_v10  ;;  %v453_v26 = vld [vmem:[%s7574_s1 + $0xd30] sm:$0xff]  ;;  %v462_v31 = vld [vmem:[%s7574_s1 + $0xd78] sm:$0xff]  ;;  %v712_v32 = vld [vmem:[%s7574_s1 + $0x1548] sm:$0xff]  ;;  %v3013_v2 = vpack.c.bf16 %v707_v29, %v703_v41 }
 0x110   :  { %3006 = vmatpush1.bf16.msra.mxu0 %v3005_v9  ;;  %v716_v34 = vld [vmem:[%s7574_s1 + $0x1568] sm:$0xff]  ;;  %v3397_v35 = vpack.c.bf16 %v453_v26, %v449_v24  ;;  %v3399_v36 = vpack.c.bf16 %v462_v31, %v458_v30  ;;  %v711_v37 = vld [vmem:[%s7574_s1 + $0x1540] sm:$0xff]  ;;  %v457_v39 = vld [vmem:[%s7574_s1 + $0xd50] sm:$0xff] }
 0x111   :  { %3008 = vmatprep.subr.bf16.mxu0 %v3007_v3  ;;  %v461_v40 = vld [vmem:[%s7574_s1 + $0xd70] sm:$0xff]  ;;  %v3015_v42 = vpack.c.bf16 %v716_v34, %v712_v32  ;;  %v715_v45 = vld [vmem:[%s7574_s1 + $0x1560] sm:$0xff]  ;;  %v466_v46 = vld [vmem:[%s7574_s1 + $0xd98] sm:$0xff] }
 0x112   :  { %3394 = vmatpush1.bf16.msra.mxu1 %v3393_v21  ;;  %v470_v47 = vld [vmem:[%s7574_s1 + $0xdb8] sm:$0xff]  ;;  %v720_v38 = vld [vmem:[%s7574_s1 + $0x1588] sm:$0xff]  ;;  %v3401_v50 = vpack.c.bf16 %v461_v40, %v457_v39  ;;  %v3017_v51 = vpack.c.bf16 %v715_v45, %v711_v37  ;;  %v719_v52 = vld [vmem:[%s7574_s1 + $0x1580] sm:$0xff] }
 0x113   :  { %3396 = vmatprep.subr.bf16.mxu1 %v3395_v23  ;;  %v724_v49 = vld [vmem:[%s7574_s1 + $0x15a8] sm:$0xff]  ;;  %v3403_v48 = vpack.c.bf16 %v470_v47, %v466_v46  ;;  %v465_v53 = vld [vmem:[%s7574_s1 + $0xd90] sm:$0xff]  ;;  %v723_v59 = vld [vmem:[%s7574_s1 + $0x15a0] sm:$0xff] }
 0x114   :  { %3010 = vmatpush1.bf16.msra.mxu0 %v3009_v22  ;;  %v469_v55 = vld [vmem:[%s7574_s1 + $0xdb0] sm:$0xff]  ;;  %v3019_v58 = vpack.c.bf16 %v724_v49, %v720_v38  ;;  %v474_v33 = vld [vmem:[%s7574_s1 + $0xdd8] sm:$0xff]  ;;  %v728_v44 = vld [vmem:[%s7574_s1 + $0x15c8] sm:$0xff]  ;;  %v3021_v1 = vpack.c.bf16 %v723_v59, %v719_v52 }
 0x115   :  { %3012 = vmatprep.subr.bf16.mxu0 %v3011_v28  ;;  %v478_v60 = vld [vmem:[%s7574_s1 + $0xdf8] sm:$0xff]  ;;  %v732_v63 = vld [vmem:[%s7574_s1 + $0x15e8] sm:$0xff]  ;;  %v3405_v0 = vpack.c.bf16 %v469_v55, %v465_v53  ;;  %v727_v5 = vld [vmem:[%s7574_s1 + $0x15c0] sm:$0xff] }
 0x116   :  { %3398 = vmatpush1.bf16.msra.mxu1 %v3397_v35  ;;  %v3407_v4 = vpack.c.bf16 %v478_v60, %v474_v33  ;;  %v473_v6 = vld [vmem:[%s7574_s1 + $0xdd0] sm:$0xff]  ;;  %v3023_v8 = vpack.c.bf16 %v732_v63, %v728_v44  ;;  %v731_v25 = vld [vmem:[%s7574_s1 + $0x15e0] sm:$0xff]  ;;  %v482_v9 = vld [vmem:[%s7574_s1 + $0xe18] sm:$0xff] }
 0x117   :  { %3400 = vmatprep.subr.bf16.mxu1 %v3399_v36  ;;  %v477_v7 = vld [vmem:[%s7574_s1 + $0xdf0] sm:$0xff]  ;;  %v486_v10 = vld [vmem:[%s7574_s1 + $0xe38] sm:$0xff]  ;;  %v736_v12 = vld [vmem:[%s7574_s1 + $0x1608] sm:$0xff]  ;;  %v3025_v3 = vpack.c.bf16 %v731_v25, %v727_v5 }
 0x118   :  { %3014 = vmatpush1.bf16.msra.mxu0 %v3013_v2  ;;  %v5724_v56 = vpop.f32.mrb[0].mxu1  ;;  %v740_v13 = vld [vmem:[%s7574_s1 + $0x1628] sm:$0xff]  ;;  %v3409_v15 = vpack.c.bf16 %v477_v7, %v473_v6  ;;  %v3411_v16 = vpack.c.bf16 %v486_v10, %v482_v9  ;;  %v735_v17 = vld [vmem:[%s7574_s1 + $0x1600] sm:$0xff]  ;;  %v481_v18 = vld [vmem:[%s7574_s1 + $0xe10] sm:$0xff] }
 0x119   :  { %3016 = vmatprep.subr.bf16.mxu0 %v3015_v42  ;;  %v5735_v62 = vpop.f32.mrb[1].mxu1  ;;  %v485_v19 = vld [vmem:[%s7574_s1 + $0xe30] sm:$0xff]  ;;  %v3027_v20 = vpack.c.bf16 %v740_v13, %v736_v12  ;;  %v739_v21 = vld [vmem:[%s7574_s1 + $0x1620] sm:$0xff]  ;;  %v490_v22 = vld [vmem:[%s7574_s1 + $0xe58] sm:$0xff] }
 0x11a   :  { %3402 = vmatpush1.bf16.msra.mxu1 %v3401_v50  ;;  %v494_v23 = vld [vmem:[%s7574_s1 + $0xe78] sm:$0xff]  ;;  %v744_v41 = vld [vmem:[%s7574_s1 + $0x1648] sm:$0xff]  ;;  %v3413_v26 = vpack.c.bf16 %v485_v19, %v481_v18  ;;  %v3029_v28 = vpack.c.bf16 %v739_v21, %v735_v17  ;;  %v743_v30 = vld [vmem:[%s7574_s1 + $0x1640] sm:$0xff] }
 0x11b   :  { %3404 = vmatprep.subr.bf16.mxu1 %v3403_v48  ;;  %v748_v24 = vld [vmem:[%s7574_s1 + $0x1668] sm:$0xff]  ;;  %v3415_v29 = vpack.c.bf16 %v494_v23, %v490_v22  ;;  %v489_v31 = vld [vmem:[%s7574_s1 + $0xe50] sm:$0xff]  ;;  %v747_v35 = vld [vmem:[%s7574_s1 + $0x1660] sm:$0xff] }
 0x11c   :  { %3018 = vmatpush1.bf16.msra.mxu0 %v3017_v51  ;;  %v493_v32 = vld [vmem:[%s7574_s1 + $0xe70] sm:$0xff]  ;;  %v3031_v34 = vpack.c.bf16 %v748_v24, %v744_v41  ;;  %v498_v2 = vld [vmem:[%s7574_s1 + $0xe98] sm:$0xff]  ;;  %v752_v37 = vld [vmem:[%s7574_s1 + $0x1688] sm:$0xff]  ;;  %v3033_v42 = vpack.c.bf16 %v747_v35, %v743_v30 }
 0x11d   :  { %3020 = vmatprep.subr.bf16.mxu0 %v3019_v58  ;;  %v502_v36 = vld [vmem:[%s7574_s1 + $0xeb8] sm:$0xff]  ;;  %v756_v39 = vld [vmem:[%s7574_s1 + $0x16a8] sm:$0xff]  ;;  %v3417_v40 = vpack.c.bf16 %v493_v32, %v489_v31  ;;  %v751_v46 = vld [vmem:[%s7574_s1 + $0x1680] sm:$0xff] }
 0x11e   :  { %3406 = vmatpush1.bf16.msra.mxu1 %v3405_v0  ;;  %v3419_v45 = vpack.c.bf16 %v502_v36, %v498_v2  ;;  %v497_v47 = vld [vmem:[%s7574_s1 + $0xe90] sm:$0xff]  ;;  %v3035_v49 = vpack.c.bf16 %v756_v39, %v752_v37  ;;  %v755_v50 = vld [vmem:[%s7574_s1 + $0x16a0] sm:$0xff]  ;;  %v506_v51 = vld [vmem:[%s7574_s1 + $0xed8] sm:$0xff] }
 0x11f   :  { %3408 = vmatprep.subr.bf16.mxu1 %v3407_v4  ;;  %v501_v38 = vld [vmem:[%s7574_s1 + $0xeb0] sm:$0xff]  ;;  %v510_v48 = vld [vmem:[%s7574_s1 + $0xef8] sm:$0xff]  ;;  %v760_v52 = vld [vmem:[%s7574_s1 + $0x16c8] sm:$0xff]  ;;  %v3037_v58 = vpack.c.bf16 %v755_v50, %v751_v46 }
 0x120   :  { %3022 = vmatpush1.bf16.msra.mxu0 %v3021_v1  ;;  %v764_v53 = vld [vmem:[%s7574_s1 + $0x16e8] sm:$0xff]  ;;  %v3421_v55 = vpack.c.bf16 %v501_v38, %v497_v47  ;;  %v3423_v59 = vpack.c.bf16 %v510_v48, %v506_v51  ;;  %v759_v33 = vld [vmem:[%s7574_s1 + $0x16c0] sm:$0xff]  ;;  %v505_v60 = vld [vmem:[%s7574_s1 + $0xed0] sm:$0xff] }
 0x121   :  { %3024 = vmatprep.subr.bf16.mxu0 %v3023_v8  ;;  %v509_v44 = vld [vmem:[%s7574_s1 + $0xef0] sm:$0xff]  ;;  %v3039_v63 = vpack.c.bf16 %v764_v53, %v760_v52  ;;  %v763_v0 = vld [vmem:[%s7574_s1 + $0x16e0] sm:$0xff]  ;;  %v514_v1 = vld [vmem:[%s7574_s1 + $0xf18] sm:$0xff] }
 0x122   :  { %3410 = vmatpush1.bf16.msra.mxu1 %v3409_v15  ;;  %v518_v4 = vld [vmem:[%s7574_s1 + $0xf38] sm:$0xff]  ;;  %v768_v5 = vld [vmem:[%s7574_s1 + $0x1708] sm:$0xff]  ;;  %v3425_v7 = vpack.c.bf16 %v509_v44, %v505_v60  ;;  %v3041_v8 = vpack.c.bf16 %v763_v0, %v759_v33  ;;  %v767_v9 = vld [vmem:[%s7574_s1 + $0x1700] sm:$0xff] }
 0x123   :  { %3412 = vmatprep.subr.bf16.mxu1 %v3411_v16  ;;  %v772_v6 = vld [vmem:[%s7574_s1 + $0x1728] sm:$0xff]  ;;  %v3427_v25 = vpack.c.bf16 %v518_v4, %v514_v1  ;;  %v513_v10 = vld [vmem:[%s7574_s1 + $0xf10] sm:$0xff]  ;;  %v771_v15 = vld [vmem:[%s7574_s1 + $0x1720] sm:$0xff] }
 0x124   :  { %3026 = vmatpush1.bf16.msra.mxu0 %v3025_v3  ;;  %v517_v12 = vld [vmem:[%s7574_s1 + $0xf30] sm:$0xff]  ;;  %v3043_v13 = vpack.c.bf16 %v772_v6, %v768_v5  ;;  %v522_v3 = vld [vmem:[%s7574_s1 + $0xf58] sm:$0xff]  ;;  %v776_v17 = vld [vmem:[%s7574_s1 + $0x1748] sm:$0xff] }
 0x125   :  { %3028 = vmatprep.subr.bf16.mxu0 %v3027_v20  ;;  %v526_v16 = vld [vmem:[%s7574_s1 + $0xf78] sm:$0xff]  ;;  %v780_v18 = vld [vmem:[%s7574_s1 + $0x1768] sm:$0xff]  ;;  %v3429_v19 = vpack.c.bf16 %v517_v12, %v513_v10  ;;  %v3045_v20 = vpack.c.bf16 %v771_v15, %v767_v9  ;;  %v775_v22 = vld [vmem:[%s7574_s1 + $0x1740] sm:$0xff] }
 0x126   :  { %3414 = vmatpush1.bf16.msra.mxu1 %v3413_v26  ;;  %v3431_v21 = vpack.c.bf16 %v526_v16, %v522_v3  ;;  %v521_v23 = vld [vmem:[%s7574_s1 + $0xf50] sm:$0xff]  ;;  %v3047_v24 = vpack.c.bf16 %v780_v18, %v776_v17  ;;  %v779_v26 = vld [vmem:[%s7574_s1 + $0x1760] sm:$0xff]  ;;  %v784_v30 = vld [vmem:[%s7574_s1 + $0x1788] sm:$0xff] }
 0x127   :  { %3416 = vmatprep.subr.bf16.mxu1 %v3415_v29  ;;  %v525_v41 = vld [vmem:[%s7574_s1 + $0xf70] sm:$0xff]  ;;  %v534_v29 = vld [vmem:[%s7574_s1 + $0xfb8] sm:$0xff]  ;;  %v788_v31 = vld [vmem:[%s7574_s1 + $0x17a8] sm:$0xff] }
 0x128   :  { %3030 = vmatpush1.bf16.msra.mxu0 %v3029_v28  ;;  %v530_v28 = vld [vmem:[%s7574_s1 + $0xf98] sm:$0xff]  ;;  %v3433_v32 = vpack.c.bf16 %v525_v41, %v521_v23  ;;  %v783_v2 = vld [vmem:[%s7574_s1 + $0x1780] sm:$0xff]  ;;  %v529_v36 = vld [vmem:[%s7574_s1 + $0xf90] sm:$0xff]  ;;  %v3051_v39 = vpack.c.bf16 %v788_v31, %v784_v30 }
 0x129   :  { %3032 = vmatprep.subr.bf16.mxu0 %v3031_v34  ;;  %v3049_v34 = vpack.c.bf16 %v779_v26, %v775_v22  ;;  %v3435_v35 = vpack.c.bf16 %v534_v29, %v530_v28  ;;  %v533_v37 = vld [vmem:[%s7574_s1 + $0xfb0] sm:$0xff]  ;;  %v792_v46 = vld [vmem:[%s7574_s1 + $0x17c8] sm:$0xff]  ;;  %v791_v51 = vld [vmem:[%s7574_s1 + $0x17c0] sm:$0xff] }
 0x12a   :  { %3418 = vmatpush1.bf16.msra.mxu1 %v3417_v40  ;;  %v787_v40 = vld [vmem:[%s7574_s1 + $0x17a0] sm:$0xff]  ;;  %v796_v47 = vld [vmem:[%s7574_s1 + $0x17e8] sm:$0xff]  ;;  %v3437_v38 = vpack.c.bf16 %v533_v37, %v529_v36  ;;  %v537_v48 = vld [vmem:[%s7574_s1 + $0xfd0] sm:$0xff] }
 0x12b   :  { %3420 = vmatprep.subr.bf16.mxu1 %v3419_v45  ;;  %v542_v45 = vld [vmem:[%s7574_s1 + $0xff8] sm:$0xff]  ;;  %v541_v52 = vld [vmem:[%s7574_s1 + $0xff0] sm:$0xff]  ;;  %v3055_v53 = vpack.c.bf16 %v796_v47, %v792_v46  ;;  %v800_v33 = vld [vmem:[%s7574_s1 + $0x1808] sm:$0xff] }
 0x12c   :  { %3034 = vmatpush1.bf16.msra.mxu0 %v3033_v42  ;;  %v538_v42 = vld [vmem:[%s7574_s1 + $0xfd8] sm:$0xff]  ;;  %v804_v60 = vld [vmem:[%s7574_s1 + $0x1828] sm:$0xff]  ;;  %v799_v4 = vld [vmem:[%s7574_s1 + $0x1800] sm:$0xff] }
 0x12d   :  { %3036 = vmatprep.subr.bf16.mxu0 %v3035_v49  ;;  %v3053_v49 = vpack.c.bf16 %v787_v40, %v783_v2  ;;  %v3439_v50 = vpack.c.bf16 %v542_v45, %v538_v42  ;;  %v5962_v44 = vld [vmem:[%s7573_s0 + $0x18] sm:$0xff]  ;;  %v545_v5 = vld [vmem:[%s7574_s1 + $0x1010] sm:$0xff]  ;;  %v808_v12 = vld [vmem:[%s7574_s1 + $0x1848] sm:$0xff] }
 0x12e   :  { %3422 = vmatpush1.bf16.msra.mxu1 %v3421_v55  ;;  %v795_v55 = vld [vmem:[%s7574_s1 + $0x17e0] sm:$0xff]  ;;  %v549_v6 = vld [vmem:[%s7574_s1 + $0x1030] sm:$0xff]  ;;  %v558_v9 = vld [vmem:[%s7574_s1 + $0x1078] sm:$0xff]  ;;  %v5984_v10 = vrot.slane %v5962_v44, %v4218_v11 }
 0x12f   :  { %3424 = vmatprep.subr.bf16.mxu1 %v3423_v59  ;;  %v550_v59 = vld [vmem:[%s7574_s1 + $0x1038] sm:$0xff]  ;;  %v3057_v0 = vpack.c.bf16 %v795_v55, %v791_v51  ;;  %v3445_v15 = vpack.c.bf16 %v549_v6, %v545_v5  ;;  %v807_v17 = vld [vmem:[%s7574_s1 + $0x1840] sm:$0xff]  ;;  %v553_v18 = vld [vmem:[%s7574_s1 + $0x1050] sm:$0xff] }
 0x130   :  { %3038 = vmatpush1.bf16.msra.mxu0 %v3037_v58  ;;  %v546_v58 = vld [vmem:[%s7574_s1 + $0x1018] sm:$0xff]  ;;  %v6012_v41 = vcombine.high %v5984_v10, %v5984_v10  ;;  %v820_v26 = vld [vmem:[%s7574_s1 + $0x18a8] sm:$0xff]  ;;  %v561_v31 = vld [vmem:[%s7574_s1 + $0x1090] sm:$0xff] }
 0x131   :  { %3040 = vmatprep.subr.bf16.mxu0 %v3039_v63  ;;  %v3441_v63 = vpack.c.bf16 %v541_v52, %v537_v48  ;;  %v3443_v1 = vpack.c.bf16 %v550_v59, %v546_v58  ;;  %v562_v22 = vld [vmem:[%s7574_s1 + $0x1098] sm:$0xff]  ;;  %v824_v37 = vld [vmem:[%s7574_s1 + $0x18c8] sm:$0xff]  ;;  %v823_v46 = vld [vmem:[%s7574_s1 + $0x18c0] sm:$0xff] }
 0x132   :  { %3426 = vmatpush1.bf16.msra.mxu1 %v3425_v7  ;;  %v3059_v7 = vpack.c.bf16 %v804_v60, %v800_v33  ;;  %v566_v23 = vld [vmem:[%s7574_s1 + $0x10b8] sm:$0xff]  ;;  %v569_v47 = vld [vmem:[%s7574_s1 + $0x10d0] sm:$0xff]  ;;  %v832_v48 = vld [vmem:[%s7574_s1 + $0x1908] sm:$0xff] }
 0x133   :  { %3428 = vmatprep.subr.bf16.mxu1 %v3427_v25  ;;  %v554_v25 = vld [vmem:[%s7574_s1 + $0x1058] sm:$0xff]  ;;  %v3451_v30 = vpack.c.bf16 %v566_v23, %v562_v22  ;;  %v836_v52 = vld [vmem:[%s7574_s1 + $0x1928] sm:$0xff]  ;;  %v831_v59 = vld [vmem:[%s7574_s1 + $0x1900] sm:$0xff] }
 0x134   :  { %3042 = vmatpush1.bf16.msra.mxu0 %v3041_v8  ;;  %v803_v8 = vld [vmem:[%s7574_s1 + $0x1820] sm:$0xff]  ;;  %v3447_v16 = vpack.c.bf16 %v558_v9, %v554_v25  ;;  %v570_v2 = vld [vmem:[%s7574_s1 + $0x10d8] sm:$0xff]  ;;  %v577_v33 = vld [vmem:[%s7574_s1 + $0x1110] sm:$0xff] }
 0x135   :  { %3044 = vmatprep.subr.bf16.mxu0 %v3043_v13  ;;  %v812_v13 = vld [vmem:[%s7574_s1 + $0x1868] sm:$0xff]  ;;  %v3061_v3 = vpack.c.bf16 %v803_v8, %v799_v4  ;;  %v574_v36 = vld [vmem:[%s7574_s1 + $0x10f8] sm:$0xff]  ;;  %v581_v60 = vld [vmem:[%s7574_s1 + $0x1130] sm:$0xff] }
 0x136   :  { %3430 = vmatpush1.bf16.msra.mxu1 %v3429_v19  ;;  %v557_v19 = vld [vmem:[%s7574_s1 + $0x1070] sm:$0xff]  ;;  %v3455_v45 = vpack.c.bf16 %v574_v36, %v570_v2  ;;  %v582_v51 = vld [vmem:[%s7574_s1 + $0x1138] sm:$0xff]  ;;  %v840_v5 = vld [vmem:[%s7574_s1 + $0x1948] sm:$0xff] }
 0x137   :  { %3432 = vmatprep.subr.bf16.mxu1 %v3431_v21  ;;  %v811_v21 = vld [vmem:[%s7574_s1 + $0x1860] sm:$0xff]  ;;  %v3449_v28 = vpack.c.bf16 %v557_v19, %v553_v18  ;;  %v590_v4 = vld [vmem:[%s7574_s1 + $0x1178] sm:$0xff]  ;;  %v844_v6 = vld [vmem:[%s7574_s1 + $0x1968] sm:$0xff] }
 0x138   :  { %3046 = vmatpush1.bf16.msra.mxu0 %v3045_v20  ;;  %v3063_v20 = vpack.c.bf16 %v812_v13, %v808_v12  ;;  %v3065_v29 = vpack.c.bf16 %v811_v21, %v807_v17  ;;  %v839_v9 = vld [vmem:[%s7574_s1 + $0x1940] sm:$0xff]  ;;  %v585_v12 = vld [vmem:[%s7574_s1 + $0x1150] sm:$0xff]  ;;  %v598_v17 = vld [vmem:[%s7574_s1 + $0x11b8] sm:$0xff] }
 0x139   :  { %3048 = vmatprep.subr.bf16.mxu0 %v3047_v24  ;;  %v816_v24 = vld [vmem:[%s7574_s1 + $0x1888] sm:$0xff]  ;;  %v589_v13 = vld [vmem:[%s7574_s1 + $0x1170] sm:$0xff]  ;;  %v847_v23 = vld [vmem:[%s7574_s1 + $0x1980] sm:$0xff] }
 0x13a   :  { %3434 = vmatpush1.bf16.msra.mxu1 %v3433_v32  ;;  %v565_v32 = vld [vmem:[%s7574_s1 + $0x10b0] sm:$0xff]  ;;  %v848_v18 = vld [vmem:[%s7574_s1 + $0x1988] sm:$0xff]  ;;  %v855_v36 = vld [vmem:[%s7574_s1 + $0x19c0] sm:$0xff] }
 0x13b   :  { %3436 = vmatprep.subr.bf16.mxu1 %v3435_v35  ;;  %v819_v35 = vld [vmem:[%s7574_s1 + $0x18a0] sm:$0xff]  ;;  %v3453_v40 = vpack.c.bf16 %v565_v32, %v561_v31  ;;  %v852_v19 = vld [vmem:[%s7574_s1 + $0x19a8] sm:$0xff] }
 0x13c   :  { %3050 = vmatpush1.bf16.msra.mxu0 %v3049_v34  ;;  %v3067_v34 = vpack.c.bf16 %v820_v26, %v816_v24  ;;  %v593_v24 = vld [vmem:[%s7574_s1 + $0x1190] sm:$0xff]  ;;  %v856_v31 = vld [vmem:[%s7574_s1 + $0x19c8] sm:$0xff] }
 0x13d   :  { %3052 = vmatprep.subr.bf16.mxu0 %v3051_v39  ;;  %v828_v39 = vld [vmem:[%s7574_s1 + $0x18e8] sm:$0xff]  ;;  %v597_v26 = vld [vmem:[%s7574_s1 + $0x11b0] sm:$0xff] }
 0x13e   :  { %3438 = vmatpush1.bf16.msra.mxu1 %v3437_v38  ;;  %v573_v38 = vld [vmem:[%s7574_s1 + $0x10f0] sm:$0xff]  ;;  %v860_v32 = vld [vmem:[%s7574_s1 + $0x19e8] sm:$0xff] }
 0x13f   :  { %3440 = vmatprep.subr.bf16.mxu1 %v3439_v50  ;;  %v578_v50 = vld [vmem:[%s7574_s1 + $0x1118] sm:$0xff] }
 0x140   :  { %3054 = vmatpush1.bf16.msra.mxu0 %v3053_v49  ;;  %v827_v49 = vld [vmem:[%s7574_s1 + $0x18e0] sm:$0xff]  ;;  %v3459_v58 = vpack.c.bf16 %v582_v51, %v578_v50 }
 0x141   :  { %3056 = vmatprep.subr.bf16.mxu0 %v3055_v53  ;;  %v3457_v53 = vpack.c.bf16 %v573_v38, %v569_v47  ;;  %v3073_v55 = vpack.c.bf16 %v827_v49, %v823_v46  ;;  %v614_v46 = vld [vmem:[%s7574_s1 + $0x1238] sm:$0xff]  ;;  %v864_v47 = vld [vmem:[%s7574_s1 + $0x1a08] sm:$0xff]  ;;  %v863_v51 = vld [vmem:[%s7574_s1 + $0x1a00] sm:$0xff] }
 0x142   :  { %3442 = vmatpush1.bf16.msra.mxu1 %v3441_v63  ;;  %v3075_v63 = vpack.c.bf16 %v836_v52, %v832_v48  ;;  %v868_v38 = vld [vmem:[%s7574_s1 + $0x1a28] sm:$0xff]  ;;  %v609_v48 = vld [vmem:[%s7574_s1 + $0x1210] sm:$0xff] }
 0x143   :  { %3444 = vmatprep.subr.bf16.mxu1 %v3443_v1  ;;  %v586_v1 = vld [vmem:[%s7574_s1 + $0x1158] sm:$0xff]  ;;  %v613_v52 = vld [vmem:[%s7574_s1 + $0x1230] sm:$0xff] }
 0x144   :  { %3058 = vmatpush1.bf16.msra.mxu0 %v3057_v0  ;;  %v835_v0 = vld [vmem:[%s7574_s1 + $0x1920] sm:$0xff]  ;;  %v3463_v25 = vpack.c.bf16 %v590_v4, %v586_v1 }
 0x145   :  { %3060 = vmatprep.subr.bf16.mxu0 %v3059_v7  ;;  %2011 = vmatmul.mubr.f32.vlgmr.msra.gmra.mrb[2].mxu1 %v4781_v54  ;;  %v815_v54 = vld [vmem:[%s7574_s1 + $0x1880] sm:$0xff]  ;;  %v3461_v7 = vpack.c.bf16 %v581_v60, %v577_v33  ;;  %v3077_v8 = vpack.c.bf16 %v835_v0, %v831_v59  ;;  %v622_v59 = vld [vmem:[%s7574_s1 + $0x1278] sm:$0xff]  ;;  %v872_v33 = vld [vmem:[%s7574_s1 + $0x1a48] sm:$0xff] }
 0x146   :  { %3446 = vmatpush1.bf16.msra.mxu1 %v3445_v15  ;;  %2081 = vmatprep.mubr.f32.mxu1 %v5210_v27  ;;  %v3069_v42 = vpack.c.bf16 %v819_v35, %v815_v54  ;;  %v3071_v27 = vpack.c.bf16 %v828_v39, %v824_v37  ;;  %v3079_v15 = vpack.c.bf16 %v844_v6, %v840_v5  ;;  %v606_v54 = vld [vmem:[%s7574_s1 + $0x11f8] sm:$0xff]  ;;  %v601_v37 = vld [vmem:[%s7574_s1 + $0x11d0] sm:$0xff]  ;;  %v876_v60 = vld [vmem:[%s7574_s1 + $0x1a68] sm:$0xff] }
 0x147   :  { %1585 = vmatmul.mubr.f32.vlgmr.msra.gmra.mrb[0].mxu0 %v5579_v43  ;;  %3448 = vmatprep.subr.bf16.mxu1 %v3447_v16  ;;  %v594_v16 = vld [vmem:[%s7574_s1 + $0x1198] sm:$0xff]  ;;  %v605_v39 = vld [vmem:[%s7574_s1 + $0x11f0] sm:$0xff]  ;;  %v871_v4 = vld [vmem:[%s7574_s1 + $0x1a40] sm:$0xff] }
 0x148   :  { %3062 = vmatpush1.bf16.msra.mxu0 %v3061_v3  ;;  %1655 = vmatprep.mubr.f32.mxu0 %v6012_v41  ;;  %v843_v3 = vld [vmem:[%s7574_s1 + $0x1960] sm:$0xff]  ;;  %v3467_v22 = vpack.c.bf16 %v598_v17, %v594_v16  ;;  %v617_v5 = vld [vmem:[%s7574_s1 + $0x1250] sm:$0xff] }
 0x149   :  { %3064 = vmatprep.subr.bf16.mxu0 %v3063_v20  ;;  %v3465_v20 = vpack.c.bf16 %v589_v13, %v585_v12  ;;  %v3081_v21 = vpack.c.bf16 %v843_v3, %v839_v9  ;;  %v621_v6 = vld [vmem:[%s7574_s1 + $0x1270] sm:$0xff]  ;;  %v630_v9 = vld [vmem:[%s7574_s1 + $0x12b8] sm:$0xff]  ;;  %v880_v12 = vld [vmem:[%s7574_s1 + $0x1a88] sm:$0xff] }
 0x14a   :  { %3450 = vmatpush1.bf16.msra.mxu1 %v3449_v28  ;;  %v3083_v28 = vpack.c.bf16 %v852_v19, %v848_v18  ;;  %v884_v13 = vld [vmem:[%s7574_s1 + $0x1aa8] sm:$0xff]  ;;  %v879_v17 = vld [vmem:[%s7574_s1 + $0x1a80] sm:$0xff]  ;;  %v625_v18 = vld [vmem:[%s7574_s1 + $0x1290] sm:$0xff] }
 0x14b   :  { %3452 = vmatprep.subr.bf16.mxu1 %v3451_v30  ;;  %v602_v30 = vld [vmem:[%s7574_s1 + $0x11d8] sm:$0xff]  ;;  %v629_v19 = vld [vmem:[%s7574_s1 + $0x12b0] sm:$0xff] }
 0x14c   :  { %3066 = vmatpush1.bf16.msra.mxu0 %v3065_v29  ;;  %v851_v29 = vld [vmem:[%s7574_s1 + $0x19a0] sm:$0xff]  ;;  %v3471_v2 = vpack.c.bf16 %v606_v54, %v602_v30 }
 0x14d   :  { %3068 = vmatprep.subr.bf16.mxu0 %v3067_v34  ;;  %v3469_v34 = vpack.c.bf16 %v597_v26, %v593_v24  ;;  %v3085_v35 = vpack.c.bf16 %v851_v29, %v847_v23  ;;  %v638_v23 = vld [vmem:[%s7574_s1 + $0x12f8] sm:$0xff]  ;;  %v888_v24 = vld [vmem:[%s7574_s1 + $0x1ac8] sm:$0xff]  ;;  %v887_v54 = vld [vmem:[%s7574_s1 + $0x1ac0] sm:$0xff] }
 0x14e   :  { %3454 = vmatpush1.bf16.msra.mxu1 %v3453_v40  ;;  %v3087_v40 = vpack.c.bf16 %v860_v32, %v856_v31  ;;  %v892_v26 = vld [vmem:[%s7574_s1 + $0x1ae8] sm:$0xff]  ;;  %v633_v31 = vld [vmem:[%s7574_s1 + $0x12d0] sm:$0xff] }
 0x14f   :  { %3456 = vmatprep.subr.bf16.mxu1 %v3455_v45  ;;  %v610_v45 = vld [vmem:[%s7574_s1 + $0x1218] sm:$0xff]  ;;  %v637_v32 = vld [vmem:[%s7574_s1 + $0x12f0] sm:$0xff] }
 0x150   :  { %3070 = vmatpush1.bf16.msra.mxu0 %v3069_v42  ;;  %v859_v42 = vld [vmem:[%s7574_s1 + $0x19e0] sm:$0xff]  ;;  %v3475_v50 = vpack.c.bf16 %v614_v46, %v610_v45 }
 0x151   :  { %3072 = vmatprep.subr.bf16.mxu0 %v3071_v27  ;;  %v3473_v27 = vpack.c.bf16 %v605_v39, %v601_v37  ;;  %v3089_v49 = vpack.c.bf16 %v859_v42, %v855_v36  ;;  %v646_v36 = vld [vmem:[%s7574_s1 + $0x1338] sm:$0xff]  ;;  %v896_v37 = vld [vmem:[%s7574_s1 + $0x1b08] sm:$0xff]  ;;  %v895_v46 = vld [vmem:[%s7574_s1 + $0x1b00] sm:$0xff] }
 0x152   :  { %3458 = vmatpush1.bf16.msra.mxu1 %v3457_v53  ;;  %v3091_v53 = vpack.c.bf16 %v868_v38, %v864_v47  ;;  %v900_v39 = vld [vmem:[%s7574_s1 + $0x1b28] sm:$0xff]  ;;  %v641_v47 = vld [vmem:[%s7574_s1 + $0x1310] sm:$0xff] }
 0x153   :  { %3460 = vmatprep.subr.bf16.mxu1 %v3459_v58  ;;  %v618_v58 = vld [vmem:[%s7574_s1 + $0x1258] sm:$0xff]  ;;  %v645_v38 = vld [vmem:[%s7574_s1 + $0x1330] sm:$0xff] }
 0x154   :  { %3074 = vmatpush1.bf16.msra.mxu0 %v3073_v55  ;;  %v867_v55 = vld [vmem:[%s7574_s1 + $0x1a20] sm:$0xff]  ;;  %v3479_v1 = vpack.c.bf16 %v622_v59, %v618_v58 }
 0x155   :  { %3076 = vmatprep.subr.bf16.mxu0 %v3075_v63  ;;  %v3477_v63 = vpack.c.bf16 %v613_v52, %v609_v48  ;;  %v3093_v0 = vpack.c.bf16 %v867_v55, %v863_v51  ;;  %v654_v51 = vld [vmem:[%s7574_s1 + $0x1378] sm:$0xff]  ;;  %v904_v48 = vld [vmem:[%s7574_s1 + $0x1b48] sm:$0xff]  ;;  %v903_v59 = vld [vmem:[%s7574_s1 + $0x1b40] sm:$0xff] }
 0x156   :  { %3462 = vmatpush1.bf16.msra.mxu1 %v3461_v7  ;;  %v3095_v7 = vpack.c.bf16 %v876_v60, %v872_v33  ;;  %v908_v52 = vld [vmem:[%s7574_s1 + $0x1b68] sm:$0xff]  ;;  %v649_v33 = vld [vmem:[%s7574_s1 + $0x1350] sm:$0xff] }
 0x157   :  { %3464 = vmatprep.subr.bf16.mxu1 %v3463_v25  ;;  %v626_v25 = vld [vmem:[%s7574_s1 + $0x1298] sm:$0xff]  ;;  %v653_v60 = vld [vmem:[%s7574_s1 + $0x1370] sm:$0xff] }
 0x158   :  { %3078 = vmatpush1.bf16.msra.mxu0 %v3077_v8  ;;  %v875_v8 = vld [vmem:[%s7574_s1 + $0x1a60] sm:$0xff]  ;;  %v3483_v16 = vpack.c.bf16 %v630_v9, %v626_v25 }
 0x159   :  { %3080 = vmatprep.subr.bf16.mxu0 %v3079_v15  ;;  %v3481_v15 = vpack.c.bf16 %v621_v6, %v617_v5  ;;  %v3097_v3 = vpack.c.bf16 %v875_v8, %v871_v4  ;;  %v662_v4 = vld [vmem:[%s7574_s1 + $0x13b8] sm:$0xff]  ;;  %v912_v5 = vld [vmem:[%s7574_s1 + $0x1b88] sm:$0xff]  ;;  %v911_v9 = vld [vmem:[%s7574_s1 + $0x1b80] sm:$0xff] }
 0x15a   :  { %3466 = vmatpush1.bf16.msra.mxu1 %v3465_v20  ;;  %v3099_v20 = vpack.c.bf16 %v884_v13, %v880_v12  ;;  %v916_v6 = vld [vmem:[%s7574_s1 + $0x1ba8] sm:$0xff]  ;;  %v657_v12 = vld [vmem:[%s7574_s1 + $0x1390] sm:$0xff] }
 0x15b   :  { %3468 = vmatprep.subr.bf16.mxu1 %v3467_v22  ;;  %v634_v22 = vld [vmem:[%s7574_s1 + $0x12d8] sm:$0xff]  ;;  %v661_v13 = vld [vmem:[%s7574_s1 + $0x13b0] sm:$0xff] }
 0x15c   :  { %3082 = vmatpush1.bf16.msra.mxu0 %v3081_v21  ;;  %v883_v21 = vld [vmem:[%s7574_s1 + $0x1aa0] sm:$0xff]  ;;  %v3487_v30 = vpack.c.bf16 %v638_v23, %v634_v22 }
 0x15d   :  { %3084 = vmatprep.subr.bf16.mxu0 %v3083_v28  ;;  %v3485_v28 = vpack.c.bf16 %v629_v19, %v625_v18  ;;  %v3101_v29 = vpack.c.bf16 %v883_v21, %v879_v17  ;;  %v670_v17 = vld [vmem:[%s7574_s1 + $0x13f8] sm:$0xff]  ;;  %v920_v18 = vld [vmem:[%s7574_s1 + $0x1bc8] sm:$0xff]  ;;  %v919_v23 = vld [vmem:[%s7574_s1 + $0x1bc0] sm:$0xff] }
 0x15e   :  { %3470 = vmatpush1.bf16.msra.mxu1 %v3469_v34  ;;  %v3103_v34 = vpack.c.bf16 %v892_v26, %v888_v24  ;;  %v924_v19 = vld [vmem:[%s7574_s1 + $0x1be8] sm:$0xff]  ;;  %v665_v24 = vld [vmem:[%s7574_s1 + $0x13d0] sm:$0xff] }
 0x15f   :  { %3472 = vmatprep.subr.bf16.mxu1 %v3471_v2  ;;  %v642_v2 = vld [vmem:[%s7574_s1 + $0x1318] sm:$0xff]  ;;  %v669_v26 = vld [vmem:[%s7574_s1 + $0x13f0] sm:$0xff] }
 0x160   :  { %3086 = vmatpush1.bf16.msra.mxu0 %v3085_v35  ;;  %v891_v35 = vld [vmem:[%s7574_s1 + $0x1ae0] sm:$0xff]  ;;  %v3491_v45 = vpack.c.bf16 %v646_v36, %v642_v2 }
 0x161   :  { %3088 = vmatprep.subr.bf16.mxu0 %v3087_v40  ;;  %v3489_v40 = vpack.c.bf16 %v637_v32, %v633_v31  ;;  %v3105_v42 = vpack.c.bf16 %v891_v35, %v887_v54  ;;  %v678_v54 = vld [vmem:[%s7574_s1 + $0x1438] sm:$0xff]  ;;  %v1132_v31 = vcombine.high %v5962_v44, %v5962_v44  ;;  %v928_v32 = vld [vmem:[%s7574_s1 + $0x1c08] sm:$0xff]  ;;  %v3505_v35 = vpack.c.bf16 %v669_v26, %v665_v24  ;;  %v673_v44 = vld [vmem:[%s7574_s1 + $0x1410] sm:$0xff] }
 0x162   :  { %3474 = vmatpush1.bf16.msra.mxu1 %v3473_v27  ;;  %v3107_v27 = vpack.c.bf16 %v900_v39, %v896_v37  ;;  %v927_v37 = vld [vmem:[%s7574_s1 + $0x1c00] sm:$0xff]  ;;  %v677_v39 = vld [vmem:[%s7574_s1 + $0x1430] sm:$0xff]  ;;  %v964_v24 = vld [vmem:[%s7574_s1 + $0x1d28] sm:$0xff] }
 0x163   :  { %3476 = vmatprep.subr.bf16.mxu1 %v3475_v50  ;;  %v650_v50 = vld [vmem:[%s7574_s1 + $0x1358] sm:$0xff] }
 0x164   :  { %3090 = vmatpush1.bf16.msra.mxu0 %v3089_v49  ;;  %v899_v49 = vld [vmem:[%s7574_s1 + $0x1b20] sm:$0xff]  ;;  %v3495_v58 = vpack.c.bf16 %v654_v51, %v650_v50 }
 0x165   :  { %3092 = vmatprep.subr.bf16.mxu0 %v3091_v53  ;;  %v3493_v53 = vpack.c.bf16 %v645_v38, %v641_v47  ;;  %v3109_v55 = vpack.c.bf16 %v899_v49, %v895_v46  ;;  %v686_v46 = vld [vmem:[%s7574_s1 + $0x1478] sm:$0xff]  ;;  %v6381_v47 = vrot.slane %v1132_v31, %v4218_v11  ;;  %v936_v38 = vld [vmem:[%s7574_s1 + $0x1c48] sm:$0xff]  ;;  %v3509_v49 = vpack.c.bf16 %v677_v39, %v673_v44  ;;  %v681_v11 = vld [vmem:[%s7574_s1 + $0x1450] sm:$0xff] }
 0x166   :  { %3478 = vmatpush1.bf16.msra.mxu1 %v3477_v63  ;;  %v3111_v63 = vpack.c.bf16 %v908_v52, %v904_v48  ;;  %v935_v48 = vld [vmem:[%s7574_s1 + $0x1c40] sm:$0xff]  ;;  %v685_v52 = vld [vmem:[%s7574_s1 + $0x1470] sm:$0xff] }
 0x167   :  { %3480 = vmatprep.subr.bf16.mxu1 %v3479_v1  ;;  %v658_v1 = vld [vmem:[%s7574_s1 + $0x1398] sm:$0xff]  ;;  %v709_v31 = vld [vmem:[%s7574_s1 + $0x1530] sm:$0xff] }
 0x168   :  { %3094 = vmatpush1.bf16.msra.mxu0 %v3093_v0  ;;  %v907_v0 = vld [vmem:[%s7574_s1 + $0x1b60] sm:$0xff]  ;;  %v3499_v25 = vpack.c.bf16 %v662_v4, %v658_v1 }
 0x169   :  { %3096 = vmatprep.subr.bf16.mxu0 %v3095_v7  ;;  %v3497_v7 = vpack.c.bf16 %v653_v60, %v649_v33  ;;  %v3113_v8 = vpack.c.bf16 %v907_v0, %v903_v59  ;;  %v694_v59 = vld [vmem:[%s7574_s1 + $0x14b8] sm:$0xff]  ;;  %v6409_v33 = vcombine.high %v6381_v47, %v6381_v47  ;;  %v944_v60 = vld [vmem:[%s7574_s1 + $0x1c88] sm:$0xff]  ;;  %v3513_v0 = vpack.c.bf16 %v685_v52, %v681_v11 }
 0x16a   :  { %3482 = vmatpush1.bf16.msra.mxu1 %v3481_v15  ;;  %v3115_v15 = vpack.c.bf16 %v916_v6, %v912_v5  ;;  %v689_v5 = vld [vmem:[%s7574_s1 + $0x1490] sm:$0xff] }
 0x16b   :  { %3484 = vmatprep.subr.bf16.mxu1 %v3483_v16  ;;  %v666_v16 = vld [vmem:[%s7574_s1 + $0x13d8] sm:$0xff]  ;;  %v693_v6 = vld [vmem:[%s7574_s1 + $0x14b0] sm:$0xff] }
 0x16c   :  { %3098 = vmatpush1.bf16.msra.mxu0 %v3097_v3  ;;  %v915_v3 = vld [vmem:[%s7574_s1 + $0x1ba0] sm:$0xff]  ;;  %v3503_v22 = vpack.c.bf16 %v670_v17, %v666_v16 }
 0x16d   :  { %3100 = vmatprep.subr.bf16.mxu0 %v3099_v20  ;;  %v3501_v20 = vpack.c.bf16 %v661_v13, %v657_v12  ;;  %v3117_v21 = vpack.c.bf16 %v915_v3, %v911_v9  ;;  %v702_v9 = vld [vmem:[%s7574_s1 + $0x14f8] sm:$0xff]  ;;  %v952_v12 = vld [vmem:[%s7574_s1 + $0x1cc8] sm:$0xff]  ;;  %v951_v17 = vld [vmem:[%s7574_s1 + $0x1cc0] sm:$0xff] }
 0x16e   :  { %3486 = vmatpush1.bf16.msra.mxu1 %v3485_v28  ;;  %v3119_v28 = vpack.c.bf16 %v924_v19, %v920_v18  ;;  %v956_v13 = vld [vmem:[%s7574_s1 + $0x1ce8] sm:$0xff]  ;;  %v697_v18 = vld [vmem:[%s7574_s1 + $0x14d0] sm:$0xff] }
 0x16f   :  { %3488 = vmatprep.subr.bf16.mxu1 %v3487_v30  ;;  %v674_v30 = vld [vmem:[%s7574_s1 + $0x1418] sm:$0xff]  ;;  %v701_v19 = vld [vmem:[%s7574_s1 + $0x14f0] sm:$0xff] }
 0x170   :  { %3102 = vmatpush1.bf16.msra.mxu0 %v3101_v29  ;;  %v923_v29 = vld [vmem:[%s7574_s1 + $0x1be0] sm:$0xff]  ;;  %v3507_v36 = vpack.c.bf16 %v678_v54, %v674_v30  ;;  %v3521_v26 = vpack.c.bf16 %v701_v19, %v697_v18  ;;  %v705_v54 = vld [vmem:[%s7574_s1 + $0x1510] sm:$0xff] }
 0x171   :  { %3104 = vmatprep.subr.bf16.mxu0 %v3103_v34  ;;  %v932_v34 = vld [vmem:[%s7574_s1 + $0x1c28] sm:$0xff]  ;;  %v3121_v2 = vpack.c.bf16 %v923_v29, %v919_v23  ;;  %v959_v30 = vld [vmem:[%s7574_s1 + $0x1d00] sm:$0xff]  ;;  %v3525_v44 = vpack.c.bf16 %v709_v31, %v705_v54 }
 0x172   :  { %3490 = vmatpush1.bf16.msra.mxu1 %v3489_v40  ;;  %v3123_v40 = vpack.c.bf16 %v932_v34, %v928_v32  ;;  %v960_v23 = vld [vmem:[%s7574_s1 + $0x1d08] sm:$0xff]  ;;  %v963_v34 = vld [vmem:[%s7574_s1 + $0x1d20] sm:$0xff] }
 0x173   :  { %3492 = vmatprep.subr.bf16.mxu1 %v3491_v45  ;;  %v682_v45 = vld [vmem:[%s7574_s1 + $0x1458] sm:$0xff]  ;;  %v3139_v32 = vpack.c.bf16 %v964_v24, %v960_v23  ;;  %v3141_v39 = vpack.c.bf16 %v963_v34, %v959_v30  ;;  %v995_v24 = vld [vmem:[%s7574_s1 + $0x1e20] sm:$0xff]  ;;  %v1004_v30 = vld [vmem:[%s7574_s1 + $0x1e68] sm:$0xff] }
 0x174   :  { %3106 = vmatpush1.bf16.msra.mxu0 %v3105_v42  ;;  %v931_v42 = vld [vmem:[%s7574_s1 + $0x1c20] sm:$0xff]  ;;  %v3511_v51 = vpack.c.bf16 %v686_v46, %v682_v45  ;;  %v713_v45 = vld [vmem:[%s7574_s1 + $0x1550] sm:$0xff] }
 0x175   :  { %3108 = vmatprep.subr.bf16.mxu0 %v3107_v27  ;;  %v940_v27 = vld [vmem:[%s7574_s1 + $0x1c68] sm:$0xff]  ;;  %v3125_v50 = vpack.c.bf16 %v931_v42, %v927_v37  ;;  %v967_v42 = vld [vmem:[%s7574_s1 + $0x1d40] sm:$0xff]  ;;  %v717_v46 = vld [vmem:[%s7574_s1 + $0x1570] sm:$0xff] }
 0x176   :  { %3494 = vmatpush1.bf16.msra.mxu1 %v3493_v53  ;;  %v3127_v53 = vpack.c.bf16 %v940_v27, %v936_v38  ;;  %v972_v37 = vld [vmem:[%s7574_s1 + $0x1d68] sm:$0xff]  ;;  %v971_v27 = vld [vmem:[%s7574_s1 + $0x1d60] sm:$0xff]  ;;  %v3529_v11 = vpack.c.bf16 %v717_v46, %v713_v45 }
 0x177   :  { %3496 = vmatprep.subr.bf16.mxu1 %v3495_v58  ;;  %v690_v58 = vld [vmem:[%s7574_s1 + $0x1498] sm:$0xff]  ;;  %v3145_v52 = vpack.c.bf16 %v971_v27, %v967_v42  ;;  %v999_v34 = vld [vmem:[%s7574_s1 + $0x1e40] sm:$0xff]  ;;  %v1012_v42 = vld [vmem:[%s7574_s1 + $0x1ea8] sm:$0xff] }
 0x178   :  { %3110 = vmatpush1.bf16.msra.mxu0 %v3109_v55  ;;  %v939_v55 = vld [vmem:[%s7574_s1 + $0x1c60] sm:$0xff]  ;;  %v3515_v4 = vpack.c.bf16 %v694_v59, %v690_v58  ;;  %v721_v58 = vld [vmem:[%s7574_s1 + $0x1590] sm:$0xff] }
 0x179   :  { %3112 = vmatprep.subr.bf16.mxu0 %v3111_v63  ;;  %v948_v63 = vld [vmem:[%s7574_s1 + $0x1ca8] sm:$0xff]  ;;  %v3129_v1 = vpack.c.bf16 %v939_v55, %v935_v48  ;;  %v975_v55 = vld [vmem:[%s7574_s1 + $0x1d80] sm:$0xff]  ;;  %v725_v59 = vld [vmem:[%s7574_s1 + $0x15b0] sm:$0xff] }
 0x17a   :  { %3498 = vmatpush1.bf16.msra.mxu1 %v3497_v7  ;;  %v3131_v7 = vpack.c.bf16 %v948_v63, %v944_v60  ;;  %v980_v48 = vld [vmem:[%s7574_s1 + $0x1da8] sm:$0xff]  ;;  %v979_v63 = vld [vmem:[%s7574_s1 + $0x1da0] sm:$0xff] }
 0x17b   :  { %3500 = vmatprep.subr.bf16.mxu1 %v3499_v25  ;;  %v698_v25 = vld [vmem:[%s7574_s1 + $0x14d8] sm:$0xff]  ;;  %v1007_v27 = vld [vmem:[%s7574_s1 + $0x1e80] sm:$0xff] }
 0x17c   :  { %3114 = vmatpush1.bf16.msra.mxu0 %v3113_v8  ;;  %v947_v8 = vld [vmem:[%s7574_s1 + $0x1ca0] sm:$0xff]  ;;  %v3519_v16 = vpack.c.bf16 %v702_v9, %v698_v25  ;;  %v729_v25 = vld [vmem:[%s7574_s1 + $0x15d0] sm:$0xff] }
 0x17d   :  { %3116 = vmatprep.subr.bf16.mxu0 %v3115_v15  ;;  %v3517_v15 = vpack.c.bf16 %v693_v6, %v689_v5  ;;  %v3533_v5 = vpack.c.bf16 %v725_v59, %v721_v58  ;;  %v3149_v6 = vpack.c.bf16 %v979_v63, %v975_v55  ;;  %v733_v9 = vld [vmem:[%s7574_s1 + $0x15f0] sm:$0xff]  ;;  %v1020_v55 = vld [vmem:[%s7574_s1 + $0x1ee8] sm:$0xff]  ;;  %v1015_v63 = vld [vmem:[%s7574_s1 + $0x1ec0] sm:$0xff] }
 0x17e   :  { %3502 = vmatpush1.bf16.msra.mxu1 %v3501_v20  ;;  %v955_v20 = vld [vmem:[%s7574_s1 + $0x1ce0] sm:$0xff]  ;;  %v3537_v18 = vpack.c.bf16 %v733_v9, %v729_v25 }
 0x17f   :  { %3504 = vmatprep.subr.bf16.mxu1 %v3503_v22  ;;  %v710_v22 = vld [vmem:[%s7574_s1 + $0x1538] sm:$0xff] }
 0x180   :  { %3118 = vmatpush1.bf16.msra.mxu0 %v3117_v21  ;;  %v706_v21 = vld [vmem:[%s7574_s1 + $0x1518] sm:$0xff] }
 0x181   :  { %3120 = vmatprep.subr.bf16.mxu0 %v3119_v28  ;;  %v3137_v28 = vpack.c.bf16 %v955_v20, %v951_v17  ;;  %v3523_v29 = vpack.c.bf16 %v710_v22, %v706_v21  ;;  %v996_v17 = vld [vmem:[%s7574_s1 + $0x1e28] sm:$0xff]  ;;  %v991_v20 = vld [vmem:[%s7574_s1 + $0x1e00] sm:$0xff]  ;;  %v737_v21 = vld [vmem:[%s7574_s1 + $0x1610] sm:$0xff] }
 0x182   :  { %3506 = vmatpush1.bf16.msra.mxu1 %v3505_v35  ;;  %v714_v35 = vld [vmem:[%s7574_s1 + $0x1558] sm:$0xff]  ;;  %v741_v22 = vld [vmem:[%s7574_s1 + $0x1630] sm:$0xff]  ;;  %v3157_v31 = vpack.c.bf16 %v995_v24, %v991_v20  ;;  %v1036_v20 = vld [vmem:[%s7574_s1 + $0x1f68] sm:$0xff] }
 0x183   :  { %3508 = vmatprep.subr.bf16.mxu1 %v3507_v36  ;;  %v968_v36 = vld [vmem:[%s7574_s1 + $0x1d48] sm:$0xff]  ;;  %v3541_v54 = vpack.c.bf16 %v741_v22, %v737_v21  ;;  %v1031_v24 = vld [vmem:[%s7574_s1 + $0x1f40] sm:$0xff] }
 0x184   :  { %3122 = vmatpush1.bf16.msra.mxu0 %v3121_v2  ;;  %v718_v2 = vld [vmem:[%s7574_s1 + $0x1578] sm:$0xff]  ;;  %v3143_v38 = vpack.c.bf16 %v972_v37, %v968_v36  ;;  %v1003_v37 = vld [vmem:[%s7574_s1 + $0x1e60] sm:$0xff] }
 0x185   :  { %3124 = vmatprep.subr.bf16.mxu0 %v3123_v40  ;;  %2082 = vmatmul.mubr.f32.vlgmr.msra.gmra.mrb[2].mxu1 %v5182_v14  ;;  %v943_v14 = vld [vmem:[%s7574_s1 + $0x1c80] sm:$0xff]  ;;  %v3527_v40 = vpack.c.bf16 %v718_v2, %v714_v35  ;;  %v745_v35 = vld [vmem:[%s7574_s1 + $0x1650] sm:$0xff]  ;;  %v3161_v46 = vpack.c.bf16 %v1003_v37, %v999_v34  ;;  %v1044_v34 = vld [vmem:[%s7574_s1 + $0x1fa8] sm:$0xff] }
 0x186   :  { %3510 = vmatpush1.bf16.msra.mxu1 %v3509_v49  ;;  %2152 = vmatprep.mubr.f32.mxu1 %v5607_v57  ;;  %v3133_v3 = vpack.c.bf16 %v947_v8, %v943_v14  ;;  %v3135_v57 = vpack.c.bf16 %v956_v13, %v952_v12  ;;  %v722_v49 = vld [vmem:[%s7574_s1 + $0x1598] sm:$0xff]  ;;  %v988_v14 = vld [vmem:[%s7574_s1 + $0x1de8] sm:$0xff]  ;;  %v983_v8 = vld [vmem:[%s7574_s1 + $0x1dc0] sm:$0xff] }
 0x187   :  { %1656 = vmatmul.mubr.f32.vlgmr.msra.gmra.mrb[0].mxu0 %v5984_v10  ;;  %3512 = vmatprep.subr.bf16.mxu1 %v3511_v51  ;;  %v976_v51 = vld [vmem:[%s7574_s1 + $0x1d88] sm:$0xff]  ;;  %v987_v13 = vld [vmem:[%s7574_s1 + $0x1de0] sm:$0xff]  ;;  %v749_v2 = vld [vmem:[%s7574_s1 + $0x1670] sm:$0xff] }
 0x188   :  { %3126 = vmatpush1.bf16.msra.mxu0 %v3125_v50  ;;  %1726 = vmatprep.mubr.f32.mxu0 %v6409_v33  ;;  %v726_v50 = vld [vmem:[%s7574_s1 + $0x15b8] sm:$0xff]  ;;  %v3147_v60 = vpack.c.bf16 %v980_v48, %v976_v51  ;;  %v3153_v19 = vpack.c.bf16 %v987_v13, %v983_v8  ;;  %v3545_v45 = vpack.c.bf16 %v749_v2, %v745_v35  ;;  %v1011_v48 = vld [vmem:[%s7574_s1 + $0x1ea0] sm:$0xff]  ;;  %v1028_v8 = vld [vmem:[%s7574_s1 + $0x1f28] sm:$0xff] }
 0x189   :  { %3128 = vmatprep.subr.bf16.mxu0 %v3127_v53  ;;  %v3531_v53 = vpack.c.bf16 %v726_v50, %v722_v49  ;;  %v753_v49 = vld [vmem:[%s7574_s1 + $0x1690] sm:$0xff]  ;;  %v3165_v59 = vpack.c.bf16 %v1011_v48, %v1007_v27  ;;  %v1023_v13 = vld [vmem:[%s7574_s1 + $0x1f00] sm:$0xff]  ;;  %v1052_v27 = vld [vmem:[%s7574_s1 + $0x1fe8] sm:$0xff] }
 0x18a   :  { %3514 = vmatpush1.bf16.msra.mxu1 %v3513_v0  ;;  %v730_v0 = vld [vmem:[%s7574_s1 + $0x15d8] sm:$0xff]  ;;  %v757_v50 = vld [vmem:[%s7574_s1 + $0x16b0] sm:$0xff]  ;;  %v1039_v37 = vld [vmem:[%s7574_s1 + $0x1f80] sm:$0xff] }
 0x18b   :  { %3516 = vmatprep.subr.bf16.mxu1 %v3515_v4  ;;  %v984_v4 = vld [vmem:[%s7574_s1 + $0x1dc8] sm:$0xff]  ;;  %v3549_v58 = vpack.c.bf16 %v757_v50, %v753_v49  ;;  %v1047_v48 = vld [vmem:[%s7574_s1 + $0x1fc0] sm:$0xff] }
 0x18c   :  { %3130 = vmatpush1.bf16.msra.mxu0 %v3129_v1  ;;  %v734_v1 = vld [vmem:[%s7574_s1 + $0x15f8] sm:$0xff]  ;;  %v3151_v12 = vpack.c.bf16 %v988_v14, %v984_v4  ;;  %v1019_v14 = vld [vmem:[%s7574_s1 + $0x1ee0] sm:$0xff] }
 0x18d   :  { %3132 = vmatprep.subr.bf16.mxu0 %v3131_v7  ;;  %v3535_v7 = vpack.c.bf16 %v734_v1, %v730_v0  ;;  %v761_v0 = vld [vmem:[%s7574_s1 + $0x16d0] sm:$0xff]  ;;  %v3169_v9 = vpack.c.bf16 %v1019_v14, %v1015_v63  ;;  %v810_v14 = vld [vmem:[%s7574_s1 + $0x1858] sm:$0xff] }
 0x18e   :  { %3518 = vmatpush1.bf16.msra.mxu1 %v3517_v15  ;;  %v738_v15 = vld [vmem:[%s7574_s1 + $0x1618] sm:$0xff]  ;;  %v765_v1 = vld [vmem:[%s7574_s1 + $0x16f0] sm:$0xff] }
 0x18f   :  { %3520 = vmatprep.subr.bf16.mxu1 %v3519_v16  ;;  %v992_v16 = vld [vmem:[%s7574_s1 + $0x1e08] sm:$0xff]  ;;  %v3553_v25 = vpack.c.bf16 %v765_v1, %v761_v0  ;;  %v801_v1 = vld [vmem:[%s7574_s1 + $0x1810] sm:$0xff] }
 0x190   :  { %3134 = vmatpush1.bf16.msra.mxu0 %v3133_v3  ;;  %v742_v3 = vld [vmem:[%s7574_s1 + $0x1638] sm:$0xff]  ;;  %v3155_v23 = vpack.c.bf16 %v996_v17, %v992_v16  ;;  %v1027_v17 = vld [vmem:[%s7574_s1 + $0x1f20] sm:$0xff] }
 0x191   :  { %3136 = vmatprep.subr.bf16.mxu0 %v3135_v57  ;;  %v3539_v57 = vpack.c.bf16 %v742_v3, %v738_v15  ;;  %v769_v15 = vld [vmem:[%s7574_s1 + $0x1710] sm:$0xff]  ;;  %v3173_v22 = vpack.c.bf16 %v1027_v17, %v1023_v13 }
 0x192   :  { %3522 = vmatpush1.bf16.msra.mxu1 %v3521_v26  ;;  %v746_v26 = vld [vmem:[%s7574_s1 + $0x1658] sm:$0xff]  ;;  %v773_v3 = vld [vmem:[%s7574_s1 + $0x1730] sm:$0xff] }
 0x193   :  { %3524 = vmatprep.subr.bf16.mxu1 %v3523_v29  ;;  %v1000_v29 = vld [vmem:[%s7574_s1 + $0x1e48] sm:$0xff]  ;;  %v3557_v21 = vpack.c.bf16 %v773_v3, %v769_v15  ;;  %v817_v13 = vld [vmem:[%s7574_s1 + $0x1890] sm:$0xff] }
 0x194   :  { %3138 = vmatpush1.bf16.msra.mxu0 %v3137_v28  ;;  %v750_v28 = vld [vmem:[%s7574_s1 + $0x1678] sm:$0xff]  ;;  %v3159_v36 = vpack.c.bf16 %v1004_v30, %v1000_v29  ;;  %v1035_v30 = vld [vmem:[%s7574_s1 + $0x1f60] sm:$0xff]  ;;  %v821_v15 = vld [vmem:[%s7574_s1 + $0x18b0] sm:$0xff] }
 0x195   :  { %3140 = vmatprep.subr.bf16.mxu0 %v3139_v32  ;;  %v3543_v32 = vpack.c.bf16 %v750_v28, %v746_v26  ;;  %v777_v26 = vld [vmem:[%s7574_s1 + $0x1750] sm:$0xff]  ;;  %v3177_v2 = vpack.c.bf16 %v1035_v30, %v1031_v24  ;;  %v2306_v3 = vld [vmem:[%s7576_s3 + $0x8] sm:$0xff]  ;;  %v2309_v24 = vld [vmem:[%s7576_s3 + $0x20] sm:$0xff] }
 0x196   :  { %3526 = vmatpush1.bf16.msra.mxu1 %v3525_v44  ;;  %v754_v44 = vld [vmem:[%s7574_s1 + $0x1698] sm:$0xff]  ;;  %v781_v28 = vld [vmem:[%s7574_s1 + $0x1770] sm:$0xff] }
 0x197   :  { %3528 = vmatprep.subr.bf16.mxu1 %v3527_v40  ;;  %v1008_v40 = vld [vmem:[%s7574_s1 + $0x1e88] sm:$0xff]  ;;  %v3561_v35 = vpack.c.bf16 %v781_v28, %v777_v26  ;;  %v2311_v26 = vld [vmem:[%s7576_s3 + $0x30] sm:$0xff]  ;;  %v2316_v30 = vld [vmem:[%s7576_s3 + $0x58] sm:$0xff] }
 0x198   :  { %3142 = vmatpush1.bf16.msra.mxu0 %v3141_v39  ;;  %v758_v39 = vld [vmem:[%s7574_s1 + $0x16b8] sm:$0xff]  ;;  %v3163_v51 = vpack.c.bf16 %v1012_v42, %v1008_v40  ;;  %v1043_v42 = vld [vmem:[%s7574_s1 + $0x1fa0] sm:$0xff]  ;;  %v2314_v28 = vld [vmem:[%s7576_s3 + $0x48] sm:$0xff] }
 0x199   :  { %3144 = vmatprep.subr.bf16.mxu0 %v3143_v38  ;;  %v3547_v38 = vpack.c.bf16 %v758_v39, %v754_v44  ;;  %v785_v44 = vld [vmem:[%s7574_s1 + $0x1790] sm:$0xff]  ;;  %v3181_v50 = vpack.c.bf16 %v1043_v42, %v1039_v37  ;;  %v838_v42 = vld [vmem:[%s7574_s1 + $0x1938] sm:$0xff] }
 0x19a   :  { %3530 = vmatpush1.bf16.msra.mxu1 %v3529_v11  ;;  %v762_v11 = vld [vmem:[%s7574_s1 + $0x16d8] sm:$0xff]  ;;  %v789_v39 = vld [vmem:[%s7574_s1 + $0x17b0] sm:$0xff] }
 0x19b   :  { %3532 = vmatprep.subr.bf16.mxu1 %v3531_v53  ;;  %v1016_v53 = vld [vmem:[%s7574_s1 + $0x1ec8] sm:$0xff]  ;;  %v3565_v49 = vpack.c.bf16 %v789_v39, %v785_v44  ;;  %v829_v37 = vld [vmem:[%s7574_s1 + $0x18f0] sm:$0xff]  ;;  %v2320_v39 = vld [vmem:[%s7576_s3 + $0x78] sm:$0xff] }
 0x19c   :  { %3146 = vmatpush1.bf16.msra.mxu0 %v3145_v52  ;;  %v766_v52 = vld [vmem:[%s7574_s1 + $0x16f8] sm:$0xff]  ;;  %v3167_v4 = vpack.c.bf16 %v1020_v55, %v1016_v53  ;;  %v1051_v55 = vld [vmem:[%s7574_s1 + $0x1fe0] sm:$0xff]  ;;  %v2318_v44 = vld [vmem:[%s7576_s3 + $0x68] sm:$0xff] }
 0x19d   :  { %3148 = vmatprep.subr.bf16.mxu0 %v3147_v60  ;;  %v3551_v60 = vpack.c.bf16 %v766_v52, %v762_v11  ;;  %v793_v11 = vld [vmem:[%s7574_s1 + $0x17d0] sm:$0xff]  ;;  %v3185_v63 = vpack.c.bf16 %v1051_v55, %v1047_v48  ;;  %v846_v55 = vld [vmem:[%s7574_s1 + $0x1978] sm:$0xff] }
 0x19e   :  { %3534 = vmatpush1.bf16.msra.mxu1 %v3533_v5  ;;  %v770_v5 = vld [vmem:[%s7574_s1 + $0x1718] sm:$0xff]  ;;  %v797_v52 = vld [vmem:[%s7574_s1 + $0x17f0] sm:$0xff] }
 0x19f   :  { %3536 = vmatprep.subr.bf16.mxu1 %v3535_v7  ;;  %v1024_v7 = vld [vmem:[%s7574_s1 + $0x1f08] sm:$0xff]  ;;  %v837_v48 = vld [vmem:[%s7574_s1 + $0x1930] sm:$0xff] }
 0x1a0   :  { %3150 = vmatpush1.bf16.msra.mxu0 %v3149_v6  ;;  %v774_v6 = vld [vmem:[%s7574_s1 + $0x1738] sm:$0xff]  ;;  %v3171_v16 = vpack.c.bf16 %v1028_v8, %v1024_v7  ;;  %v809_v8 = vld [vmem:[%s7574_s1 + $0x1850] sm:$0xff] }
 0x1a1   :  { %3152 = vmatprep.subr.bf16.mxu0 %v3151_v12  ;;  %v3555_v12 = vpack.c.bf16 %v774_v6, %v770_v5  ;;  %v814_v5 = vld [vmem:[%s7574_s1 + $0x1878] sm:$0xff] }
 0x1a2   :  { %3538 = vmatpush1.bf16.msra.mxu1 %v3537_v18  ;;  %v778_v18 = vld [vmem:[%s7574_s1 + $0x1758] sm:$0xff]  ;;  %v3575_v7 = vpack.c.bf16 %v814_v5, %v810_v14  ;;  %v845_v14 = vld [vmem:[%s7574_s1 + $0x1970] sm:$0xff]  ;;  %v2326_v5 = vld [vmem:[%s7576_s3 + $0xa8] sm:$0xff] }
 0x1a3   :  { %3540 = vmatprep.subr.bf16.mxu1 %v3539_v57  ;;  %v1032_v57 = vld [vmem:[%s7574_s1 + $0x1f48] sm:$0xff] }
 0x1a4   :  { %3154 = vmatpush1.bf16.msra.mxu0 %v3153_v19  ;;  %v782_v19 = vld [vmem:[%s7574_s1 + $0x1778] sm:$0xff]  ;;  %v3175_v29 = vpack.c.bf16 %v1036_v20, %v1032_v57  ;;  %v2310_v57 = vld [vmem:[%s7576_s3 + $0x28] sm:$0xff] }
 0x1a5   :  { %3156 = vmatprep.subr.bf16.mxu0 %v3155_v23  ;;  %v3559_v23 = vpack.c.bf16 %v782_v19, %v778_v18  ;;  %v2307_v19 = vld [vmem:[%s7576_s3 + $0x10] sm:$0xff]  ;;  %v2312_v20 = vld [vmem:[%s7576_s3 + $0x38] sm:$0xff] }
 0x1a6   :  { %3542 = vmatpush1.bf16.msra.mxu1 %v3541_v54  ;;  %v786_v54 = vld [vmem:[%s7574_s1 + $0x1798] sm:$0xff] }
 0x1a7   :  { %3544 = vmatprep.subr.bf16.mxu1 %v3543_v32  ;;  %v1040_v32 = vld [vmem:[%s7574_s1 + $0x1f88] sm:$0xff] }
 0x1a8   :  { %3158 = vmatpush1.bf16.msra.mxu0 %v3157_v31  ;;  %v790_v31 = vld [vmem:[%s7574_s1 + $0x17b8] sm:$0xff]  ;;  %v3179_v40 = vpack.c.bf16 %v1044_v34, %v1040_v32  ;;  %v825_v32 = vld [vmem:[%s7574_s1 + $0x18d0] sm:$0xff]  ;;  %v3707_v34 = vpack.c.bf16 %v2316_v30, %v2314_v28 }
 0x1a9   :  { %3160 = vmatprep.subr.bf16.mxu0 %v3159_v36  ;;  %v3563_v36 = vpack.c.bf16 %v790_v31, %v786_v54  ;;  %v3705_v54 = vpack.c.bf16 %v2311_v26, %v2309_v24  ;;  %v3581_v31 = vpack.c.bf16 %v821_v15, %v817_v13  ;;  %v2325_v15 = vld [vmem:[%s7576_s3 + $0xa0] sm:$0xff]  ;;  %v2331_v26 = vld [vmem:[%s7576_s3 + $0xd0] sm:$0xff]  ;;  %v2336_v30 = vld [vmem:[%s7576_s3 + $0xf8] sm:$0xff] }
 0x1aa   :  { %3546 = vmatpush1.bf16.msra.mxu1 %v3545_v45  ;;  %v794_v45 = vld [vmem:[%s7574_s1 + $0x17d8] sm:$0xff]  ;;  %v2329_v24 = vld [vmem:[%s7576_s3 + $0xc0] sm:$0xff] }
 0x1ab   :  { %3548 = vmatprep.subr.bf16.mxu1 %v3547_v38  ;;  %v1048_v38 = vld [vmem:[%s7574_s1 + $0x1fc8] sm:$0xff] }
 0x1ac   :  { %3162 = vmatpush1.bf16.msra.mxu0 %v3161_v46  ;;  %v798_v46 = vld [vmem:[%s7574_s1 + $0x17f8] sm:$0xff]  ;;  %v3183_v53 = vpack.c.bf16 %v1052_v27, %v1048_v38  ;;  %v833_v38 = vld [vmem:[%s7574_s1 + $0x1910] sm:$0xff]  ;;  %v3711_v27 = vpack.c.bf16 %v2320_v39, %v2318_v44 }
 0x1ad   :  { %3164 = vmatprep.subr.bf16.mxu0 %v3163_v51  ;;  %v3567_v51 = vpack.c.bf16 %v798_v46, %v794_v45  ;;  %v3585_v46 = vpack.c.bf16 %v829_v37, %v825_v32  ;;  %v3725_v32 = vpack.c.bf16 %v2331_v26, %v2329_v24  ;;  %v2335_v37 = vld [vmem:[%s7576_s3 + $0xf0] sm:$0xff] }
 0x1ae   :  { %3550 = vmatpush1.bf16.msra.mxu1 %v3549_v58  ;;  %v802_v58 = vld [vmem:[%s7574_s1 + $0x1818] sm:$0xff]  ;;  %v869_v39 = vld [vmem:[%s7574_s1 + $0x1a30] sm:$0xff] }
 0x1af   :  { %3552 = vmatprep.subr.bf16.mxu1 %v3551_v60  ;;  %v3569_v60 = vpack.c.bf16 %v797_v52, %v793_v11  ;;  %v2322_v11 = vld [vmem:[%s7576_s3 + $0x88] sm:$0xff]  ;;  %v2324_v52 = vld [vmem:[%s7576_s3 + $0x98] sm:$0xff]  ;;  %v897_v24 = vld [vmem:[%s7574_s1 + $0x1b10] sm:$0xff] }
 0x1b0   :  { %3166 = vmatpush1.bf16.msra.mxu0 %v3165_v59  ;;  %v806_v59 = vld [vmem:[%s7574_s1 + $0x1838] sm:$0xff] }
 0x1b1   :  { %3168 = vmatprep.subr.bf16.mxu0 %v3167_v4  ;;  %v3571_v0 = vpack.c.bf16 %v806_v59, %v802_v58  ;;  %v805_v4 = vld [vmem:[%s7574_s1 + $0x1830] sm:$0xff]  ;;  %v3589_v59 = vpack.c.bf16 %v837_v48, %v833_v38 }
 0x1b2   :  { %3554 = vmatpush1.bf16.msra.mxu1 %v3553_v25  ;;  %v3573_v6 = vpack.c.bf16 %v805_v4, %v801_v1  ;;  %v813_v25 = vld [vmem:[%s7574_s1 + $0x1870] sm:$0xff] }
 0x1b3   :  { %3556 = vmatprep.subr.bf16.mxu1 %v3555_v12  ;;  %v822_v12 = vld [vmem:[%s7574_s1 + $0x18b8] sm:$0xff]  ;;  %v3577_v17 = vpack.c.bf16 %v813_v25, %v809_v8  ;;  %v2323_v1 = vld [vmem:[%s7576_s3 + $0x90] sm:$0xff] }
 0x1b4   :  { %3170 = vmatpush1.bf16.msra.mxu0 %v3169_v9  ;;  %v818_v9 = vld [vmem:[%s7574_s1 + $0x1898] sm:$0xff]  ;;  %v2339_v48 = vld [vmem:[%s7576_s3 + $0x110] sm:$0xff] }
 0x1b5   :  { %3172 = vmatprep.subr.bf16.mxu0 %v3171_v16  ;;  %v2308_v16 = vld [vmem:[%s7576_s3 + $0x18] sm:$0xff] }
 0x1b6   :  { %3558 = vmatpush1.bf16.msra.mxu1 %v3557_v21  ;;  %v3699_v18 = vpack.c.bf16 %v2308_v16, %v2306_v3  ;;  %v3579_v21 = vpack.c.bf16 %v822_v12, %v818_v9  ;;  %v854_v8 = vld [vmem:[%s7574_s1 + $0x19b8] sm:$0xff]  ;;  %v849_v12 = vld [vmem:[%s7574_s1 + $0x1990] sm:$0xff] }
 0x1b7   :  { %3560 = vmatprep.subr.bf16.mxu1 %v3559_v23  ;;  %v3703_v23 = vpack.c.bf16 %v2312_v20, %v2310_v57  ;;  %v2327_v3 = vld [vmem:[%s7576_s3 + $0xb0] sm:$0xff]  ;;  %v862_v57 = vld [vmem:[%s7574_s1 + $0x19f8] sm:$0xff] }
 0x1b8   :  { %3174 = vmatpush1.bf16.msra.mxu0 %v3173_v22  ;;  %v3721_v20 = vpack.c.bf16 %v2327_v3, %v2325_v15  ;;  %v889_v15 = vld [vmem:[%s7574_s1 + $0x1ad0] sm:$0xff] }
 0x1b9   :  { %3176 = vmatprep.subr.bf16.mxu0 %v3175_v29  ;;  %v826_v29 = vld [vmem:[%s7574_s1 + $0x18d8] sm:$0xff] }
 0x1ba   :  { %3562 = vmatpush1.bf16.msra.mxu1 %v3561_v35  ;;  %v2313_v35 = vld [vmem:[%s7576_s3 + $0x40] sm:$0xff] }
 0x1bb   :  { %3564 = vmatprep.subr.bf16.mxu1 %v3563_v36 }
 0x1bc   :  { %3178 = vmatpush1.bf16.msra.mxu0 %v3177_v2  ;;  %v2315_v2 = vld [vmem:[%s7576_s3 + $0x50] sm:$0xff] }
 0x1bd   :  { %3180 = vmatprep.subr.bf16.mxu0 %v3179_v40  ;;  %v834_v40 = vld [vmem:[%s7574_s1 + $0x1918] sm:$0xff]  ;;  %v3709_v45 = vpack.c.bf16 %v2315_v2, %v2313_v35  ;;  %v865_v35 = vld [vmem:[%s7574_s1 + $0x1a10] sm:$0xff] }
 0x1be   :  { %3566 = vmatpush1.bf16.msra.mxu1 %v3565_v49  ;;  %v2317_v49 = vld [vmem:[%s7576_s3 + $0x60] sm:$0xff] }
 0x1bf   :  { %3568 = vmatprep.subr.bf16.mxu1 %v3567_v51  ;;  %v3587_v51 = vpack.c.bf16 %v838_v42, %v834_v40  ;;  %v2338_v40 = vld [vmem:[%s7576_s3 + $0x108] sm:$0xff]  ;;  %v2340_v42 = vld [vmem:[%s7576_s3 + $0x118] sm:$0xff] }
 0x1c0   :  { %3182 = vmatpush1.bf16.msra.mxu0 %v3181_v50  ;;  %v2319_v50 = vld [vmem:[%s7576_s3 + $0x70] sm:$0xff] }
 0x1c1   :  { %3184 = vmatprep.subr.bf16.mxu0 %v3183_v53  ;;  %v842_v53 = vld [vmem:[%s7574_s1 + $0x1958] sm:$0xff]  ;;  %v3713_v58 = vpack.c.bf16 %v2319_v50, %v2317_v49  ;;  %v873_v49 = vld [vmem:[%s7574_s1 + $0x1a50] sm:$0xff]  ;;  %v3731_v50 = vpack.c.bf16 %v2340_v42, %v2338_v40 }
 0x1c2   :  { %3570 = vmatpush1.bf16.msra.mxu1 %v3569_v60  ;;  %v841_v60 = vld [vmem:[%s7574_s1 + $0x1950] sm:$0xff]  ;;  %v3591_v4 = vpack.c.bf16 %v846_v55, %v842_v53  ;;  %v2342_v53 = vld [vmem:[%s7576_s3 + $0x128] sm:$0xff]  ;;  %v2344_v55 = vld [vmem:[%s7576_s3 + $0x138] sm:$0xff] }
 0x1c3   :  { %3572 = vmatprep.subr.bf16.mxu1 %v3571_v0  ;;  %v2321_v0 = vld [vmem:[%s7576_s3 + $0x80] sm:$0xff]  ;;  %v3593_v9 = vpack.c.bf16 %v845_v14, %v841_v60  ;;  %v2343_v14 = vld [vmem:[%s7576_s3 + $0x130] sm:$0xff] }
 0x1c4   :  { %3186 = vmatpush1.bf16.msra.mxu0 %v3185_v63  ;;  %v3715_v63 = vpack.c.bf16 %v2324_v52, %v2322_v11  ;;  %v3717_v25 = vpack.c.bf16 %v2323_v1, %v2321_v0  ;;  %v877_v52 = vld [vmem:[%s7574_s1 + $0x1a70] sm:$0xff]  ;;  %v3735_v1 = vpack.c.bf16 %v2344_v55, %v2342_v53 }
 0x1c5   :  { %2153 = vmatmul.mubr.f32.vlgmr.msra.gmra.mrb[2].mxu1 %v5579_v43  ;;  %v2305_v43 = vld [vmem:[%s7576_s3] sm:$0xff]  ;;  %3700 = vmatprep.subr.bf16.mxu0 %v3699_v18  ;;  %v2332_v18 = vld [vmem:[%s7576_s3 + $0xd8] sm:$0xff]  ;;  %v881_v0 = vld [vmem:[%s7574_s1 + $0x1a90] sm:$0xff] }
 0x1c6   :  { %3574 = vmatpush1.bf16.msra.mxu1 %v3573_v6  ;;  %2223 = vmatprep.mubr.f32.mxu1 %v6012_v41  ;;  %v3701_v22 = vpack.c.bf16 %v2307_v19, %v2305_v43  ;;  %v830_v41 = vld [vmem:[%s7574_s1 + $0x18f8] sm:$0xff]  ;;  %v853_v43 = vld [vmem:[%s7574_s1 + $0x19b0] sm:$0xff] }
 0x1c7   :  { %1727 = vmatmul.mubr.f32.vlgmr.msra.gmra.mrb[0].mxu0 %v6381_v47  ;;  %3576 = vmatprep.subr.bf16.mxu1 %v3575_v7  ;;  %v3583_v36 = vpack.c.bf16 %v830_v41, %v826_v29  ;;  %v2328_v6 = vld [vmem:[%s7576_s3 + $0xb8] sm:$0xff]  ;;  %v861_v29 = vld [vmem:[%s7574_s1 + $0x19f0] sm:$0xff]  ;;  %v2334_v41 = vld [vmem:[%s7576_s3 + $0xe8] sm:$0xff] }
 0x1c8   :  { %3702 = vmatpush1.bf16.msra.mxu0 %v3701_v22  ;;  %v850_v7 = vld [vmem:[%s7574_s1 + $0x1998] sm:$0xff]  ;;  %v3719_v13 = vpack.c.bf16 %v2328_v6, %v2326_v5  ;;  %v857_v22 = vld [vmem:[%s7574_s1 + $0x19d0] sm:$0xff]  ;;  %v3727_v2 = vpack.c.bf16 %v2336_v30, %v2334_v41 }
 0x1c9   :  { %3704 = vmatprep.subr.bf16.mxu0 %v3703_v23  ;;  %v3595_v16 = vpack.c.bf16 %v854_v8, %v850_v7  ;;  %v858_v19 = vld [vmem:[%s7574_s1 + $0x19d8] sm:$0xff]  ;;  %v885_v6 = vld [vmem:[%s7574_s1 + $0x1ab0] sm:$0xff]  ;;  %v2346_v7 = vld [vmem:[%s7576_s3 + $0x148] sm:$0xff] }
 0x1ca   :  { %3578 = vmatpush1.bf16.msra.mxu1 %v3577_v17  ;;  %v2330_v17 = vld [vmem:[%s7576_s3 + $0xc8] sm:$0xff]  ;;  %v3599_v28 = vpack.c.bf16 %v862_v57, %v858_v19  ;;  %v2348_v8 = vld [vmem:[%s7576_s3 + $0x158] sm:$0xff]  ;;  %v901_v30 = vld [vmem:[%s7574_s1 + $0x1b30] sm:$0xff] }
 0x1cb   :  { %3580 = vmatprep.subr.bf16.mxu1 %v3579_v21  ;;  %v3597_v21 = vpack.c.bf16 %v853_v43, %v849_v12  ;;  %v3723_v23 = vpack.c.bf16 %v2332_v18, %v2330_v17  ;;  %v3739_v3 = vpack.c.bf16 %v2348_v8, %v2346_v7  ;;  %v2347_v43 = vld [vmem:[%s7576_s3 + $0x150] sm:$0xff]  ;;  %v2350_v19 = vld [vmem:[%s7576_s3 + $0x168] sm:$0xff]  ;;  %v2352_v57 = vld [vmem:[%s7576_s3 + $0x178] sm:$0xff] }
 0x1cc   :  { %3706 = vmatpush1.bf16.msra.mxu0 %v3705_v54  ;;  %v866_v54 = vld [vmem:[%s7574_s1 + $0x1a18] sm:$0xff]  ;;  %v893_v18 = vld [vmem:[%s7574_s1 + $0x1af0] sm:$0xff]  ;;  %v3743_v26 = vpack.c.bf16 %v2352_v57, %v2350_v19 }
 0x1cd   :  { %3708 = vmatprep.subr.bf16.mxu0 %v3707_v34  ;;  %v3601_v34 = vpack.c.bf16 %v861_v29, %v857_v22  ;;  %v2351_v29 = vld [vmem:[%s7576_s3 + $0x170] sm:$0xff]  ;;  %v930_v7 = vld [vmem:[%s7574_s1 + $0x1c18] sm:$0xff] }
 0x1ce   :  { %3582 = vmatpush1.bf16.msra.mxu1 %v3581_v31  ;;  %v870_v31 = vld [vmem:[%s7574_s1 + $0x1a38] sm:$0xff]  ;;  %v909_v42 = vld [vmem:[%s7574_s1 + $0x1b70] sm:$0xff] }
 0x1cf   :  { %3584 = vmatprep.subr.bf16.mxu1 %v3583_v36  ;;  %v2333_v36 = vld [vmem:[%s7576_s3 + $0xe0] sm:$0xff]  ;;  %v3603_v44 = vpack.c.bf16 %v870_v31, %v866_v54  ;;  %v2354_v54 = vld [vmem:[%s7576_s3 + $0x188] sm:$0xff]  ;;  %v2356_v31 = vld [vmem:[%s7576_s3 + $0x198] sm:$0xff] }
 0x1d0   :  { %3710 = vmatpush1.bf16.msra.mxu0 %v3709_v45  ;;  %v874_v45 = vld [vmem:[%s7574_s1 + $0x1a58] sm:$0xff]  ;;  %v3729_v38 = vpack.c.bf16 %v2335_v37, %v2333_v36  ;;  %v905_v36 = vld [vmem:[%s7574_s1 + $0x1b50] sm:$0xff]  ;;  %v3747_v37 = vpack.c.bf16 %v2356_v31, %v2354_v54 }
 0x1d1   :  { %3712 = vmatprep.subr.bf16.mxu0 %v3711_v27  ;;  %v3605_v27 = vpack.c.bf16 %v869_v39, %v865_v35  ;;  %v2355_v39 = vld [vmem:[%s7576_s3 + $0x190] sm:$0xff]  ;;  %v934_v8 = vld [vmem:[%s7574_s1 + $0x1c38] sm:$0xff] }
 0x1d2   :  { %3586 = vmatpush1.bf16.msra.mxu1 %v3585_v46  ;;  %v878_v46 = vld [vmem:[%s7574_s1 + $0x1a78] sm:$0xff]  ;;  %v917_v55 = vld [vmem:[%s7574_s1 + $0x1bb0] sm:$0xff] }
 0x1d3   :  { %3588 = vmatprep.subr.bf16.mxu1 %v3587_v51  ;;  %v2337_v51 = vld [vmem:[%s7576_s3 + $0x100] sm:$0xff]  ;;  %v3607_v11 = vpack.c.bf16 %v878_v46, %v874_v45  ;;  %v2358_v45 = vld [vmem:[%s7576_s3 + $0x1a8] sm:$0xff]  ;;  %v2360_v46 = vld [vmem:[%s7576_s3 + $0x1b8] sm:$0xff] }
 0x1d4   :  { %3714 = vmatpush1.bf16.msra.mxu0 %v3713_v58  ;;  %v882_v58 = vld [vmem:[%s7574_s1 + $0x1a98] sm:$0xff]  ;;  %v3733_v60 = vpack.c.bf16 %v2339_v48, %v2337_v51  ;;  %v913_v51 = vld [vmem:[%s7574_s1 + $0x1b90] sm:$0xff]  ;;  %v3751_v48 = vpack.c.bf16 %v2360_v46, %v2358_v45  ;;  %v2361_v46 = vld [vmem:[%s7576_s3 + $0x1c0] sm:$0xff] }
 0x1d5   :  { %3716 = vmatprep.subr.bf16.mxu0 %v3715_v63  ;;  %v3609_v63 = vpack.c.bf16 %v877_v52, %v873_v49  ;;  %v2359_v52 = vld [vmem:[%s7576_s3 + $0x1b0] sm:$0xff]  ;;  %v946_v19 = vld [vmem:[%s7574_s1 + $0x1c98] sm:$0xff] }
 0x1d6   :  { %3590 = vmatpush1.bf16.msra.mxu1 %v3589_v59  ;;  %v886_v59 = vld [vmem:[%s7574_s1 + $0x1ab8] sm:$0xff] }
 0x1d7   :  { %3592 = vmatprep.subr.bf16.mxu1 %v3591_v4  ;;  %v2341_v4 = vld [vmem:[%s7576_s3 + $0x120] sm:$0xff]  ;;  %v3611_v5 = vpack.c.bf16 %v886_v59, %v882_v58  ;;  %v2362_v58 = vld [vmem:[%s7576_s3 + $0x1c8] sm:$0xff]  ;;  %v2364_v59 = vld [vmem:[%s7576_s3 + $0x1d8] sm:$0xff] }
 0x1d8   :  { %3718 = vmatpush1.bf16.msra.mxu0 %v3717_v25  ;;  %v890_v25 = vld [vmem:[%s7574_s1 + $0x1ad8] sm:$0xff]  ;;  %v3737_v12 = vpack.c.bf16 %v2343_v14, %v2341_v4  ;;  %v3755_v4 = vpack.c.bf16 %v2364_v59, %v2362_v58  ;;  %v2365_v59 = vld [vmem:[%s7576_s3 + $0x1e0] sm:$0xff] }
 0x1d9   :  { %3720 = vmatprep.subr.bf16.mxu0 %v3719_v13  ;;  %v3613_v13 = vpack.c.bf16 %v885_v6, %v881_v0  ;;  %v925_v6 = vld [vmem:[%s7574_s1 + $0x1bf0] sm:$0xff]  ;;  %v950_v57 = vld [vmem:[%s7574_s1 + $0x1cb8] sm:$0xff] }
 0x1da   :  { %3594 = vmatpush1.bf16.msra.mxu1 %v3593_v9  ;;  %v894_v9 = vld [vmem:[%s7574_s1 + $0x1af8] sm:$0xff] }
 0x1db   :  { %3596 = vmatprep.subr.bf16.mxu1 %v3595_v16  ;;  %v2345_v16 = vld [vmem:[%s7576_s3 + $0x140] sm:$0xff]  ;;  %v3615_v17 = vpack.c.bf16 %v894_v9, %v890_v25  ;;  %v3635_v9 = vpack.c.bf16 %v934_v8, %v930_v7  ;;  %v993_v8 = vld [vmem:[%s7574_s1 + $0x1e10] sm:$0xff] }
 0x1dc   :  { %3722 = vmatpush1.bf16.msra.mxu0 %v3721_v20  ;;  %v898_v20 = vld [vmem:[%s7574_s1 + $0x1b18] sm:$0xff]  ;;  %v3741_v22 = vpack.c.bf16 %v2347_v43, %v2345_v16 }
 0x1dd   :  { %3724 = vmatprep.subr.bf16.mxu0 %v3723_v23  ;;  %v3617_v23 = vpack.c.bf16 %v893_v18, %v889_v15  ;;  %v938_v15 = vld [vmem:[%s7574_s1 + $0x1c58] sm:$0xff]  ;;  %v941_v18 = vld [vmem:[%s7574_s1 + $0x1c70] sm:$0xff] }
 0x1de   :  { %3598 = vmatpush1.bf16.msra.mxu1 %v3597_v21  ;;  %v902_v21 = vld [vmem:[%s7574_s1 + $0x1b38] sm:$0xff] }
 0x1df   :  { %3600 = vmatprep.subr.bf16.mxu1 %v3599_v28  ;;  %v2349_v28 = vld [vmem:[%s7576_s3 + $0x160] sm:$0xff]  ;;  %v3619_v41 = vpack.c.bf16 %v902_v21, %v898_v20  ;;  %v3643_v21 = vpack.c.bf16 %v950_v57, %v946_v19  ;;  %v1010_v19 = vld [vmem:[%s7574_s1 + $0x1e98] sm:$0xff] }
 0x1e0   :  { %3726 = vmatpush1.bf16.msra.mxu0 %v3725_v32  ;;  %v906_v32 = vld [vmem:[%s7574_s1 + $0x1b58] sm:$0xff]  ;;  %v3745_v35 = vpack.c.bf16 %v2351_v29, %v2349_v28  ;;  %v953_v28 = vld [vmem:[%s7574_s1 + $0x1cd0] sm:$0xff] }
 0x1e1   :  { %3728 = vmatprep.subr.bf16.mxu0 %v3727_v2  ;;  %v3621_v2 = vpack.c.bf16 %v901_v30, %v897_v24  ;;  %v954_v24 = vld [vmem:[%s7574_s1 + $0x1cd8] sm:$0xff]  ;;  %v957_v29 = vld [vmem:[%s7574_s1 + $0x1cf0] sm:$0xff] }
 0x1e2   :  { %3602 = vmatpush1.bf16.msra.mxu1 %v3601_v34  ;;  %v910_v34 = vld [vmem:[%s7574_s1 + $0x1b78] sm:$0xff]  ;;  %v3649_v54 = vpack.c.bf16 %v957_v29, %v953_v28  ;;  %v1017_v28 = vld [vmem:[%s7574_s1 + $0x1ed0] sm:$0xff] }
 0x1e3   :  { %3604 = vmatprep.subr.bf16.mxu1 %v3603_v44  ;;  %v2353_v44 = vld [vmem:[%s7576_s3 + $0x180] sm:$0xff]  ;;  %v3623_v40 = vpack.c.bf16 %v910_v34, %v906_v32  ;;  %v966_v30 = vld [vmem:[%s7574_s1 + $0x1d38] sm:$0xff]  ;;  %v961_v32 = vld [vmem:[%s7574_s1 + $0x1d10] sm:$0xff] }
 0x1e4   :  { %3730 = vmatpush1.bf16.msra.mxu0 %v3729_v38  ;;  %v914_v38 = vld [vmem:[%s7574_s1 + $0x1b98] sm:$0xff]  ;;  %v3749_v49 = vpack.c.bf16 %v2355_v39, %v2353_v44  ;;  %v965_v34 = vld [vmem:[%s7574_s1 + $0x1d30] sm:$0xff] }
 0x1e5   :  { %3732 = vmatprep.subr.bf16.mxu0 %v3731_v50  ;;  %v3625_v50 = vpack.c.bf16 %v909_v42, %v905_v36  ;;  %v3653_v36 = vpack.c.bf16 %v965_v34, %v961_v32  ;;  %v969_v44 = vld [vmem:[%s7574_s1 + $0x1d50] sm:$0xff]  ;;  %v982_v42 = vld [vmem:[%s7574_s1 + $0x1db8] sm:$0xff] }
 0x1e6   :  { %3606 = vmatpush1.bf16.msra.mxu1 %v3605_v27  ;;  %v918_v27 = vld [vmem:[%s7574_s1 + $0x1bb8] sm:$0xff]  ;;  %v973_v39 = vld [vmem:[%s7574_s1 + $0x1d70] sm:$0xff] }
 0x1e7   :  { %3608 = vmatprep.subr.bf16.mxu1 %v3607_v11  ;;  %v2357_v11 = vld [vmem:[%s7576_s3 + $0x1a0] sm:$0xff]  ;;  %v3627_v53 = vpack.c.bf16 %v918_v27, %v914_v38  ;;  %v3657_v45 = vpack.c.bf16 %v973_v39, %v969_v44  ;;  %v2363_v38 = vld [vmem:[%s7576_s3 + $0x1d0] sm:$0xff]  ;;  %v1014_v57 = vld [vmem:[%s7574_s1 + $0x1eb8] sm:$0xff] }
 0x1e8   :  { %3734 = vmatpush1.bf16.msra.mxu0 %v3733_v60  ;;  %v922_v60 = vld [vmem:[%s7574_s1 + $0x1bd8] sm:$0xff]  ;;  %v3753_v0 = vpack.c.bf16 %v2359_v52, %v2357_v11  ;;  %v2366_v52 = vld [vmem:[%s7576_s3 + $0x1e8] sm:$0xff]  ;;  %v1021_v29 = vld [vmem:[%s7574_s1 + $0x1ef0] sm:$0xff] }
 0x1e9   :  { %3736 = vmatprep.subr.bf16.mxu0 %v3735_v1  ;;  %v3629_v1 = vpack.c.bf16 %v917_v55, %v913_v51  ;;  %v3757_v51 = vpack.c.bf16 %v2363_v38, %v2361_v46  ;;  %v990_v11 = vld [vmem:[%s7574_s1 + $0x1df8] sm:$0xff]  ;;  %v1025_v32 = vld [vmem:[%s7574_s1 + $0x1f10] sm:$0xff] }
 0x1ea   :  { %3610 = vmatpush1.bf16.msra.mxu1 %v3609_v63  ;;  %v926_v63 = vld [vmem:[%s7574_s1 + $0x1bf8] sm:$0xff]  ;;  %v1029_v34 = vld [vmem:[%s7574_s1 + $0x1f30] sm:$0xff] }
 0x1eb   :  { %3612 = vmatprep.subr.bf16.mxu1 %v3611_v5  ;;  %v3631_v14 = vpack.c.bf16 %v926_v63, %v922_v60  ;;  %v921_v5 = vld [vmem:[%s7574_s1 + $0x1bd0] sm:$0xff] }
 0x1ec   :  { %3738 = vmatpush1.bf16.msra.mxu0 %v3737_v12  ;;  %v3633_v25 = vpack.c.bf16 %v925_v6, %v921_v5  ;;  %v929_v12 = vld [vmem:[%s7574_s1 + $0x1c10] sm:$0xff]  ;;  %v998_v5 = vld [vmem:[%s7574_s1 + $0x1e38] sm:$0xff] }
 0x1ed   :  { %3740 = vmatprep.subr.bf16.mxu0 %v3739_v3  ;;  %v942_v3 = vld [vmem:[%s7574_s1 + $0x1c78] sm:$0xff]  ;;  %v2367_v60 = vld [vmem:[%s7576_s3 + $0x1f0] sm:$0xff] }
 0x1ee   :  { %3614 = vmatpush1.bf16.msra.mxu1 %v3613_v13  ;;  %v933_v13 = vld [vmem:[%s7574_s1 + $0x1c30] sm:$0xff]  ;;  %v3639_v43 = vpack.c.bf16 %v942_v3, %v938_v15  ;;  %v2372_v15 = vld [vmem:[%s7576_s3 + $0x218] sm:$0xff] }
 0x1ef   :  { %3616 = vmatprep.subr.bf16.mxu1 %v3615_v17  ;;  %v3637_v16 = vpack.c.bf16 %v933_v13, %v929_v12  ;;  %v937_v17 = vld [vmem:[%s7574_s1 + $0x1c50] sm:$0xff]  ;;  %v1006_v12 = vld [vmem:[%s7574_s1 + $0x1e78] sm:$0xff]  ;;  %v2370_v13 = vld [vmem:[%s7576_s3 + $0x208] sm:$0xff] }
 0x1f0   :  { %3742 = vmatpush1.bf16.msra.mxu0 %v3741_v22  ;;  %v3641_v20 = vpack.c.bf16 %v941_v18, %v937_v17  ;;  %v945_v22 = vld [vmem:[%s7574_s1 + $0x1c90] sm:$0xff]  ;;  %v3763_v3 = vpack.c.bf16 %v2372_v15, %v2370_v13  ;;  %v2373_v13 = vld [vmem:[%s7576_s3 + $0x220] sm:$0xff] }
 0x1f1   :  { %3744 = vmatprep.subr.bf16.mxu0 %v3743_v26  ;;  %v1001_v17 = vld [vmem:[%s7574_s1 + $0x1e50] sm:$0xff] }
 0x1f2   :  { %3618 = vmatpush1.bf16.msra.mxu1 %v3617_v23  ;;  %v949_v23 = vld [vmem:[%s7574_s1 + $0x1cb0] sm:$0xff] }
 0x1f3   :  { %3620 = vmatprep.subr.bf16.mxu1 %v3619_v41  ;;  %v962_v41 = vld [vmem:[%s7574_s1 + $0x1d18] sm:$0xff]  ;;  %v1005_v18 = vld [vmem:[%s7574_s1 + $0x1e70] sm:$0xff] }
 0x1f4   :  { %3746 = vmatpush1.bf16.msra.mxu0 %v3745_v35  ;;  %v3651_v31 = vpack.c.bf16 %v966_v30, %v962_v41  ;;  %v970_v35 = vld [vmem:[%s7574_s1 + $0x1d58] sm:$0xff]  ;;  %v1033_v44 = vld [vmem:[%s7574_s1 + $0x1f50] sm:$0xff] }
 0x1f5   :  { %3748 = vmatprep.subr.bf16.mxu0 %v3747_v37  ;;  %v1026_v41 = vld [vmem:[%s7574_s1 + $0x1f18] sm:$0xff]  ;;  %v1037_v39 = vld [vmem:[%s7574_s1 + $0x1f70] sm:$0xff] }
 0x1f6   :  { %3622 = vmatpush1.bf16.msra.mxu1 %v3621_v2  ;;  %v974_v2 = vld [vmem:[%s7574_s1 + $0x1d78] sm:$0xff]  ;;  %v1041_v38 = vld [vmem:[%s7574_s1 + $0x1f90] sm:$0xff] }
 0x1f7   :  { %3624 = vmatprep.subr.bf16.mxu1 %v3623_v40  ;;  %v3655_v37 = vpack.c.bf16 %v974_v2, %v970_v35  ;;  %v978_v40 = vld [vmem:[%s7574_s1 + $0x1d98] sm:$0xff]  ;;  %v2375_v15 = vld [vmem:[%s7576_s3 + $0x230] sm:$0xff] }
 0x1f8   :  { %3750 = vmatpush1.bf16.msra.mxu0 %v3749_v49  ;;  %v3659_v27 = vpack.c.bf16 %v982_v42, %v978_v40  ;;  %v977_v49 = vld [vmem:[%s7574_s1 + $0x1d90] sm:$0xff]  ;;  %v1030_v30 = vld [vmem:[%s7574_s1 + $0x1f38] sm:$0xff] }
 0x1f9   :  { %3752 = vmatprep.subr.bf16.mxu0 %v3751_v48  ;;  %v986_v48 = vld [vmem:[%s7574_s1 + $0x1dd8] sm:$0xff] }
 0x1fa   :  { %3626 = vmatpush1.bf16.msra.mxu1 %v3625_v50  ;;  %v981_v50 = vld [vmem:[%s7574_s1 + $0x1db0] sm:$0xff]  ;;  %v3663_v63 = vpack.c.bf16 %v990_v11, %v986_v48  ;;  %v1034_v35 = vld [vmem:[%s7574_s1 + $0x1f58] sm:$0xff] }
 0x1fb   :  { %3628 = vmatprep.subr.bf16.mxu1 %v3627_v53  ;;  %v2368_v53 = vld [vmem:[%s7576_s3 + $0x1f8] sm:$0xff]  ;;  %v3661_v55 = vpack.c.bf16 %v981_v50, %v977_v49  ;;  %v1049_v11 = vld [vmem:[%s7574_s1 + $0x1fd0] sm:$0xff] }
 0x1fc   :  { %3754 = vmatpush1.bf16.msra.mxu0 %v3753_v0  ;;  %v3759_v58 = vpack.c.bf16 %v2368_v53, %v2366_v52  ;;  %v985_v0 = vld [vmem:[%s7574_s1 + $0x1dd0] sm:$0xff]  ;;  %v1038_v2 = vld [vmem:[%s7574_s1 + $0x1f78] sm:$0xff] }
 0x1fd   :  { %3756 = vmatprep.subr.bf16.mxu0 %v3755_v4  ;;  %v3761_v4 = vpack.c.bf16 %v2367_v60, %v2365_v59  ;;  %v1042_v40 = vld [vmem:[%s7574_s1 + $0x1f98] sm:$0xff]  ;;  %v1053_v52 = vld [vmem:[%s7574_s1 + $0x1ff0] sm:$0xff]  ;;  %v7342_v59 = vsub.s32 1, %v4191_v61 }
 0x1fe   :  { %3630 = vmatpush1.bf16.msra.mxu1 %v3629_v1  ;;  %v989_v1 = vld [vmem:[%s7574_s1 + $0x1df0] sm:$0xff]  ;;  %v1046_v42 = vld [vmem:[%s7574_s1 + $0x1fb8] sm:$0xff]  ;;  %v3697_v53 = vpack.c.bf16 %v1053_v52, %v1049_v11  ;;  %v2401_v52 = vld [vmem:[%s7576_s3 + $0x300] sm:$0xff] }
 0x1ff   :  { %3632 = vmatprep.subr.bf16.mxu1 %v3631_v14  ;;  %v994_v14 = vld [vmem:[%s7574_s1 + $0x1e18] sm:$0xff]  ;;  %v3665_v6 = vpack.c.bf16 %v989_v1, %v985_v0  ;;  %v3691_v46 = vpack.c.bf16 %v1046_v42, %v1042_v40  ;;  %v2395_v40 = vld [vmem:[%s7576_s3 + $0x2d0] sm:$0xff]  ;;  %v2398_v42 = vld [vmem:[%s7576_s3 + $0x2e8] sm:$0xff] }
 0x200   :  { %3758 = vmatpush1.bf16.msra.mxu0 %v3757_v51  ;;  %v3667_v7 = vpack.c.bf16 %v998_v5, %v994_v14  ;;  %v1050_v49 = vld [vmem:[%s7574_s1 + $0x1fd8] sm:$0xff]  ;;  %v2369_v5 = vld [vmem:[%s7576_s3 + $0x200] sm:$0xff] }
 0x201   :  { %3760 = vmatprep.subr.bf16.mxu0 %v3759_v58  ;;  %v1054_v50 = vld [vmem:[%s7574_s1 + $0x1ff8] sm:$0xff]  ;;  %v7339_v58 = vld [vmem:[%s7575_s2] sm:$0xf] }
 0x202   :  { %3634 = vmatpush1.bf16.msra.mxu1 %v3633_v25  ;;  %v997_v25 = vld [vmem:[%s7574_s1 + $0x1e30] sm:$0xff]  ;;  %v3695_v48 = vpack.c.bf16 %v1054_v50, %v1050_v49  ;;  %v2402_v50 = vld [vmem:[%s7576_s3 + $0x308] sm:$0xff] }
 0x203   :  { %3636 = vmatprep.subr.bf16.mxu1 %v3635_v9  ;;  %v1002_v9 = vld [vmem:[%s7574_s1 + $0x1e58] sm:$0xff]  ;;  %v2399_v49 = vld [vmem:[%s7576_s3 + $0x2f0] sm:$0xff] }
 0x204   :  { %3762 = vmatpush1.bf16.msra.mxu0 %v3761_v4 }
 0x205   :  { %2224 = vmatmul.mubr.f32.vlgmr.msra.gmra.mrb[2].mxu1 %v5984_v10  ;;  %v958_v10 = vld [vmem:[%s7574_s1 + $0x1cf8] sm:$0xff]  ;;  %3764 = vmatprep.subr.bf16.mxu0 %v3763_v3  ;;  %v2378_v3 = vld [vmem:[%s7576_s3 + $0x248] sm:$0xff] }
 0x206   :  { %3638 = vmatpush1.bf16.msra.mxu1 %v3637_v16  ;;  %2294 = vmatprep.mubr.f32.mxu1 %v6409_v33  ;;  %v3645_v33 = vpack.c.bf16 %v949_v23, %v945_v22  ;;  %v3647_v26 = vpack.c.bf16 %v958_v10, %v954_v24  ;;  %v3669_v16 = vpack.c.bf16 %v997_v25, %v993_v8  ;;  %v1009_v22 = vld [vmem:[%s7574_s1 + $0x1e90] sm:$0xff]  ;;  %v1018_v24 = vld [vmem:[%s7574_s1 + $0x1ed8] sm:$0xff]  ;;  %v2374_v8 = vld [vmem:[%s7576_s3 + $0x228] sm:$0xff] }
 0x207   :  { %3640 = vmatprep.subr.bf16.mxu1 %v3639_v43  ;;  %v3671_v43 = vpack.c.bf16 %v1006_v12, %v1002_v9  ;;  %v1013_v23 = vld [vmem:[%s7574_s1 + $0x1eb0] sm:$0xff]  ;;  %v1022_v10 = vld [vmem:[%s7574_s1 + $0x1ef8] sm:$0xff] }
 0x20a   :  { %3642 = vmatpush1.bf16.msra.mxu1 %v3641_v20  ;;  %v3673_v20 = vpack.c.bf16 %v1005_v18, %v1001_v17  ;;  %v2377_v18 = vld [vmem:[%s7576_s3 + $0x240] sm:$0xff] }
 0x20b   :  { %3644 = vmatprep.subr.bf16.mxu1 %v3643_v21  ;;  %v3675_v21 = vpack.c.bf16 %v1014_v57, %v1010_v19  ;;  %v2379_v19 = vld [vmem:[%s7576_s3 + $0x250] sm:$0xff]  ;;  %v2382_v57 = vld [vmem:[%s7576_s3 + $0x268] sm:$0xff] }
 0x20e   :  { %3646 = vmatpush1.bf16.msra.mxu1 %v3645_v33  ;;  %v3677_v33 = vpack.c.bf16 %v1013_v23, %v1009_v22  ;;  %v2381_v23 = vld [vmem:[%s7576_s3 + $0x260] sm:$0xff] }
 0x20f   :  { %3648 = vmatprep.subr.bf16.mxu1 %v3647_v26  ;;  %v3679_v26 = vpack.c.bf16 %v1022_v10, %v1018_v24  ;;  %v2383_v24 = vld [vmem:[%s7576_s3 + $0x270] sm:$0xff]  ;;  %v2386_v10 = vld [vmem:[%s7576_s3 + $0x288] sm:$0xff] }
 0x212   :  { %3650 = vmatpush1.bf16.msra.mxu1 %v3649_v54  ;;  %v3681_v54 = vpack.c.bf16 %v1021_v29, %v1017_v28  ;;  %v2385_v29 = vld [vmem:[%s7576_s3 + $0x280] sm:$0xff] }
 0x213   :  { %3652 = vmatprep.subr.bf16.mxu1 %v3651_v31  ;;  %v3683_v31 = vpack.c.bf16 %v1030_v30, %v1026_v41  ;;  %v2387_v41 = vld [vmem:[%s7576_s3 + $0x290] sm:$0xff]  ;;  %v2390_v30 = vld [vmem:[%s7576_s3 + $0x2a8] sm:$0xff] }
 0x216   :  { %3654 = vmatpush1.bf16.msra.mxu1 %v3653_v36  ;;  %v3685_v36 = vpack.c.bf16 %v1029_v34, %v1025_v32  ;;  %v2389_v34 = vld [vmem:[%s7576_s3 + $0x2a0] sm:$0xff] }
 0x217   :  { %3656 = vmatprep.subr.bf16.mxu1 %v3655_v37  ;;  %v3687_v37 = vpack.c.bf16 %v1038_v2, %v1034_v35  ;;  %v2391_v35 = vld [vmem:[%s7576_s3 + $0x2b0] sm:$0xff]  ;;  %v2394_v2 = vld [vmem:[%s7576_s3 + $0x2c8] sm:$0xff] }
 0x21a   :  { %3658 = vmatpush1.bf16.msra.mxu1 %v3657_v45  ;;  %v3689_v45 = vpack.c.bf16 %v1037_v39, %v1033_v44  ;;  %v2393_v39 = vld [vmem:[%s7576_s3 + $0x2c0] sm:$0xff] }
 0x21b   :  { %3660 = vmatprep.subr.bf16.mxu1 %v3659_v27  ;;  %v1045_v27 = vld [vmem:[%s7574_s1 + $0x1fb0] sm:$0xff] }
 0x21c   :  { %v3693_v51 = vpack.c.bf16 %v1045_v27, %v1041_v38  ;;  %v2397_v27 = vld [vmem:[%s7576_s3 + $0x2e0] sm:$0xff] }
 0x21e   :  { %3662 = vmatpush1.bf16.msra.mxu1 %v3661_v55  ;;  %v7334_v55 = vsub.s32 0, %v4191_v61 }
 0x21f   :  { %3664 = vmatprep.subr.bf16.mxu1 %v3663_v63  ;;  %v1064_v63 = vrot.slane %v7339_v58, %v7342_v59 }
 0x220   :  { %v1060_v60 = vrot.slane %v7339_v58, %v7334_v55 }
 0x222   :  { %3666 = vmatpush1.bf16.msra.mxu1 %v3665_v6  ;;  %v1232_v0 = vadd.f32 %v5724_v56, %v1060_v60  ;;  %v2371_v6 = vld [vmem:[%s7576_s3 + $0x210] sm:$0xff]  ;;  %v2376_v56 = vld [vmem:[%s7576_s3 + $0x238] sm:$0xff]  ;;  %v2406_v60 = vld [vmem:[%s7576_s3 + $0x328] sm:$0xff] }
 0x223   :  { %3668 = vmatprep.subr.bf16.mxu1 %v3667_v7  ;;  %v3765_v25 = vpack.c.bf16 %v2371_v6, %v2369_v5  ;;  %v3767_v12 = vpack.c.bf16 %v2376_v56, %v2374_v8  ;;  %v2412_v5 = vld [vmem:[%s7576_s3 + $0x358] sm:$0xff]  ;;  %v2409_v8 = vld [vmem:[%s7576_s3 + $0x340] sm:$0xff]  ;;  %v2411_v56 = vld [vmem:[%s7576_s3 + $0x350] sm:$0xff] }
 0x226   :  { %3670 = vmatpush1.bf16.msra.mxu1 %v3669_v16  ;;  %v2380_v16 = vld [vmem:[%s7576_s3 + $0x258] sm:$0xff] }
 0x227   :  { %3672 = vmatprep.subr.bf16.mxu1 %v3671_v43  ;;  %v3769_v43 = vpack.c.bf16 %v2375_v15, %v2373_v13  ;;  %v3771_v17 = vpack.c.bf16 %v2380_v16, %v2378_v3  ;;  %v2413_v13 = vld [vmem:[%s7576_s3 + $0x360] sm:$0xff]  ;;  %v2415_v15 = vld [vmem:[%s7576_s3 + $0x370] sm:$0xff]  ;;  %v2418_v3 = vld [vmem:[%s7576_s3 + $0x388] sm:$0xff] }
 0x228   :  { %v2420_v16 = vld [vmem:[%s7576_s3 + $0x398] sm:$0xff] }
 0x22a   :  { %3674 = vmatpush1.bf16.msra.mxu1 %v3673_v20  ;;  %v2384_v20 = vld [vmem:[%s7576_s3 + $0x278] sm:$0xff] }
 0x22b   :  { %3676 = vmatprep.subr.bf16.mxu1 %v3675_v21  ;;  %v3773_v21 = vpack.c.bf16 %v2379_v19, %v2377_v18  ;;  %v3775_v22 = vpack.c.bf16 %v2384_v20, %v2382_v57  ;;  %v2417_v18 = vld [vmem:[%s7576_s3 + $0x380] sm:$0xff]  ;;  %v2419_v19 = vld [vmem:[%s7576_s3 + $0x390] sm:$0xff]  ;;  %v2422_v57 = vld [vmem:[%s7576_s3 + $0x3a8] sm:$0xff] }
 0x22c   :  { %v2424_v20 = vld [vmem:[%s7576_s3 + $0x3b8] sm:$0xff] }
 0x22e   :  { %3678 = vmatpush1.bf16.msra.mxu1 %v3677_v33  ;;  %v2388_v33 = vld [vmem:[%s7576_s3 + $0x298] sm:$0xff] }
 0x22f   :  { %3680 = vmatprep.subr.bf16.mxu1 %v3679_v26  ;;  %v3777_v26 = vpack.c.bf16 %v2383_v24, %v2381_v23  ;;  %v3779_v28 = vpack.c.bf16 %v2388_v33, %v2386_v10  ;;  %v2421_v23 = vld [vmem:[%s7576_s3 + $0x3a0] sm:$0xff]  ;;  %v2423_v24 = vld [vmem:[%s7576_s3 + $0x3b0] sm:$0xff]  ;;  %v2426_v10 = vld [vmem:[%s7576_s3 + $0x3c8] sm:$0xff] }
 0x230   :  { %v2428_v33 = vld [vmem:[%s7576_s3 + $0x3d8] sm:$0xff] }
 0x232   :  { %3682 = vmatpush1.bf16.msra.mxu1 %v3681_v54  ;;  %v2392_v54 = vld [vmem:[%s7576_s3 + $0x2b8] sm:$0xff] }
 0x233   :  { %3684 = vmatprep.subr.bf16.mxu1 %v3683_v31  ;;  %v3781_v31 = vpack.c.bf16 %v2387_v41, %v2385_v29  ;;  %v3783_v32 = vpack.c.bf16 %v2392_v54, %v2390_v30  ;;  %v2425_v29 = vld [vmem:[%s7576_s3 + $0x3c0] sm:$0xff]  ;;  %v2427_v41 = vld [vmem:[%s7576_s3 + $0x3d0] sm:$0xff]  ;;  %v2430_v30 = vld [vmem:[%s7576_s3 + $0x3e8] sm:$0xff] }
 0x234   :  { %v2432_v54 = vld [vmem:[%s7576_s3 + $0x3f8] sm:$0xff] }
 0x236   :  { %3686 = vmatpush1.bf16.msra.mxu1 %v3685_v36  ;;  %v2396_v36 = vld [vmem:[%s7576_s3 + $0x2d8] sm:$0xff] }
 0x237   :  { %3688 = vmatprep.subr.bf16.mxu1 %v3687_v37  ;;  %v3785_v37 = vpack.c.bf16 %v2391_v35, %v2389_v34  ;;  %v3787_v44 = vpack.c.bf16 %v2396_v36, %v2394_v2  ;;  %v2429_v34 = vld [vmem:[%s7576_s3 + $0x3e0] sm:$0xff]  ;;  %v2431_v35 = vld [vmem:[%s7576_s3 + $0x3f0] sm:$0xff]  ;;  %v1067_v36 = vsub.s32 2, %v4191_v61 }
 0x238   :  { %v3825_v2 = vpack.c.bf16 %v2431_v35, %v2429_v34 }
 0x23a   :  { %3690 = vmatpush1.bf16.msra.mxu1 %v3689_v45  ;;  %v2400_v45 = vld [vmem:[%s7576_s3 + $0x2f8] sm:$0xff] }
 0x23b   :  { %3692 = vmatprep.subr.bf16.mxu1 %v3691_v46  ;;  %v3789_v46 = vpack.c.bf16 %v2395_v40, %v2393_v39  ;;  %v3791_v38 = vpack.c.bf16 %v2400_v45, %v2398_v42 }
 0x23e   :  { %3694 = vmatpush1.bf16.msra.mxu1 %v3693_v51  ;;  %v2404_v51 = vld [vmem:[%s7576_s3 + $0x318] sm:$0xff] }
 0x23f   :  { %3696 = vmatprep.subr.bf16.mxu1 %v3695_v48  ;;  %v3793_v48 = vpack.c.bf16 %v2399_v49, %v2397_v27  ;;  %v3795_v11 = vpack.c.bf16 %v2404_v51, %v2402_v50  ;;  %v2433_v49 = vld [vmem:[%s7577_s4] sm:$0x3] }
 0x240   :  { %v2438_v50 = vrot.slane %v2433_v49, %v7334_v55 }
 0x242   :  { %3698 = vmatpush1.bf16.msra.mxu1 %v3697_v53  ;;  %v2403_v53 = vld [vmem:[%s7576_s3 + $0x310] sm:$0xff] }
 0x245   :  { %2295 = vmatmul.mubr.f32.vlgmr.msra.gmra.mrb[2].mxu1 %v6381_v47  ;;  %v1234_v47 = vadd.f32 %v5735_v62, %v1064_v63  ;;  %v2408_v63 = vld [vmem:[%s7576_s3 + $0x338] sm:$0xff] }
 0x29a   :  { %v1728_v1 = vpop.f32.mrb[0].mxu0 }
 0x29b   :  { %v3828_v4 = vadd.f32 %v1728_v1, %v1232_v0  ;;  %v1730_v14 = vpop.f32.mrb[1].mxu0  ;;  %v3797_v0 = vpack.c.bf16 %v2403_v53, %v2401_v52  ;;  %v2405_v1 = vld [vmem:[%s7576_s3 + $0x320] sm:$0xff] }
 0x29c   :  { %v3830_v7 = vadd.f32 %v1730_v14, %v1234_v47  ;;  %v3799_v47 = vpack.c.bf16 %v2408_v63, %v2406_v60  ;;  %v2410_v14 = vld [vmem:[%s7576_s3 + $0x348] sm:$0xff] }
 0x29d   :  { %v2301_v9 = vmax.f32 %v3828_v4, 0.0  ;;  %v2407_v4 = vld [vmem:[%s7576_s3 + $0x330] sm:$0xff] }
 0x29e   :  { %v2302_v62 = vmax.f32 %v3830_v7, 0.0  ;;  %v3801_v6 = vpack.c.bf16 %v2407_v4, %v2405_v1  ;;  %v3803_v7 = vpack.c.bf16 %v2412_v5, %v2410_v14 }
 0x2a0   :  { %2509 = vmatprep.mubr.f32.mxu0 %v2302_v62  ;;  %v2414_v62 = vld [vmem:[%s7576_s3 + $0x368] sm:$0xff] }
 0x2a1   :  { %2510 = vmatmul.mubr.f32.vlgmr.msra.gmra.mrb[2].mxu0 %v2301_v9  ;;  %v3805_v9 = vpack.c.bf16 %v2411_v56, %v2409_v8 }
 0x2a2   :  { %3766 = vmatpush1.bf16.msra.mxu0 %v3765_v25  ;;  %v2416_v25 = vld [vmem:[%s7576_s3 + $0x378] sm:$0xff] }
 0x2a3   :  { %3768 = vmatprep.subr.bf16.mxu0 %v3767_v12  ;;  %v3807_v12 = vpack.c.bf16 %v2416_v25, %v2414_v62 }
 0x2a6   :  { %3770 = vmatpush1.bf16.msra.mxu0 %v3769_v43  ;;  %v3809_v43 = vpack.c.bf16 %v2415_v15, %v2413_v13 }
 0x2a7   :  { %3772 = vmatprep.subr.bf16.mxu0 %v3771_v17  ;;  %v3811_v17 = vpack.c.bf16 %v2420_v16, %v2418_v3 }
 0x2aa   :  { %3774 = vmatpush1.bf16.msra.mxu0 %v3773_v21  ;;  %v3813_v21 = vpack.c.bf16 %v2419_v19, %v2417_v18  ;;  %v2620_v19 = vld [vmem:[%s7578_s5] sm:$0x3]  ;;  %s3873_s5 = scalar_lea.vmem %s2667_s14, 64 }
 0x2ab   :  { %3776 = vmatprep.subr.bf16.mxu0 %v3775_v22  ;;  %v3815_v22 = vpack.c.bf16 %v2424_v20, %v2422_v57  ;;  %v2634_v57 = vld [vmem:[%s7579_s6] sm:$0x3]  ;;  %v2625_v20 = vrot.slane %v2620_v19, %v7334_v55  ;;  %p3874_p0 = scmp.ne.s32.totalorder %s2667_s14, %s3873_s5  ;;  %p3879_p2 = scmp.lt.s32.totalorder %s3873_s5, %s3873_s5 }
 0x2ad   :  { %p3880_p3 = por %p3879_p2, %p3878_p1 }
 0x2ae   :  { %3778 = vmatpush1.bf16.msra.mxu0 %v3777_v26  ;;  %v3817_v26 = vpack.c.bf16 %v2423_v24, %v2421_v23 }
 0x2af   :  { %3780 = vmatprep.subr.bf16.mxu0 %v3779_v28  ;;  %v3819_v28 = vpack.c.bf16 %v2428_v33, %v2426_v10  ;;  %v2639_v10 = vrot.slane %v2634_v57, %v7334_v55  ;;  %v2643_v33 = vrot.slane %v2634_v57, %v7342_v59  ;;  %p3881_p4 = pnand %p3880_p3, %p3874_p0 }
 0x2b2   :  { %3782 = vmatpush1.bf16.msra.mxu0 %v3781_v31  ;;  %v3821_v31 = vpack.c.bf16 %v2427_v41, %v2425_v29 }
 0x2b3   :  { %3784 = vmatprep.subr.bf16.mxu0 %v3783_v32  ;;  %v3823_v32 = vpack.c.bf16 %v2432_v54, %v2430_v30 }
 0x2b6   :  { %3786 = vmatpush1.bf16.msra.mxu0 %v3785_v37  ;;  %v1071_v37 = vsub.s32 3, %v4191_v61  ;;  %v2442_v61 = vrot.slane %v2433_v49, %v7342_v59 }
 0x2b7   :  { %3788 = vmatprep.subr.bf16.mxu0 %v3787_v44  ;;  %v1068_v44 = vrot.slane %v7339_v58, %v1067_v36 }
 0x2b8   :  { %v1072_v39 = vrot.slane %v7339_v58, %v1071_v37 }
 0x2ba   :  { %3790 = vmatpush1.bf16.msra.mxu0 %v3789_v46 }
 0x2bb   :  { %3792 = vmatprep.subr.bf16.mxu0 %v3791_v38 }
 0x2be   :  { %3794 = vmatpush1.bf16.msra.mxu0 %v3793_v48 }
 0x2bf   :  { %3796 = vmatprep.subr.bf16.mxu0 %v3795_v11 }
 0x2c2   :  { %3798 = vmatpush1.bf16.msra.mxu0 %v3797_v0 }
 0x2c3   :  { %3800 = vmatprep.subr.bf16.mxu0 %v3799_v47 }
 0x2c6   :  { %3802 = vmatpush1.bf16.msra.mxu0 %v3801_v6 }
 0x2c7   :  { %3804 = vmatprep.subr.bf16.mxu0 %v3803_v7 }
 0x2ca   :  { %3806 = vmatpush1.bf16.msra.mxu0 %v3805_v9 }
 0x2cb   :  { %3808 = vmatprep.subr.bf16.mxu0 %v3807_v12 }
 0x2ce   :  { %3810 = vmatpush1.bf16.msra.mxu0 %v3809_v43 }
 0x2cf   :  { %3812 = vmatprep.subr.bf16.mxu0 %v3811_v17 }
 0x2d2   :  { %3814 = vmatpush1.bf16.msra.mxu0 %v3813_v21  ;;  %v2629_v21 = vrot.slane %v2620_v19, %v7342_v59 }
 0x2d3   :  { %3816 = vmatprep.subr.bf16.mxu0 %v3815_v22 }
 0x2d6   :  { %3818 = vmatpush1.bf16.msra.mxu0 %v3817_v26 }
 0x2d7   :  { %3820 = vmatprep.subr.bf16.mxu0 %v3819_v28 }
 0x2da   :  { %3822 = vmatpush1.bf16.msra.mxu0 %v3821_v31 }
 0x2db   :  { %3824 = vmatprep.subr.bf16.mxu0 %v3823_v32 }
 0x2de   :  { %3826 = vmatpush1.bf16.msra.mxu0 %v3825_v2 }
 0x318   :  { %v2296_v40 = vpop.f32.mrb[2].mxu1 }
 0x319   :  { %v3831_v42 = vadd.f32 %v2296_v40, %v1068_v44  ;;  %v2298_v45 = vpop.f32.mrb[3].mxu1 }
 0x31a   :  { %v3832_v46 = vadd.f32 %v2298_v45, %v1072_v39 }
 0x31b   :  { %v2303_v27 = vmax.f32 %v3831_v42, 0.0 }
 0x31c   :  { %v2304_v38 = vmax.f32 %v3832_v46, 0.0 }
 0x31e   :  { %2580 = vmatprep.mubr.f32.mxu0 %v2304_v38 }
 0x31f   :  { %2581 = vmatmul.mubr.f32.vlgmr.msra.gmra.mrb[2].mxu0 %v2303_v27 }
 0x3f2   :  { %v2582_v51 = vpop.f32.mrb[2].mxu0 }
 0x3f3   :  { %v3833_v48 = vadd.f32 %v2582_v51, %v2438_v50  ;;  %v2584_v11 = vpop.f32.mrb[3].mxu0 }
 0x3f4   :  { %v3834_v58 = vadd.f32 %v2584_v11, %v2442_v61 }
 0x3f5   :  { %v2587_v52 = vmul.f32 %v3833_v48, %v3833_v48 }
 0x3f6   :  { %v2588_v53 = vmul.f32 %v3834_v58, %v3834_v58 }
 0x3f7   :  { %v2590_v60 = vsel %vm2589_vm0, %v2587_v52, 0.0 }
 0x3f8   :  { %v2591_v63 = vsel %vm2589_vm0, %v2588_v53, 0.0 }
 0x3f9   :  { %v2592_v0 = vadd.f32 %v2591_v63, %v2590_v60 }
 0x3fb   :  { %2593 = vadd.xlane.f32.xlu0 %v2592_v0 }
 0x488   :  { %v2594_v47 = vpop.xlane.xlu0 %2593 }
 0x489   :  { %v2595_v1 = vmax.f32 %v2594_v47, 1e-24 }
 0x48b   :  { %3869 = vrsqrt.f32 %v2595_v1 }
 0x495   :  { %v3870_v4 = vpop.eup %3869 }
 0x496   :  { %v2597_v14 = vmul.f32 %v3870_v4, %v3833_v48  ;;  %v2598_v5 = vmul.f32 %v3870_v4, %v3834_v58 }
 0x498   :  { %v2599_v6 = vsel %vm2589_vm0, %v2597_v14, 0.0  ;;  %v2600_v7 = vsel %vm2589_vm0, %v2598_v5, 0.0 }
 0x499   :  { %v2601_v8 = vadd.f32 %v2600_v7, %v2599_v6 }
 0x49b   :  { %2602 = vadd.xlane.f32.xlu0 %v2601_v8 }
 0x528   :  { %v2603_v56 = vpop.xlane.xlu0 %2602 }
 0x529   :  { %v2605_v62 = vmul.f32 0.00390625, %v2603_v56 }
 0x52b   :  { %v2606_v25 = vsub.f32 %v2597_v14, %v2605_v62  ;;  %v2607_v9 = vsub.f32 %v2598_v5, %v2605_v62 }
 0x52d   :  { %v2608_v12 = vmul.f32 %v2606_v25, %v2606_v25  ;;  %v2609_v13 = vmul.f32 %v2607_v9, %v2607_v9 }
 0x52f   :  { %v2610_v15 = vsel %vm2589_vm0, %v2608_v12, 0.0  ;;  %v2611_v3 = vsel %vm2589_vm0, %v2609_v13, 0.0 }
 0x530   :  { %v2612_v16 = vadd.f32 %v2611_v3, %v2610_v15 }
 0x532   :  { %2613 = vadd.xlane.f32.xlu1 %v2612_v16 }
 0x5bf   :  { %v2614_v43 = vpop.xlane.xlu1 %2613 }
 0x5c0   :  { %v2615_v17 = vmul.f32 0.00390625, %v2614_v43 }
 0x5c2   :  { %v2616_v18 = vadd.f32 1e-05, %v2615_v17 }
 0x5c4   :  { %3871 = vrsqrt.f32 %v2616_v18 }
 0x5ce   :  { %v3872_v22 = vpop.eup %3871 }
 0x5cf   :  { %v2618_v23 = vmul.f32 %v3872_v22, %v2606_v25  ;;  %v2619_v24 = vmul.f32 %v3872_v22, %v2607_v9 }
 0x5d1   :  { %v2632_v26 = vmul.f32 %v2625_v20, %v2618_v23  ;;  %v2633_v28 = vmul.f32 %v2629_v21, %v2619_v24 }
 0x5d3   :  { %v2646_v29 = vadd.f32 %v2639_v10, %v2632_v26  ;;  %v2647_v41 = vadd.f32 %v2643_v33, %v2633_v28 }
 0x5d5   :  { %v2650_v30 = vcombine.low %v2646_v29, %v2647_v41 }
 0x5d7   :  { %2674 = vst.sshfl [vmem:[#allocation2] sm:$0x33 pattern:$0x76325410] %v2650_v30 }
 0x5d8   :  { %3884 = shalt.err (!%p3881_p4)
}
 0x5d9   :  { %s3885_s0 = scalar_lea.hbm %s7580_s7, 64 }
 0x5da   :  { %p3886_p5 = scmp.ne.s32.totalorder %s7580_s7, %s3885_s0  ;;  %p3889_p6 = scmp.lt.u32.totalorder %s3885_s0, %s7580_s7 }
 0x5dc   :  { %p3891_p7 = pnand %p3889_p6, %p3886_p5 }
 0x5de   :  { %3894 = shalt.err (!%p3891_p7)
}
 0x5df   :  { %2669 = dma.vmem_to_hbm [thread:$0]  %s2667_s14, 64, %s7580_s7, [#allocation3]  }
 0x5e0   :  { %3895 = dma.done.wait [#allocation3], 64  }
 0x5e1   :  { %3896 = vsyncadd [#allocation3], 4294967232 }
 0x5e2   :  { %2673 = vsyncpa [#allocation3], 1 }

</bundles_post_ra>
